<compile_context>
chip_gen: v7x
topology: tpu7x:2x2x1
jax: 0.10.0
libtpu: 0.0.40
codegen_flags: <defaults>
</compile_context>

<pallas_src>
import functools

import jax
import jax.numpy as jnp
from jax.experimental import pallas as pl
from jax.experimental.pallas import tpu as pltpu


# ----------------------------------------------------------------------------
# Fused Pallas kernel: the whole bottleneck block in one pass over VMEM
# ----------------------------------------------------------------------------
def _bottleneck_kernel(x_ref, w1_ref, w2_ref, w3_ref,
                       g1_ref, b1_ref, g2_ref, b2_ref, g3_ref, b3_ref,
                       o_ref, a1_ref, *, n, h, w, eps):
    m = n * h * w
    c_mid = w1_ref.shape[1]
    inv_m = 1.0 / m

    def batchnorm(y, g_ref, b_ref):
        # Training-mode BN, single-pass batch statistics (biased variance).
        mean = jnp.sum(y, axis=0, keepdims=True) * inv_m
        mean_sq = jnp.sum(y * y, axis=0, keepdims=True) * inv_m
        var = mean_sq - mean * mean
        scale = g_ref[...] * jax.lax.rsqrt(var + eps)
        return y * scale + (b_ref[...] - mean * scale)

    x = x_ref[...]                                                  # (M, Cin) f32

    # ---- conv1 (1x1) + bn1 + relu ------------------------------------------
    # Conv bias is omitted: it is exactly cancelled by batch-statistics BN.
    y1 = jnp.dot(x.astype(jnp.bfloat16), w1_ref[...],
                 preferred_element_type=jnp.float32)                # (M, Cmid) f32
    a1 = jnp.maximum(batchnorm(y1, g1_ref, b1_ref), 0.0)

    # Stage the relu output into a zero-filled halo scratch (N, H+2, W+16, Cmid).
    # The left W-halo is widened to 8 so the interior store is sublane-aligned.
    a1_ref[...] = jnp.zeros_like(a1_ref)
    a1_ref[:, pl.ds(1, h), pl.ds(8, w), :] = a1.reshape(n, h, w, c_mid)

    # ---- conv2 (3x3, stride=1, pad=1) + bn2 + relu ---------------------------
    # In-VMEM im2col: 9 shifted slices of the halo scratch, merged into a single
    # K = 9*Cmid contraction to fill the MXU depth (no HBM im2col traffic).
    cols = [
        a1_ref[:, pl.ds(ky, h), pl.ds(7 + kx, w), :]
        .reshape(m, c_mid).astype(jnp.bfloat16)
        for ky in range(3) for kx in range(3)
    ]
    patches = jnp.concatenate(cols, axis=-1)                        # (M, 9*Cmid) bf16
    y2 = jnp.dot(patches, w2_ref[...], preferred_element_type=jnp.float32)
    a2 = jnp.maximum(batchnorm(y2, g2_ref, b2_ref), 0.0)

    # ---- conv3 (1x1) + bn3 + identity residual + relu ------------------------
    y3 = jnp.dot(a2.astype(jnp.bfloat16), w3_ref[...],
                 preferred_element_type=jnp.float32)                # (M, Cout) f32
    y3 = batchnorm(y3, g3_ref, b3_ref)
    o_ref[...] = jnp.maximum(y3 + x, 0.0).astype(o_ref.dtype)


def _full_block(shape):
    """BlockSpec covering the whole array (everything resident in VMEM)."""
    ndim = len(shape)

    def index_map(i):
        return (0,) * ndim

    return pl.BlockSpec(tuple(shape), index_map)


def bottleneck_fused(x2d, w1, w2, w3, g1, b1, g2, b2, g3, b3, *, n, h, w, eps):
    """x2d: (M, Cin) f32 pixels.  w1:(Cin,Cmid) w2:(9*Cmid,Cmid) w3:(Cmid,Cout) bf16."""
    m, c_in = x2d.shape
    c_mid = w1.shape[1]
    c_out = w3.shape[1]
    assert m == n * h * w
    assert c_in == c_out, "identity residual requires in_channels == 4*out_channels"

    inputs = (x2d, w1, w2, w3,
              g1.reshape(1, c_mid), b1.reshape(1, c_mid),
              g2.reshape(1, c_mid), b2.reshape(1, c_mid),
              g3.reshape(1, c_out), b3.reshape(1, c_out))

    kernel = functools.partial(_bottleneck_kernel, n=n, h=h, w=w, eps=eps)

    return pl.pallas_call(
        kernel,
        out_shape=jax.ShapeDtypeStruct((m, c_out), jnp.float32),
        grid=(1,),
        in_specs=[_full_block(a.shape) for a in inputs],
        out_specs=_full_block((m, c_out)),
        scratch_shapes=[pltpu.VMEM((n, h + 2, w + 16, c_mid), jnp.float32)],
        compiler_params=pltpu.CompilerParams(
            dimension_semantics=("arbitrary",),
            vmem_limit_bytes=32 * 1024 * 1024),
    )(*inputs)


# ----------------------------------------------------------------------------
# Bottleneck module (parameters initialized deterministically in-script)
# ----------------------------------------------------------------------------
class BottleneckPallas:
    expansion = 4

    def __init__(self, key, in_channels, out_channels, identity_downsample=None,
                 stride=1):
        # TODO(synk): identity_downsample submodule / stride != 1 not implemented;
        # the fused kernel assumes the identity residual path (stride == 1 and
        # in_channels == expansion * out_channels), as exercised below.
        assert identity_downsample is None and stride == 1
        self.stride = stride
        self.eps = 1e-5
        ks = jax.random.split(key, 6)

        def conv_init(kw, kb, cout, cin, kh, kwd):
            fan_in = cin * kh * kwd
            bound = 1.0 / float(fan_in) ** 0.5
            wgt = jax.random.uniform(kw, (cout, cin, kh, kwd), jnp.float32, -bound, bound)
            b = jax.random.uniform(kb, (cout,), jnp.float32, -bound, bound)
            return wgt, b

        c_mid = out_channels
        c_out = out_channels * self.expansion
        self.c_mid, self.c_out = c_mid, c_out

        # torch-layout parameters (Cout, Cin, kh, kw).  Biases are kept to mirror
        # the PyTorch module even though batch-stat BN cancels them exactly
        # (the Pallas kernel therefore skips them).
        self.w1, self.b1 = conv_init(ks[0], ks[1], c_mid, in_channels, 1, 1)
        self.w2, self.b2 = conv_init(ks[2], ks[3], c_mid, c_mid, 3, 3)
        self.w3, self.b3 = conv_init(ks[4], ks[5], c_out, c_mid, 1, 1)

        # BatchNorm affine params (torch defaults: gamma=1, beta=0).
        self.g1, self.be1 = jnp.ones((c_mid,), jnp.float32), jnp.zeros((c_mid,), jnp.float32)
        self.g2, self.be2 = jnp.ones((c_mid,), jnp.float32), jnp.zeros((c_mid,), jnp.float32)
        self.g3, self.be3 = jnp.ones((c_out,), jnp.float32), jnp.zeros((c_out,), jnp.float32)

        # Kernel-layout (K, C) matmul weights, precomputed once, bf16 for the MXU.
        self.w1_kc = jnp.transpose(self.w1[:, :, 0, 0], (1, 0)).astype(jnp.bfloat16)
        self.w2_kc = (jnp.transpose(self.w2, (2, 3, 1, 0))          # [ky, kx, cin, cout]
                      .reshape(9 * c_mid, c_mid).astype(jnp.bfloat16))
        self.w3_kc = jnp.transpose(self.w3[:, :, 0, 0], (1, 0)).astype(jnp.bfloat16)

    def __call__(self, x_nchw):
        # Layout glue: PyTorch NCHW -> NHWC (channels-last) for the matmul kernels.
        x = jnp.transpose(x_nchw, (0, 2, 3, 1)).astype(jnp.float32)
        n, h, w, c_in = x.shape
        out2d = bottleneck_fused(
            x.reshape(n * h * w, c_in),
            self.w1_kc, self.w2_kc, self.w3_kc,
            self.g1, self.be1, self.g2, self.be2, self.g3, self.be3,
            n=n, h=h, w=w, eps=self.eps)
        out = out2d.reshape(n, h, w, self.c_out)
        return jnp.transpose(out, (0, 3, 1, 2))                     # back to NCHW


# ----------------------------------------------------------------------------
# Pure-JAX reference (faithful to the PyTorch module; convs fed bf16 like kernel)
# ----------------------------------------------------------------------------
def ref_forward(mod, x_nchw):
    eps = mod.eps
    x = jnp.transpose(x_nchw, (0, 2, 3, 1)).astype(jnp.float32)

    def conv(inp, w_oihw, b, stride, pad):
        wh = jnp.transpose(w_oihw, (2, 3, 1, 0)).astype(jnp.bfloat16)   # HWIO
        y = jax.lax.conv_general_dilated(
            inp.astype(jnp.bfloat16), wh, (stride, stride),
            [(pad, pad), (pad, pad)],
            dimension_numbers=("NHWC", "HWIO", "NHWC"),
            preferred_element_type=jnp.float32)
        return y + b                                                    # bias kept here

    def bn(y, g, beta):
        mean = jnp.mean(y, axis=(0, 1, 2), keepdims=True)
        var = jnp.mean((y - mean) ** 2, axis=(0, 1, 2), keepdims=True)
        return g * (y - mean) * jax.lax.rsqrt(var + eps) + beta

    identity = x
    y = jax.nn.relu(bn(conv(x, mod.w1, mod.b1, 1, 0), mod.g1, mod.be1))
    y = jax.nn.relu(bn(conv(y, mod.w2, mod.b2, mod.stride, 1), mod.g2, mod.be2))
    y = bn(conv(y, mod.w3, mod.b3, 1, 0), mod.g3, mod.be3)
    y = jax.nn.relu(y + identity)
    return jnp.transpose(y, (0, 3, 1, 2))


if __name__ == "__main__":
    key = jax.random.PRNGKey(0)
    k_param, k_x = jax.random.split(key)

    # Lane-aligned, real-ResNet channel counts (perf feedback: avoid 4/16-wide
    # channels that leave the 128-lane datapath idle).  in == 4*out -> identity
    # residual, no downsample needed.
    in_channels, out_channels = 256, 64
    N, H, W = 2, 16, 16

    block = BottleneckPallas(k_param, in_channels, out_channels, stride=1)
    x = jax.random.normal(k_x, (N, in_channels, H, W), jnp.float32)     # NCHW input

    out = jax.block_until_ready(block(x))
    ref = jax.block_until_ready(ref_forward(block, x))

    assert out.shape == (N, in_channels, H, W)
    max_err = float(jnp.max(jnp.abs(out - ref)))
    # Both paths feed the MXU bf16 activations/weights (f32 accumulation); the
    # tolerance is sized for bf16 rounding divergence through the 3-conv chain.
    assert jnp.allclose(out, ref, rtol=1e-2, atol=1e-2), max_err

    print("KERNEL_OK")
</pallas_src>

<mosaic_0001>
module attributes {stable_mosaic.version = 11 : i64} {
  func.func @_bottleneck_kernel(%arg0: i32, %arg1: memref<512x256xf32, #tpu.memory_space<vmem>>, %arg2: memref<256x64xbf16, #tpu.memory_space<vmem>>, %arg3: memref<576x64xbf16, #tpu.memory_space<vmem>>, %arg4: memref<64x256xbf16, #tpu.memory_space<vmem>>, %arg5: memref<1x64xf32, #tpu.memory_space<vmem>>, %arg6: memref<1x64xf32, #tpu.memory_space<vmem>>, %arg7: memref<1x64xf32, #tpu.memory_space<vmem>>, %arg8: memref<1x64xf32, #tpu.memory_space<vmem>>, %arg9: memref<1x256xf32, #tpu.memory_space<vmem>>, %arg10: memref<1x256xf32, #tpu.memory_space<vmem>>, %arg11: memref<512x256xf32, #tpu.memory_space<vmem>>, %arg12: memref<2x18x32x64xf32, #tpu.memory_space<vmem>>) attributes {dimension_semantics = [#tpu.dimension_semantics<arbitrary>], iteration_bounds = array<i64: 1>, scalar_prefetch = 0 : i64, scratch_operands = 1 : i64, tpu.core_type = #tpu.core_type<tc>, window_params = [{pipeline_mode = #tpu.pipeline_mode<synchronous>, transform_indices = @transform_0, window_bounds = array<i64: 512, 256>}, {pipeline_mode = #tpu.pipeline_mode<synchronous>, transform_indices = @transform_1, window_bounds = array<i64: 256, 64>}, {pipeline_mode = #tpu.pipeline_mode<synchronous>, transform_indices = @transform_2, window_bounds = array<i64: 576, 64>}, {pipeline_mode = #tpu.pipeline_mode<synchronous>, transform_indices = @transform_3, window_bounds = array<i64: 64, 256>}, {pipeline_mode = #tpu.pipeline_mode<synchronous>, transform_indices = @transform_4, window_bounds = array<i64: 1, 64>}, {pipeline_mode = #tpu.pipeline_mode<synchronous>, transform_indices = @transform_5, window_bounds = array<i64: 1, 64>}, {pipeline_mode = #tpu.pipeline_mode<synchronous>, transform_indices = @transform_6, window_bounds = array<i64: 1, 64>}, {pipeline_mode = #tpu.pipeline_mode<synchronous>, transform_indices = @transform_7, window_bounds = array<i64: 1, 64>}, {pipeline_mode = #tpu.pipeline_mode<synchronous>, transform_indices = @transform_8, window_bounds = array<i64: 1, 256>}, {pipeline_mode = #tpu.pipeline_mode<synchronous>, transform_indices = @transform_9, window_bounds = array<i64: 1, 256>}, {pipeline_mode = #tpu.pipeline_mode<synchronous>, transform_indices = @transform_10, window_bounds = array<i64: 512, 256>}]} {
    %c0 = arith.constant 0 : index
    %c0_0 = arith.constant 0 : index
    %0 = vector.load %arg1[%c0, %c0_0] : memref<512x256xf32, #tpu.memory_space<vmem>>, vector<512x256xf32>
    %1 = arith.truncf %0 : vector<512x256xf32> to vector<512x256xbf16>
    %c0_1 = arith.constant 0 : index
    %c0_2 = arith.constant 0 : index
    %2 = vector.load %arg2[%c0_1, %c0_2] : memref<256x64xbf16, #tpu.memory_space<vmem>>, vector<256x64xbf16>
    %cst = arith.constant dense<0.000000e+00> : vector<512x64xf32>
    %3 = tpu.matmul %1, %2, %cst {dimension_numbers = #tpu.dot_dimension_numbers<[1], [0], [0], [1], [0, 0, 1, 1], [], []>} : vector<512x256xbf16>, vector<256x64xbf16>, vector<512x64xf32> -> vector<512x64xf32>
    %cst_3 = arith.constant dense<0.000000e+00> : vector<64xf32>
    %4 = vector.multi_reduction <add>, %3, %cst_3 [0] : vector<512x64xf32> to vector<64xf32>
    %5 = vector.shape_cast %4 : vector<64xf32> to vector<1x64xf32>
    %cst_4 = arith.constant 0.001953125 : f32
    %6 = vector.broadcast %cst_4 : f32 to vector<1x64xf32>
    %7 = arith.mulf %5, %6 : vector<1x64xf32>
    %8 = arith.mulf %3, %3 : vector<512x64xf32>
    %cst_5 = arith.constant dense<0.000000e+00> : vector<64xf32>
    %9 = vector.multi_reduction <add>, %8, %cst_5 [0] : vector<512x64xf32> to vector<64xf32>
    %10 = vector.shape_cast %9 : vector<64xf32> to vector<1x64xf32>
    %cst_6 = arith.constant 0.001953125 : f32
    %11 = vector.broadcast %cst_6 : f32 to vector<1x64xf32>
    %12 = arith.mulf %10, %11 : vector<1x64xf32>
    %13 = arith.mulf %7, %7 : vector<1x64xf32>
    %14 = arith.subf %12, %13 : vector<1x64xf32>
    %c0_7 = arith.constant 0 : index
    %c0_8 = arith.constant 0 : index
    %15 = vector.load %arg5[%c0_7, %c0_8] : memref<1x64xf32, #tpu.memory_space<vmem>>, vector<1x64xf32>
    %cst_9 = arith.constant 9.99999974E-6 : f32
    %16 = vector.broadcast %cst_9 : f32 to vector<1x64xf32>
    %17 = arith.addf %14, %16 : vector<1x64xf32>
    %18 = math.rsqrt %17 : vector<1x64xf32>
    %19 = arith.mulf %15, %18 : vector<1x64xf32>
    %20 = vector.broadcast %19 : vector<1x64xf32> to vector<512x64xf32>
    %21 = arith.mulf %3, %20 : vector<512x64xf32>
    %c0_10 = arith.constant 0 : index
    %c0_11 = arith.constant 0 : index
    %22 = vector.load %arg6[%c0_10, %c0_11] : memref<1x64xf32, #tpu.memory_space<vmem>>, vector<1x64xf32>
    %23 = arith.mulf %7, %19 : vector<1x64xf32>
    %24 = arith.subf %22, %23 : vector<1x64xf32>
    %25 = vector.broadcast %24 : vector<1x64xf32> to vector<512x64xf32>
    %26 = arith.addf %21, %25 : vector<512x64xf32>
    %cst_12 = arith.constant 0.000000e+00 : f32
    %27 = vector.broadcast %cst_12 : f32 to vector<512x64xf32>
    %28 = arith.maximumf %26, %27 : vector<512x64xf32>
    %cst_13 = arith.constant 0.000000e+00 : f32
    %29 = vector.broadcast %cst_13 : f32 to vector<2x18x32x64xf32>
    %c0_14 = arith.constant 0 : index
    %c0_15 = arith.constant 0 : index
    %c0_16 = arith.constant 0 : index
    %c0_17 = arith.constant 0 : index
    %30 = vector.load %arg12[%c0_14, %c0_15, %c0_16, %c0_17] : memref<2x18x32x64xf32, #tpu.memory_space<vmem>>, vector<2x18x32x64xf32>
    tpu.vector_store %arg12[%c0_14, %c0_15, %c0_16, %c0_17], %29 {strides = array<i32>} : memref<2x18x32x64xf32, #tpu.memory_space<vmem>>, vector<2x18x32x64xf32>,
    %31 = vector.shape_cast %28 : vector<512x64xf32> to vector<2x16x16x64xf32>
    %c0_18 = arith.constant 0 : index
    %c1 = arith.constant 1 : index
    %c8 = arith.constant 8 : index
    %c0_19 = arith.constant 0 : index
    %32 = vector.load %arg12[%c0_18, %c1, %c8, %c0_19] : memref<2x18x32x64xf32, #tpu.memory_space<vmem>>, vector<2x16x16x64xf32>
    tpu.vector_store %arg12[%c0_18, %c1, %c8, %c0_19], %31 {strides = array<i32>} : memref<2x18x32x64xf32, #tpu.memory_space<vmem>>, vector<2x16x16x64xf32>,
    %c0_20 = arith.constant 0 : index
    %c0_21 = arith.constant 0 : index
    %c7 = arith.constant 7 : index
    %c0_22 = arith.constant 0 : index
    %33 = vector.load %arg12[%c0_20, %c0_21, %c7, %c0_22] : memref<2x18x32x64xf32, #tpu.memory_space<vmem>>, vector<2x16x16x64xf32>
    %34 = vector.shape_cast %33 : vector<2x16x16x64xf32> to vector<512x64xf32>
    %35 = arith.truncf %34 : vector<512x64xf32> to vector<512x64xbf16>
    %c0_23 = arith.constant 0 : index
    %c0_24 = arith.constant 0 : index
    %c8_25 = arith.constant 8 : index
    %c0_26 = arith.constant 0 : index
    %36 = vector.load %arg12[%c0_23, %c0_24, %c8_25, %c0_26] : memref<2x18x32x64xf32, #tpu.memory_space<vmem>>, vector<2x16x16x64xf32>
    %37 = vector.shape_cast %36 : vector<2x16x16x64xf32> to vector<512x64xf32>
    %38 = arith.truncf %37 : vector<512x64xf32> to vector<512x64xbf16>
    %c0_27 = arith.constant 0 : index
    %c0_28 = arith.constant 0 : index
    %c9 = arith.constant 9 : index
    %c0_29 = arith.constant 0 : index
    %39 = vector.load %arg12[%c0_27, %c0_28, %c9, %c0_29] : memref<2x18x32x64xf32, #tpu.memory_space<vmem>>, vector<2x16x16x64xf32>
    %40 = vector.shape_cast %39 : vector<2x16x16x64xf32> to vector<512x64xf32>
    %41 = arith.truncf %40 : vector<512x64xf32> to vector<512x64xbf16>
    %c0_30 = arith.constant 0 : index
    %c1_31 = arith.constant 1 : index
    %c7_32 = arith.constant 7 : index
    %c0_33 = arith.constant 0 : index
    %42 = vector.load %arg12[%c0_30, %c1_31, %c7_32, %c0_33] : memref<2x18x32x64xf32, #tpu.memory_space<vmem>>, vector<2x16x16x64xf32>
    %43 = vector.shape_cast %42 : vector<2x16x16x64xf32> to vector<512x64xf32>
    %44 = arith.truncf %43 : vector<512x64xf32> to vector<512x64xbf16>
    %c0_34 = arith.constant 0 : index
    %c1_35 = arith.constant 1 : index
    %c8_36 = arith.constant 8 : index
    %c0_37 = arith.constant 0 : index
    %45 = vector.load %arg12[%c0_34, %c1_35, %c8_36, %c0_37] : memref<2x18x32x64xf32, #tpu.memory_space<vmem>>, vector<2x16x16x64xf32>
    %46 = vector.shape_cast %45 : vector<2x16x16x64xf32> to vector<512x64xf32>
    %47 = arith.truncf %46 : vector<512x64xf32> to vector<512x64xbf16>
    %c0_38 = arith.constant 0 : index
    %c1_39 = arith.constant 1 : index
    %c9_40 = arith.constant 9 : index
    %c0_41 = arith.constant 0 : index
    %48 = vector.load %arg12[%c0_38, %c1_39, %c9_40, %c0_41] : memref<2x18x32x64xf32, #tpu.memory_space<vmem>>, vector<2x16x16x64xf32>
    %49 = vector.shape_cast %48 : vector<2x16x16x64xf32> to vector<512x64xf32>
    %50 = arith.truncf %49 : vector<512x64xf32> to vector<512x64xbf16>
    %c0_42 = arith.constant 0 : index
    %c2 = arith.constant 2 : index
    %c7_43 = arith.constant 7 : index
    %c0_44 = arith.constant 0 : index
    %51 = vector.load %arg12[%c0_42, %c2, %c7_43, %c0_44] : memref<2x18x32x64xf32, #tpu.memory_space<vmem>>, vector<2x16x16x64xf32>
    %52 = vector.shape_cast %51 : vector<2x16x16x64xf32> to vector<512x64xf32>
    %53 = arith.truncf %52 : vector<512x64xf32> to vector<512x64xbf16>
    %c0_45 = arith.constant 0 : index
    %c2_46 = arith.constant 2 : index
    %c8_47 = arith.constant 8 : index
    %c0_48 = arith.constant 0 : index
    %54 = vector.load %arg12[%c0_45, %c2_46, %c8_47, %c0_48] : memref<2x18x32x64xf32, #tpu.memory_space<vmem>>, vector<2x16x16x64xf32>
    %55 = vector.shape_cast %54 : vector<2x16x16x64xf32> to vector<512x64xf32>
    %56 = arith.truncf %55 : vector<512x64xf32> to vector<512x64xbf16>
    %c0_49 = arith.constant 0 : index
    %c2_50 = arith.constant 2 : index
    %c9_51 = arith.constant 9 : index
    %c0_52 = arith.constant 0 : index
    %57 = vector.load %arg12[%c0_49, %c2_50, %c9_51, %c0_52] : memref<2x18x32x64xf32, #tpu.memory_space<vmem>>, vector<2x16x16x64xf32>
    %58 = vector.shape_cast %57 : vector<2x16x16x64xf32> to vector<512x64xf32>
    %59 = arith.truncf %58 : vector<512x64xf32> to vector<512x64xbf16>
    %60 = tpu.concatenate %35, %38, %41, %44, %47, %50, %53, %56, %59 in 1 : vector<512x64xbf16>, vector<512x64xbf16>, vector<512x64xbf16>, vector<512x64xbf16>, vector<512x64xbf16>, vector<512x64xbf16>, vector<512x64xbf16>, vector<512x64xbf16>, vector<512x64xbf16> -> vector<512x576xbf16>
    %c0_53 = arith.constant 0 : index
    %c0_54 = arith.constant 0 : index
    %61 = vector.load %arg3[%c0_53, %c0_54] : memref<576x64xbf16, #tpu.memory_space<vmem>>, vector<576x64xbf16>
    %cst_55 = arith.constant dense<0.000000e+00> : vector<512x64xf32>
    %62 = tpu.matmul %60, %61, %cst_55 {dimension_numbers = #tpu.dot_dimension_numbers<[1], [0], [0], [1], [0, 0, 1, 1], [], []>} : vector<512x576xbf16>, vector<576x64xbf16>, vector<512x64xf32> -> vector<512x64xf32>
    %cst_56 = arith.constant dense<0.000000e+00> : vector<64xf32>
    %63 = vector.multi_reduction <add>, %62, %cst_56 [0] : vector<512x64xf32> to vector<64xf32>
    %64 = vector.shape_cast %63 : vector<64xf32> to vector<1x64xf32>
    %cst_57 = arith.constant 0.001953125 : f32
    %65 = vector.broadcast %cst_57 : f32 to vector<1x64xf32>
    %66 = arith.mulf %64, %65 : vector<1x64xf32>
    %67 = arith.mulf %62, %62 : vector<512x64xf32>
    %cst_58 = arith.constant dense<0.000000e+00> : vector<64xf32>
    %68 = vector.multi_reduction <add>, %67, %cst_58 [0] : vector<512x64xf32> to vector<64xf32>
    %69 = vector.shape_cast %68 : vector<64xf32> to vector<1x64xf32>
    %cst_59 = arith.constant 0.001953125 : f32
    %70 = vector.broadcast %cst_59 : f32 to vector<1x64xf32>
    %71 = arith.mulf %69, %70 : vector<1x64xf32>
    %72 = arith.mulf %66, %66 : vector<1x64xf32>
    %73 = arith.subf %71, %72 : vector<1x64xf32>
    %c0_60 = arith.constant 0 : index
    %c0_61 = arith.constant 0 : index
    %74 = vector.load %arg7[%c0_60, %c0_61] : memref<1x64xf32, #tpu.memory_space<vmem>>, vector<1x64xf32>
    %cst_62 = arith.constant 9.99999974E-6 : f32
    %75 = vector.broadcast %cst_62 : f32 to vector<1x64xf32>
    %76 = arith.addf %73, %75 : vector<1x64xf32>
    %77 = math.rsqrt %76 : vector<1x64xf32>
    %78 = arith.mulf %74, %77 : vector<1x64xf32>
    %79 = vector.broadcast %78 : vector<1x64xf32> to vector<512x64xf32>
    %80 = arith.mulf %62, %79 : vector<512x64xf32>
    %c0_63 = arith.constant 0 : index
    %c0_64 = arith.constant 0 : index
    %81 = vector.load %arg8[%c0_63, %c0_64] : memref<1x64xf32, #tpu.memory_space<vmem>>, vector<1x64xf32>
    %82 = arith.mulf %66, %78 : vector<1x64xf32>
    %83 = arith.subf %81, %82 : vector<1x64xf32>
    %84 = vector.broadcast %83 : vector<1x64xf32> to vector<512x64xf32>
    %85 = arith.addf %80, %84 : vector<512x64xf32>
    %cst_65 = arith.constant 0.000000e+00 : f32
    %86 = vector.broadcast %cst_65 : f32 to vector<512x64xf32>
    %87 = arith.maximumf %85, %86 : vector<512x64xf32>
    %88 = arith.truncf %87 : vector<512x64xf32> to vector<512x64xbf16>
    %c0_66 = arith.constant 0 : index
    %c0_67 = arith.constant 0 : index
    %89 = vector.load %arg4[%c0_66, %c0_67] : memref<64x256xbf16, #tpu.memory_space<vmem>>, vector<64x256xbf16>
    %cst_68 = arith.constant dense<0.000000e+00> : vector<512x256xf32>
    %90 = tpu.matmul %88, %89, %cst_68 {dimension_numbers = #tpu.dot_dimension_numbers<[1], [0], [0], [1], [0, 0, 1, 1], [], []>} : vector<512x64xbf16>, vector<64x256xbf16>, vector<512x256xf32> -> vector<512x256xf32>
    %cst_69 = arith.constant dense<0.000000e+00> : vector<256xf32>
    %91 = vector.multi_reduction <add>, %90, %cst_69 [0] : vector<512x256xf32> to vector<256xf32>
    %92 = vector.shape_cast %91 : vector<256xf32> to vector<1x256xf32>
    %cst_70 = arith.constant 0.001953125 : f32
    %93 = vector.broadcast %cst_70 : f32 to vector<1x256xf32>
    %94 = arith.mulf %92, %93 : vector<1x256xf32>
    %95 = arith.mulf %90, %90 : vector<512x256xf32>
    %cst_71 = arith.constant dense<0.000000e+00> : vector<256xf32>
    %96 = vector.multi_reduction <add>, %95, %cst_71 [0] : vector<512x256xf32> to vector<256xf32>
    %97 = vector.shape_cast %96 : vector<256xf32> to vector<1x256xf32>
    %cst_72 = arith.constant 0.001953125 : f32
    %98 = vector.broadcast %cst_72 : f32 to vector<1x256xf32>
    %99 = arith.mulf %97, %98 : vector<1x256xf32>
    %100 = arith.mulf %94, %94 : vector<1x256xf32>
    %101 = arith.subf %99, %100 : vector<1x256xf32>
    %c0_73 = arith.constant 0 : index
    %c0_74 = arith.constant 0 : index
    %102 = vector.load %arg9[%c0_73, %c0_74] : memref<1x256xf32, #tpu.memory_space<vmem>>, vector<1x256xf32>
    %cst_75 = arith.constant 9.99999974E-6 : f32
    %103 = vector.broadcast %cst_75 : f32 to vector<1x256xf32>
    %104 = arith.addf %101, %103 : vector<1x256xf32>
    %105 = math.rsqrt %104 : vector<1x256xf32>
    %106 = arith.mulf %102, %105 : vector<1x256xf32>
    %107 = vector.broadcast %106 : vector<1x256xf32> to vector<512x256xf32>
    %108 = arith.mulf %90, %107 : vector<512x256xf32>
    %c0_76 = arith.constant 0 : index
    %c0_77 = arith.constant 0 : index
    %109 = vector.load %arg10[%c0_76, %c0_77] : memref<1x256xf32, #tpu.memory_space<vmem>>, vector<1x256xf32>
    %110 = arith.mulf %94, %106 : vector<1x256xf32>
    %111 = arith.subf %109, %110 : vector<1x256xf32>
    %112 = vector.broadcast %111 : vector<1x256xf32> to vector<512x256xf32>
    %113 = arith.addf %108, %112 : vector<512x256xf32>
    %114 = arith.addf %113, %0 : vector<512x256xf32>
    %cst_78 = arith.constant 0.000000e+00 : f32
    %115 = vector.broadcast %cst_78 : f32 to vector<512x256xf32>
    %116 = arith.maximumf %114, %115 : vector<512x256xf32>
    %c0_79 = arith.constant 0 : index
    %c0_80 = arith.constant 0 : index
    %117 = vector.load %arg11[%c0_79, %c0_80] : memref<512x256xf32, #tpu.memory_space<vmem>>, vector<512x256xf32>
    tpu.vector_store %arg11[%c0_79, %c0_80], %116 {strides = array<i32>} : memref<512x256xf32, #tpu.memory_space<vmem>>, vector<512x256xf32>,
    return
  }
  func.func @transform_0(%arg0: i32) -> (i32, i32) {
    %c0_i32 = arith.constant 0 : i32
    %c0_i32_0 = arith.constant 0 : i32
    %c0_i32_1 = arith.constant 0 : i32
    return %c0_i32, %c0_i32_0 : i32, i32
  }
  func.func @transform_1(%arg0: i32) -> (i32, i32) {
    %c0_i32 = arith.constant 0 : i32
    %c0_i32_0 = arith.constant 0 : i32
    %c0_i32_1 = arith.constant 0 : i32
    return %c0_i32, %c0_i32_0 : i32, i32
  }
  func.func @transform_2(%arg0: i32) -> (i32, i32) {
    %c0_i32 = arith.constant 0 : i32
    %c0_i32_0 = arith.constant 0 : i32
    %c0_i32_1 = arith.constant 0 : i32
    return %c0_i32, %c0_i32_0 : i32, i32
  }
  func.func @transform_3(%arg0: i32) -> (i32, i32) {
    %c0_i32 = arith.constant 0 : i32
    %c0_i32_0 = arith.constant 0 : i32
    %c0_i32_1 = arith.constant 0 : i32
    return %c0_i32, %c0_i32_0 : i32, i32
  }
  func.func @transform_4(%arg0: i32) -> (i32, i32) {
    %c0_i32 = arith.constant 0 : i32
    %c0_i32_0 = arith.constant 0 : i32
    %c0_i32_1 = arith.constant 0 : i32
    return %c0_i32, %c0_i32_0 : i32, i32
  }
  func.func @transform_5(%arg0: i32) -> (i32, i32) {
    %c0_i32 = arith.constant 0 : i32
    %c0_i32_0 = arith.constant 0 : i32
    %c0_i32_1 = arith.constant 0 : i32
    return %c0_i32, %c0_i32_0 : i32, i32
  }
  func.func @transform_6(%arg0: i32) -> (i32, i32) {
    %c0_i32 = arith.constant 0 : i32
    %c0_i32_0 = arith.constant 0 : i32
    %c0_i32_1 = arith.constant 0 : i32
    return %c0_i32, %c0_i32_0 : i32, i32
  }
  func.func @transform_7(%arg0: i32) -> (i32, i32) {
    %c0_i32 = arith.constant 0 : i32
    %c0_i32_0 = arith.constant 0 : i32
    %c0_i32_1 = arith.constant 0 : i32
    return %c0_i32, %c0_i32_0 : i32, i32
  }
  func.func @transform_8(%arg0: i32) -> (i32, i32) {
    %c0_i32 = arith.constant 0 : i32
    %c0_i32_0 = arith.constant 0 : i32
    %c0_i32_1 = arith.constant 0 : i32
    return %c0_i32, %c0_i32_0 : i32, i32
  }
  func.func @transform_9(%arg0: i32) -> (i32, i32) {
    %c0_i32 = arith.constant 0 : i32
    %c0_i32_0 = arith.constant 0 : i32
    %c0_i32_1 = arith.constant 0 : i32
    return %c0_i32, %c0_i32_0 : i32, i32
  }
  func.func @transform_10(%arg0: i32) -> (i32, i32) {
    %c0_i32 = arith.constant 0 : i32
    %c0_i32_0 = arith.constant 0 : i32
    %c0_i32_1 = arith.constant 0 : i32
    return %c0_i32, %c0_i32_0 : i32, i32
  }
}

</mosaic_0001>

<bundles_post_ra>
// kernel: tpu_custom_call.1
= control target key start
LH: loop header
LB: loop body
LE: loop exit
PB: predicated region body
PF: predicated region fallthrough
CT: control target
= control target key end

     0   :  { %15 = vsyncpa [#allocation4], 0  ;;  %s12981_s0 = inlined_call_operand.hbm [shape: f32[512,256], index: 0, kind: input, shape index: {}]   ;;  %s12982_s1 = inlined_call_operand.vmem [shape: bf16[256,64], index: 1, kind: input, shape index: {}]   ;;  %s12983_s2 = inlined_call_operand.vmem [shape: bf16[576,64], index: 2, kind: input, shape index: {}]   ;;  %s12984_s3 = inlined_call_operand.vmem [shape: bf16[64,256], index: 3, kind: input, shape index: {}]   ;;  %s12985_s4 = inlined_call_operand.vmem [shape: f32[1,64], index: 4, kind: input, shape index: {}]   ;;  %s12986_s5 = inlined_call_operand.vmem [shape: f32[1,64], index: 5, kind: input, shape index: {}]   ;;  %s12987_s6 = inlined_call_operand.vmem [shape: f32[1,64], index: 6, kind: input, shape index: {}]   ;;  %s12988_s7 = inlined_call_operand.vmem [shape: f32[1,64], index: 7, kind: input, shape index: {}]   ;;  %s12989_s8 = inlined_call_operand.vmem [shape: f32[1,256], index: 8, kind: input, shape index: {}]   ;;  %s12990_s9 = inlined_call_operand.vmem [shape: f32[1,256], index: 9, kind: input, shape index: {}]   ;;  %s12991_s10 = inlined_call_operand.hbm [shape: f32[512,256], index: 10, kind: output, shape index: {}]  }
   0x1   :  { %16 = vsyncpa [#allocation5], 0  ;;  %s7286_s13 = smov [#allocation3]   ;;  %s7238_s17 = scalar_lea.hbm %s12981_s0, 16384 }
   0x2   :  { %s22_s14 = sshll.u32 %s7286_s13, 4  ;;  %p7239_p0 = scmp.ne.s32.totalorder %s12981_s0, %s7238_s17  ;;  %s23_s14 = int_to_ptr.vmem [resolvable:$true] %s22_s14 }
   0x3   :  { %p7242_p1 = scmp.lt.u32.totalorder %s7238_s17, %s12981_s0 }
   0x5   :  { %p7244_p2 = pnand %p7242_p1, %p7239_p0 }
   0x7   :  { %7247 = shalt.err (!%p7244_p2)
}
   0x8   :  { %s7248_s22 = scalar_lea.vmem %s23_s14, 16384  ;;  %p7253_p4 = scmp.lt.s32.totalorder %s23_s14, %s23_s14 }
   0x9   :  { %p7249_p3 = scmp.ne.s32.totalorder %s23_s14, %s7248_s22  ;;  %p7254_p5 = scmp.lt.s32.totalorder %s7248_s22, %s7248_s22 }
   0xb   :  { %p7255_p6 = por %p7254_p5, %p7253_p4 }
   0xd   :  { %p7256_p7 = pnand %p7255_p6, %p7249_p3 }
   0xf   :  { %7259 = shalt.err (!%p7256_p7)
}
  0x10   :  { %s7287_s23 = smov 256   ;;  %s7288_s24 = smov 16  }
  0x11   :  { %28 = dma.hbm_to_vmem [thread:$0]  %s12981_s0, 16384, %s23_s14, [#allocation4], %s7287_s23, %s7287_s23, %s7288_s24  }
  0x12   :  { %7282 = dma.done.wait [#allocation4], 16384  }
  0x13   :  { %7283 = vsyncadd [#allocation4], 4294950912  ;;  %v12992_v0 = vmov 0   ;;  %v7038_v1 = vld [vmem:[%s12982_s1] sm:$0xff]   ;;  %v7039_v2 = vld [vmem:[%s12982_s1 + $0x8] sm:$0xff]   ;;  %vm660_vm0 = vcmask 523264  }
  0x14   :  { %371 = vmatprep.subr.bf16.mxu0 %v12992_v0  ;;  %6870 = vmatprep.subr.bf16.mxu1 %v12992_v0  ;;  %v7040_v3 = vld [vmem:[%s12982_s1 + $0x10] sm:$0xff]   ;;  %v7041_v4 = vld [vmem:[%s12982_s1 + $0x18] sm:$0xff]   ;;  %v7042_v5 = vld [vmem:[%s12982_s1 + $0x20] sm:$0xff]   ;;  %s7291_s20 = smov 64  }
  0x15   :  { %372 = vmatpush1.bf16.msra.mxu0 %v7038_v1  ;;  %6886 = vmatpush1.bf16.msra.mxu1 %v7038_v1  ;;  %v52_v6 = vld [vmem:[#allocation3 + $0x8] sm:$0xff]  ;;  %v54_v7 = vld [vmem:[#allocation3 + $0x18] sm:$0xff]  ;;  %v7044_v10 = vld [vmem:[%s12982_s1 + $0x30] sm:$0xff]  }
  0x16   :  { %373 = vmatprep.subr.bf16.mxu0 %v12992_v0  ;;  %6871 = vmatprep.subr.bf16.mxu1 %v12992_v0  ;;  %v180_v8 = vpack.c.bf16 %v54_v7, %v52_v6  ;;  %v7043_v9 = vld [vmem:[%s12982_s1 + $0x28] sm:$0xff]   ;;  %v7045_v11 = vld [vmem:[%s12982_s1 + $0x38] sm:$0xff]   ;;  %v7046_v12 = vld [vmem:[%s12982_s1 + $0x40] sm:$0xff]  }
  0x17   :  { %v7047_v13 = vld [vmem:[%s12982_s1 + $0x48] sm:$0xff]   ;;  %v7048_v14 = vld [vmem:[%s12982_s1 + $0x50] sm:$0xff]   ;;  %v7049_v15 = vld [vmem:[%s12982_s1 + $0x58] sm:$0xff]  }
  0x18   :  { %403 = vmatprep.mubr.bf16.mxu0 %v180_v8  ;;  %v7050_v16 = vld [vmem:[%s12982_s1 + $0x60] sm:$0xff]   ;;  %v7051_v17 = vld [vmem:[%s12982_s1 + $0x68] sm:$0xff]   ;;  %v7052_v18 = vld [vmem:[%s12982_s1 + $0x70] sm:$0xff]  }
  0x19   :  { %374 = vmatpush1.bf16.msra.mxu0 %v7039_v2  ;;  %6887 = vmatpush1.bf16.msra.mxu1 %v7039_v2  ;;  %v7053_v19 = vld [vmem:[%s12982_s1 + $0x78] sm:$0xff]   ;;  %v51_v20 = vld [vmem:[#allocation3] sm:$0xff]  ;;  %v53_v21 = vld [vmem:[#allocation3 + $0x10] sm:$0xff] }
  0x1a   :  { %375 = vmatprep.subr.bf16.mxu0 %v12992_v0  ;;  %6872 = vmatprep.subr.bf16.mxu1 %v12992_v0  ;;  %v56_v22 = vld [vmem:[#allocation3 + $0x28] sm:$0xff]  ;;  %v58_v23 = vld [vmem:[#allocation3 + $0x38] sm:$0xff]  ;;  %v179_v24 = vpack.c.bf16 %v53_v21, %v51_v20  ;;  %v55_v26 = vld [vmem:[#allocation3 + $0x20] sm:$0xff] }
  0x1b   :  { %v182_v25 = vpack.c.bf16 %v58_v23, %v56_v22  ;;  %v57_v27 = vld [vmem:[#allocation3 + $0x30] sm:$0xff]  ;;  %v60_v28 = vld [vmem:[#allocation3 + $0x48] sm:$0xff]  ;;  %v62_v29 = vld [vmem:[#allocation3 + $0x58] sm:$0xff] }
  0x1c   :  { %v181_v30 = vpack.c.bf16 %v57_v27, %v55_v26  ;;  %v184_v31 = vpack.c.bf16 %v62_v29, %v60_v28  ;;  %v59_v32 = vld [vmem:[#allocation3 + $0x40] sm:$0xff]  ;;  %v61_v33 = vld [vmem:[#allocation3 + $0x50] sm:$0xff]  ;;  %v64_v34 = vld [vmem:[#allocation3 + $0x68] sm:$0xff] }
  0x1d   :  { %376 = vmatpush1.bf16.msra.mxu0 %v7040_v3  ;;  %6888 = vmatpush1.bf16.msra.mxu1 %v7040_v3  ;;  %v66_v35 = vld [vmem:[#allocation3 + $0x78] sm:$0xff]  ;;  %v183_v36 = vpack.c.bf16 %v61_v33, %v59_v32  ;;  %v63_v38 = vld [vmem:[#allocation3 + $0x60] sm:$0xff]  ;;  %v65_v39 = vld [vmem:[#allocation3 + $0x70] sm:$0xff] }
  0x1e   :  { %377 = vmatprep.subr.bf16.mxu0 %v12992_v0  ;;  %6873 = vmatprep.subr.bf16.mxu1 %v12992_v0  ;;  %v186_v37 = vpack.c.bf16 %v66_v35, %v64_v34  ;;  %v68_v40 = vld [vmem:[#allocation3 + $0x88] sm:$0xff]  ;;  %v70_v41 = vld [vmem:[#allocation3 + $0x98] sm:$0xff]  ;;  %v185_v42 = vpack.c.bf16 %v65_v39, %v63_v38  ;;  %v147_v46 = vld [vmem:[#allocation3 + $0x300] sm:$0xff] }
  0x1f   :  { %v188_v43 = vpack.c.bf16 %v70_v41, %v68_v40  ;;  %v148_v44 = vld [vmem:[#allocation3 + $0x308] sm:$0xff]  ;;  %v150_v45 = vld [vmem:[#allocation3 + $0x318] sm:$0xff]  ;;  %v67_v47 = vld [vmem:[#allocation3 + $0x80] sm:$0xff] }
  0x20   :  { %v69_v48 = vld [vmem:[#allocation3 + $0x90] sm:$0xff]  ;;  %v228_v49 = vpack.c.bf16 %v150_v45, %v148_v44  ;;  %v72_v51 = vld [vmem:[#allocation3 + $0xa8] sm:$0xff]  ;;  %v74_v52 = vld [vmem:[#allocation3 + $0xb8] sm:$0xff] }
  0x21   :  { %378 = vmatpush1.bf16.msra.mxu0 %v7041_v4  ;;  %6889 = vmatpush1.bf16.msra.mxu1 %v7041_v4  ;;  %v149_v50 = vld [vmem:[#allocation3 + $0x310] sm:$0xff]  ;;  %v187_v54 = vpack.c.bf16 %v69_v48, %v67_v47  ;;  %v190_v55 = vpack.c.bf16 %v74_v52, %v72_v51  ;;  %v152_v56 = vld [vmem:[#allocation3 + $0x328] sm:$0xff]  ;;  %v154_v57 = vld [vmem:[#allocation3 + $0x338] sm:$0xff] }
  0x22   :  { %379 = vmatprep.subr.bf16.mxu0 %v12992_v0  ;;  %6874 = vmatprep.subr.bf16.mxu1 %v12992_v0  ;;  %v227_v53 = vpack.c.bf16 %v149_v50, %v147_v46  ;;  %v151_v58 = vld [vmem:[#allocation3 + $0x320] sm:$0xff]  ;;  %v73_v60 = vld [vmem:[#allocation3 + $0xb0] sm:$0xff]  ;;  %v230_v61 = vpack.c.bf16 %v154_v57, %v152_v56  ;;  %v76_v63 = vld [vmem:[#allocation3 + $0xc8] sm:$0xff] }
  0x23   :  { %595 = vmatprep.mubr.bf16.mxu1 %v228_v49  ;;  %v71_v59 = vld [vmem:[#allocation3 + $0xa0] sm:$0xff]  ;;  %v153_v62 = vld [vmem:[#allocation3 + $0x330] sm:$0xff]  ;;  %v78_v1 = vld [vmem:[#allocation3 + $0xd8] sm:$0xff] }
  0x24   :  { %v229_v2 = vpack.c.bf16 %v153_v62, %v151_v58  ;;  %v189_v3 = vpack.c.bf16 %v73_v60, %v71_v59  ;;  %v192_v4 = vpack.c.bf16 %v78_v1, %v76_v63  ;;  %v158_v6 = vld [vmem:[#allocation3 + $0x358] sm:$0xff]  ;;  %v155_v7 = vld [vmem:[#allocation3 + $0x340] sm:$0xff]  ;;  %v81_v21 = vld [vmem:[#allocation3 + $0xf0] sm:$0xff] }
  0x25   :  { %380 = vmatpush1.bf16.msra.mxu0 %v7042_v5  ;;  %6890 = vmatpush1.bf16.msra.mxu1 %v7042_v5  ;;  %v156_v5 = vld [vmem:[#allocation3 + $0x348] sm:$0xff]  ;;  %v75_v8 = vld [vmem:[#allocation3 + $0xc0] sm:$0xff]  ;;  %v161_v23 = vld [vmem:[#allocation3 + $0x370] sm:$0xff] }
  0x26   :  { %381 = vmatprep.subr.bf16.mxu0 %v12992_v0  ;;  %6875 = vmatprep.subr.bf16.mxu1 %v12992_v0  ;;  %v79_v20 = vld [vmem:[#allocation3 + $0xe0] sm:$0xff]  ;;  %v166_v32 = vld [vmem:[#allocation3 + $0x398] sm:$0xff]  ;;  %v165_v35 = vld [vmem:[#allocation3 + $0x390] sm:$0xff] }
  0x27   :  { %v193_v27 = vpack.c.bf16 %v81_v21, %v79_v20  ;;  %v83_v29 = vld [vmem:[#allocation3 + $0x100] sm:$0xff]  ;;  %v88_v38 = vld [vmem:[#allocation3 + $0x128] sm:$0xff]  ;;  %v90_v39 = vld [vmem:[#allocation3 + $0x138] sm:$0xff] }
  0x28   :  { %v163_v33 = vld [vmem:[#allocation3 + $0x380] sm:$0xff]  ;;  %v169_v45 = vld [vmem:[#allocation3 + $0x3b0] sm:$0xff]  ;;  %v172_v46 = vld [vmem:[#allocation3 + $0x3c8] sm:$0xff] }
  0x29   :  { %382 = vmatpush1.bf16.msra.mxu0 %v7043_v9  ;;  %6891 = vmatpush1.bf16.msra.mxu1 %v7043_v9  ;;  %v77_v9 = vld [vmem:[#allocation3 + $0xd0] sm:$0xff]  ;;  %v235_v40 = vpack.c.bf16 %v165_v35, %v163_v33  ;;  %v167_v44 = vld [vmem:[#allocation3 + $0x3a0] sm:$0xff]  ;;  %v174_v47 = vld [vmem:[#allocation3 + $0x3d8] sm:$0xff] }
  0x2a   :  { %383 = vmatprep.subr.bf16.mxu0 %v12992_v0  ;;  %6876 = vmatprep.subr.bf16.mxu1 %v12992_v0  ;;  %v237_v48 = vpack.c.bf16 %v169_v45, %v167_v44  ;;  %v87_v49 = vld [vmem:[#allocation3 + $0x120] sm:$0xff]  ;;  %v89_v50 = vld [vmem:[#allocation3 + $0x130] sm:$0xff]  ;;  %v240_v51 = vpack.c.bf16 %v174_v47, %v172_v46  ;;  %v92_v52 = vld [vmem:[#allocation3 + $0x148] sm:$0xff] }
  0x2b   :  { %v171_v56 = vld [vmem:[#allocation3 + $0x3c0] sm:$0xff]  ;;  %v173_v57 = vld [vmem:[#allocation3 + $0x3d0] sm:$0xff]  ;;  %v98_v62 = vld [vmem:[#allocation3 + $0x178] sm:$0xff] }
  0x2c   :  { %v239_v58 = vpack.c.bf16 %v173_v57, %v171_v56  ;;  %v91_v59 = vld [vmem:[#allocation3 + $0x140] sm:$0xff]  ;;  %v93_v60 = vld [vmem:[#allocation3 + $0x150] sm:$0xff]  ;;  %v116_v35 = vld [vmem:[#allocation3 + $0x208] sm:$0xff] }
  0x2d   :  { %384 = vmatpush1.bf16.msra.mxu0 %v7044_v10  ;;  %6892 = vmatpush1.bf16.msra.mxu1 %v7044_v10  ;;  %v232_v10 = vpack.c.bf16 %v158_v6, %v156_v5  ;;  %v199_v63 = vpack.c.bf16 %v93_v60, %v91_v59  ;;  %v176_v5 = vld [vmem:[#allocation3 + $0x3e8] sm:$0xff]  ;;  %v178_v6 = vld [vmem:[#allocation3 + $0x3f8] sm:$0xff]  ;;  %v103_v21 = vld [vmem:[#allocation3 + $0x1a0] sm:$0xff] }
  0x2e   :  { %385 = vmatprep.subr.bf16.mxu0 %v12992_v0  ;;  %6877 = vmatprep.subr.bf16.mxu1 %v12992_v0  ;;  %v111_v33 = vld [vmem:[#allocation3 + $0x1e0] sm:$0xff]  ;;  %v121_v46 = vld [vmem:[#allocation3 + $0x230] sm:$0xff]  ;;  %v124_v47 = vld [vmem:[#allocation3 + $0x248] sm:$0xff] }
  0x2f   :  { %v119_v45 = vld [vmem:[#allocation3 + $0x220] sm:$0xff]  ;;  %v132_v59 = vld [vmem:[#allocation3 + $0x288] sm:$0xff]  ;;  %v134_v60 = vld [vmem:[#allocation3 + $0x298] sm:$0xff] }
  0x30   :  { %v127_v57 = vld [vmem:[#allocation3 + $0x260] sm:$0xff] }
  0x31   :  { %386 = vmatpush1.bf16.msra.mxu0 %v7045_v11  ;;  %6893 = vmatpush1.bf16.msra.mxu1 %v7045_v11  ;;  %v157_v11 = vld [vmem:[#allocation3 + $0x350] sm:$0xff] }
  0x32   :  { %387 = vmatprep.subr.bf16.mxu0 %v12992_v0  ;;  %6878 = vmatprep.subr.bf16.mxu1 %v12992_v0 }
  0x35   :  { %388 = vmatpush1.bf16.msra.mxu0 %v7046_v12  ;;  %6894 = vmatpush1.bf16.msra.mxu1 %v7046_v12  ;;  %v80_v12 = vld [vmem:[#allocation3 + $0xe8] sm:$0xff] }
  0x36   :  { %389 = vmatprep.subr.bf16.mxu0 %v12992_v0  ;;  %6879 = vmatprep.subr.bf16.mxu1 %v12992_v0 }
  0x39   :  { %390 = vmatpush1.bf16.msra.mxu0 %v7047_v13  ;;  %6895 = vmatpush1.bf16.msra.mxu1 %v7047_v13  ;;  %v82_v13 = vld [vmem:[#allocation3 + $0xf8] sm:$0xff] }
  0x3a   :  { %391 = vmatprep.subr.bf16.mxu0 %v12992_v0  ;;  %6880 = vmatprep.subr.bf16.mxu1 %v12992_v0 }
  0x3d   :  { %392 = vmatpush1.bf16.msra.mxu0 %v7048_v14  ;;  %6896 = vmatpush1.bf16.msra.mxu1 %v7048_v14  ;;  %v231_v14 = vpack.c.bf16 %v157_v11, %v155_v7  ;;  %v7451_v7 = vld [vmem:[#allocation3 + $0x198] sm:$0xff] }
  0x3e   :  { %393 = vmatprep.subr.bf16.mxu0 %v12992_v0  ;;  %6881 = vmatprep.subr.bf16.mxu1 %v12992_v0 }
  0x41   :  { %394 = vmatpush1.bf16.msra.mxu0 %v7049_v15  ;;  %6897 = vmatpush1.bf16.msra.mxu1 %v7049_v15  ;;  %v191_v15 = vpack.c.bf16 %v77_v9, %v75_v8  ;;  %v242_v8 = vpack.c.bf16 %v178_v6, %v176_v5  ;;  %v175_v9 = vld [vmem:[#allocation3 + $0x3e0] sm:$0xff] }
  0x42   :  { %395 = vmatprep.subr.bf16.mxu0 %v12992_v0  ;;  %6882 = vmatprep.subr.bf16.mxu1 %v12992_v0  ;;  %v135_v6 = vld [vmem:[#allocation3 + $0x2a0] sm:$0xff] }
  0x45   :  { %396 = vmatpush1.bf16.msra.mxu0 %v7050_v16  ;;  %6898 = vmatpush1.bf16.msra.mxu1 %v7050_v16  ;;  %v194_v16 = vpack.c.bf16 %v82_v13, %v80_v12 }
  0x46   :  { %397 = vmatprep.subr.bf16.mxu0 %v12992_v0  ;;  %6883 = vmatprep.subr.bf16.mxu1 %v12992_v0 }
  0x49   :  { %398 = vmatpush1.bf16.msra.mxu0 %v7051_v17  ;;  %6899 = vmatpush1.bf16.msra.mxu1 %v7051_v17  ;;  %v160_v17 = vld [vmem:[#allocation3 + $0x368] sm:$0xff] }
  0x4a   :  { %399 = vmatprep.subr.bf16.mxu0 %v12992_v0  ;;  %6884 = vmatprep.subr.bf16.mxu1 %v12992_v0 }
  0x4d   :  { %400 = vmatpush1.bf16.msra.mxu0 %v7052_v18  ;;  %6900 = vmatpush1.bf16.msra.mxu1 %v7052_v18  ;;  %v162_v18 = vld [vmem:[#allocation3 + $0x378] sm:$0xff] }
  0x4e   :  { %401 = vmatprep.subr.bf16.mxu0 %v12992_v0  ;;  %6885 = vmatprep.subr.bf16.mxu1 %v12992_v0  ;;  %v234_v22 = vpack.c.bf16 %v162_v18, %v160_v17  ;;  %v104_v17 = vld [vmem:[#allocation3 + $0x1a8] sm:$0xff]  ;;  %v106_v18 = vld [vmem:[#allocation3 + $0x1b8] sm:$0xff] }
  0x4f   :  { %v206_v20 = vpack.c.bf16 %v106_v18, %v104_v17  ;;  %v143_v18 = vld [vmem:[#allocation3 + $0x2e0] sm:$0xff] }
  0x51   :  { %402 = vmatpush1.bf16.msra.mxu0 %v7053_v19  ;;  %6901 = vmatpush1.bf16.msra.mxu1 %v7053_v19  ;;  %v159_v19 = vld [vmem:[#allocation3 + $0x360] sm:$0xff] }
  0x52   :  { %3560 = vmatprep.subr.bf16.mxu1 %v12992_v0  ;;  %v233_v26 = vpack.c.bf16 %v161_v23, %v159_v19  ;;  %v108_v23 = vld [vmem:[#allocation3 + $0x1c8] sm:$0xff] }
  0x54   :  { %404 = vmatmul.mubr.bf16.vlgmr.msra.gmra.mrb[0].mxu0 %v179_v24  ;;  %596 = vmatmul.mubr.bf16.vlgmr.msra.gmra.mrb[0].mxu1 %v227_v53  ;;  %v84_v24 = vld [vmem:[#allocation3 + $0x108] sm:$0xff]  ;;  %v94_v53 = vld [vmem:[#allocation3 + $0x158] sm:$0xff] }
  0x55   :  { %411 = vmatprep.mubr.bf16.mxu0 %v182_v25  ;;  %603 = vmatprep.mubr.bf16.mxu1 %v230_v61  ;;  %v86_v25 = vld [vmem:[#allocation3 + $0x118] sm:$0xff]  ;;  %v96_v61 = vld [vmem:[#allocation3 + $0x168] sm:$0xff] }
  0x56   :  { %v196_v28 = vpack.c.bf16 %v86_v25, %v84_v24  ;;  %v202_v1 = vpack.c.bf16 %v98_v62, %v96_v61  ;;  %v110_v24 = vld [vmem:[#allocation3 + $0x1d8] sm:$0xff]  ;;  %v220_v62 = vpack.c.bf16 %v134_v60, %v132_v59 }
  0x5c   :  { %412 = vmatmul.mubr.bf16.gmra.mrb[4].mxu0 %v181_v30  ;;  %604 = vmatmul.mubr.bf16.gmra.mrb[4].mxu1 %v229_v2  ;;  %v85_v30 = vld [vmem:[#allocation3 + $0x110] sm:$0xff]  ;;  %v7445_v2 = vld [vmem:[#allocation3 + $0x160] sm:$0xff] }
  0x5d   :  { %419 = vmatprep.mubr.bf16.mxu0 %v184_v31  ;;  %611 = vmatprep.mubr.bf16.mxu1 %v232_v10  ;;  %v164_v31 = vld [vmem:[#allocation3 + $0x388] sm:$0xff]  ;;  %v177_v10 = vld [vmem:[#allocation3 + $0x3f0] sm:$0xff] }
  0x5e   :  { %v236_v34 = vpack.c.bf16 %v166_v32, %v164_v31  ;;  %v241_v11 = vpack.c.bf16 %v177_v10, %v175_v9  ;;  %v142_v9 = vld [vmem:[#allocation3 + $0x2d8] sm:$0xff] }
  0x64   :  { %420 = vmatmul.mubr.bf16.gmra.mrb[8].mxu0 %v183_v36  ;;  %612 = vmatmul.mubr.bf16.gmra.mrb[8].mxu1 %v231_v14  ;;  %v168_v36 = vld [vmem:[#allocation3 + $0x3a8] sm:$0xff]  ;;  %v7290_v14 = vmov 0.0  }
  0x65   :  { %427 = vmatprep.mubr.bf16.mxu0 %v186_v37  ;;  %619 = vmatprep.mubr.bf16.mxu1 %v234_v22  ;;  %v170_v37 = vld [vmem:[#allocation3 + $0x3b8] sm:$0xff]  ;;  %1211 = vst.msk [vmem:[#allocation2 + $0x28] sm:$0xff] %vm660_vm0, %v7290_v14  ;;  %1206 = vst.msk [vmem:[#allocation2] sm:$0xff] %vm660_vm0, %v7290_v14  ;;  %v105_v22 = vld [vmem:[#allocation3 + $0x1b0] sm:$0xff] }
  0x66   :  { %v238_v41 = vpack.c.bf16 %v170_v37, %v168_v36  ;;  %1207 = vst.msk [vmem:[#allocation2 + $0x8] sm:$0xff] %vm660_vm0, %v7290_v14  ;;  %1208 = vst.msk [vmem:[#allocation2 + $0x10] sm:$0xff] %vm660_vm0, %v7290_v14  ;;  %v205_v25 = vpack.c.bf16 %v105_v22, %v103_v21  ;;  %v118_v36 = vld [vmem:[#allocation3 + $0x218] sm:$0xff] }
  0x67   :  { %1209 = vst.msk [vmem:[#allocation2 + $0x18] sm:$0xff] %vm660_vm0, %v7290_v14  ;;  %1210 = vst.msk [vmem:[#allocation2 + $0x20] sm:$0xff] %vm660_vm0, %v7290_v14 }
  0x68   :  { %1212 = vst.msk [vmem:[#allocation2 + $0x30] sm:$0xff] %vm660_vm0, %v7290_v14  ;;  %1213 = vst.msk [vmem:[#allocation2 + $0x38] sm:$0xff] %vm660_vm0, %v7290_v14 }
  0x69   :  { %1214 = vst.msk [vmem:[#allocation2 + $0x40] sm:$0xff] %vm660_vm0, %v7290_v14  ;;  %1215 = vst.msk [vmem:[#allocation2 + $0x48] sm:$0xff] %vm660_vm0, %v7290_v14 }
  0x6a   :  { %1216 = vst.msk [vmem:[#allocation2 + $0x50] sm:$0xff] %vm660_vm0, %v7290_v14  ;;  %1217 = vst.msk [vmem:[#allocation2 + $0x58] sm:$0xff] %vm660_vm0, %v7290_v14 }
  0x6b   :  { %1218 = vst.msk [vmem:[#allocation2 + $0x60] sm:$0xff] %vm660_vm0, %v7290_v14  ;;  %1219 = vst.msk [vmem:[#allocation2 + $0x68] sm:$0xff] %vm660_vm0, %v7290_v14 }
  0x6c   :  { %428 = vmatmul.mubr.bf16.gmra.mrb[12].mxu0 %v185_v42  ;;  %620 = vmatmul.mubr.bf16.gmra.mrb[12].mxu1 %v233_v26  ;;  %v195_v42 = vpack.c.bf16 %v85_v30, %v83_v29  ;;  %1220 = vst.msk [vmem:[#allocation2 + $0x70] sm:$0xff] %vm660_vm0, %v7290_v14  ;;  %1221 = vst.msk [vmem:[#allocation2 + $0x78] sm:$0xff] %vm660_vm0, %v7290_v14  ;;  %v208_v26 = vpack.c.bf16 %v110_v24, %v108_v23  ;;  %v112_v29 = vld [vmem:[#allocation3 + $0x1e8] sm:$0xff]  ;;  %v114_v30 = vld [vmem:[#allocation3 + $0x1f8] sm:$0xff] }
  0x6d   :  { %435 = vmatprep.mubr.bf16.mxu0 %v188_v43  ;;  %627 = vmatprep.mubr.bf16.mxu1 %v236_v34  ;;  %v198_v43 = vpack.c.bf16 %v90_v39, %v88_v38  ;;  %1222 = vst.msk [vmem:[#allocation2 + $0x80] sm:$0xff] %vm660_vm0, %v7290_v14  ;;  %1223 = vst.msk [vmem:[#allocation2 + $0x88] sm:$0xff] %vm660_vm0, %v7290_v14  ;;  %v210_v32 = vpack.c.bf16 %v114_v30, %v112_v29  ;;  %v113_v34 = vld [vmem:[#allocation3 + $0x1f0] sm:$0xff]  ;;  %v115_v39 = vld [vmem:[#allocation3 + $0x200] sm:$0xff] }
  0x6e   :  { %1224 = vst.msk [vmem:[#allocation2 + $0x90] sm:$0xff] %vm660_vm0, %v7290_v14  ;;  %1225 = vst.msk [vmem:[#allocation2 + $0x98] sm:$0xff] %vm660_vm0, %v7290_v14  ;;  %v209_v37 = vpack.c.bf16 %v113_v34, %v111_v33  ;;  %v212_v38 = vpack.c.bf16 %v118_v36, %v116_v35 }
  0x6f   :  { %1226 = vst.msk [vmem:[#allocation2 + $0xa0] sm:$0xff] %vm660_vm0, %v7290_v14  ;;  %1227 = vst.msk [vmem:[#allocation2 + $0xa8] sm:$0xff] %vm660_vm0, %v7290_v14 }
  0x70   :  { %1228 = vst.msk [vmem:[#allocation2 + $0xb0] sm:$0xff] %vm660_vm0, %v7290_v14  ;;  %1229 = vst.msk [vmem:[#allocation2 + $0xb8] sm:$0xff] %vm660_vm0, %v7290_v14 }
  0x71   :  { %1230 = vst.msk [vmem:[#allocation2 + $0xc0] sm:$0xff] %vm660_vm0, %v7290_v14  ;;  %1231 = vst.msk [vmem:[#allocation2 + $0xc8] sm:$0xff] %vm660_vm0, %v7290_v14 }
  0x72   :  { %1232 = vst.msk [vmem:[#allocation2 + $0xd0] sm:$0xff] %vm660_vm0, %v7290_v14  ;;  %1233 = vst.msk [vmem:[#allocation2 + $0xd8] sm:$0xff] %vm660_vm0, %v7290_v14 }
  0x73   :  { %1234 = vst.msk [vmem:[#allocation2 + $0xe0] sm:$0xff] %vm660_vm0, %v7290_v14  ;;  %1235 = vst.msk [vmem:[#allocation2 + $0xe8] sm:$0xff] %vm660_vm0, %v7290_v14 }
  0x74   :  { %436 = vmatmul.mubr.bf16.gmra.mrb[16].mxu0 %v187_v54  ;;  %628 = vmatmul.mubr.bf16.gmra.mrb[16].mxu1 %v235_v40  ;;  %v197_v54 = vpack.c.bf16 %v89_v50, %v87_v49  ;;  %1236 = vst.msk [vmem:[#allocation2 + $0xf0] sm:$0xff] %vm660_vm0, %v7290_v14  ;;  %1237 = vst.msk [vmem:[#allocation2 + $0xf8] sm:$0xff] %vm660_vm0, %v7290_v14  ;;  %v117_v40 = vld [vmem:[#allocation3 + $0x210] sm:$0xff]  ;;  %v213_v49 = vpack.c.bf16 %v121_v46, %v119_v45 }
  0x75   :  { %443 = vmatprep.mubr.bf16.mxu0 %v190_v55  ;;  %635 = vmatprep.mubr.bf16.mxu1 %v238_v41  ;;  %v200_v55 = vpack.c.bf16 %v94_v53, %v92_v52  ;;  %1238 = vst.msk [vmem:[#allocation2 + $0x100] sm:$0xff] %vm660_vm0, %v7290_v14  ;;  %1239 = vst.msk [vmem:[#allocation2 + $0x108] sm:$0xff] %vm660_vm0, %v7290_v14  ;;  %v120_v41 = vld [vmem:[#allocation3 + $0x228] sm:$0xff]  ;;  %v125_v52 = vld [vmem:[#allocation3 + $0x250] sm:$0xff] }
  0x76   :  { %1240 = vst.msk [vmem:[#allocation2 + $0x110] sm:$0xff] %vm660_vm0, %v7290_v14  ;;  %1241 = vst.msk [vmem:[#allocation2 + $0x118] sm:$0xff] %vm660_vm0, %v7290_v14  ;;  %v128_v53 = vld [vmem:[#allocation3 + $0x268] sm:$0xff] }
  0x77   :  { %1242 = vst.msk [vmem:[#allocation2 + $0x120] sm:$0xff] %vm660_vm0, %v7290_v14  ;;  %1243 = vst.msk [vmem:[#allocation2 + $0x128] sm:$0xff] %vm660_vm0, %v7290_v14 }
  0x78   :  { %1244 = vst.msk [vmem:[#allocation2 + $0x130] sm:$0xff] %vm660_vm0, %v7290_v14  ;;  %1245 = vst.msk [vmem:[#allocation2 + $0x138] sm:$0xff] %vm660_vm0, %v7290_v14 }
  0x79   :  { %1246 = vst.msk [vmem:[#allocation2 + $0x140] sm:$0xff] %vm660_vm0, %v7290_v14  ;;  %1247 = vst.msk [vmem:[#allocation2 + $0x148] sm:$0xff] %vm660_vm0, %v7290_v14 }
  0x7a   :  { %1248 = vst.msk [vmem:[#allocation2 + $0x150] sm:$0xff] %vm660_vm0, %v7290_v14  ;;  %1249 = vst.msk [vmem:[#allocation2 + $0x158] sm:$0xff] %vm660_vm0, %v7290_v14 }
  0x7b   :  { %1250 = vst.msk [vmem:[#allocation2 + $0x160] sm:$0xff] %vm660_vm0, %v7290_v14  ;;  %1251 = vst.msk [vmem:[#allocation2 + $0x168] sm:$0xff] %vm660_vm0, %v7290_v14 }
  0x7c   :  { %444 = vmatmul.mubr.bf16.gmra.mrb[20].mxu0 %v189_v3  ;;  %636 = vmatmul.mubr.bf16.gmra.mrb[20].mxu1 %v237_v48  ;;  %v7447_v3 = vld [vmem:[#allocation3 + $0x170] sm:$0xff]  ;;  %1252 = vst.msk [vmem:[#allocation2 + $0x170] sm:$0xff] %vm660_vm0, %v7290_v14  ;;  %1253 = vst.msk [vmem:[#allocation2 + $0x178] sm:$0xff] %vm660_vm0, %v7290_v14  ;;  %v126_v48 = vld [vmem:[#allocation3 + $0x258] sm:$0xff] }
  0x7d   :  { %451 = vmatprep.mubr.bf16.mxu0 %v192_v4  ;;  %643 = vmatprep.mubr.bf16.mxu1 %v240_v51  ;;  %v7449_v4 = vld [vmem:[#allocation3 + $0x188] sm:$0xff]  ;;  %v201_v12 = vpack.c.bf16 %v7447_v3, %v7445_v2  ;;  %1254 = vst.msk [vmem:[#allocation2 + $0x180] sm:$0xff] %vm660_vm0, %v7290_v14  ;;  %1255 = vst.msk [vmem:[#allocation2 + $0x188] sm:$0xff] %vm660_vm0, %v7290_v14  ;;  %v216_v50 = vpack.c.bf16 %v126_v48, %v124_v47  ;;  %v123_v51 = vld [vmem:[#allocation3 + $0x240] sm:$0xff] }
  0x7e   :  { %v204_v13 = vpack.c.bf16 %v7451_v7, %v7449_v4  ;;  %1256 = vst.msk [vmem:[#allocation2 + $0x190] sm:$0xff] %vm660_vm0, %v7290_v14  ;;  %1257 = vst.msk [vmem:[#allocation2 + $0x198] sm:$0xff] %vm660_vm0, %v7290_v14  ;;  %v136_v2 = vld [vmem:[#allocation3 + $0x2a8] sm:$0xff]  ;;  %v138_v3 = vld [vmem:[#allocation3 + $0x2b8] sm:$0xff] }
  0x7f   :  { %1258 = vst.msk [vmem:[#allocation2 + $0x1a0] sm:$0xff] %vm660_vm0, %v7290_v14  ;;  %1259 = vst.msk [vmem:[#allocation2 + $0x1a8] sm:$0xff] %vm660_vm0, %v7290_v14  ;;  %v222_v5 = vpack.c.bf16 %v138_v3, %v136_v2  ;;  %v137_v7 = vld [vmem:[#allocation3 + $0x2b0] sm:$0xff] }
  0x80   :  { %1260 = vst.msk [vmem:[#allocation2 + $0x1b0] sm:$0xff] %vm660_vm0, %v7290_v14  ;;  %1261 = vst.msk [vmem:[#allocation2 + $0x1b8] sm:$0xff] %vm660_vm0, %v7290_v14  ;;  %v221_v10 = vpack.c.bf16 %v137_v7, %v135_v6 }
  0x81   :  { %1262 = vst.msk [vmem:[#allocation2 + $0x1c0] sm:$0xff] %vm660_vm0, %v7290_v14  ;;  %1263 = vst.msk [vmem:[#allocation2 + $0x1c8] sm:$0xff] %vm660_vm0, %v7290_v14 }
  0x82   :  { %1264 = vst.msk [vmem:[#allocation2 + $0x1d0] sm:$0xff] %vm660_vm0, %v7290_v14  ;;  %1265 = vst.msk [vmem:[#allocation2 + $0x1d8] sm:$0xff] %vm660_vm0, %v7290_v14 }
  0x83   :  { %1266 = vst.msk [vmem:[#allocation2 + $0x1e0] sm:$0xff] %vm660_vm0, %v7290_v14  ;;  %1267 = vst.msk [vmem:[#allocation2 + $0x1e8] sm:$0xff] %vm660_vm0, %v7290_v14 }
  0x84   :  { %452 = vmatmul.mubr.bf16.gmra.mrb[24].mxu0 %v191_v15  ;;  %644 = vmatmul.mubr.bf16.gmra.mrb[24].mxu1 %v239_v58  ;;  %1268 = vst.msk [vmem:[#allocation2 + $0x1f0] sm:$0xff] %vm660_vm0, %v7290_v14  ;;  %1269 = vst.msk [vmem:[#allocation2 + $0x1f8] sm:$0xff] %vm660_vm0, %v7290_v14  ;;  %v99_v15 = vld [vmem:[#allocation3 + $0x180] sm:$0xff]  ;;  %v129_v58 = vld [vmem:[#allocation3 + $0x270] sm:$0xff] }
  0x85   :  { %459 = vmatprep.mubr.bf16.mxu0 %v194_v16  ;;  %651 = vmatprep.mubr.bf16.mxu1 %v242_v8  ;;  %1270 = vst.msk [vmem:[#allocation2 + $0x200] sm:$0xff] %vm660_vm0, %v7290_v14  ;;  %1271 = vst.msk [vmem:[#allocation2 + $0x208] sm:$0xff] %vm660_vm0, %v7290_v14  ;;  %v101_v16 = vld [vmem:[#allocation3 + $0x190] sm:$0xff]  ;;  %v217_v61 = vpack.c.bf16 %v129_v58, %v127_v57  ;;  %v140_v8 = vld [vmem:[#allocation3 + $0x2c8] sm:$0xff] }
  0x86   :  { %1272 = vst.msk [vmem:[#allocation2 + $0x210] sm:$0xff] %vm660_vm0, %v7290_v14  ;;  %1273 = vst.msk [vmem:[#allocation2 + $0x218] sm:$0xff] %vm660_vm0, %v7290_v14  ;;  %v203_v19 = vpack.c.bf16 %v101_v16, %v99_v15  ;;  %v146_v15 = vld [vmem:[#allocation3 + $0x2f8] sm:$0xff] }
  0x87   :  { %1274 = vst.msk [vmem:[#allocation2 + $0x220] sm:$0xff] %vm660_vm0, %v7290_v14  ;;  %1275 = vst.msk [vmem:[#allocation2 + $0x228] sm:$0xff] %vm660_vm0, %v7290_v14 }
  0x88   :  { %1276 = vst.msk [vmem:[#allocation2 + $0x230] sm:$0xff] %vm660_vm0, %v7290_v14  ;;  %1277 = vst.msk [vmem:[#allocation2 + $0x238] sm:$0xff] %vm660_vm0, %v7290_v14 }
  0x89   :  { %1278 = vst.msk [vmem:[#allocation2 + $0x240] sm:$0xff] %vm660_vm0, %v7290_v14  ;;  %1279 = vst.msk [vmem:[#allocation2 + $0x248] sm:$0xff] %vm660_vm0, %v7290_v14 }
  0x8a   :  { %1280 = vst.msk [vmem:[#allocation2 + $0x250] sm:$0xff] %vm660_vm0, %v7290_v14  ;;  %1281 = vst.msk [vmem:[#allocation2 + $0x258] sm:$0xff] %vm660_vm0, %v7290_v14 }
  0x8b   :  { %1282 = vst.msk [vmem:[#allocation2 + $0x260] sm:$0xff] %vm660_vm0, %v7290_v14  ;;  %1283 = vst.msk [vmem:[#allocation2 + $0x268] sm:$0xff] %vm660_vm0, %v7290_v14 }
  0x8c   :  { %460 = vmatmul.mubr.bf16.gmra.mrb[28].mxu0 %v193_v27  ;;  %652 = vmatmul.mubr.bf16.gmra.mrb[28].mxu1 %v241_v11  ;;  %1284 = vst.msk [vmem:[#allocation2 + $0x270] sm:$0xff] %vm660_vm0, %v7290_v14  ;;  %1285 = vst.msk [vmem:[#allocation2 + $0x278] sm:$0xff] %vm660_vm0, %v7290_v14  ;;  %v107_v27 = vld [vmem:[#allocation3 + $0x1c0] sm:$0xff]  ;;  %v224_v11 = vpack.c.bf16 %v142_v9, %v140_v8 }
  0x8d   :  { %467 = vmatprep.mubr.bf16.mxu0 %v196_v28  ;;  %1286 = vst.msk [vmem:[#allocation2 + $0x280] sm:$0xff] %vm660_vm0, %v7290_v14  ;;  %1287 = vst.msk [vmem:[#allocation2 + $0x288] sm:$0xff] %vm660_vm0, %v7290_v14  ;;  %v109_v28 = vld [vmem:[#allocation3 + $0x1d0] sm:$0xff] }
  0x8e   :  { %1288 = vst.msk [vmem:[#allocation2 + $0x290] sm:$0xff] %vm660_vm0, %v7290_v14  ;;  %1289 = vst.msk [vmem:[#allocation2 + $0x298] sm:$0xff] %vm660_vm0, %v7290_v14  ;;  %v207_v31 = vpack.c.bf16 %v109_v28, %v107_v27 }
  0x8f   :  { %1290 = vst.msk [vmem:[#allocation2 + $0x2a0] sm:$0xff] %vm660_vm0, %v7290_v14  ;;  %1291 = vst.msk [vmem:[#allocation2 + $0x2a8] sm:$0xff] %vm660_vm0, %v7290_v14 }
  0x90   :  { %1292 = vst.msk [vmem:[#allocation2 + $0x2b0] sm:$0xff] %vm660_vm0, %v7290_v14  ;;  %1293 = vst.msk [vmem:[#allocation2 + $0x2b8] sm:$0xff] %vm660_vm0, %v7290_v14 }
  0x91   :  { %1294 = vst.msk [vmem:[#allocation2 + $0x2c0] sm:$0xff] %vm660_vm0, %v7290_v14  ;;  %1295 = vst.msk [vmem:[#allocation2 + $0x2c8] sm:$0xff] %vm660_vm0, %v7290_v14 }
  0x92   :  { %1296 = vst.msk [vmem:[#allocation2 + $0x2d0] sm:$0xff] %vm660_vm0, %v7290_v14  ;;  %1297 = vst.msk [vmem:[#allocation2 + $0x2d8] sm:$0xff] %vm660_vm0, %v7290_v14 }
  0x93   :  { %1298 = vst.msk [vmem:[#allocation2 + $0x2e0] sm:$0xff] %vm660_vm0, %v7290_v14  ;;  %1299 = vst.msk [vmem:[#allocation2 + $0x2e8] sm:$0xff] %vm660_vm0, %v7290_v14 }
  0x94   :  { %468 = vmatmul.mubr.bf16.gmra.mrb[32].mxu0 %v195_v42  ;;  %1300 = vst.msk [vmem:[#allocation2 + $0x2f0] sm:$0xff] %vm660_vm0, %v7290_v14  ;;  %1301 = vst.msk [vmem:[#allocation2 + $0x2f8] sm:$0xff] %vm660_vm0, %v7290_v14  ;;  %v122_v42 = vld [vmem:[#allocation3 + $0x238] sm:$0xff] }
  0x95   :  { %475 = vmatprep.mubr.bf16.mxu0 %v198_v43  ;;  %1302 = vst.msk [vmem:[#allocation2 + $0x300] sm:$0xff] %vm660_vm0, %v7290_v14  ;;  %1303 = vst.msk [vmem:[#allocation2 + $0x308] sm:$0xff] %vm660_vm0, %v7290_v14  ;;  %v211_v43 = vpack.c.bf16 %v117_v40, %v115_v39  ;;  %v214_v44 = vpack.c.bf16 %v122_v42, %v120_v41 }
  0x96   :  { %1304 = vst.msk [vmem:[#allocation2 + $0x310] sm:$0xff] %vm660_vm0, %v7290_v14  ;;  %1305 = vst.msk [vmem:[#allocation2 + $0x318] sm:$0xff] %vm660_vm0, %v7290_v14 }
  0x97   :  { %1306 = vst.msk [vmem:[#allocation2 + $0x320] sm:$0xff] %vm660_vm0, %v7290_v14  ;;  %1307 = vst.msk [vmem:[#allocation2 + $0x328] sm:$0xff] %vm660_vm0, %v7290_v14 }
  0x98   :  { %1308 = vst.msk [vmem:[#allocation2 + $0x330] sm:$0xff] %vm660_vm0, %v7290_v14  ;;  %1309 = vst.msk [vmem:[#allocation2 + $0x338] sm:$0xff] %vm660_vm0, %v7290_v14 }
  0x99   :  { %1310 = vst.msk [vmem:[#allocation2 + $0x340] sm:$0xff] %vm660_vm0, %v7290_v14  ;;  %1311 = vst.msk [vmem:[#allocation2 + $0x348] sm:$0xff] %vm660_vm0, %v7290_v14 }
  0x9a   :  { %1312 = vst.msk [vmem:[#allocation2 + $0x350] sm:$0xff] %vm660_vm0, %v7290_v14  ;;  %1313 = vst.msk [vmem:[#allocation2 + $0x358] sm:$0xff] %vm660_vm0, %v7290_v14 }
  0x9b   :  { %1314 = vst.msk [vmem:[#allocation2 + $0x360] sm:$0xff] %vm660_vm0, %v7290_v14  ;;  %1315 = vst.msk [vmem:[#allocation2 + $0x368] sm:$0xff] %vm660_vm0, %v7290_v14 }
  0x9c   :  { %476 = vmatmul.mubr.bf16.gmra.mrb[36].mxu0 %v197_v54  ;;  %1316 = vst.msk [vmem:[#allocation2 + $0x370] sm:$0xff] %vm660_vm0, %v7290_v14  ;;  %1317 = vst.msk [vmem:[#allocation2 + $0x378] sm:$0xff] %vm660_vm0, %v7290_v14  ;;  %v130_v54 = vld [vmem:[#allocation3 + $0x278] sm:$0xff] }
  0x9d   :  { %483 = vmatprep.mubr.bf16.mxu0 %v200_v55  ;;  %1318 = vst.msk [vmem:[#allocation2 + $0x380] sm:$0xff] %vm660_vm0, %v7290_v14  ;;  %1319 = vst.msk [vmem:[#allocation2 + $0x388] sm:$0xff] %vm660_vm0, %v7290_v14  ;;  %v215_v55 = vpack.c.bf16 %v125_v52, %v123_v51  ;;  %v218_v56 = vpack.c.bf16 %v130_v54, %v128_v53 }
  0x9e   :  { %1320 = vst.msk [vmem:[#allocation2 + $0x390] sm:$0xff] %vm660_vm0, %v7290_v14  ;;  %1321 = vst.msk [vmem:[#allocation2 + $0x398] sm:$0xff] %vm660_vm0, %v7290_v14 }
  0x9f   :  { %1322 = vst.msk [vmem:[#allocation2 + $0x3a0] sm:$0xff] %vm660_vm0, %v7290_v14  ;;  %1323 = vst.msk [vmem:[#allocation2 + $0x3a8] sm:$0xff] %vm660_vm0, %v7290_v14 }
  0xa0   :  { %1324 = vst.msk [vmem:[#allocation2 + $0x3b0] sm:$0xff] %vm660_vm0, %v7290_v14  ;;  %1325 = vst.msk [vmem:[#allocation2 + $0x3b8] sm:$0xff] %vm660_vm0, %v7290_v14 }
  0xa1   :  { %1326 = vst.msk [vmem:[#allocation2 + $0x3c0] sm:$0xff] %vm660_vm0, %v7290_v14  ;;  %1327 = vst.msk [vmem:[#allocation2 + $0x3c8] sm:$0xff] %vm660_vm0, %v7290_v14 }
  0xa2   :  { %1328 = vst.msk [vmem:[#allocation2 + $0x3d0] sm:$0xff] %vm660_vm0, %v7290_v14  ;;  %1329 = vst.msk [vmem:[#allocation2 + $0x3d8] sm:$0xff] %vm660_vm0, %v7290_v14 }
  0xa3   :  { %1330 = vst.msk [vmem:[#allocation2 + $0x3e0] sm:$0xff] %vm660_vm0, %v7290_v14  ;;  %1331 = vst.msk [vmem:[#allocation2 + $0x3e8] sm:$0xff] %vm660_vm0, %v7290_v14 }
  0xa4   :  { %484 = vmatmul.mubr.bf16.gmra.mrb[40].mxu0 %v199_v63  ;;  %1332 = vst.msk [vmem:[#allocation2 + $0x3f0] sm:$0xff] %vm660_vm0, %v7290_v14  ;;  %1333 = vst.msk [vmem:[#allocation2 + $0x3f8] sm:$0xff] %vm660_vm0, %v7290_v14  ;;  %v131_v63 = vld [vmem:[#allocation3 + $0x280] sm:$0xff] }
  0xa5   :  { %491 = vmatprep.mubr.bf16.mxu0 %v202_v1  ;;  %1334 = vst.msk [vmem:[#allocation2 + $0x400] sm:$0xff] %vm660_vm0, %v7290_v14  ;;  %1335 = vst.msk [vmem:[#allocation2 + $0x408] sm:$0xff] %vm660_vm0, %v7290_v14  ;;  %v133_v1 = vld [vmem:[#allocation3 + $0x290] sm:$0xff] }
  0xa6   :  { %1336 = vst.msk [vmem:[#allocation2 + $0x410] sm:$0xff] %vm660_vm0, %v7290_v14  ;;  %1337 = vst.msk [vmem:[#allocation2 + $0x418] sm:$0xff] %vm660_vm0, %v7290_v14  ;;  %v219_v4 = vpack.c.bf16 %v133_v1, %v131_v63 }
  0xa7   :  { %1338 = vst.msk [vmem:[#allocation2 + $0x420] sm:$0xff] %vm660_vm0, %v7290_v14  ;;  %1339 = vst.msk [vmem:[#allocation2 + $0x428] sm:$0xff] %vm660_vm0, %v7290_v14 }
  0xa8   :  { %1340 = vst.msk [vmem:[#allocation2 + $0x430] sm:$0xff] %vm660_vm0, %v7290_v14  ;;  %1341 = vst.msk [vmem:[#allocation2 + $0x438] sm:$0xff] %vm660_vm0, %v7290_v14 }
  0xa9   :  { %1342 = vst.msk [vmem:[#allocation2 + $0x440] sm:$0xff] %vm660_vm0, %v7290_v14  ;;  %1343 = vst.msk [vmem:[#allocation2 + $0x448] sm:$0xff] %vm660_vm0, %v7290_v14 }
  0xaa   :  { %1344 = vst.msk [vmem:[#allocation2 + $0x450] sm:$0xff] %vm660_vm0, %v7290_v14  ;;  %1345 = vst.msk [vmem:[#allocation2 + $0x458] sm:$0xff] %vm660_vm0, %v7290_v14 }
  0xab   :  { %1346 = vst.msk [vmem:[#allocation2 + $0x460] sm:$0xff] %vm660_vm0, %v7290_v14  ;;  %1347 = vst.msk [vmem:[#allocation2 + $0x468] sm:$0xff] %vm660_vm0, %v7290_v14 }
  0xac   :  { %1348 = vst.msk [vmem:[#allocation2 + $0x470] sm:$0xff] %vm660_vm0, %v7290_v14  ;;  %1349 = vst.msk [vmem:[#allocation2 + $0x478] sm:$0xff] %vm660_vm0, %v7290_v14  ;;  %492 = vmatmul.mubr.bf16.gmra.mrb[44].mxu0 %v201_v12  ;;  %v139_v12 = vld [vmem:[#allocation3 + $0x2c0] sm:$0xff]  ;;  %v144_v14 = vld [vmem:[#allocation3 + $0x2e8] sm:$0xff] }
  0xad   :  { %499 = vmatprep.mubr.bf16.mxu0 %v204_v13  ;;  %v141_v13 = vld [vmem:[#allocation3 + $0x2d0] sm:$0xff]  ;;  %v226_v17 = vpack.c.bf16 %v146_v15, %v144_v14 }
  0xae   :  { %v223_v16 = vpack.c.bf16 %v141_v13, %v139_v12 }
  0xb4   :  { %500 = vmatmul.mubr.bf16.gmra.mrb[48].mxu0 %v203_v19  ;;  %v145_v19 = vld [vmem:[#allocation3 + $0x2f0] sm:$0xff] }
  0xb5   :  { %507 = vmatprep.mubr.bf16.mxu0 %v206_v20  ;;  %v225_v20 = vpack.c.bf16 %v145_v19, %v143_v18 }
  0xbc   :  { %508 = vmatmul.mubr.bf16.gmra.mrb[52].mxu0 %v205_v25 }
  0xbd   :  { %515 = vmatprep.mubr.bf16.mxu0 %v208_v26 }
  0xc4   :  { %516 = vmatmul.mubr.bf16.gmra.mrb[56].mxu0 %v207_v31 }
  0xc5   :  { %523 = vmatprep.mubr.bf16.mxu0 %v210_v32 }
  0xcc   :  { %524 = vmatmul.mubr.bf16.gmra.mrb[60].mxu0 %v209_v37 }
  0xcd   :  { %531 = vmatprep.mubr.bf16.mxu0 %v212_v38 }
  0xd4   :  { %532 = vmatmul.mubr.bf16.gmra.mrb[64].mxu0 %v211_v43 }
  0xd5   :  { %539 = vmatprep.mubr.bf16.mxu0 %v214_v44 }
  0xdc   :  { %540 = vmatmul.mubr.bf16.gmra.mrb[68].mxu0 %v213_v49 }
  0xdd   :  { %547 = vmatprep.mubr.bf16.mxu0 %v216_v50 }
  0xe4   :  { %548 = vmatmul.mubr.bf16.gmra.mrb[72].mxu0 %v215_v55 }
  0xe5   :  { %555 = vmatprep.mubr.bf16.mxu0 %v218_v56 }
  0xec   :  { %556 = vmatmul.mubr.bf16.gmra.mrb[76].mxu0 %v217_v61 }
  0xed   :  { %563 = vmatprep.mubr.bf16.mxu0 %v220_v62 }
  0xf4   :  { %564 = vmatmul.mubr.bf16.gmra.mrb[80].mxu0 %v219_v4 }
  0xf5   :  { %571 = vmatprep.mubr.bf16.mxu0 %v222_v5 }
  0xfc   :  { %572 = vmatmul.mubr.bf16.gmra.mrb[84].mxu0 %v221_v10 }
  0xfd   :  { %579 = vmatprep.mubr.bf16.mxu0 %v224_v11 }
 0x104   :  { %580 = vmatmul.mubr.bf16.gmra.mrb[88].mxu0 %v223_v16 }
 0x105   :  { %587 = vmatprep.mubr.bf16.mxu0 %v226_v17 }
 0x10c   :  { %588 = vmatmul.mubr.bf16.gmra.mrb[92].mxu0 %v225_v20 }
 0x127   :  { %v7751_v21 = vpop.f32.mrb[0].mxu0  ;;  %v7807_v11 = vpop.f32.mrb[0].mxu1 }
 0x128   :  { %v795_v22 = vmul.f32 %v7751_v21, %v7751_v21  ;;  %v407_v23 = vpop.f32.mrb[1].mxu0  ;;  %v661_v25 = vsel %vm660_vm0, %v7751_v21, 0.0  ;;  %v599_v13 = vpop.f32.mrb[1].mxu1 }
 0x129   :  { %v7755_v24 = vpop.f32.mrb[2].mxu0  ;;  %v7809_v14 = vpop.f32.mrb[2].mxu1 }
 0x12a   :  { %v662_v26 = vsel %vm660_vm0, %v7755_v24, 0.0  ;;  %v796_v27 = vmul.f32 %v7755_v24, %v7755_v24  ;;  %v410_v28 = vpop.f32.mrb[3].mxu0  ;;  %v859_v30 = vsel %vm660_vm0, %v795_v22, 0.0  ;;  %v602_v16 = vpop.f32.mrb[3].mxu1 }
 0x12b   :  { %v663_v29 = vadd.f32 %v662_v26, %v661_v25 }
 0x12c   :  { %v860_v31 = vsel %vm660_vm0, %v796_v27, 0.0 }
 0x12d   :  { %v861_v32 = vadd.f32 %v860_v31, %v859_v30 }
 0x12f   :  { %v7765_v33 = vpop.f32.mrb[4].mxu0  ;;  %v7825_v31 = vpop.f32.mrb[4].mxu1 }
 0x130   :  { %v664_v34 = vsel %vm660_vm0, %v7765_v33, 0.0  ;;  %v797_v35 = vmul.f32 %v7765_v33, %v7765_v33  ;;  %v415_v36 = vpop.f32.mrb[5].mxu0 }
 0x131   :  { %v665_v37 = vadd.f32 %v664_v34, %v663_v29  ;;  %v7771_v38 = vpop.f32.mrb[6].mxu0  ;;  %v607_v34 = vpop.f32.mrb[5].mxu1 }
 0x132   :  { %v862_v39 = vsel %vm660_vm0, %v797_v35, 0.0  ;;  %v666_v40 = vsel %vm660_vm0, %v7771_v38, 0.0  ;;  %v798_v41 = vmul.f32 %v7771_v38, %v7771_v38  ;;  %v418_v42 = vpop.f32.mrb[7].mxu0  ;;  %v7827_v35 = vpop.f32.mrb[6].mxu1 }
 0x133   :  { %v863_v43 = vadd.f32 %v862_v39, %v861_v32  ;;  %v667_v44 = vadd.f32 %v666_v40, %v665_v37  ;;  %v610_v37 = vpop.f32.mrb[7].mxu1 }
 0x134   :  { %v864_v45 = vsel %vm660_vm0, %v798_v41, 0.0 }
 0x135   :  { %v865_v46 = vadd.f32 %v864_v45, %v863_v43 }
 0x137   :  { %v7779_v47 = vpop.f32.mrb[8].mxu0 }
 0x138   :  { %v668_v48 = vsel %vm660_vm0, %v7779_v47, 0.0  ;;  %v799_v49 = vmul.f32 %v7779_v47, %v7779_v47  ;;  %v423_v50 = vpop.f32.mrb[9].mxu0 }
 0x139   :  { %v669_v51 = vadd.f32 %v668_v48, %v667_v44  ;;  %v7785_v52 = vpop.f32.mrb[10].mxu0 }
 0x13a   :  { %v866_v53 = vsel %vm660_vm0, %v799_v49, 0.0  ;;  %v670_v54 = vsel %vm660_vm0, %v7785_v52, 0.0  ;;  %v800_v55 = vmul.f32 %v7785_v52, %v7785_v52  ;;  %v426_v56 = vpop.f32.mrb[11].mxu0 }
 0x13b   :  { %v867_v57 = vadd.f32 %v866_v53, %v865_v46  ;;  %v671_v58 = vadd.f32 %v670_v54, %v669_v51  ;;  %v7843_v53 = vpop.f32.mrb[8].mxu1 }
 0x13c   :  { %v868_v59 = vsel %vm660_vm0, %v800_v55, 0.0  ;;  %v615_v55 = vpop.f32.mrb[9].mxu1 }
 0x13d   :  { %v869_v60 = vadd.f32 %v868_v59, %v867_v57  ;;  %v7845_v56 = vpop.f32.mrb[10].mxu1 }
 0x13f   :  { %v7793_v61 = vpop.f32.mrb[12].mxu0 }
 0x140   :  { %v672_v62 = vsel %vm660_vm0, %v7793_v61, 0.0  ;;  %v801_v63 = vmul.f32 %v7793_v61, %v7793_v61  ;;  %v431_v1 = vpop.f32.mrb[13].mxu0 }
 0x141   :  { %v673_v2 = vadd.f32 %v672_v62, %v671_v58  ;;  %v7799_v3 = vpop.f32.mrb[14].mxu0  ;;  %v618_v58 = vpop.f32.mrb[11].mxu1 }
 0x142   :  { %v870_v4 = vsel %vm660_vm0, %v801_v63, 0.0  ;;  %v674_v5 = vsel %vm660_vm0, %v7799_v3, 0.0  ;;  %v802_v6 = vmul.f32 %v7799_v3, %v7799_v3  ;;  %v434_v7 = vpop.f32.mrb[15].mxu0 }
 0x143   :  { %v871_v8 = vadd.f32 %v870_v4, %v869_v60  ;;  %v675_v9 = vadd.f32 %v674_v5, %v673_v2 }
 0x144   :  { %v872_v10 = vsel %vm660_vm0, %v802_v6, 0.0 }
 0x145   :  { %v873_v12 = vadd.f32 %v872_v10, %v871_v8  ;;  %v7861_v10 = vpop.f32.mrb[12].mxu1 }
 0x146   :  { %v623_v13 = vpop.f32.mrb[13].mxu1 }
 0x147   :  { %v7811_v15 = vpop.f32.mrb[16].mxu0  ;;  %v7863_v16 = vpop.f32.mrb[14].mxu1 }
 0x148   :  { %v676_v17 = vsel %vm660_vm0, %v7811_v15, 0.0  ;;  %v803_v18 = vmul.f32 %v7811_v15, %v7811_v15  ;;  %v439_v19 = vpop.f32.mrb[17].mxu0 }
 0x149   :  { %v677_v20 = vadd.f32 %v676_v17, %v675_v9  ;;  %v7817_v22 = vpop.f32.mrb[18].mxu0 }
 0x14a   :  { %v874_v23 = vsel %vm660_vm0, %v803_v18, 0.0  ;;  %v678_v25 = vsel %vm660_vm0, %v7817_v22, 0.0  ;;  %v804_v26 = vmul.f32 %v7817_v22, %v7817_v22  ;;  %v442_v27 = vpop.f32.mrb[19].mxu0  ;;  %v626_v18 = vpop.f32.mrb[15].mxu1 }
 0x14b   :  { %v875_v28 = vadd.f32 %v874_v23, %v873_v12  ;;  %v679_v29 = vadd.f32 %v678_v25, %v677_v20 }
 0x14c   :  { %v876_v30 = vsel %vm660_vm0, %v804_v26, 0.0 }
 0x14d   :  { %v877_v32 = vadd.f32 %v876_v30, %v875_v28 }
 0x14f   :  { %v7829_v36 = vpop.f32.mrb[20].mxu0 }
 0x150   :  { %v680_v39 = vsel %vm660_vm0, %v7829_v36, 0.0  ;;  %v805_v40 = vmul.f32 %v7829_v36, %v7829_v36  ;;  %v447_v41 = vpop.f32.mrb[21].mxu0 }
 0x151   :  { %v681_v42 = vadd.f32 %v680_v39, %v679_v29  ;;  %v7835_v43 = vpop.f32.mrb[22].mxu0  ;;  %v7879_v39 = vpop.f32.mrb[16].mxu1 }
 0x152   :  { %v878_v44 = vsel %vm660_vm0, %v805_v40, 0.0  ;;  %v682_v45 = vsel %vm660_vm0, %v7835_v43, 0.0  ;;  %v806_v46 = vmul.f32 %v7835_v43, %v7835_v43  ;;  %v450_v48 = vpop.f32.mrb[23].mxu0  ;;  %v631_v41 = vpop.f32.mrb[17].mxu1 }
 0x153   :  { %v879_v49 = vadd.f32 %v878_v44, %v877_v32  ;;  %v683_v50 = vadd.f32 %v682_v45, %v681_v42  ;;  %v7881_v42 = vpop.f32.mrb[18].mxu1 }
 0x154   :  { %v880_v51 = vsel %vm660_vm0, %v806_v46, 0.0  ;;  %13147 = vst [vmem:[#allocation9_spill] sm:$0xff] %v7881_v42  ;;  %v634_v45 = vpop.f32.mrb[19].mxu1 }
 0x155   :  { %v881_v54 = vadd.f32 %v880_v51, %v879_v49 }
 0x157   :  { %v7847_v57 = vpop.f32.mrb[24].mxu0 }
 0x158   :  { %v684_v59 = vsel %vm660_vm0, %v7847_v57, 0.0  ;;  %v807_v60 = vmul.f32 %v7847_v57, %v7847_v57  ;;  %v455_v62 = vpop.f32.mrb[25].mxu0 }
 0x159   :  { %v685_v63 = vadd.f32 %v684_v59, %v683_v50  ;;  %v7853_v1 = vpop.f32.mrb[26].mxu0 }
 0x15a   :  { %v882_v2 = vsel %vm660_vm0, %v807_v60, 0.0  ;;  %v686_v4 = vsel %vm660_vm0, %v7853_v1, 0.0  ;;  %v808_v5 = vmul.f32 %v7853_v1, %v7853_v1  ;;  %v458_v6 = vpop.f32.mrb[27].mxu0 }
 0x15b   :  { %v883_v7 = vadd.f32 %v882_v2, %v881_v54  ;;  %v687_v8 = vadd.f32 %v686_v4, %v685_v63  ;;  %v7897_v2 = vpop.f32.mrb[20].mxu1 }
 0x15c   :  { %v884_v9 = vsel %vm660_vm0, %v808_v5, 0.0  ;;  %13148 = vst [vmem:[#allocation10_spill] sm:$0xff] %v7897_v2  ;;  %v639_v5 = vpop.f32.mrb[21].mxu1 }
 0x15d   :  { %v885_v12 = vadd.f32 %v884_v9, %v883_v7  ;;  %v7899_v6 = vpop.f32.mrb[22].mxu1 }
 0x15e   :  { %13149 = vst [vmem:[#allocation11_spill] sm:$0xff] %v7899_v6 }
 0x15f   :  { %v7865_v17 = vpop.f32.mrb[28].mxu0 }
 0x160   :  { %v688_v19 = vsel %vm660_vm0, %v7865_v17, 0.0  ;;  %v809_v20 = vmul.f32 %v7865_v17, %v7865_v17  ;;  %v463_v23 = vpop.f32.mrb[29].mxu0 }
 0x161   :  { %v689_v25 = vadd.f32 %v688_v19, %v687_v8  ;;  %v7871_v26 = vpop.f32.mrb[30].mxu0  ;;  %v642_v8 = vpop.f32.mrb[23].mxu1 }
 0x162   :  { %v886_v27 = vsel %vm660_vm0, %v809_v20, 0.0  ;;  %v690_v28 = vsel %vm660_vm0, %v7871_v26, 0.0  ;;  %v810_v29 = vmul.f32 %v7871_v26, %v7871_v26  ;;  %v466_v30 = vpop.f32.mrb[31].mxu0 }
 0x163   :  { %v887_v32 = vadd.f32 %v886_v27, %v885_v12  ;;  %v691_v34 = vadd.f32 %v690_v28, %v689_v25 }
 0x164   :  { %v888_v37 = vsel %vm660_vm0, %v810_v29, 0.0 }
 0x165   :  { %v889_v40 = vadd.f32 %v888_v37, %v887_v32  ;;  %v7915_v32 = vpop.f32.mrb[24].mxu1 }
 0x166   :  { %13150 = vst [vmem:[#allocation12_spill] sm:$0xff] %v7915_v32  ;;  %v647_v37 = vpop.f32.mrb[25].mxu1 }
 0x167   :  { %v7883_v44 = vpop.f32.mrb[32].mxu0 }
 0x168   :  { %v692_v46 = vsel %vm660_vm0, %v7883_v44, 0.0  ;;  %v811_v48 = vmul.f32 %v7883_v44, %v7883_v44  ;;  %v471_v49 = vpop.f32.mrb[33].mxu0 }
 0x169   :  { %v693_v50 = vadd.f32 %v692_v46, %v691_v34  ;;  %v7889_v51 = vpop.f32.mrb[34].mxu0 }
 0x16a   :  { %v890_v54 = vsel %vm660_vm0, %v811_v48, 0.0  ;;  %v694_v55 = vsel %vm660_vm0, %v7889_v51, 0.0  ;;  %v812_v58 = vmul.f32 %v7889_v51, %v7889_v51  ;;  %v474_v59 = vpop.f32.mrb[35].mxu0 }
 0x16b   :  { %v891_v60 = vadd.f32 %v890_v54, %v889_v40  ;;  %v695_v62 = vadd.f32 %v694_v55, %v693_v50  ;;  %v7917_v40 = vpop.f32.mrb[26].mxu1 }
 0x16c   :  { %v892_v63 = vsel %vm660_vm0, %v812_v58, 0.0  ;;  %13151 = vst [vmem:[#allocation13_spill] sm:$0xff] %v7917_v40  ;;  %v650_v45 = vpop.f32.mrb[27].mxu1 }
 0x16d   :  { %v893_v4 = vadd.f32 %v892_v63, %v891_v60  ;;  %v7933_v5 = vpop.f32.mrb[28].mxu1 }
 0x16e   :  { %13152 = vst [vmem:[#allocation14_spill] sm:$0xff] %v7933_v5 }
 0x16f   :  { %v7901_v7 = vpop.f32.mrb[36].mxu0 }
 0x170   :  { %v696_v9 = vsel %vm660_vm0, %v7901_v7, 0.0  ;;  %v813_v12 = vmul.f32 %v7901_v7, %v7901_v7  ;;  %v479_v13 = vpop.f32.mrb[37].mxu0 }
 0x171   :  { %v697_v18 = vadd.f32 %v696_v9, %v695_v62  ;;  %v7907_v19 = vpop.f32.mrb[38].mxu0  ;;  %v655_v9 = vpop.f32.mrb[29].mxu1 }
 0x172   :  { %v894_v20 = vsel %vm660_vm0, %v813_v12, 0.0  ;;  %v698_v23 = vsel %vm660_vm0, %v7907_v19, 0.0  ;;  %v814_v25 = vmul.f32 %v7907_v19, %v7907_v19  ;;  %v482_v27 = vpop.f32.mrb[39].mxu0  ;;  %v7935_v12 = vpop.f32.mrb[30].mxu1 }
 0x173   :  { %v895_v28 = vadd.f32 %v894_v20, %v893_v4  ;;  %v699_v29 = vadd.f32 %v698_v23, %v697_v18  ;;  %v658_v18 = vpop.f32.mrb[31].mxu1 }
 0x174   :  { %v896_v30 = vsel %vm660_vm0, %v814_v25, 0.0 }
 0x175   :  { %v897_v34 = vadd.f32 %v896_v30, %v895_v28 }
 0x177   :  { %v7919_v41 = vpop.f32.mrb[40].mxu0 }
 0x178   :  { %v700_v46 = vsel %vm660_vm0, %v7919_v41, 0.0  ;;  %v815_v48 = vmul.f32 %v7919_v41, %v7919_v41  ;;  %v487_v49 = vpop.f32.mrb[41].mxu0 }
 0x179   :  { %v701_v50 = vadd.f32 %v700_v46, %v699_v29  ;;  %v7925_v54 = vpop.f32.mrb[42].mxu0 }
 0x17a   :  { %v898_v55 = vsel %vm660_vm0, %v815_v48, 0.0  ;;  %v702_v58 = vsel %vm660_vm0, %v7925_v54, 0.0  ;;  %v816_v59 = vmul.f32 %v7925_v54, %v7925_v54  ;;  %v490_v60 = vpop.f32.mrb[43].mxu0 }
 0x17b   :  { %v899_v62 = vadd.f32 %v898_v55, %v897_v34  ;;  %v703_v63 = vadd.f32 %v702_v58, %v701_v50 }
 0x17c   :  { %v900_v4 = vsel %vm660_vm0, %v816_v59, 0.0 }
 0x17d   :  { %v901_v8 = vadd.f32 %v900_v4, %v899_v62 }
 0x17f   :  { %v7937_v13 = vpop.f32.mrb[44].mxu0 }
 0x180   :  { %v704_v20 = vsel %vm660_vm0, %v7937_v13, 0.0  ;;  %v817_v23 = vmul.f32 %v7937_v13, %v7937_v13  ;;  %v495_v25 = vpop.f32.mrb[45].mxu0 }
 0x181   :  { %v705_v27 = vadd.f32 %v704_v20, %v703_v63  ;;  %v7943_v28 = vpop.f32.mrb[46].mxu0 }
 0x182   :  { %v902_v29 = vsel %vm660_vm0, %v817_v23, 0.0  ;;  %v706_v30 = vsel %vm660_vm0, %v7943_v28, 0.0  ;;  %v818_v34 = vmul.f32 %v7943_v28, %v7943_v28  ;;  %v498_v37 = vpop.f32.mrb[47].mxu0 }
 0x183   :  { %v903_v45 = vadd.f32 %v902_v29, %v901_v8  ;;  %v707_v46 = vadd.f32 %v706_v30, %v705_v27 }
 0x184   :  { %v904_v48 = vsel %vm660_vm0, %v818_v34, 0.0 }
 0x185   :  { %v905_v49 = vadd.f32 %v904_v48, %v903_v45 }
 0x187   :  { %v7951_v50 = vpop.f32.mrb[48].mxu0 }
 0x188   :  { %v708_v55 = vsel %vm660_vm0, %v7951_v50, 0.0  ;;  %v819_v58 = vmul.f32 %v7951_v50, %v7951_v50  ;;  %v503_v59 = vpop.f32.mrb[49].mxu0 }
 0x189   :  { %v709_v60 = vadd.f32 %v708_v55, %v707_v46  ;;  %v7957_v62 = vpop.f32.mrb[50].mxu0 }
 0x18a   :  { %v906_v63 = vsel %vm660_vm0, %v819_v58, 0.0  ;;  %v710_v4 = vsel %vm660_vm0, %v7957_v62, 0.0  ;;  %v820_v8 = vmul.f32 %v7957_v62, %v7957_v62  ;;  %v506_v9 = vpop.f32.mrb[51].mxu0 }
 0x18b   :  { %v907_v18 = vadd.f32 %v906_v63, %v905_v49  ;;  %v711_v20 = vadd.f32 %v710_v4, %v709_v60 }
 0x18c   :  { %v908_v23 = vsel %vm660_vm0, %v820_v8, 0.0 }
 0x18d   :  { %v909_v25 = vadd.f32 %v908_v23, %v907_v18 }
 0x18f   :  { %v7965_v27 = vpop.f32.mrb[52].mxu0 }
 0x190   :  { %v712_v29 = vsel %vm660_vm0, %v7965_v27, 0.0  ;;  %v821_v30 = vmul.f32 %v7965_v27, %v7965_v27  ;;  %v511_v34 = vpop.f32.mrb[53].mxu0 }
 0x191   :  { %v713_v37 = vadd.f32 %v712_v29, %v711_v20  ;;  %v7971_v45 = vpop.f32.mrb[54].mxu0 }
 0x192   :  { %v910_v46 = vsel %vm660_vm0, %v821_v30, 0.0  ;;  %v714_v48 = vsel %vm660_vm0, %v7971_v45, 0.0  ;;  %v822_v49 = vmul.f32 %v7971_v45, %v7971_v45  ;;  %v514_v55 = vpop.f32.mrb[55].mxu0 }
 0x193   :  { %v911_v58 = vadd.f32 %v910_v46, %v909_v25  ;;  %v715_v59 = vadd.f32 %v714_v48, %v713_v37 }
 0x194   :  { %v912_v60 = vsel %vm660_vm0, %v822_v49, 0.0 }
 0x195   :  { %v913_v63 = vadd.f32 %v912_v60, %v911_v58 }
 0x197   :  { %v7979_v4 = vpop.f32.mrb[56].mxu0 }
 0x198   :  { %v716_v8 = vsel %vm660_vm0, %v7979_v4, 0.0  ;;  %v823_v9 = vmul.f32 %v7979_v4, %v7979_v4  ;;  %v519_v18 = vpop.f32.mrb[57].mxu0 }
 0x199   :  { %v717_v20 = vadd.f32 %v716_v8, %v715_v59  ;;  %v7985_v23 = vpop.f32.mrb[58].mxu0 }
 0x19a   :  { %v914_v29 = vsel %vm660_vm0, %v823_v9, 0.0  ;;  %v718_v25 = vsel %vm660_vm0, %v7985_v23, 0.0  ;;  %v824_v30 = vmul.f32 %v7985_v23, %v7985_v23  ;;  %v522_v34 = vpop.f32.mrb[59].mxu0 }
 0x19b   :  { %v915_v37 = vadd.f32 %v914_v29, %v913_v63  ;;  %v719_v46 = vadd.f32 %v718_v25, %v717_v20 }
 0x19c   :  { %v916_v48 = vsel %vm660_vm0, %v824_v30, 0.0 }
 0x19d   :  { %v917_v49 = vadd.f32 %v916_v48, %v915_v37 }
 0x19f   :  { %v7993_v55 = vpop.f32.mrb[60].mxu0 }
 0x1a0   :  { %13153 = vst [vmem:[#allocation15_spill] sm:$0xff] %v7993_v55  ;;  %v720_v58 = vsel %vm660_vm0, %v7993_v55, 0.0  ;;  %v825_v59 = vmul.f32 %v7993_v55, %v7993_v55  ;;  %v527_v60 = vpop.f32.mrb[61].mxu0  ;;  %v758_v55 = vsel %vm660_vm0, %v7809_v14, 0.0 }
 0x1a1   :  { %v721_v8 = vadd.f32 %v720_v58, %v719_v46  ;;  %v7999_v9 = vpop.f32.mrb[62].mxu0 }
 0x1a2   :  { %13154 = vst [vmem:[#allocation16_spill] sm:$0xff] %v7999_v9  ;;  %v918_v18 = vsel %vm660_vm0, %v825_v59, 0.0  ;;  %v722_v63 = vsel %vm660_vm0, %v7999_v9, 0.0  ;;  %v826_v20 = vmul.f32 %v7999_v9, %v7999_v9  ;;  %v530_v29 = vpop.f32.mrb[63].mxu0 }
 0x1a3   :  { %v919_v25 = vadd.f32 %v918_v18, %v917_v49  ;;  %v723_v30 = vadd.f32 %v722_v63, %v721_v8 }
 0x1a4   :  { %v920_v34 = vsel %vm660_vm0, %v826_v20, 0.0 }
 0x1a5   :  { %v921_v37 = vadd.f32 %v920_v34, %v919_v25 }
 0x1a7   :  { %v8007_v48 = vpop.f32.mrb[64].mxu0 }
 0x1a8   :  { %13155 = vst [vmem:[#allocation17_spill] sm:$0xff] %v8007_v48  ;;  %v724_v46 = vsel %vm660_vm0, %v8007_v48, 0.0  ;;  %v827_v58 = vmul.f32 %v8007_v48, %v8007_v48  ;;  %v535_v59 = vpop.f32.mrb[65].mxu0 }
 0x1a9   :  { %v725_v60 = vadd.f32 %v724_v46, %v723_v30  ;;  %v8013_v0 = vpop.f32.mrb[66].mxu0 }
 0x1aa   :  { %13156 = vst [vmem:[#allocation18_spill] sm:$0xff] %v8013_v0  ;;  %v922_v9 = vsel %vm660_vm0, %v827_v58, 0.0  ;;  %v726_v49 = vsel %vm660_vm0, %v8013_v0, 0.0  ;;  %v828_v8 = vmul.f32 %v8013_v0, %v8013_v0  ;;  %v538_v18 = vpop.f32.mrb[67].mxu0 }
 0x1ab   :  { %v923_v63 = vadd.f32 %v922_v9, %v921_v37  ;;  %v727_v20 = vadd.f32 %v726_v49, %v725_v60 }
 0x1ac   :  { %v924_v29 = vsel %vm660_vm0, %v828_v8, 0.0 }
 0x1ad   :  { %v925_v25 = vadd.f32 %v924_v29, %v923_v63 }
 0x1af   :  { %v8021_v34 = vpop.f32.mrb[68].mxu0 }
 0x1b0   :  { %13157 = vst [vmem:[#allocation19_spill] sm:$0xff] %v8021_v34  ;;  %v728_v30 = vsel %vm660_vm0, %v8021_v34, 0.0  ;;  %v829_v46 = vmul.f32 %v8021_v34, %v8021_v34  ;;  %v543_v58 = vpop.f32.mrb[69].mxu0 }
 0x1b1   :  { %v729_v59 = vadd.f32 %v728_v30, %v727_v20  ;;  %v8027_v48 = vpop.f32.mrb[70].mxu0 }
 0x1b2   :  { %13158 = vst [vmem:[#allocation20_spill] sm:$0xff] %v8027_v48  ;;  %v926_v0 = vsel %vm660_vm0, %v829_v46, 0.0  ;;  %v730_v9 = vsel %vm660_vm0, %v8027_v48, 0.0  ;;  %v830_v37 = vmul.f32 %v8027_v48, %v8027_v48  ;;  %v546_v60 = vpop.f32.mrb[71].mxu0 }
 0x1b3   :  { %v927_v49 = vadd.f32 %v926_v0, %v925_v25  ;;  %v731_v8 = vadd.f32 %v730_v9, %v729_v59 }
 0x1b4   :  { %v928_v18 = vsel %vm660_vm0, %v830_v37, 0.0 }
 0x1b5   :  { %v929_v63 = vadd.f32 %v928_v18, %v927_v49 }
 0x1b7   :  { %v8035_v29 = vpop.f32.mrb[72].mxu0 }
 0x1b8   :  { %13159 = vst [vmem:[#allocation21_spill] sm:$0xff] %v8035_v29  ;;  %v732_v20 = vsel %vm660_vm0, %v8035_v29, 0.0  ;;  %v831_v30 = vmul.f32 %v8035_v29, %v8035_v29  ;;  %v551_v46 = vpop.f32.mrb[73].mxu0 }
 0x1b9   :  { %v733_v58 = vadd.f32 %v732_v20, %v731_v8  ;;  %v8041_v34 = vpop.f32.mrb[74].mxu0 }
 0x1ba   :  { %13160 = vst [vmem:[#allocation22_spill] sm:$0xff] %v8041_v34  ;;  %v930_v48 = vsel %vm660_vm0, %v831_v30, 0.0  ;;  %v734_v0 = vsel %vm660_vm0, %v8041_v34, 0.0  ;;  %v832_v25 = vmul.f32 %v8041_v34, %v8041_v34  ;;  %v554_v59 = vpop.f32.mrb[75].mxu0 }
 0x1bb   :  { %v931_v9 = vadd.f32 %v930_v48, %v929_v63  ;;  %v735_v37 = vadd.f32 %v734_v0, %v733_v58 }
 0x1bc   :  { %v932_v60 = vsel %vm660_vm0, %v832_v25, 0.0 }
 0x1bd   :  { %v933_v49 = vadd.f32 %v932_v60, %v931_v9 }
 0x1bf   :  { %v8049_v18 = vpop.f32.mrb[76].mxu0 }
 0x1c0   :  { %13161 = vst [vmem:[#allocation23_spill] sm:$0xff] %v8049_v18  ;;  %v736_v8 = vsel %vm660_vm0, %v8049_v18, 0.0  ;;  %v833_v20 = vmul.f32 %v8049_v18, %v8049_v18  ;;  %v559_v30 = vpop.f32.mrb[77].mxu0 }
 0x1c1   :  { %v737_v46 = vadd.f32 %v736_v8, %v735_v37  ;;  %v8055_v29 = vpop.f32.mrb[78].mxu0  ;;  %v7054_v37 = vld [vmem:[%s12983_s2 + $0x100] sm:$0xff]  }
 0x1c2   :  { %13162 = vst [vmem:[#allocation24_spill] sm:$0xff] %v8055_v29  ;;  %v934_v34 = vsel %vm660_vm0, %v833_v20, 0.0  ;;  %v738_v48 = vsel %vm660_vm0, %v8055_v29, 0.0  ;;  %v834_v63 = vmul.f32 %v8055_v29, %v8055_v29  ;;  %v562_v58 = vpop.f32.mrb[79].mxu0  ;;  %6798 = vmatprep.subr.bf16.mxu0 %v7054_v37 }
 0x1c3   :  { %v935_v0 = vadd.f32 %v934_v34, %v933_v49  ;;  %v739_v25 = vadd.f32 %v738_v48, %v737_v46  ;;  %6799 = vmatpush3.bf16.msra.mxu0 %v7054_v37 }
 0x1c4   :  { %v936_v59 = vsel %vm660_vm0, %v834_v63, 0.0 }
 0x1c5   :  { %v937_v9 = vadd.f32 %v936_v59, %v935_v0 }
 0x1c7   :  { %v8066_v60 = vpop.f32.mrb[80].mxu0 }
 0x1c8   :  { %13163 = vst [vmem:[#allocation25_spill] sm:$0xff] %v8066_v60  ;;  %v740_v8 = vsel %vm660_vm0, %v8066_v60, 0.0  ;;  %v835_v20 = vmul.f32 %v8066_v60, %v8066_v60  ;;  %v567_v30 = vpop.f32.mrb[81].mxu0 }
 0x1c9   :  { %v741_v34 = vadd.f32 %v740_v8, %v739_v25  ;;  %v8072_v49 = vpop.f32.mrb[82].mxu0 }
 0x1ca   :  { %13164 = vst [vmem:[#allocation26_spill] sm:$0xff] %v8072_v49  ;;  %v938_v46 = vsel %vm660_vm0, %v835_v20, 0.0  ;;  %v742_v48 = vsel %vm660_vm0, %v8072_v49, 0.0  ;;  %v836_v63 = vmul.f32 %v8072_v49, %v8072_v49  ;;  %v570_v58 = vpop.f32.mrb[83].mxu0 }
 0x1cb   :  { %v939_v0 = vadd.f32 %v938_v46, %v937_v9  ;;  %v743_v59 = vadd.f32 %v742_v48, %v741_v34 }
 0x1cc   :  { %v940_v29 = vsel %vm660_vm0, %v836_v63, 0.0 }
 0x1cd   :  { %v941_v18 = vadd.f32 %v940_v29, %v939_v0 }
 0x1cf   :  { %v8080_v60 = vpop.f32.mrb[84].mxu0 }
 0x1d0   :  { %13165 = vst [vmem:[#allocation27_spill] sm:$0xff] %v8080_v60  ;;  %v744_v25 = vsel %vm660_vm0, %v8080_v60, 0.0  ;;  %v837_v37 = vmul.f32 %v8080_v60, %v8080_v60  ;;  %v575_v8 = vpop.f32.mrb[85].mxu0 }
 0x1d1   :  { %v745_v20 = vadd.f32 %v744_v25, %v743_v59  ;;  %v8086_v30 = vpop.f32.mrb[86].mxu0  ;;  %v7055_v59 = vld [vmem:[%s12983_s2 + $0x108] sm:$0xff]  }
 0x1d2   :  { %13166 = vst [vmem:[#allocation28_spill] sm:$0xff] %v8086_v30  ;;  %v942_v49 = vsel %vm660_vm0, %v837_v37, 0.0  ;;  %v746_v9 = vsel %vm660_vm0, %v8086_v30, 0.0  ;;  %v838_v29 = vmul.f32 %v8086_v30, %v8086_v30  ;;  %v578_v34 = vpop.f32.mrb[87].mxu0  ;;  %6800 = vmatprep.subr.bf16.mxu0 %v7055_v59 }
 0x1d3   :  { %v943_v46 = vadd.f32 %v942_v49, %v941_v18  ;;  %v747_v48 = vadd.f32 %v746_v9, %v745_v20  ;;  %6801 = vmatpush3.bf16.msra.mxu0 %v7055_v59 }
 0x1d4   :  { %v944_v63 = vsel %vm660_vm0, %v838_v29, 0.0  ;;  %v7056_v29 = vld [vmem:[%s12983_s2 + $0x110] sm:$0xff]  }
 0x1d5   :  { %v945_v58 = vadd.f32 %v944_v63, %v943_v46  ;;  %6802 = vmatprep.subr.bf16.mxu0 %v7056_v29 }
 0x1d7   :  { %v8094_v0 = vpop.f32.mrb[88].mxu0  ;;  %6803 = vmatpush3.bf16.msra.mxu0 %v7056_v29 }
 0x1d8   :  { %13167 = vst [vmem:[#allocation29_spill] sm:$0xff] %v8094_v0  ;;  %v748_v25 = vsel %vm660_vm0, %v8094_v0, 0.0  ;;  %v839_v37 = vmul.f32 %v8094_v0, %v8094_v0  ;;  %v583_v8 = vpop.f32.mrb[89].mxu0 }
 0x1d9   :  { %v749_v30 = vadd.f32 %v748_v25, %v747_v48  ;;  %v8103_v34 = vpop.f32.mrb[90].mxu0  ;;  %v7057_v48 = vld [vmem:[%s12983_s2 + $0x118] sm:$0xff]  }
 0x1da   :  { %13168 = vst [vmem:[#allocation30_spill] sm:$0xff] %v8103_v34  ;;  %v946_v18 = vsel %vm660_vm0, %v839_v37, 0.0  ;;  %v750_v49 = vsel %vm660_vm0, %v8103_v34, 0.0  ;;  %v840_v20 = vmul.f32 %v8103_v34, %v8103_v34  ;;  %v586_v9 = vpop.f32.mrb[91].mxu0  ;;  %6804 = vmatprep.subr.bf16.mxu0 %v7057_v48 }
 0x1db   :  { %v947_v46 = vadd.f32 %v946_v18, %v945_v58  ;;  %v751_v63 = vadd.f32 %v750_v49, %v749_v30  ;;  %v843_v49 = vmul.f32 %v7807_v11, %v7807_v11  ;;  %6805 = vmatpush3.bf16.msra.mxu0 %v7057_v48  ;;  %v845_v48 = vmul.f32 %v7825_v31, %v7825_v31 }
 0x1dc   :  { %v948_v25 = vsel %vm660_vm0, %v840_v20, 0.0 }
 0x1dd   :  { %v949_v37 = vadd.f32 %v948_v25, %v947_v46  ;;  %v954_v60 = vsel %vm660_vm0, %v843_v49, 0.0  ;;  %v958_v49 = vsel %vm660_vm0, %v845_v48, 0.0 }
 0x1df   :  { %v8117_v8 = vpop.f32.mrb[92].mxu0 }
 0x1e0   :  { %13169 = vst [vmem:[#allocation31_spill] sm:$0xff] %v8117_v8  ;;  %v752_v59 = vsel %vm660_vm0, %v8117_v8, 0.0  ;;  %v841_v9 = vmul.f32 %v8117_v8, %v8117_v8  ;;  %v591_v58 = vpop.f32.mrb[93].mxu0 }
 0x1e1   :  { %v753_v30 = vadd.f32 %v752_v59, %v751_v63  ;;  %v8123_v18 = vpop.f32.mrb[94].mxu0  ;;  %v756_v63 = vsel %vm660_vm0, %v7807_v11, 0.0  ;;  %v844_v59 = vmul.f32 %v7809_v14, %v7809_v14 }
 0x1e2   :  { %v950_v20 = vsel %vm660_vm0, %v841_v9, 0.0  ;;  %v754_v29 = vsel %vm660_vm0, %v8123_v18, 0.0  ;;  %v842_v46 = vmul.f32 %v8123_v18, %v8123_v18  ;;  %v594_v25 = vpop.f32.mrb[95].mxu0 }
 0x1e3   :  { %v951_v34 = vadd.f32 %v950_v20, %v949_v37  ;;  %v755_v0 = vadd.f32 %v754_v29, %v753_v30  ;;  %v956_v20 = vsel %vm660_vm0, %v844_v59, 0.0  ;;  %v760_v29 = vsel %vm660_vm0, %v7825_v31, 0.0 }
 0x1e4   :  { %v952_v58 = vsel %vm660_vm0, %v842_v46, 0.0  ;;  %v846_v46 = vmul.f32 %v7827_v35, %v7827_v35  ;;  %v762_v25 = vsel %vm660_vm0, %v7827_v35, 0.0  ;;  %v764_v59 = vsel %vm660_vm0, %v7843_v53, 0.0 }
 0x1e5   :  { %v757_v8 = vadd.f32 %v756_v63, %v755_v0  ;;  %v953_v9 = vadd.f32 %v952_v58, %v951_v34  ;;  %v847_v63 = vmul.f32 %v7843_v53, %v7843_v53  ;;  %v848_v58 = vmul.f32 %v7845_v56, %v7845_v56 }
 0x1e7   :  { %v759_v37 = vadd.f32 %v758_v55, %v757_v8  ;;  %v955_v30 = vadd.f32 %v954_v60, %v953_v9  ;;  %v960_v8 = vsel %vm660_vm0, %v846_v46, 0.0  ;;  %v962_v48 = vsel %vm660_vm0, %v847_v63, 0.0 }
 0x1e8   :  { %v964_v46 = vsel %vm660_vm0, %v848_v58, 0.0 }
 0x1e9   :  { %v761_v0 = vadd.f32 %v760_v29, %v759_v37  ;;  %v957_v34 = vadd.f32 %v956_v20, %v955_v30  ;;  %v766_v30 = vsel %vm660_vm0, %v7845_v56, 0.0  ;;  %v849_v20 = vmul.f32 %v7861_v10, %v7861_v10 }
 0x1eb   :  { %v763_v55 = vadd.f32 %v762_v25, %v761_v0  ;;  %v959_v60 = vadd.f32 %v958_v49, %v957_v34  ;;  %v768_v34 = vsel %vm660_vm0, %v7861_v10, 0.0  ;;  %v850_v49 = vmul.f32 %v7863_v16, %v7863_v16 }
 0x1ec   :  { %v966_v63 = vsel %vm660_vm0, %v849_v20, 0.0 }
 0x1ed   :  { %v961_v9 = vadd.f32 %v960_v8, %v959_v60  ;;  %v765_v37 = vadd.f32 %v764_v59, %v763_v55  ;;  %v770_v60 = vsel %vm660_vm0, %v7863_v16, 0.0  ;;  %v851_v8 = vmul.f32 %v7879_v39, %v7879_v39 }
 0x1ee   :  { %v968_v58 = vsel %vm660_vm0, %v850_v49, 0.0 }
 0x1ef   :  { %v767_v29 = vadd.f32 %v766_v30, %v765_v37  ;;  %v963_v0 = vadd.f32 %v962_v48, %v961_v9  ;;  %v772_v37 = vsel %vm660_vm0, %v7879_v39, 0.0  ;;  %v852_v48 = vmul.f32 %v7881_v42, %v7881_v42 }
 0x1f0   :  { %v970_v20 = vsel %vm660_vm0, %v851_v8, 0.0 }
 0x1f1   :  { %v769_v25 = vadd.f32 %v768_v34, %v767_v29  ;;  %v965_v55 = vadd.f32 %v964_v46, %v963_v0  ;;  %v774_v0 = vsel %vm660_vm0, %v7881_v42, 0.0  ;;  %v853_v46 = vmul.f32 %v7897_v2, %v7897_v2 }
 0x1f2   :  { %v972_v49 = vsel %vm660_vm0, %v852_v48, 0.0 }
 0x1f3   :  { %v771_v59 = vadd.f32 %v770_v60, %v769_v25  ;;  %v967_v9 = vadd.f32 %v966_v63, %v965_v55  ;;  %v776_v55 = vsel %vm660_vm0, %v7897_v2, 0.0  ;;  %v854_v63 = vmul.f32 %v7899_v6, %v7899_v6 }
 0x1f4   :  { %v974_v8 = vsel %vm660_vm0, %v853_v46, 0.0 }
 0x1f5   :  { %v773_v30 = vadd.f32 %v772_v37, %v771_v59  ;;  %v969_v29 = vadd.f32 %v968_v58, %v967_v9  ;;  %v778_v9 = vsel %vm660_vm0, %v7899_v6, 0.0  ;;  %v855_v58 = vmul.f32 %v7915_v32, %v7915_v32 }
 0x1f6   :  { %v976_v48 = vsel %vm660_vm0, %v854_v63, 0.0 }
 0x1f7   :  { %v971_v34 = vadd.f32 %v970_v20, %v969_v29  ;;  %v775_v25 = vadd.f32 %v774_v0, %v773_v30  ;;  %v780_v29 = vsel %vm660_vm0, %v7915_v32, 0.0  ;;  %v856_v20 = vmul.f32 %v7917_v40, %v7917_v40 }
 0x1f8   :  { %v857_v0 = vmul.f32 %v7933_v5, %v7933_v5 }
 0x1f9   :  { %v973_v60 = vadd.f32 %v972_v49, %v971_v34  ;;  %v777_v59 = vadd.f32 %v776_v55, %v775_v25  ;;  %v978_v25 = vsel %vm660_vm0, %v855_v58, 0.0  ;;  %v782_v49 = vsel %vm660_vm0, %v7917_v40, 0.0 }
 0x1fa   :  { %v784_v55 = vsel %vm660_vm0, %v7933_v5, 0.0  ;;  %v786_v58 = vsel %vm660_vm0, %v7935_v12, 0.0 }
 0x1fb   :  { %v975_v37 = vadd.f32 %v974_v8, %v973_v60  ;;  %v779_v30 = vadd.f32 %v778_v9, %v777_v59  ;;  %v980_v59 = vsel %vm660_vm0, %v856_v20, 0.0  ;;  %v982_v8 = vsel %vm660_vm0, %v857_v0, 0.0 }
 0x1fc   :  { %v858_v9 = vmul.f32 %v7935_v12, %v7935_v12 }
 0x1fd   :  { %v977_v46 = vadd.f32 %v976_v48, %v975_v37  ;;  %v781_v34 = vadd.f32 %v780_v29, %v779_v30 }
 0x1fe   :  { %v984_v29 = vsel %vm660_vm0, %v858_v9, 0.0 }
 0x1ff   :  { %v979_v63 = vadd.f32 %v978_v25, %v977_v46  ;;  %v783_v60 = vadd.f32 %v782_v49, %v781_v34 }
 0x201   :  { %v981_v32 = vadd.f32 %v980_v59, %v979_v63  ;;  %v785_v37 = vadd.f32 %v784_v55, %v783_v60  ;;  %v7058_v55 = vld [vmem:[%s12983_s2] sm:$0xff]   ;;  %v13170_v59 = vmov 0  }
 0x202   :  { %3561 = vmatpush1.bf16.msra.mxu1 %v7058_v55 }
 0x203   :  { %v983_v30 = vadd.f32 %v982_v8, %v981_v32  ;;  %v787_v48 = vadd.f32 %v786_v58, %v785_v37  ;;  %3562 = vmatprep.subr.bf16.mxu1 %v13170_v59 }
 0x205   :  { %v788_v40 = vrot.slane %v787_v48, 4  ;;  %v985_v5 = vadd.f32 %v984_v29, %v983_v30  ;;  %v7062_v30 = vld [vmem:[%s12983_s2 + $0x20] sm:$0xff]  }
 0x207   :  { %v789_v46 = vadd.f32 %v788_v40, %v787_v48  ;;  %v986_v34 = vrot.slane %v985_v5, 4  ;;  %v995_v48 = vld [vmem:[%s12985_s4] sm:$0x1] }
 0x209   :  { %v790_v25 = vrot.slane %v789_v46, 2  ;;  %v987_v20 = vadd.f32 %v986_v34, %v985_v5  ;;  %v7059_v5 = vld [vmem:[%s12983_s2 + $0x8] sm:$0xff]  }
 0x20a   :  { %3563 = vmatpush1.bf16.msra.mxu1 %v7059_v5 }
 0x20b   :  { %v791_v49 = vadd.f32 %v790_v25, %v789_v46  ;;  %v988_v0 = vrot.slane %v987_v20, 2  ;;  %3564 = vmatprep.subr.bf16.mxu1 %v13170_v59  ;;  %v7063_v25 = vld [vmem:[%s12983_s2 + $0x28] sm:$0xff]  }
 0x20d   :  { %v792_v6 = vrot.slane %v791_v49, 1  ;;  %v989_v2 = vadd.f32 %v988_v0, %v987_v20  ;;  %v1069_v20 = vld [vmem:[%s12986_s5] sm:$0x1] }
 0x20f   :  { %v793_v42 = vadd.f32 %v792_v6, %v791_v49  ;;  %v990_v63 = vrot.slane %v989_v2, 1  ;;  %v7060_v6 = vld [vmem:[%s12983_s2 + $0x10] sm:$0xff]  }
 0x210   :  { %3565 = vmatpush1.bf16.msra.mxu1 %v7060_v6 }
 0x211   :  { %v794_v32 = vmul.f32 0.001953125, %v793_v42  ;;  %v991_v60 = vadd.f32 %v990_v63, %v989_v2  ;;  %v1000_v42 = vlaneseq  ;;  %3566 = vmatprep.subr.bf16.mxu1 %v13170_v59  ;;  %v7061_v2 = vld [vmem:[%s12983_s2 + $0x18] sm:$0xff]   ;;  %v7064_v63 = vld [vmem:[%s12983_s2 + $0x30] sm:$0xff]  }
 0x213   :  { %v992_v8 = vmul.f32 0.001953125, %v991_v60  ;;  %v993_v40 = vmul.f32 %v794_v32, %v794_v32  ;;  %v8226_v58 = vshrl.u32 %v1000_v42, 7 }
 0x214   :  { %3567 = vmatpush1.bf16.msra.mxu1 %v7061_v2 }
 0x215   :  { %v994_v9 = vsub.f32 %v992_v8, %v993_v40  ;;  %13171 = vst [vmem:[#allocation32_spill] sm:$0xff] %v8226_v58  ;;  %3568 = vmatprep.subr.bf16.mxu1 %v13170_v59  ;;  %v8236_v29 = vsub.s32 0, %v8226_v58 }
 0x217   :  { %v996_v37 = vadd.f32 1e-05, %v994_v9  ;;  %13172 = vst [vmem:[#allocation33_spill] sm:$0xff] %v8236_v29 }
 0x218   :  { %3569 = vmatpush1.bf16.msra.mxu1 %v7062_v30  ;;  %v13174_v30 = vld [vmem:[#allocation16_spill] sm:$0xff] }
 0x219   :  { %7102 = vrsqrt.f32 %v996_v37  ;;  %3570 = vmatprep.subr.bf16.mxu1 %v13170_v59 }
 0x21c   :  { %3571 = vmatpush1.bf16.msra.mxu1 %v7063_v25  ;;  %v13177_v25 = vld [vmem:[#allocation19_spill] sm:$0xff] }
 0x21d   :  { %3572 = vmatprep.subr.bf16.mxu1 %v13170_v59 }
 0x220   :  { %3573 = vmatpush1.bf16.msra.mxu1 %v7064_v63  ;;  %v13179_v63 = vld [vmem:[#allocation21_spill] sm:$0xff] }
 0x221   :  { %3574 = vmatprep.subr.bf16.mxu1 %v13170_v59 }
 0x223   :  { %v7103_v46 = vpop.eup %7102 }
 0x224   :  { %v998_v34 = vmul.f32 %v7103_v46, %v995_v48  ;;  %v13175_v46 = vld [vmem:[#allocation17_spill] sm:$0xff] }
 0x226   :  { %v8246_v49 = vrot.slane %v998_v34, %v8236_v29  ;;  %v1070_v0 = vmul.f32 %v998_v34, %v794_v32  ;;  %v13176_v34 = vld [vmem:[#allocation18_spill] sm:$0xff] }
 0x228   :  { %v1068_v55 = vmul.f32 %v8246_v49, %v7935_v12  ;;  %v1071_v60 = vsub.f32 %v1069_v20, %v1070_v0  ;;  %v8256_v8 = vmul.f32 %v8246_v49, %v7751_v21  ;;  %v8260_v40 = vmul.f32 %v8246_v49, %v7755_v24  ;;  %v13178_v20 = vld [vmem:[#allocation20_spill] sm:$0xff] }
 0x229   :  { %v8264_v32 = vmul.f32 %v8246_v49, %v7765_v33  ;;  %v8268_v5 = vmul.f32 %v8246_v49, %v7771_v38  ;;  %v8272_v12 = vmul.f32 %v8246_v49, %v7779_v47  ;;  %v8276_v21 = vmul.f32 %v8246_v49, %v7785_v52 }
 0x22a   :  { %v8279_v9 = vrot.slane %v1071_v60, %v8236_v29  ;;  %v8283_v24 = vmul.f32 %v8246_v49, %v7793_v61  ;;  %v8287_v33 = vmul.f32 %v8246_v49, %v7799_v3  ;;  %v8291_v38 = vmul.f32 %v8246_v49, %v7811_v15  ;;  %v13180_v60 = vld [vmem:[#allocation22_spill] sm:$0xff] }
 0x22b   :  { %v8295_v47 = vmul.f32 %v8246_v49, %v7817_v22  ;;  %v8299_v52 = vmul.f32 %v8246_v49, %v7829_v36  ;;  %v8303_v61 = vmul.f32 %v8246_v49, %v7835_v43  ;;  %v8307_v3 = vmul.f32 %v8246_v49, %v7847_v57  ;;  %v7065_v57 = vld [vmem:[%s12983_s2 + $0x38] sm:$0xff]  }
 0x22c   :  { %v1141_v15 = vadd.f32 %v8279_v9, %v1068_v55  ;;  %v8313_v22 = vmul.f32 %v8246_v49, %v7853_v1  ;;  %v8317_v36 = vmul.f32 %v8246_v49, %v7865_v17  ;;  %v8321_v43 = vmul.f32 %v8246_v49, %v7871_v26  ;;  %3575 = vmatpush1.bf16.msra.mxu1 %v7065_v57  ;;  %v13181_v57 = vld [vmem:[#allocation23_spill] sm:$0xff] }
 0x22d   :  { %v8328_v37 = vmul.f32 %v8246_v49, %v7883_v44  ;;  %v8332_v1 = vmul.f32 %v8246_v49, %v7889_v51  ;;  %v8336_v17 = vmul.f32 %v8246_v49, %v7901_v7  ;;  %v8340_v26 = vmul.f32 %v8246_v49, %v7907_v19  ;;  %3576 = vmatprep.subr.bf16.mxu1 %v13170_v59 }
 0x22e   :  { %v1205_v6 = vmax.f32 %v1141_v15, 0.0  ;;  %v8344_v42 = vmul.f32 %v8246_v49, %v7919_v41  ;;  %v8348_v44 = vmul.f32 %v8246_v49, %v7925_v54  ;;  %v8352_v51 = vmul.f32 %v8246_v49, %v7937_v13  ;;  %v7066_v13 = vld [vmem:[%s12983_s2 + $0x40] sm:$0xff]  }
 0x22f   :  { %v8356_v7 = vmul.f32 %v8246_v49, %v7943_v28  ;;  %v8360_v19 = vmul.f32 %v8246_v49, %v7951_v50  ;;  %v8364_v41 = vmul.f32 %v8246_v49, %v7957_v62  ;;  %v8368_v54 = vmul.f32 %v8246_v49, %v7965_v27  ;;  %v13173_v27 = vld [vmem:[#allocation15_spill] sm:$0xff] }
 0x230   :  { %1414 = vst.msk [vmem:[#allocation2 + $0x450] sm:$0xff] %vm660_vm0, %v1205_v6  ;;  %v8377_v28 = vmul.f32 %v8246_v49, %v7971_v45  ;;  %v8381_v50 = vmul.f32 %v8246_v49, %v7979_v4  ;;  %v8385_v62 = vmul.f32 %v8246_v49, %v7985_v23  ;;  %v8389_v2 = vmul.f32 %v8246_v49, %v13173_v27  ;;  %v13182_v27 = vld [vmem:[#allocation24_spill] sm:$0xff] }
 0x231   :  { %v8393_v48 = vmul.f32 %v8246_v49, %v13174_v30  ;;  %v8397_v45 = vmul.f32 %v8246_v49, %v13175_v46  ;;  %v8401_v4 = vmul.f32 %v8246_v49, %v13176_v34  ;;  %v8405_v23 = vmul.f32 %v8246_v49, %v13177_v25  ;;  %3577 = vmatpush1.bf16.msra.mxu1 %v7066_v13  ;;  %v13183_v46 = vld [vmem:[#allocation25_spill] sm:$0xff]  ;;  %v13184_v25 = vld [vmem:[#allocation26_spill] sm:$0xff] }
 0x232   :  { %v8409_v0 = vmul.f32 %v8246_v49, %v13178_v20  ;;  %v8413_v55 = vmul.f32 %v8246_v49, %v13179_v63  ;;  %v8417_v15 = vmul.f32 %v8246_v49, %v13180_v60  ;;  %v8421_v6 = vmul.f32 %v8246_v49, %v13181_v57  ;;  %v13186_v63 = vld [vmem:[#allocation27_spill] sm:$0xff]  ;;  %3578 = vmatprep.subr.bf16.mxu1 %v13170_v59  ;;  %v13187_v57 = vld [vmem:[#allocation28_spill] sm:$0xff] }
 0x233   :  { %v8425_v30 = vmul.f32 %v8246_v49, %v13182_v27  ;;  %v8429_v34 = vmul.f32 %v8246_v49, %v13183_v46  ;;  %v8433_v20 = vmul.f32 %v8246_v49, %v13184_v25  ;;  %v8437_v60 = vmul.f32 %v8246_v49, %v13186_v63  ;;  %v13188_v27 = vld [vmem:[#allocation29_spill] sm:$0xff]  ;;  %v13189_v46 = vld [vmem:[#allocation30_spill] sm:$0xff]  ;;  %v13190_v25 = vld [vmem:[#allocation31_spill] sm:$0xff] }
 0x234   :  { %v8442_v13 = vmul.f32 %v8246_v49, %v13187_v57  ;;  %v8446_v58 = vmul.f32 %v8246_v49, %v13188_v27  ;;  %v8450_v29 = vmul.f32 %v8246_v49, %v13189_v46  ;;  %v7067_v63 = vld [vmem:[%s12983_s2 + $0x48] sm:$0xff]   ;;  %v8461_v57 = vmul.f32 %v8246_v49, %v8123_v18 }
 0x235   :  { %13185 = vst [vmem:[#allocation15_spill] sm:$0xff] %v8433_v20  ;;  %v8454_v20 = vmul.f32 %v8246_v49, %v13190_v25  ;;  %v8465_v27 = vmul.f32 %v8246_v49, %v7807_v11  ;;  %v8469_v46 = vmul.f32 %v8246_v49, %v7809_v14  ;;  %v8473_v25 = vmul.f32 %v8246_v49, %v7825_v31 }
 0x236   :  { %v8481_v18 = vmul.f32 %v8246_v49, %v7843_v53  ;;  %v8485_v11 = vmul.f32 %v8246_v49, %v7845_v56  ;;  %v8489_v14 = vmul.f32 %v8246_v49, %v7861_v10  ;;  %3579 = vmatpush1.bf16.msra.mxu1 %v7067_v63  ;;  %v8493_v31 = vmul.f32 %v8246_v49, %v7863_v16  ;;  %v7068_v10 = vld [vmem:[%s12983_s2 + $0x50] sm:$0xff]  }
 0x237   :  { %13191 = vst [vmem:[#allocation16_spill] sm:$0xff] %v8454_v20  ;;  %v8477_v20 = vmul.f32 %v8246_v49, %v7827_v35  ;;  %v8497_v35 = vmul.f32 %v8246_v49, %v7879_v39  ;;  %3580 = vmatprep.subr.bf16.mxu1 %v13170_v59  ;;  %v13200_v16 = vld [vmem:[#allocation11_spill] sm:$0xff]  ;;  %v13201_v39 = vld [vmem:[#allocation12_spill] sm:$0xff] }
 0x238   :  { %13193 = vst [vmem:[#allocation18_spill] sm:$0xff] %v8481_v18  ;;  %13194 = vst [vmem:[#allocation19_spill] sm:$0xff] %v8493_v31  ;;  %v13198_v18 = vld [vmem:[#allocation10_spill] sm:$0xff]  ;;  %v8513_v63 = vmul.f32 %v8246_v49, %v13200_v16  ;;  %v8529_v31 = vadd.f32 %v8279_v9, %v8256_v8  ;;  %v8533_v16 = vadd.f32 %v8279_v9, %v8260_v40 }
 0x239   :  { %13192 = vst [vmem:[#allocation17_spill] sm:$0xff] %v8477_v20  ;;  %13195 = vst [vmem:[#allocation20_spill] sm:$0xff] %v8497_v35  ;;  %v13196_v20 = vld [vmem:[#allocation9_spill] sm:$0xff]  ;;  %v8505_v56 = vmul.f32 %v8246_v49, %v13198_v18  ;;  %v8517_v35 = vmul.f32 %v8246_v49, %v13201_v39  ;;  %v13203_v18 = vld [vmem:[#allocation14_spill] sm:$0xff]  ;;  %v8537_v39 = vadd.f32 %v8279_v9, %v8264_v32 }
 0x23a   :  { %v8501_v53 = vmul.f32 %v8246_v49, %v13196_v20  ;;  %v13202_v20 = vld [vmem:[#allocation13_spill] sm:$0xff]  ;;  %v8549_v8 = vadd.f32 %v8279_v9, %v8276_v21  ;;  %v8553_v40 = vadd.f32 %v8279_v9, %v8283_v24  ;;  %v8557_v32 = vadd.f32 %v8279_v9, %v8287_v33  ;;  %3581 = vmatpush1.bf16.msra.mxu1 %v7068_v10 }
 0x23b   :  { %13199 = vst [vmem:[#allocation22_spill] sm:$0xff] %v8505_v56  ;;  %v8525_v56 = vmul.f32 %v8246_v49, %v13203_v18  ;;  %v8569_v21 = vadd.f32 %v8279_v9, %v8299_v52  ;;  %v8573_v24 = vadd.f32 %v8279_v9, %v8303_v61  ;;  %3582 = vmatprep.subr.bf16.mxu1 %v13170_v59  ;;  %v7069_v61 = vld [vmem:[%s12983_s2 + $0x58] sm:$0xff]  }
 0x23c   :  { %13197 = vst [vmem:[#allocation21_spill] sm:$0xff] %v8501_v53  ;;  %v8521_v53 = vmul.f32 %v8246_v49, %v13202_v20  ;;  %v8541_v20 = vadd.f32 %v8279_v9, %v8268_v5  ;;  %v8545_v49 = vadd.f32 %v8279_v9, %v8272_v12  ;;  %v8561_v5 = vadd.f32 %v8279_v9, %v8291_v38 }
 0x23d   :  { %v8565_v12 = vadd.f32 %v8279_v9, %v8295_v47  ;;  %v8578_v33 = vadd.f32 %v8279_v9, %v8307_v3  ;;  %v8582_v38 = vadd.f32 %v8279_v9, %v8313_v22  ;;  %v8586_v47 = vadd.f32 %v8279_v9, %v8317_v36 }
 0x23e   :  { %v8590_v52 = vadd.f32 %v8279_v9, %v8321_v43  ;;  %v8597_v3 = vadd.f32 %v8279_v9, %v8328_v37  ;;  %v8601_v22 = vadd.f32 %v8279_v9, %v8332_v1  ;;  %v8605_v36 = vadd.f32 %v8279_v9, %v8336_v17  ;;  %3583 = vmatpush1.bf16.msra.mxu1 %v7069_v61  ;;  %v13204_v61 = vld [vmem:[#allocation15_spill] sm:$0xff] }
 0x23f   :  { %v8609_v43 = vadd.f32 %v8279_v9, %v8340_v26  ;;  %v8613_v10 = vadd.f32 %v8279_v9, %v8344_v42  ;;  %v8617_v37 = vadd.f32 %v8279_v9, %v8348_v44  ;;  %v8621_v1 = vadd.f32 %v8279_v9, %v8352_v51  ;;  %3584 = vmatprep.subr.bf16.mxu1 %v13170_v59 }
 0x240   :  { %v8625_v17 = vadd.f32 %v8279_v9, %v8356_v7  ;;  %v8629_v26 = vadd.f32 %v8279_v9, %v8360_v19  ;;  %v8633_v42 = vadd.f32 %v8279_v9, %v8364_v41  ;;  %v8637_v44 = vadd.f32 %v8279_v9, %v8368_v54  ;;  %v7070_v7 = vld [vmem:[%s12983_s2 + $0x60] sm:$0xff]  }
 0x241   :  { %v8641_v51 = vadd.f32 %v8279_v9, %v8377_v28  ;;  %v8649_v19 = vadd.f32 %v8279_v9, %v8381_v50  ;;  %v8653_v41 = vadd.f32 %v8279_v9, %v8385_v62  ;;  %v8657_v54 = vadd.f32 %v8279_v9, %v8389_v2 }
 0x242   :  { %v8661_v28 = vadd.f32 %v8279_v9, %v8393_v48  ;;  %v8665_v18 = vadd.f32 %v8279_v9, %v8397_v45  ;;  %v8669_v50 = vadd.f32 %v8279_v9, %v8401_v4  ;;  %v8673_v62 = vadd.f32 %v8279_v9, %v8405_v23  ;;  %3585 = vmatpush1.bf16.msra.mxu1 %v7070_v7  ;;  %v13206_v7 = vld [vmem:[#allocation16_spill] sm:$0xff] }
 0x243   :  { %v8677_v2 = vadd.f32 %v8279_v9, %v8409_v0  ;;  %v8681_v48 = vadd.f32 %v8279_v9, %v8413_v55  ;;  %v8685_v45 = vadd.f32 %v8279_v9, %v8417_v15  ;;  %v8689_v4 = vadd.f32 %v8279_v9, %v8421_v6  ;;  %3586 = vmatprep.subr.bf16.mxu1 %v13170_v59 }
 0x244   :  { %v8693_v23 = vadd.f32 %v8279_v9, %v8425_v30  ;;  %v8697_v0 = vadd.f32 %v8279_v9, %v8429_v34  ;;  %v8701_v55 = vadd.f32 %v8279_v9, %v13204_v61  ;;  %v8705_v15 = vadd.f32 %v8279_v9, %v8437_v60 }
 0x245   :  { %v8709_v6 = vadd.f32 %v8279_v9, %v8442_v13  ;;  %v8714_v30 = vadd.f32 %v8279_v9, %v8446_v58  ;;  %v8718_v34 = vadd.f32 %v8279_v9, %v8450_v29  ;;  %v8722_v61 = vadd.f32 %v8279_v9, %v13206_v7  ;;  %v7071_v13 = vld [vmem:[%s12983_s2 + $0x68] sm:$0xff]  }
 0x246   :  { %v8726_v60 = vadd.f32 %v8279_v9, %v8461_v57  ;;  %v8733_v58 = vadd.f32 %v8279_v9, %v8465_v27  ;;  %v8737_v29 = vadd.f32 %v8279_v9, %v8469_v46  ;;  %v8741_v7 = vadd.f32 %v8279_v9, %v8473_v25  ;;  %3587 = vmatpush1.bf16.msra.mxu1 %v7071_v13  ;;  %v7072_v13 = vld [vmem:[%s12983_s2 + $0x70] sm:$0xff]  }
 0x247   :  { %13205 = vst [vmem:[#allocation23_spill] sm:$0xff] %v8718_v34  ;;  %13207 = vst [vmem:[#allocation24_spill] sm:$0xff] %v8722_v61  ;;  %v13211_v61 = vld [vmem:[#allocation17_spill] sm:$0xff]  ;;  %v8753_v27 = vadd.f32 %v8279_v9, %v8485_v11  ;;  %v8757_v46 = vadd.f32 %v8279_v9, %v8489_v14  ;;  %v8777_v14 = vadd.f32 %v8279_v9, %v8513_v63  ;;  %3588 = vmatprep.subr.bf16.mxu1 %v13170_v59 }
 0x248   :  { %13208 = vst [vmem:[#allocation25_spill] sm:$0xff] %v8726_v60  ;;  %13209 = vst [vmem:[#allocation26_spill] sm:$0xff] %v8737_v29  ;;  %v8745_v57 = vadd.f32 %v8279_v9, %v13211_v61  ;;  %v13213_v60 = vld [vmem:[#allocation18_spill] sm:$0xff]  ;;  %v13215_v29 = vld [vmem:[#allocation19_spill] sm:$0xff]  ;;  %v1142_v63 = vmax.f32 %v8529_v31, 0.0  ;;  %v1152_v31 = vmax.f32 %v8569_v21, 0.0 }
 0x249   :  { %13210 = vst [vmem:[#allocation27_spill] sm:$0xff] %v8741_v7  ;;  %v8749_v34 = vadd.f32 %v8279_v9, %v13213_v60  ;;  %v8761_v25 = vadd.f32 %v8279_v9, %v13215_v29  ;;  %v13216_v7 = vld [vmem:[#allocation20_spill] sm:$0xff]  ;;  %13221 = vst [vmem:[#allocation9_spill] sm:$0xff] %v8777_v14  ;;  %v8785_v29 = vadd.f32 %v8279_v9, %v8517_v35  ;;  %v1144_v14 = vmax.f32 %v8537_v39, 0.0 }
 0x24a   :  { %13212 = vst [vmem:[#allocation28_spill] sm:$0xff] %v8745_v57  ;;  %v8765_v61 = vadd.f32 %v8279_v9, %v13216_v7  ;;  %v13217_v57 = vld [vmem:[#allocation21_spill] sm:$0xff]  ;;  %v8789_v7 = vadd.f32 %v8279_v9, %v8521_v53  ;;  %v1147_v35 = vmax.f32 %v8549_v8, 0.0  ;;  %v1149_v53 = vmax.f32 %v8557_v32, 0.0  ;;  %1351 = vst.msk [vmem:[#allocation2 + $0x28] sm:$0xff] %vm660_vm0, %v1142_v63  ;;  %3589 = vmatpush1.bf16.msra.mxu1 %v7072_v13  ;;  %v7073_v21 = vld [vmem:[%s12983_s2 + $0x78] sm:$0xff]  }
 0x24b   :  { %13214 = vst [vmem:[#allocation29_spill] sm:$0xff] %v8749_v34  ;;  %v8769_v60 = vadd.f32 %v8279_v9, %v13217_v57  ;;  %v13219_v34 = vld [vmem:[#allocation22_spill] sm:$0xff]  ;;  %13222 = vst [vmem:[#allocation10_spill] sm:$0xff] %v8785_v29  ;;  %v1143_v57 = vmax.f32 %v8533_v16, 0.0  ;;  %v1148_v29 = vmax.f32 %v8553_v40, 0.0  ;;  %v1154_v16 = vmax.f32 %v8578_v33, 0.0  ;;  %3590 = vmatprep.subr.bf16.mxu1 %v13170_v59 }
 0x24c   :  { %v8773_v11 = vadd.f32 %v8279_v9, %v13219_v34  ;;  %13223 = vst [vmem:[#allocation11_spill] sm:$0xff] %v8789_v7  ;;  %v8793_v34 = vadd.f32 %v8279_v9, %v8525_v56  ;;  %v1150_v7 = vmax.f32 %v8561_v5, 0.0  ;;  %v1151_v9 = vmax.f32 %v8565_v12, 0.0  ;;  %1353 = vst.msk [vmem:[#allocation2 + $0x48] sm:$0xff] %vm660_vm0, %v1144_v14 }
 0x24d   :  { %13218 = vst [vmem:[#allocation30_spill] sm:$0xff] %v8769_v60  ;;  %v1146_v60 = vmax.f32 %v8545_v49, 0.0  ;;  %v1153_v56 = vmax.f32 %v8573_v24, 0.0  ;;  %1352 = vst.msk [vmem:[#allocation2 + $0x30] sm:$0xff] %vm660_vm0, %v1143_v57  ;;  %v1155_v39 = vmax.f32 %v8582_v38, 0.0  ;;  %v1157_v49 = vmax.f32 %v8590_v52, 0.0 }
 0x24e   :  { %13220 = vst [vmem:[#allocation31_spill] sm:$0xff] %v8773_v11  ;;  %v1145_v11 = vmax.f32 %v8541_v20, 0.0  ;;  %v1156_v20 = vmax.f32 %v8586_v47, 0.0  ;;  %v1158_v8 = vmax.f32 %v8597_v3, 0.0  ;;  %1356 = vst.msk [vmem:[#allocation2 + $0x70] sm:$0xff] %vm660_vm0, %v1147_v35  ;;  %v1159_v40 = vmax.f32 %v8601_v22, 0.0  ;;  %3591 = vmatpush1.bf16.msra.mxu1 %v7073_v21 }
 0x24f   :  { %1355 = vst.msk [vmem:[#allocation2 + $0x68] sm:$0xff] %vm660_vm0, %v1146_v60  ;;  %1357 = vst.msk [vmem:[#allocation2 + $0x88] sm:$0xff] %vm660_vm0, %v1148_v29  ;;  %v1160_v32 = vmax.f32 %v8605_v36, 0.0  ;;  %v1161_v5 = vmax.f32 %v8609_v43, 0.0  ;;  %v1162_v12 = vmax.f32 %v8613_v10, 0.0  ;;  %v1163_v24 = vmax.f32 %v8617_v37, 0.0  ;;  %3849 = vmatprep.subr.bf16.mxu1 %v13170_v59 }
 0x250   :  { %1354 = vst.msk [vmem:[#allocation2 + $0x50] sm:$0xff] %vm660_vm0, %v1145_v11  ;;  %1358 = vst.msk [vmem:[#allocation2 + $0x90] sm:$0xff] %vm660_vm0, %v1149_v53  ;;  %v1164_v33 = vmax.f32 %v8621_v1, 0.0  ;;  %v1165_v38 = vmax.f32 %v8625_v17, 0.0  ;;  %v1166_v47 = vmax.f32 %v8629_v26, 0.0  ;;  %v1167_v52 = vmax.f32 %v8633_v42, 0.0 }
 0x251   :  { %1359 = vst.msk [vmem:[#allocation2 + $0xa8] sm:$0xff] %vm660_vm0, %v1150_v7  ;;  %1360 = vst.msk [vmem:[#allocation2 + $0xb0] sm:$0xff] %vm660_vm0, %v1151_v9  ;;  %v1168_v3 = vmax.f32 %v8637_v44, 0.0  ;;  %v1169_v22 = vmax.f32 %v8641_v51, 0.0  ;;  %v1170_v36 = vmax.f32 %v8649_v19, 0.0  ;;  %v1171_v43 = vmax.f32 %v8653_v41, 0.0 }
 0x252   :  { %1361 = vst.msk [vmem:[#allocation2 + $0xc8] sm:$0xff] %vm660_vm0, %v1152_v31  ;;  %1362 = vst.msk [vmem:[#allocation2 + $0xd0] sm:$0xff] %vm660_vm0, %v1153_v56  ;;  %v1172_v10 = vmax.f32 %v8657_v54, 0.0  ;;  %v1173_v37 = vmax.f32 %v8661_v28, 0.0  ;;  %v1174_v1 = vmax.f32 %v8665_v18, 0.0  ;;  %v1175_v17 = vmax.f32 %v8669_v50, 0.0 }
 0x253   :  { %1363 = vst.msk [vmem:[#allocation2 + $0xe8] sm:$0xff] %vm660_vm0, %v1154_v16  ;;  %1364 = vst.msk [vmem:[#allocation2 + $0xf0] sm:$0xff] %vm660_vm0, %v1155_v39  ;;  %v1176_v26 = vmax.f32 %v8673_v62, 0.0  ;;  %v1177_v42 = vmax.f32 %v8677_v2, 0.0  ;;  %v1178_v44 = vmax.f32 %v8681_v48, 0.0  ;;  %v1179_v51 = vmax.f32 %v8685_v45, 0.0 }
 0x254   :  { %1365 = vst.msk [vmem:[#allocation2 + $0x108] sm:$0xff] %vm660_vm0, %v1156_v20  ;;  %1366 = vst.msk [vmem:[#allocation2 + $0x110] sm:$0xff] %vm660_vm0, %v1157_v49  ;;  %v1180_v19 = vmax.f32 %v8689_v4, 0.0  ;;  %v1181_v41 = vmax.f32 %v8693_v23, 0.0  ;;  %v1182_v54 = vmax.f32 %v8697_v0, 0.0  ;;  %v1183_v28 = vmax.f32 %v8701_v55, 0.0 }
 0x255   :  { %1367 = vst.msk [vmem:[#allocation2 + $0x128] sm:$0xff] %vm660_vm0, %v1158_v8  ;;  %1368 = vst.msk [vmem:[#allocation2 + $0x130] sm:$0xff] %vm660_vm0, %v1159_v40  ;;  %v1184_v18 = vmax.f32 %v8705_v15, 0.0  ;;  %v1185_v50 = vmax.f32 %v8709_v6, 0.0  ;;  %v1186_v62 = vmax.f32 %v8714_v30, 0.0  ;;  %v13224_v48 = vld [vmem:[#allocation23_spill] sm:$0xff] }
 0x256   :  { %1369 = vst.msk [vmem:[#allocation2 + $0x148] sm:$0xff] %vm660_vm0, %v1160_v32  ;;  %1370 = vst.msk [vmem:[#allocation2 + $0x150] sm:$0xff] %vm660_vm0, %v1161_v5  ;;  %v1187_v45 = vmax.f32 %v13224_v48, 0.0  ;;  %v13225_v4 = vld [vmem:[#allocation24_spill] sm:$0xff]  ;;  %v13226_v0 = vld [vmem:[#allocation25_spill] sm:$0xff]  ;;  %v1190_v15 = vmax.f32 %v8733_v58, 0.0 }
 0x257   :  { %1371 = vst.msk [vmem:[#allocation2 + $0x168] sm:$0xff] %vm660_vm0, %v1162_v12  ;;  %1372 = vst.msk [vmem:[#allocation2 + $0x170] sm:$0xff] %vm660_vm0, %v1163_v24  ;;  %v2184_v2 = vld [vmem:[#allocation2 + $0x49] sm:$0xff]  ;;  %v1188_v23 = vmax.f32 %v13225_v4, 0.0  ;;  %v1189_v55 = vmax.f32 %v13226_v0, 0.0  ;;  %v2185_v6 = vld [vmem:[#allocation2 + $0x51] sm:$0xff] }
 0x258   :  { %1373 = vst.msk [vmem:[#allocation2 + $0x188] sm:$0xff] %vm660_vm0, %v1164_v33  ;;  %1374 = vst.msk [vmem:[#allocation2 + $0x190] sm:$0xff] %vm660_vm0, %v1165_v38  ;;  %v1705_v30 = vld [vmem:[#allocation2 + $0x47] sm:$0xff]  ;;  %v13228_v13 = vld [vmem:[#allocation27_spill] sm:$0xff]  ;;  %v1195_v9 = vmax.f32 %v8753_v27, 0.0  ;;  %v1196_v31 = vmax.f32 %v8757_v46, 0.0  ;;  %v8920_v38 = vpack.c.bf16 %v2185_v6, %v2184_v2 }
 0x259   :  { %1375 = vst.msk [vmem:[#allocation2 + $0x1a8] sm:$0xff] %vm660_vm0, %v1166_v47  ;;  %1376 = vst.msk [vmem:[#allocation2 + $0x1b0] sm:$0xff] %vm660_vm0, %v1167_v52  ;;  %v1703_v60 = vld [vmem:[#allocation2 + $0x27] sm:$0xff]  ;;  %v1192_v29 = vmax.f32 %v13228_v13, 0.0  ;;  %v13229_v7 = vld [vmem:[#allocation28_spill] sm:$0xff]  ;;  %v1197_v56 = vmax.f32 %v8761_v25, 0.0 }
 0x25a   :  { %1377 = vst.msk [vmem:[#allocation2 + $0x1c8] sm:$0xff] %vm660_vm0, %v1168_v3  ;;  %1378 = vst.msk [vmem:[#allocation2 + $0x1d0] sm:$0xff] %vm660_vm0, %v1169_v22  ;;  %v13227_v11 = vld [vmem:[#allocation26_spill] sm:$0xff]  ;;  %v1193_v63 = vmax.f32 %v13229_v7, 0.0  ;;  %v13230_v57 = vld [vmem:[#allocation29_spill] sm:$0xff]  ;;  %v1198_v16 = vmax.f32 %v8765_v61, 0.0  ;;  %6806 = vmatprep.mubr.msk.bf16.mxu0 %vm660_vm0, %v8920_v38 }
 0x25b   :  { %1379 = vst.msk [vmem:[#allocation2 + $0x1e8] sm:$0xff] %vm660_vm0, %v1170_v36  ;;  %1380 = vst.msk [vmem:[#allocation2 + $0x1f0] sm:$0xff] %vm660_vm0, %v1171_v43  ;;  %v1191_v14 = vmax.f32 %v13227_v11, 0.0  ;;  %v1194_v35 = vmax.f32 %v13230_v57, 0.0  ;;  %v1706_v58 = vld [vmem:[#allocation2 + $0x4f] sm:$0xff]  ;;  %v13233_v32 = vld [vmem:[#allocation9_spill] sm:$0xff] }
 0x25c   :  { %1381 = vst.msk [vmem:[#allocation2 + $0x208] sm:$0xff] %vm660_vm0, %v1172_v10  ;;  %1382 = vst.msk [vmem:[#allocation2 + $0x210] sm:$0xff] %vm660_vm0, %v1173_v37  ;;  %v1704_v53 = vld [vmem:[#allocation2 + $0x2f] sm:$0xff]  ;;  %v1201_v46 = vmax.f32 %v13233_v32, 0.0  ;;  %v1204_v33 = vmax.f32 %v8793_v34, 0.0  ;;  %v1768_v47 = vpack.c.bf16 %v1706_v58, %v1705_v30 }
 0x25d   :  { %1383 = vst.msk [vmem:[#allocation2 + $0x268] sm:$0xff] %vm660_vm0, %v1174_v1  ;;  %1384 = vst.msk [vmem:[#allocation2 + $0x270] sm:$0xff] %vm660_vm0, %v1175_v17  ;;  %v2186_v39 = vld [vmem:[#allocation2 + $0x69] sm:$0xff]  ;;  %v2187_v20 = vld [vmem:[#allocation2 + $0x71] sm:$0xff]  ;;  %v8926_v34 = vpack.c.bf16 %v1704_v53, %v1703_v60 }
 0x25e   :  { %1385 = vst.msk [vmem:[#allocation2 + $0x288] sm:$0xff] %vm660_vm0, %v1176_v26  ;;  %1386 = vst.msk [vmem:[#allocation2 + $0x290] sm:$0xff] %vm660_vm0, %v1177_v42  ;;  %v13231_v49 = vld [vmem:[#allocation30_spill] sm:$0xff]  ;;  %v13232_v40 = vld [vmem:[#allocation31_spill] sm:$0xff]  ;;  %v2249_v22 = vpack.c.bf16 %v2187_v20, %v2186_v39  ;;  %2410 = vrot.lane.b32.xlu1 %v1768_v47, %s7291_s20 }
 0x25f   :  { %1387 = vst.msk [vmem:[#allocation2 + $0x2a8] sm:$0xff] %vm660_vm0, %v1178_v44  ;;  %1388 = vst.msk [vmem:[#allocation2 + $0x2b0] sm:$0xff] %vm660_vm0, %v1179_v51  ;;  %v1199_v8 = vmax.f32 %v13231_v49, 0.0  ;;  %v1200_v27 = vmax.f32 %v13232_v40, 0.0  ;;  %v13234_v5 = vld [vmem:[#allocation10_spill] sm:$0xff]  ;;  %v2189_v12 = vld [vmem:[#allocation2 + $0x91] sm:$0xff]  ;;  %2408 = vrot.lane.b32.xlu0 %v8926_v34, %s7291_s20 }
 0x260   :  { %1389 = vst.msk [vmem:[#allocation2 + $0x2c8] sm:$0xff] %vm660_vm0, %v1180_v19  ;;  %1390 = vst.msk [vmem:[#allocation2 + $0x2d0] sm:$0xff] %vm660_vm0, %v1181_v41  ;;  %v1202_v25 = vmax.f32 %v13234_v5, 0.0  ;;  %v2188_v61 = vld [vmem:[#allocation2 + $0x89] sm:$0xff]  ;;  %6807 = vmatmul.mubr.msk.bf16.vlgmr.msra.gmra.mrb[96].mxu0 %vm660_vm0, %v2249_v22  ;;  %v2191_v19 = vld [vmem:[#allocation2 + $0xb1] sm:$0xff] }
 0x261   :  { %1391 = vst.msk [vmem:[#allocation2 + $0x2e8] sm:$0xff] %vm660_vm0, %v1182_v54  ;;  %1392 = vst.msk [vmem:[#allocation2 + $0x2f0] sm:$0xff] %vm660_vm0, %v1183_v28  ;;  %v13235_v21 = vld [vmem:[#allocation11_spill] sm:$0xff]  ;;  %v1511_v52 = vld [vmem:[#allocation2 + $0x8] sm:$0xff]  ;;  %v2250_v10 = vpack.c.bf16 %v2189_v12, %v2188_v61 }
 0x262   :  { %1393 = vst.msk [vmem:[#allocation2 + $0x308] sm:$0xff] %vm660_vm0, %v1184_v18  ;;  %1394 = vst.msk [vmem:[#allocation2 + $0x310] sm:$0xff] %vm660_vm0, %v1185_v50  ;;  %v1203_v24 = vmax.f32 %v13235_v21, 0.0  ;;  %v1512_v3 = vld [vmem:[#allocation2 + $0x10] sm:$0xff]  ;;  %v1513_v36 = vld [vmem:[#allocation2 + $0x28] sm:$0xff] }
 0x263   :  { %1395 = vst.msk [vmem:[#allocation2 + $0x328] sm:$0xff] %vm660_vm0, %v1186_v62  ;;  %1396 = vst.msk [vmem:[#allocation2 + $0x330] sm:$0xff] %vm660_vm0, %v1187_v45  ;;  %v1514_v43 = vld [vmem:[#allocation2 + $0x30] sm:$0xff]  ;;  %v1575_v37 = vpack.c.bf16 %v1512_v3, %v1511_v52  ;;  %6810 = vmatprep.mubr.msk.bf16.mxu0 %vm660_vm0, %v2250_v10  ;;  %v1707_v17 = vld [vmem:[#allocation2 + $0x67] sm:$0xff] }
 0x264   :  { %1397 = vst.msk [vmem:[#allocation2 + $0x348] sm:$0xff] %vm660_vm0, %v1188_v23  ;;  %1398 = vst.msk [vmem:[#allocation2 + $0x350] sm:$0xff] %vm660_vm0, %v1189_v55  ;;  %v1576_v1 = vpack.c.bf16 %v1514_v43, %v1513_v36  ;;  %v1515_v26 = vld [vmem:[#allocation2 + $0x48] sm:$0xff]  ;;  %v1516_v42 = vld [vmem:[#allocation2 + $0x50] sm:$0xff] }
 0x265   :  { %1399 = vst.msk [vmem:[#allocation2 + $0x368] sm:$0xff] %vm660_vm0, %v1190_v15  ;;  %1400 = vst.msk [vmem:[#allocation2 + $0x370] sm:$0xff] %vm660_vm0, %v1191_v14  ;;  %v1708_v44 = vld [vmem:[#allocation2 + $0x6f] sm:$0xff]  ;;  %2312 = vrot.lane.b32.xlu0 %v1575_v37, %s7291_s20  ;;  %v8939_v28 = vpack.c.bf16 %v1516_v42, %v1515_v26  ;;  %v1709_v45 = vld [vmem:[#allocation2 + $0x87] sm:$0xff] }
 0x266   :  { %1401 = vst.msk [vmem:[#allocation2 + $0x388] sm:$0xff] %vm660_vm0, %v1192_v29  ;;  %1402 = vst.msk [vmem:[#allocation2 + $0x390] sm:$0xff] %vm660_vm0, %v1193_v63  ;;  %2314 = vrot.lane.b32.xlu1 %v1576_v1, %s7291_s20  ;;  %v2190_v51 = vld [vmem:[#allocation2 + $0xa9] sm:$0xff]  ;;  %v2193_v54 = vld [vmem:[#allocation2 + $0xd1] sm:$0xff]  ;;  %v1769_v18 = vpack.c.bf16 %v1708_v44, %v1707_v17 }
 0x267   :  { %1403 = vst.msk [vmem:[#allocation2 + $0x3a8] sm:$0xff] %vm660_vm0, %v1194_v35  ;;  %1404 = vst.msk [vmem:[#allocation2 + $0x3b0] sm:$0xff] %vm660_vm0, %v1195_v9  ;;  %v2192_v41 = vld [vmem:[#allocation2 + $0xc9] sm:$0xff]  ;;  %v2251_v50 = vpack.c.bf16 %v2191_v19, %v2190_v51  ;;  %v2195_v11 = vld [vmem:[#allocation2 + $0xf1] sm:$0xff] }
 0x268   :  { %1405 = vst.msk [vmem:[#allocation2 + $0x3c8] sm:$0xff] %vm660_vm0, %v1196_v31  ;;  %1406 = vst.msk [vmem:[#allocation2 + $0x3d0] sm:$0xff] %vm660_vm0, %v1197_v56  ;;  %v1517_v62 = vld [vmem:[#allocation2 + $0x68] sm:$0xff]  ;;  %v1518_v2 = vld [vmem:[#allocation2 + $0x70] sm:$0xff]  ;;  %v2252_v48 = vpack.c.bf16 %v2193_v54, %v2192_v41 }
 0x269   :  { %1407 = vst.msk [vmem:[#allocation2 + $0x3e8] sm:$0xff] %vm660_vm0, %v1198_v16  ;;  %1408 = vst.msk [vmem:[#allocation2 + $0x3f0] sm:$0xff] %vm660_vm0, %v1199_v8  ;;  %v1710_v4 = vld [vmem:[#allocation2 + $0x8f] sm:$0xff]  ;;  %2412 = vrot.lane.b32.xlu0 %v1769_v18, %s7291_s20  ;;  %6811 = vmatmul.mubr.msk.bf16.gmra.mrb[100].mxu0 %vm660_vm0, %v2251_v50  ;;  %v8946_v23 = vpack.c.bf16 %v1518_v2, %v1517_v62  ;;  %v1711_v55 = vld [vmem:[#allocation2 + $0xa7] sm:$0xff] }
 0x26a   :  { %1409 = vst.msk [vmem:[#allocation2 + $0x408] sm:$0xff] %vm660_vm0, %v1200_v27  ;;  %1410 = vst.msk [vmem:[#allocation2 + $0x410] sm:$0xff] %vm660_vm0, %v1201_v46  ;;  %2316 = vrot.lane.b32.xlu1 %v8939_v28, %s7291_s20  ;;  %6814 = vmatprep.mubr.msk.bf16.mxu0 %vm660_vm0, %v2252_v48  ;;  %v1770_v0 = vpack.c.bf16 %v1710_v4, %v1709_v45  ;;  %v1519_v15 = vld [vmem:[#allocation2 + $0x88] sm:$0xff]  ;;  %v1520_v6 = vld [vmem:[#allocation2 + $0x90] sm:$0xff] }
 0x26b   :  { %1411 = vst.msk [vmem:[#allocation2 + $0x428] sm:$0xff] %vm660_vm0, %v1202_v25  ;;  %1412 = vst.msk [vmem:[#allocation2 + $0x430] sm:$0xff] %vm660_vm0, %v1203_v24  ;;  %v1712_v30 = vld [vmem:[#allocation2 + $0xaf] sm:$0xff]  ;;  %v8951_v29 = vpack.c.bf16 %v1520_v6, %v1519_v15  ;;  %v1713_v53 = vld [vmem:[#allocation2 + $0xc7] sm:$0xff] }
 0x26c   :  { %1413 = vst.msk [vmem:[#allocation2 + $0x448] sm:$0xff] %vm660_vm0, %v1204_v33  ;;  %v2194_v60 = vld [vmem:[#allocation2 + $0xe9] sm:$0xff]  ;;  %v2197_v13 = vld [vmem:[#allocation2 + $0x111] sm:$0xff]  ;;  %v1771_v7 = vpack.c.bf16 %v1712_v30, %v1711_v55 }
 0x26d   :  { %2414 = vrot.lane.b32.xlu0 %v1770_v0, %s7291_s20  ;;  %v2196_v14 = vld [vmem:[#allocation2 + $0x109] sm:$0xff]  ;;  %v2253_v63 = vpack.c.bf16 %v2195_v11, %v2194_v60  ;;  %v2199_v40 = vld [vmem:[#allocation2 + $0x131] sm:$0xff] }
 0x26e   :  { %2318 = vrot.lane.b32.xlu1 %v8946_v23, %s7291_s20  ;;  %v1521_v57 = vld [vmem:[#allocation2 + $0xa8] sm:$0xff]  ;;  %v1522_v35 = vld [vmem:[#allocation2 + $0xb0] sm:$0xff]  ;;  %v2254_v58 = vpack.c.bf16 %v2197_v13, %v2196_v14 }
 0x26f   :  { %v1714_v9 = vld [vmem:[#allocation2 + $0xcf] sm:$0xff]  ;;  %v8958_v31 = vpack.c.bf16 %v1522_v35, %v1521_v57  ;;  %v1715_v16 = vld [vmem:[#allocation2 + $0xe7] sm:$0xff] }
 0x270   :  { %v1772_v56 = vpack.c.bf16 %v1714_v9, %v1713_v53  ;;  %v1523_v39 = vld [vmem:[#allocation2 + $0xc8] sm:$0xff]  ;;  %v1524_v20 = vld [vmem:[#allocation2 + $0xd0] sm:$0xff] }
 0x271   :  { %2416 = vrot.lane.b32.xlu0 %v1771_v7, %s7291_s20  ;;  %6815 = vmatmul.mubr.msk.bf16.gmra.mrb[104].mxu0 %vm660_vm0, %v2253_v63  ;;  %v1716_v49 = vld [vmem:[#allocation2 + $0xef] sm:$0xff]  ;;  %v8963_v46 = vpack.c.bf16 %v1524_v20, %v1523_v39  ;;  %v1717_v24 = vld [vmem:[#allocation2 + $0x107] sm:$0xff] }
 0x272   :  { %2320 = vrot.lane.b32.xlu1 %v8951_v29, %s7291_s20  ;;  %6818 = vmatprep.mubr.msk.bf16.mxu0 %vm660_vm0, %v2254_v58  ;;  %v2198_v8 = vld [vmem:[#allocation2 + $0x129] sm:$0xff]  ;;  %v2201_v32 = vld [vmem:[#allocation2 + $0x151] sm:$0xff]  ;;  %v1773_v5 = vpack.c.bf16 %v1716_v49, %v1715_v16 }
 0x273   :  { %v2200_v27 = vld [vmem:[#allocation2 + $0x149] sm:$0xff]  ;;  %v2255_v25 = vpack.c.bf16 %v2199_v40, %v2198_v8  ;;  %v2203_v37 = vld [vmem:[#allocation2 + $0x171] sm:$0xff] }
 0x274   :  { %v1525_v61 = vld [vmem:[#allocation2 + $0xe8] sm:$0xff]  ;;  %v1526_v12 = vld [vmem:[#allocation2 + $0xf0] sm:$0xff]  ;;  %v2256_v21 = vpack.c.bf16 %v2201_v32, %v2200_v27 }
 0x275   :  { %2418 = vrot.lane.b32.xlu0 %v1772_v56, %s7291_s20  ;;  %v1718_v33 = vld [vmem:[#allocation2 + $0x10f] sm:$0xff]  ;;  %v8970_v47 = vpack.c.bf16 %v1526_v12, %v1525_v61  ;;  %v1719_v3 = vld [vmem:[#allocation2 + $0x127] sm:$0xff] }
 0x276   :  { %2322 = vrot.lane.b32.xlu1 %v8958_v31, %s7291_s20  ;;  %v1774_v52 = vpack.c.bf16 %v1718_v33, %v1717_v24  ;;  %v1527_v22 = vld [vmem:[#allocation2 + $0x108] sm:$0xff]  ;;  %v1528_v36 = vld [vmem:[#allocation2 + $0x110] sm:$0xff] }
 0x277   :  { %v1720_v43 = vld [vmem:[#allocation2 + $0x12f] sm:$0xff]  ;;  %v8975_v26 = vpack.c.bf16 %v1528_v36, %v1527_v22  ;;  %v1721_v54 = vld [vmem:[#allocation2 + $0x147] sm:$0xff] }
 0x278   :  { %v2202_v10 = vld [vmem:[#allocation2 + $0x169] sm:$0xff]  ;;  %v2205_v17 = vld [vmem:[#allocation2 + $0x191] sm:$0xff]  ;;  %v1775_v42 = vpack.c.bf16 %v1720_v43, %v1719_v3 }
 0x279   :  { %2420 = vrot.lane.b32.xlu0 %v1773_v5, %s7291_s20  ;;  %6819 = vmatmul.mubr.msk.bf16.gmra.mrb[108].mxu0 %vm660_vm0, %v2255_v25  ;;  %v2204_v1 = vld [vmem:[#allocation2 + $0x189] sm:$0xff]  ;;  %v2257_v44 = vpack.c.bf16 %v2203_v37, %v2202_v10  ;;  %v2207_v55 = vld [vmem:[#allocation2 + $0x1b1] sm:$0xff] }
 0x27a   :  { %2324 = vrot.lane.b32.xlu1 %v8963_v46, %s7291_s20  ;;  %6822 = vmatprep.mubr.msk.bf16.mxu0 %vm660_vm0, %v2256_v21  ;;  %v1529_v51 = vld [vmem:[#allocation2 + $0x128] sm:$0xff]  ;;  %v1530_v19 = vld [vmem:[#allocation2 + $0x130] sm:$0xff]  ;;  %v2258_v41 = vpack.c.bf16 %v2205_v17, %v2204_v1 }
 0x27b   :  { %v1722_v18 = vld [vmem:[#allocation2 + $0x14f] sm:$0xff]  ;;  %v8982_v50 = vpack.c.bf16 %v1530_v19, %v1529_v51  ;;  %v1723_v2 = vld [vmem:[#allocation2 + $0x167] sm:$0xff] }
 0x27c   :  { %v1776_v62 = vpack.c.bf16 %v1722_v18, %v1721_v54  ;;  %v1531_v48 = vld [vmem:[#allocation2 + $0x148] sm:$0xff]  ;;  %v1532_v45 = vld [vmem:[#allocation2 + $0x150] sm:$0xff] }
 0x27d   :  { %2422 = vrot.lane.b32.xlu0 %v1774_v52, %s7291_s20  ;;  %v1724_v4 = vld [vmem:[#allocation2 + $0x16f] sm:$0xff]  ;;  %v8987_v30 = vpack.c.bf16 %v1532_v45, %v1531_v48  ;;  %v1725_v63 = vld [vmem:[#allocation2 + $0x187] sm:$0xff] }
 0x27e   :  { %2326 = vrot.lane.b32.xlu1 %v8970_v47, %s7291_s20  ;;  %v2206_v0 = vld [vmem:[#allocation2 + $0x1a9] sm:$0xff]  ;;  %v2209_v6 = vld [vmem:[#allocation2 + $0x1d1] sm:$0xff]  ;;  %v1777_v60 = vpack.c.bf16 %v1724_v4, %v1723_v2 }
 0x27f   :  { %v2208_v15 = vld [vmem:[#allocation2 + $0x1c9] sm:$0xff]  ;;  %v2259_v11 = vpack.c.bf16 %v2207_v55, %v2206_v0  ;;  %v2211_v20 = vld [vmem:[#allocation2 + $0x1f1] sm:$0xff] }
 0x280   :  { %v1533_v14 = vld [vmem:[#allocation2 + $0x168] sm:$0xff]  ;;  %v1534_v13 = vld [vmem:[#allocation2 + $0x170] sm:$0xff]  ;;  %v2260_v7 = vpack.c.bf16 %v2209_v6, %v2208_v15 }
 0x281   :  { %2424 = vrot.lane.b32.xlu0 %v1775_v42, %s7291_s20  ;;  %6823 = vmatmul.mubr.msk.bf16.gmra.mrb[112].mxu0 %vm660_vm0, %v2257_v44  ;;  %v1726_v57 = vld [vmem:[#allocation2 + $0x18f] sm:$0xff]  ;;  %v8994_v35 = vpack.c.bf16 %v1534_v13, %v1533_v14  ;;  %v1727_v53 = vld [vmem:[#allocation2 + $0x1a7] sm:$0xff] }
 0x282   :  { %2328 = vrot.lane.b32.xlu1 %v8975_v26, %s7291_s20  ;;  %6826 = vmatprep.mubr.msk.bf16.mxu0 %vm660_vm0, %v2258_v41  ;;  %v1778_v58 = vpack.c.bf16 %v1726_v57, %v1725_v63  ;;  %v1535_v9 = vld [vmem:[#allocation2 + $0x188] sm:$0xff]  ;;  %v1536_v56 = vld [vmem:[#allocation2 + $0x190] sm:$0xff] }
 0x283   :  { %v1728_v16 = vld [vmem:[#allocation2 + $0x1af] sm:$0xff]  ;;  %v8999_v40 = vpack.c.bf16 %v1536_v56, %v1535_v9  ;;  %v1729_v12 = vld [vmem:[#allocation2 + $0x1c7] sm:$0xff] }
 0x284   :  { %v2210_v39 = vld [vmem:[#allocation2 + $0x1e9] sm:$0xff]  ;;  %v2213_v8 = vld [vmem:[#allocation2 + $0x211] sm:$0xff]  ;;  %v1779_v27 = vpack.c.bf16 %v1728_v16, %v1727_v53 }
 0x285   :  { %2426 = vrot.lane.b32.xlu0 %v1776_v62, %s7291_s20  ;;  %v2212_v49 = vld [vmem:[#allocation2 + $0x209] sm:$0xff]  ;;  %v2261_v32 = vpack.c.bf16 %v2211_v20, %v2210_v39  ;;  %v2215_v52 = vld [vmem:[#allocation2 + $0x231] sm:$0xff] }
 0x286   :  { %2330 = vrot.lane.b32.xlu1 %v8982_v50, %s7291_s20  ;;  %v1537_v5 = vld [vmem:[#allocation2 + $0x1a8] sm:$0xff]  ;;  %v1538_v25 = vld [vmem:[#allocation2 + $0x1b0] sm:$0xff]  ;;  %v2262_v61 = vpack.c.bf16 %v2213_v8, %v2212_v49 }
 0x287   :  { %v1730_v21 = vld [vmem:[#allocation2 + $0x1cf] sm:$0xff]  ;;  %v9006_v24 = vpack.c.bf16 %v1538_v25, %v1537_v5  ;;  %v1731_v43 = vld [vmem:[#allocation2 + $0x1e7] sm:$0xff] }
 0x288   :  { %v2214_v33 = vld [vmem:[#allocation2 + $0x229] sm:$0xff]  ;;  %v1780_v3 = vpack.c.bf16 %v1730_v21, %v1729_v12  ;;  %v2217_v17 = vld [vmem:[#allocation2 + $0x291] sm:$0xff] }
 0x289   :  { %2428 = vrot.lane.b32.xlu0 %v1777_v60, %s7291_s20  ;;  %6827 = vmatmul.mubr.msk.bf16.gmra.mrb[116].mxu0 %vm660_vm0, %v2259_v11  ;;  %v1539_v22 = vld [vmem:[#allocation2 + $0x1c8] sm:$0xff]  ;;  %v1540_v36 = vld [vmem:[#allocation2 + $0x1d0] sm:$0xff]  ;;  %v2263_v37 = vpack.c.bf16 %v2215_v52, %v2214_v33 }
 0x28a   :  { %2332 = vrot.lane.b32.xlu1 %v8987_v30, %s7291_s20  ;;  %6830 = vmatprep.mubr.msk.bf16.mxu0 %vm660_vm0, %v2260_v7  ;;  %v1732_v10 = vld [vmem:[#allocation2 + $0x1ef] sm:$0xff]  ;;  %v9011_v42 = vpack.c.bf16 %v1540_v36, %v1539_v22  ;;  %v1733_v54 = vld [vmem:[#allocation2 + $0x207] sm:$0xff] }
 0x28b   :  { %v2216_v1 = vld [vmem:[#allocation2 + $0x289] sm:$0xff]  ;;  %v1781_v44 = vpack.c.bf16 %v1732_v10, %v1731_v43  ;;  %v2219_v6 = vld [vmem:[#allocation2 + $0x2b1] sm:$0xff] }
 0x28c   :  { %v1541_v51 = vld [vmem:[#allocation2 + $0x1e8] sm:$0xff]  ;;  %v1542_v19 = vld [vmem:[#allocation2 + $0x1f0] sm:$0xff]  ;;  %v2264_v41 = vpack.c.bf16 %v2217_v17, %v2216_v1 }
 0x28d   :  { %2430 = vrot.lane.b32.xlu0 %v1778_v58, %s7291_s20  ;;  %v1734_v18 = vld [vmem:[#allocation2 + $0x20f] sm:$0xff]  ;;  %v9018_v48 = vpack.c.bf16 %v1542_v19, %v1541_v51  ;;  %v1735_v4 = vld [vmem:[#allocation2 + $0x267] sm:$0xff] }
 0x28e   :  { %2334 = vrot.lane.b32.xlu1 %v8994_v35, %s7291_s20  ;;  %v1543_v62 = vld [vmem:[#allocation2 + $0x248] sm:$0xff]  ;;  %v1544_v2 = vld [vmem:[#allocation2 + $0x250] sm:$0xff]  ;;  %v1782_v45 = vpack.c.bf16 %v1734_v18, %v1733_v54 }
 0x28f   :  { %v1736_v0 = vld [vmem:[#allocation2 + $0x26f] sm:$0xff]  ;;  %v1591_v55 = vpack.c.bf16 %v1544_v2, %v1543_v62  ;;  %v1737_v58 = vld [vmem:[#allocation2 + $0x287] sm:$0xff] }
 0x290   :  { %v2218_v15 = vld [vmem:[#allocation2 + $0x2a9] sm:$0xff]  ;;  %v2221_v11 = vld [vmem:[#allocation2 + $0x2d1] sm:$0xff]  ;;  %v1783_v14 = vpack.c.bf16 %v1736_v0, %v1735_v4 }
 0x291   :  { %2432 = vrot.lane.b32.xlu0 %v1779_v27, %s7291_s20  ;;  %6831 = vmatmul.mubr.msk.bf16.gmra.mrb[120].mxu0 %vm660_vm0, %v2261_v32  ;;  %v2220_v60 = vld [vmem:[#allocation2 + $0x2c9] sm:$0xff]  ;;  %v2265_v13 = vpack.c.bf16 %v2219_v6, %v2218_v15  ;;  %v2223_v27 = vld [vmem:[#allocation2 + $0x2f1] sm:$0xff] }
 0x292   :  { %2336 = vrot.lane.b32.xlu1 %v8999_v40, %s7291_s20  ;;  %6834 = vmatprep.mubr.msk.bf16.mxu0 %vm660_vm0, %v2262_v61  ;;  %v1545_v7 = vld [vmem:[#allocation2 + $0x268] sm:$0xff]  ;;  %v1546_v63 = vld [vmem:[#allocation2 + $0x270] sm:$0xff]  ;;  %v2266_v57 = vpack.c.bf16 %v2221_v11, %v2220_v60 }
 0x293   :  { %v1738_v53 = vld [vmem:[#allocation2 + $0x28f] sm:$0xff]  ;;  %v1592_v9 = vpack.c.bf16 %v1546_v63, %v1545_v7  ;;  %v1739_v16 = vld [vmem:[#allocation2 + $0x2a7] sm:$0xff] }
 0x294   :  { %v1784_v56 = vpack.c.bf16 %v1738_v53, %v1737_v58  ;;  %v1547_v39 = vld [vmem:[#allocation2 + $0x288] sm:$0xff]  ;;  %v1548_v20 = vld [vmem:[#allocation2 + $0x290] sm:$0xff] }
 0x295   :  { %2434 = vrot.lane.b32.xlu0 %v1780_v3, %s7291_s20  ;;  %v1740_v49 = vld [vmem:[#allocation2 + $0x2af] sm:$0xff]  ;;  %v9029_v25 = vpack.c.bf16 %v1548_v20, %v1547_v39  ;;  %v1741_v3 = vld [vmem:[#allocation2 + $0x2c7] sm:$0xff] }
 0x296   :  { %2338 = vrot.lane.b32.xlu1 %v9006_v24, %s7291_s20  ;;  %v2222_v8 = vld [vmem:[#allocation2 + $0x2e9] sm:$0xff]  ;;  %v2225_v5 = vld [vmem:[#allocation2 + $0x311] sm:$0xff]  ;;  %v1785_v61 = vpack.c.bf16 %v1740_v49, %v1739_v16 }
 0x297   :  { %v2224_v32 = vld [vmem:[#allocation2 + $0x309] sm:$0xff]  ;;  %v2267_v12 = vpack.c.bf16 %v2223_v27, %v2222_v8  ;;  %v2227_v51 = vld [vmem:[#allocation2 + $0x331] sm:$0xff] }
 0x298   :  { %v1549_v21 = vld [vmem:[#allocation2 + $0x2a8] sm:$0xff]  ;;  %v1550_v33 = vld [vmem:[#allocation2 + $0x2b0] sm:$0xff]  ;;  %v2268_v52 = vpack.c.bf16 %v2225_v5, %v2224_v32 }
 0x299   :  { %2436 = vrot.lane.b32.xlu0 %v1781_v44, %s7291_s20  ;;  %6835 = vmatmul.mubr.msk.bf16.gmra.mrb[124].mxu0 %vm660_vm0, %v2263_v37  ;;  %v1742_v22 = vld [vmem:[#allocation2 + $0x2cf] sm:$0xff]  ;;  %v9036_v36 = vpack.c.bf16 %v1550_v33, %v1549_v21  ;;  %v1743_v10 = vld [vmem:[#allocation2 + $0x2e7] sm:$0xff] }
 0x29a   :  { %2340 = vrot.lane.b32.xlu1 %v9011_v42, %s7291_s20  ;;  %6838 = vmatprep.mubr.msk.bf16.mxu0 %vm660_vm0, %v2264_v41  ;;  %v1786_v43 = vpack.c.bf16 %v1742_v22, %v1741_v3  ;;  %v1551_v37 = vld [vmem:[#allocation2 + $0x2c8] sm:$0xff]  ;;  %v1552_v1 = vld [vmem:[#allocation2 + $0x2d0] sm:$0xff] }
 0x29b   :  { %v1744_v17 = vld [vmem:[#allocation2 + $0x2ef] sm:$0xff]  ;;  %v9041_v54 = vpack.c.bf16 %v1552_v1, %v1551_v37  ;;  %v1745_v0 = vld [vmem:[#allocation2 + $0x307] sm:$0xff] }
 0x29c   :  { %v2226_v44 = vld [vmem:[#allocation2 + $0x329] sm:$0xff]  ;;  %v2229_v41 = vld [vmem:[#allocation2 + $0x351] sm:$0xff]  ;;  %v1787_v18 = vpack.c.bf16 %v1744_v17, %v1743_v10 }
 0x29d   :  { %2438 = vrot.lane.b32.xlu0 %v1782_v45, %s7291_s20  ;;  %v2228_v19 = vld [vmem:[#allocation2 + $0x349] sm:$0xff]  ;;  %v2269_v62 = vpack.c.bf16 %v2227_v51, %v2226_v44  ;;  %v2231_v63 = vld [vmem:[#allocation2 + $0x371] sm:$0xff] }
 0x29e   :  { %2342 = vrot.lane.b32.xlu1 %v9018_v48, %s7291_s20  ;;  %v1553_v2 = vld [vmem:[#allocation2 + $0x2e8] sm:$0xff]  ;;  %v1554_v45 = vld [vmem:[#allocation2 + $0x2f0] sm:$0xff]  ;;  %v2270_v4 = vpack.c.bf16 %v2229_v41, %v2228_v19 }
 0x29f   :  { %v9048_v15 = vpack.c.bf16 %v1554_v45, %v1553_v2  ;;  %v1747_v60 = vld [vmem:[#allocation2 + $0x327] sm:$0xff]  ;;  %v2233_v58 = vld [vmem:[#allocation2 + $0x391] sm:$0xff] }
 0x2a0   :  { %v1555_v11 = vld [vmem:[#allocation2 + $0x308] sm:$0xff]  ;;  %v1558_v39 = vld [vmem:[#allocation2 + $0x330] sm:$0xff] }
 0x2a1   :  { %2440 = vrot.lane.b32.xlu0 %v1783_v14, %s7291_s20  ;;  %6839 = vmatmul.mubr.msk.bf16.gmra.mrb[128].mxu0 %vm660_vm0, %v2265_v13  ;;  %v1556_v14 = vld [vmem:[#allocation2 + $0x310] sm:$0xff]  ;;  %v1557_v16 = vld [vmem:[#allocation2 + $0x328] sm:$0xff] }
 0x2a2   :  { %2344 = vrot.lane.b32.xlu1 %v1591_v55, %s7291_s20  ;;  %6842 = vmatprep.mubr.msk.bf16.mxu0 %vm660_vm0, %v2266_v57  ;;  %v1746_v55 = vld [vmem:[#allocation2 + $0x30f] sm:$0xff]  ;;  %v9053_v53 = vpack.c.bf16 %v1556_v14, %v1555_v11  ;;  %v1749_v49 = vld [vmem:[#allocation2 + $0x347] sm:$0xff]  ;;  %v9060_v27 = vpack.c.bf16 %v1558_v39, %v1557_v16 }
 0x2a3   :  { %v1788_v6 = vpack.c.bf16 %v1746_v55, %v1745_v0  ;;  %v1748_v13 = vld [vmem:[#allocation2 + $0x32f] sm:$0xff]  ;;  %v1751_v5 = vld [vmem:[#allocation2 + $0x367] sm:$0xff] }
 0x2a4   :  { %v2230_v7 = vld [vmem:[#allocation2 + $0x369] sm:$0xff]  ;;  %v2237_v22 = vld [vmem:[#allocation2 + $0x3d1] sm:$0xff] }
 0x2a5   :  { %2442 = vrot.lane.b32.xlu0 %v1784_v56, %s7291_s20  ;;  %v2232_v57 = vld [vmem:[#allocation2 + $0x389] sm:$0xff]  ;;  %v2271_v56 = vpack.c.bf16 %v2231_v63, %v2230_v7  ;;  %v2239_v55 = vld [vmem:[#allocation2 + $0x3f1] sm:$0xff] }
 0x2a6   :  { %2346 = vrot.lane.b32.xlu1 %v1592_v9, %s7291_s20  ;;  %v1789_v9 = vpack.c.bf16 %v1748_v13, %v1747_v60  ;;  %v2272_v20 = vpack.c.bf16 %v2233_v58, %v2232_v57  ;;  %v1750_v8 = vld [vmem:[#allocation2 + $0x34f] sm:$0xff]  ;;  %v1753_v51 = vld [vmem:[#allocation2 + $0x387] sm:$0xff] }
 0x2a7   :  { %v1790_v32 = vpack.c.bf16 %v1750_v8, %v1749_v49  ;;  %v1752_v21 = vld [vmem:[#allocation2 + $0x36f] sm:$0xff]  ;;  %v1757_v58 = vld [vmem:[#allocation2 + $0x3c7] sm:$0xff] }
 0x2a8   :  { %v2234_v33 = vld [vmem:[#allocation2 + $0x3a9] sm:$0xff]  ;;  %v1791_v10 = vpack.c.bf16 %v1752_v21, %v1751_v5  ;;  %v2241_v60 = vld [vmem:[#allocation2 + $0x411] sm:$0xff] }
 0x2a9   :  { %2444 = vrot.lane.b32.xlu0 %v1785_v61, %s7291_s20  ;;  %6843 = vmatmul.mubr.msk.bf16.gmra.mrb[132].mxu0 %vm660_vm0, %v2267_v12  ;;  %v1559_v61 = vld [vmem:[#allocation2 + $0x348] sm:$0xff]  ;;  %v1560_v12 = vld [vmem:[#allocation2 + $0x350] sm:$0xff] }
 0x2aa   :  { %2348 = vrot.lane.b32.xlu1 %v9029_v25, %s7291_s20  ;;  %6846 = vmatprep.mubr.msk.bf16.mxu0 %vm660_vm0, %v2268_v52  ;;  %v2235_v52 = vld [vmem:[#allocation2 + $0x3b1] sm:$0xff]  ;;  %v2236_v3 = vld [vmem:[#allocation2 + $0x3c9] sm:$0xff] }
 0x2ab   :  { %v2273_v37 = vpack.c.bf16 %v2235_v52, %v2234_v33  ;;  %v1561_v1 = vld [vmem:[#allocation2 + $0x368] sm:$0xff]  ;;  %v1562_v17 = vld [vmem:[#allocation2 + $0x370] sm:$0xff]  ;;  %v2274_v44 = vpack.c.bf16 %v2237_v22, %v2236_v3 }
 0x2ac   :  { %v1754_v19 = vld [vmem:[#allocation2 + $0x38f] sm:$0xff]  ;;  %v9072_v41 = vpack.c.bf16 %v1562_v17, %v1561_v1  ;;  %v1759_v39 = vld [vmem:[#allocation2 + $0x3e7] sm:$0xff] }
 0x2ad   :  { %2446 = vrot.lane.b32.xlu0 %v1786_v43, %s7291_s20  ;;  %v9065_v43 = vpack.c.bf16 %v1560_v12, %v1559_v61  ;;  %v1563_v2 = vld [vmem:[#allocation2 + $0x388] sm:$0xff]  ;;  %v1564_v45 = vld [vmem:[#allocation2 + $0x390] sm:$0xff] }
 0x2ae   :  { %2350 = vrot.lane.b32.xlu1 %v9036_v36, %s7291_s20  ;;  %v2238_v0 = vld [vmem:[#allocation2 + $0x3e9] sm:$0xff]  ;;  %v9077_v11 = vpack.c.bf16 %v1564_v45, %v1563_v2  ;;  %v2245_v8 = vld [vmem:[#allocation2 + $0x451] sm:$0xff] }
 0x2af   :  { %v2275_v13 = vpack.c.bf16 %v2239_v55, %v2238_v0  ;;  %v1565_v7 = vld [vmem:[#allocation2 + $0x3a8] sm:$0xff]  ;;  %v1566_v63 = vld [vmem:[#allocation2 + $0x3b0] sm:$0xff] }
 0x2b0   :  { %v1568_v49 = vld [vmem:[#allocation2 + $0x3d0] sm:$0xff]  ;;  %v1761_v17 = vld [vmem:[#allocation2 + $0x407] sm:$0xff] }
 0x2b1   :  { %2448 = vrot.lane.b32.xlu0 %v1787_v18, %s7291_s20  ;;  %6847 = vmatmul.mubr.msk.bf16.gmra.mrb[136].mxu0 %vm660_vm0, %v2269_v62  ;;  %v1792_v18 = vpack.c.bf16 %v1754_v19, %v1753_v51  ;;  %v1755_v62 = vld [vmem:[#allocation2 + $0x3a7] sm:$0xff]  ;;  %v2243_v61 = vld [vmem:[#allocation2 + $0x431] sm:$0xff] }
 0x2b2   :  { %2352 = vrot.lane.b32.xlu1 %v9041_v54, %s7291_s20  ;;  %6850 = vmatprep.mubr.msk.bf16.mxu0 %vm660_vm0, %v2270_v4  ;;  %v1756_v4 = vld [vmem:[#allocation2 + $0x3af] sm:$0xff]  ;;  %v1415_v19 = vld [vmem:[#allocation2 + $0x7] sm:$0xff] }
 0x2b3   :  { %v1793_v14 = vpack.c.bf16 %v1756_v4, %v1755_v62  ;;  %v2242_v5 = vld [vmem:[#allocation2 + $0x429] sm:$0xff]  ;;  %v1608_v33 = vld [vmem:[#allocation2 + $0x11] sm:$0xff] }
 0x2b4   :  { %v2244_v12 = vld [vmem:[#allocation2 + $0x449] sm:$0xff]  ;;  %v2277_v22 = vpack.c.bf16 %v2243_v61, %v2242_v5 }
 0x2b5   :  { %2450 = vrot.lane.b32.xlu0 %v1788_v6, %s7291_s20  ;;  %v2240_v6 = vld [vmem:[#allocation2 + $0x409] sm:$0xff]  ;;  %v2278_v1 = vpack.c.bf16 %v2245_v8, %v2244_v12 }
 0x2b6   :  { %2354 = vrot.lane.b32.xlu1 %v9048_v15, %s7291_s20  ;;  %v2276_v57 = vpack.c.bf16 %v2241_v60, %v2240_v6  ;;  %v1607_v21 = vld [vmem:[#allocation2 + $0x9] sm:$0xff] }
 0x2b7   :  { %v1671_v51 = vpack.c.bf16 %v1608_v33, %v1607_v21  ;;  %v1763_v4 = vld [vmem:[#allocation2 + $0x427] sm:$0xff]  ;;  %v1572_v55 = vld [vmem:[#allocation2 + $0x410] sm:$0xff] }
 0x2b8   :  { %v1571_v0 = vld [vmem:[#allocation2 + $0x408] sm:$0xff] }
 0x2b9   :  { %2452 = vrot.lane.b32.xlu0 %v1789_v9, %s7291_s20  ;;  %6851 = vmatmul.mubr.msk.bf16.gmra.mrb[140].mxu0 %vm660_vm0, %v2271_v56  ;;  %v1758_v9 = vld [vmem:[#allocation2 + $0x3cf] sm:$0xff]  ;;  %v9084_v56 = vpack.c.bf16 %v1566_v63, %v1565_v7 }
 0x2ba   :  { %2356 = vrot.lane.b32.xlu1 %v9053_v53, %s7291_s20  ;;  %6854 = vmatprep.mubr.msk.bf16.mxu0 %vm660_vm0, %v2272_v20  ;;  %v1794_v16 = vpack.c.bf16 %v1758_v9, %v1757_v58  ;;  %v1567_v20 = vld [vmem:[#allocation2 + $0x3c8] sm:$0xff]  ;;  %v1610_v7 = vld [vmem:[#allocation2 + $0x31] sm:$0xff]  ;;  %v9105_v58 = vpack.c.bf16 %v1572_v55, %v1571_v0  ;;  %v7078_v55 = vld [vmem:[%s12983_s2 + $0xa0] sm:$0xff]  }
 0x2bb   :  { %v9089_v52 = vpack.c.bf16 %v1568_v49, %v1567_v20  ;;  %v1573_v20 = vld [vmem:[#allocation2 + $0x428] sm:$0xff]  ;;  %v1574_v49 = vld [vmem:[#allocation2 + $0x430] sm:$0xff] }
 0x2bc   :  { %v1766_v5 = vld [vmem:[#allocation2 + $0x44f] sm:$0xff]  ;;  %v9112_v12 = vpack.c.bf16 %v1574_v49, %v1573_v20 }
 0x2bd   :  { %2454 = vrot.lane.b32.xlu0 %v1790_v32, %s7291_s20  ;;  %v1760_v32 = vld [vmem:[#allocation2 + $0x3ef] sm:$0xff] }
 0x2be   :  { %2358 = vrot.lane.b32.xlu1 %v9060_v27, %s7291_s20  ;;  %v1795_v3 = vpack.c.bf16 %v1760_v32, %v1759_v39  ;;  %v1765_v32 = vld [vmem:[#allocation2 + $0x447] sm:$0xff] }
 0x2bf   :  { %v7075_v21 = vld [vmem:[%s12983_s2 + $0x88] sm:$0xff]   ;;  %v1798_v33 = vpack.c.bf16 %v1766_v5, %v1765_v32  ;;  %v1906_v5 = vld [vmem:[#allocation2 + $0xd1] sm:$0xff] }
 0x2c0   :  { %v1905_v32 = vld [vmem:[#allocation2 + $0xc9] sm:$0xff] }
 0x2c1   :  { %2456 = vrot.lane.b32.xlu0 %v1791_v10, %s7291_s20  ;;  %6855 = vmatmul.mubr.msk.bf16.gmra.mrb[144].mxu0 %vm660_vm0, %v2273_v37  ;;  %v1569_v10 = vld [vmem:[#allocation2 + $0x3e8] sm:$0xff]  ;;  %v1570_v37 = vld [vmem:[#allocation2 + $0x3f0] sm:$0xff] }
 0x2c2   :  { %2360 = vrot.lane.b32.xlu1 %v9065_v43, %s7291_s20  ;;  %6858 = vmatprep.mubr.msk.bf16.mxu0 %vm660_vm0, %v2274_v44  ;;  %v1762_v44 = vld [vmem:[#allocation2 + $0x40f] sm:$0xff]  ;;  %v9096_v62 = vpack.c.bf16 %v1570_v37, %v1569_v10 }
 0x2c3   :  { %v1796_v45 = vpack.c.bf16 %v1762_v44, %v1761_v17  ;;  %v7076_v10 = vld [vmem:[%s12983_s2 + $0x90] sm:$0xff]  }
 0x2c4   :  { %v1897_v37 = vld [vmem:[#allocation2 + $0x49] sm:$0xff] }
 0x2c5   :  { %2458 = vrot.lane.b32.xlu0 %v1792_v18, %s7291_s20  ;;  %v1416_v18 = vld [vmem:[#allocation2 + $0xf] sm:$0xff] }
 0x2c6   :  { %2362 = vrot.lane.b32.xlu1 %v9072_v41, %s7291_s20  ;;  %v1479_v60 = vpack.c.bf16 %v1416_v18, %v1415_v19  ;;  %v1899_v19 = vld [vmem:[#allocation2 + $0x69] sm:$0xff]  ;;  %v7077_v18 = vld [vmem:[%s12983_s2 + $0x98] sm:$0xff]  }
 0x2c9   :  { %2460 = vrot.lane.b32.xlu0 %v1793_v14, %s7291_s20  ;;  %6859 = vmatmul.mubr.msk.bf16.gmra.mrb[148].mxu0 %vm660_vm0, %v2275_v13  ;;  %v1764_v14 = vld [vmem:[#allocation2 + $0x42f] sm:$0xff] }
 0x2ca   :  { %2364 = vrot.lane.b32.xlu1 %v9077_v11, %s7291_s20  ;;  %6862 = vmatprep.mubr.msk.bf16.mxu0 %vm660_vm0, %v2276_v57  ;;  %v1609_v13 = vld [vmem:[#allocation2 + $0x29] sm:$0xff]  ;;  %v7074_v57 = vld [vmem:[%s12983_s2 + $0x80] sm:$0xff]  }
 0x2cb   :  { %v1672_v39 = vpack.c.bf16 %v1610_v7, %v1609_v13  ;;  %v1903_v7 = vld [vmem:[#allocation2 + $0xa9] sm:$0xff] }
 0x2cd   :  { %2462 = vrot.lane.b32.xlu0 %v1794_v16, %s7291_s20  ;;  %v1797_v16 = vpack.c.bf16 %v1764_v14, %v1763_v4  ;;  %v1420_v4 = vld [vmem:[#allocation2 + $0x4f] sm:$0xff] }
 0x2ce   :  { %2366 = vrot.lane.b32.xlu1 %v9084_v56, %s7291_s20 }
 0x2d0   :  { %v2411_v63 = vpop.permute.xlu1 %2410 }
 0x2d1   :  { %2464 = vrot.lane.b32.xlu0 %v1795_v3, %s7291_s20  ;;  %6863 = vmatmul.mubr.msk.bf16.gmra.mrb[152].mxu0 %vm660_vm0, %v2277_v22  ;;  %v2409_v2 = vpop.permute.xlu0 %2408  ;;  %v2798_v61 = vsel %vm660_vm0, %v1672_v39, %v2411_v63  ;;  %v7079_v63 = vld [vmem:[%s12983_s2 + $0xa8] sm:$0xff]  }
 0x2d2   :  { %2368 = vrot.lane.b32.xlu1 %v9089_v52, %s7291_s20  ;;  %6866 = vmatprep.mubr.msk.bf16.mxu0 %vm660_vm0, %v2278_v1  ;;  %v2794_v6 = vsel %vm660_vm0, %v1671_v51, %v2409_v2  ;;  %v1898_v1 = vld [vmem:[#allocation2 + $0x51] sm:$0xff] }
 0x2d3   :  { %3592 = vmatprep.mubr.bf16.mxu1 %v2794_v6  ;;  %v1960_v51 = vpack.c.bf16 %v1898_v1, %v1897_v37  ;;  %v1900_v2 = vld [vmem:[#allocation2 + $0x71] sm:$0xff]  ;;  %v1901_v6 = vld [vmem:[#allocation2 + $0x89] sm:$0xff] }
 0x2d4   :  { %v1424_v37 = vld [vmem:[#allocation2 + $0x8f] sm:$0xff] }
 0x2d5   :  { %2466 = vrot.lane.b32.xlu0 %v1796_v45, %s7291_s20  ;;  %v1419_v45 = vld [vmem:[#allocation2 + $0x47] sm:$0xff] }
 0x2d6   :  { %2370 = vrot.lane.b32.xlu1 %v9096_v62, %s7291_s20  ;;  %v1481_v0 = vpack.c.bf16 %v1420_v4, %v1419_v45  ;;  %v1911_v4 = vld [vmem:[#allocation2 + $0x129] sm:$0xff] }
 0x2d7   :  { %v2313_v9 = vpop.permute.xlu0 %2312 }
 0x2d8   :  { %v2666_v8 = vsel %vm660_vm0, %v1479_v60, %v2313_v9  ;;  %v2315_v3 = vpop.permute.xlu1 %2314  ;;  %v1902_v60 = vld [vmem:[#allocation2 + $0x91] sm:$0xff]  ;;  %v1421_v9 = vld [vmem:[#allocation2 + $0x67] sm:$0xff] }
 0x2d9   :  { %2468 = vrot.lane.b32.xlu0 %v1797_v16, %s7291_s20  ;;  %3593 = vmatmul.mubr.bf16.vlgmr.msra.gmra.mrb[32].mxu1 %v2666_v8  ;;  %v2670_v17 = vsel %vm660_vm0, %v8926_v34, %v2315_v3  ;;  %v1962_v13 = vpack.c.bf16 %v1902_v60, %v1901_v6  ;;  %v1422_v16 = vld [vmem:[#allocation2 + $0x6f] sm:$0xff]  ;;  %v7081_v3 = vld [vmem:[%s12983_s2 + $0xb8] sm:$0xff]  }
 0x2da   :  { %2372 = vrot.lane.b32.xlu1 %v9105_v58, %s7291_s20  ;;  %3850 = vmatpush1.bf16.msra.mxu1 %v7074_v57  ;;  %v1904_v57 = vld [vmem:[#allocation2 + $0xb1] sm:$0xff]  ;;  %v1482_v49 = vpack.c.bf16 %v1422_v16, %v1421_v9  ;;  %v1427_v16 = vld [vmem:[#allocation2 + $0xc7] sm:$0xff] }
 0x2db   :  { %3600 = vmatprep.mubr.bf16.mxu1 %v2798_v61  ;;  %3851 = vmatprep.subr.bf16.mxu1 %v13170_v59  ;;  %v2413_v22 = vpop.permute.xlu0 %2412  ;;  %v1963_v20 = vpack.c.bf16 %v1904_v57, %v1903_v7  ;;  %v7080_v8 = vld [vmem:[%s12983_s2 + $0xb0] sm:$0xff]  }
 0x2dc   :  { %v2802_v44 = vsel %vm660_vm0, %v8920_v38, %v2413_v22  ;;  %v2317_v34 = vpop.permute.xlu1 %2316  ;;  %v1908_v22 = vld [vmem:[#allocation2 + $0xf1] sm:$0xff]  ;;  %v1915_v57 = vld [vmem:[#allocation2 + $0x169] sm:$0xff] }
 0x2dd   :  { %2470 = vrot.lane.b32.xlu0 %v1798_v33, %s7291_s20  ;;  %v2674_v14 = vsel %vm660_vm0, %v1481_v0, %v2317_v34  ;;  %v1907_v33 = vld [vmem:[#allocation2 + $0xe9] sm:$0xff]  ;;  %v1916_v9 = vld [vmem:[#allocation2 + $0x171] sm:$0xff] }
 0x2de   :  { %2374 = vrot.lane.b32.xlu1 %v9112_v12, %s7291_s20  ;;  %3852 = vmatpush1.bf16.msra.mxu1 %v7075_v21  ;;  %v1964_v21 = vpack.c.bf16 %v1906_v5, %v1905_v32  ;;  %v7083_v34 = vld [vmem:[%s12983_s2 + $0xc8] sm:$0xff]   ;;  %v1918_v32 = vld [vmem:[#allocation2 + $0x191] sm:$0xff] }
 0x2df   :  { %3853 = vmatprep.subr.bf16.mxu1 %v13170_v59  ;;  %v2415_v38 = vpop.permute.xlu0 %2414  ;;  %v1426_v0 = vld [vmem:[#allocation2 + $0xaf] sm:$0xff] }
 0x2e1   :  { %2600 = vrot.lane.b32.xlu0 %v8939_v28, %s7291_s20  ;;  %3601 = vmatmul.mubr.bf16.gmra.mrb[36].mxu1 %v2670_v17  ;;  %v1961_v28 = vpack.c.bf16 %v1900_v2, %v1899_v19  ;;  %v1965_v17 = vpack.c.bf16 %v1908_v22, %v1907_v33  ;;  %v1909_v19 = vld [vmem:[#allocation2 + $0x109] sm:$0xff]  ;;  %v1920_v33 = vld [vmem:[#allocation2 + $0x1b1] sm:$0xff] }
 0x2e2   :  { %2504 = vrot.lane.b32.xlu1 %v1672_v39, %s7291_s20  ;;  %3608 = vmatprep.mubr.bf16.mxu1 %v2802_v44  ;;  %v2319_v39 = vpop.permute.xlu1 %2318  ;;  %v1430_v22 = vld [vmem:[#allocation2 + $0xef] sm:$0xff] }
 0x2e3   :  { %3854 = vmatpush1.bf16.msra.mxu1 %v7076_v10  ;;  %v2678_v61 = vsel %vm660_vm0, %v1482_v49, %v2319_v39  ;;  %v1423_v10 = vld [vmem:[#allocation2 + $0x87] sm:$0xff]  ;;  %v1428_v39 = vld [vmem:[#allocation2 + $0xcf] sm:$0xff] }
 0x2e4   :  { %3855 = vmatprep.subr.bf16.mxu1 %v13170_v59  ;;  %v1483_v44 = vpack.c.bf16 %v1424_v37, %v1423_v10  ;;  %v1485_v49 = vpack.c.bf16 %v1428_v39, %v1427_v16  ;;  %v1433_v16 = vld [vmem:[#allocation2 + $0x127] sm:$0xff]  ;;  %v1434_v39 = vld [vmem:[#allocation2 + $0x12f] sm:$0xff] }
 0x2e5   :  { %2602 = vrot.lane.b32.xlu0 %v8946_v23, %s7291_s20  ;;  %v2806_v23 = vsel %vm660_vm0, %v1961_v28, %v2415_v38  ;;  %v1912_v38 = vld [vmem:[#allocation2 + $0x131] sm:$0xff] }
 0x2e6   :  { %2506 = vrot.lane.b32.xlu1 %v1960_v51, %s7291_s20  ;;  %v2321_v1 = vpop.permute.xlu1 %2320  ;;  %v7082_v51 = vld [vmem:[%s12983_s2 + $0xc0] sm:$0xff]   ;;  %v9190_v6 = vpack.c.bf16 %v1912_v38, %v1911_v4  ;;  %v2116_v4 = vld [vmem:[#allocation2 + $0x208] sm:$0xff] }
 0x2e7   :  { %3856 = vmatpush1.bf16.msra.mxu1 %v7077_v18  ;;  %v1910_v18 = vld [vmem:[#allocation2 + $0x111] sm:$0xff]  ;;  %v2682_v2 = vsel %vm660_vm0, %v1483_v44, %v2321_v1 }
 0x2e8   :  { %3857 = vmatprep.subr.bf16.mxu1 %v13170_v59  ;;  %v9180_v45 = vpack.c.bf16 %v1910_v18, %v1909_v19  ;;  %v1923_v19 = vld [vmem:[#allocation2 + $0x1e9] sm:$0xff]  ;;  %v1924_v18 = vld [vmem:[#allocation2 + $0x1f1] sm:$0xff] }
 0x2e9   :  { %2604 = vrot.lane.b32.xlu0 %v8951_v29, %s7291_s20  ;;  %3609 = vmatmul.mubr.bf16.gmra.mrb[40].mxu1 %v2674_v14  ;;  %v2417_v29 = vpop.permute.xlu0 %2416  ;;  %v7084_v14 = vld [vmem:[%s12983_s2 + $0xd0] sm:$0xff]  }
 0x2ea   :  { %2508 = vrot.lane.b32.xlu1 %v1961_v28, %s7291_s20  ;;  %3616 = vmatprep.mubr.bf16.mxu1 %v2806_v23  ;;  %v1425_v28 = vld [vmem:[#allocation2 + $0xa7] sm:$0xff] }
 0x2eb   :  { %3858 = vmatpush1.bf16.msra.mxu1 %v7078_v55  ;;  %v1484_v60 = vpack.c.bf16 %v1426_v0, %v1425_v28  ;;  %v1913_v23 = vld [vmem:[#allocation2 + $0x149] sm:$0xff]  ;;  %v9242_v28 = vpack.c.bf16 %v1924_v18, %v1923_v19  ;;  %v1936_v18 = vld [vmem:[#allocation2 + $0x2f1] sm:$0xff] }
 0x2ec   :  { %3859 = vmatprep.subr.bf16.mxu1 %v13170_v59  ;;  %v2118_v0 = vld [vmem:[#allocation2 + $0x228] sm:$0xff] }
 0x2ed   :  { %2606 = vrot.lane.b32.xlu0 %v8958_v31, %s7291_s20  ;;  %v2810_v31 = vsel %vm660_vm0, %v1962_v13, %v2417_v29  ;;  %v1935_v19 = vld [vmem:[#allocation2 + $0x2e9] sm:$0xff] }
 0x2ee   :  { %2510 = vrot.lane.b32.xlu1 %v1962_v13, %s7291_s20  ;;  %v1914_v13 = vld [vmem:[#allocation2 + $0x151] sm:$0xff] }
 0x2ef   :  { %3860 = vmatpush1.bf16.msra.mxu1 %v7079_v63  ;;  %v9202_v63 = vpack.c.bf16 %v1914_v13, %v1913_v23 }
 0x2f0   :  { %3861 = vmatprep.subr.bf16.mxu1 %v13170_v59 }
 0x2f1   :  { %2608 = vrot.lane.b32.xlu0 %v8963_v46, %s7291_s20  ;;  %3617 = vmatmul.mubr.bf16.gmra.mrb[44].mxu1 %v2678_v61  ;;  %v2419_v46 = vpop.permute.xlu0 %2418 }
 0x2f2   :  { %2512 = vrot.lane.b32.xlu1 %v1963_v20, %s7291_s20  ;;  %3624 = vmatprep.mubr.bf16.mxu1 %v2810_v31 }
 0x2f3   :  { %3862 = vmatpush1.bf16.msra.mxu1 %v7080_v8  ;;  %v1917_v8 = vld [vmem:[#allocation2 + $0x189] sm:$0xff] }
 0x2f4   :  { %3863 = vmatprep.subr.bf16.mxu1 %v13170_v59  ;;  %v9220_v31 = vpack.c.bf16 %v1918_v32, %v1917_v8  ;;  %v1929_v8 = vld [vmem:[#allocation2 + $0x289] sm:$0xff]  ;;  %v1930_v32 = vld [vmem:[#allocation2 + $0x291] sm:$0xff] }
 0x2f5   :  { %2610 = vrot.lane.b32.xlu0 %v8970_v47, %s7291_s20  ;;  %v2814_v47 = vsel %vm660_vm0, %v1963_v20, %v2419_v46  ;;  %v2421_v55 = vpop.permute.xlu0 %2420  ;;  %v9209_v20 = vpack.c.bf16 %v1916_v9, %v1915_v57  ;;  %v1921_v46 = vld [vmem:[#allocation2 + $0x1c9] sm:$0xff]  ;;  %v1928_v9 = vld [vmem:[#allocation2 + $0x271] sm:$0xff] }
 0x2f6   :  { %2514 = vrot.lane.b32.xlu1 %v1964_v21, %s7291_s20  ;;  %v1927_v57 = vld [vmem:[#allocation2 + $0x269] sm:$0xff] }
 0x2f7   :  { %3864 = vmatpush1.bf16.msra.mxu1 %v7081_v3  ;;  %v1429_v3 = vld [vmem:[#allocation2 + $0xe7] sm:$0xff] }
 0x2f8   :  { %3865 = vmatprep.subr.bf16.mxu1 %v13170_v59  ;;  %v1486_v1 = vpack.c.bf16 %v1430_v22, %v1429_v3  ;;  %v1435_v3 = vld [vmem:[#allocation2 + $0x147] sm:$0xff]  ;;  %v1436_v22 = vld [vmem:[#allocation2 + $0x14f] sm:$0xff] }
 0x2f9   :  { %2612 = vrot.lane.b32.xlu0 %v8975_v26, %s7291_s20  ;;  %3625 = vmatmul.mubr.bf16.gmra.mrb[48].mxu1 %v2682_v2  ;;  %v2323_v26 = vpop.permute.xlu1 %2322  ;;  %v1431_v2 = vld [vmem:[#allocation2 + $0x107] sm:$0xff] }
 0x2fa   :  { %2516 = vrot.lane.b32.xlu1 %v1965_v17, %s7291_s20  ;;  %3632 = vmatprep.mubr.bf16.mxu1 %v2814_v47  ;;  %v2686_v7 = vsel %vm660_vm0, %v1484_v60, %v2323_v26  ;;  %v1432_v47 = vld [vmem:[#allocation2 + $0x10f] sm:$0xff] }
 0x2fb   :  { %3866 = vmatpush1.bf16.msra.mxu1 %v7082_v51  ;;  %v2119_v26 = vld [vmem:[#allocation2 + $0x230] sm:$0xff] }
 0x2fc   :  { %3867 = vmatprep.subr.bf16.mxu1 %v13170_v59  ;;  %v1925_v60 = vld [vmem:[#allocation2 + $0x209] sm:$0xff]  ;;  %v2167_v13 = vpack.c.bf16 %v2119_v26, %v2118_v0 }
 0x2fd   :  { %2614 = vrot.lane.b32.xlu0 %v8982_v50, %s7291_s20  ;;  %v2818_v50 = vsel %vm660_vm0, %v1964_v21, %v2421_v55  ;;  %v2325_v29 = vpop.permute.xlu1 %2324  ;;  %v1919_v21 = vld [vmem:[#allocation2 + $0x1a9] sm:$0xff] }
 0x2fe   :  { %2518 = vrot.lane.b32.xlu1 %v9180_v45, %s7291_s20  ;;  %v2690_v5 = vsel %vm660_vm0, %v1485_v49, %v2325_v29  ;;  %v9227_v37 = vpack.c.bf16 %v1920_v33, %v1919_v21  ;;  %v1488_v49 = vpack.c.bf16 %v1434_v39, %v1433_v16  ;;  %v1931_v21 = vld [vmem:[#allocation2 + $0x2a9] sm:$0xff]  ;;  %v1932_v33 = vld [vmem:[#allocation2 + $0x2b1] sm:$0xff] }
 0x2ff   :  { %3868 = vmatpush1.bf16.msra.mxu1 %v7083_v34  ;;  %v2117_v34 = vld [vmem:[#allocation2 + $0x210] sm:$0xff] }
 0x300   :  { %3869 = vmatprep.subr.bf16.mxu1 %v13170_v59  ;;  %v2166_v55 = vpack.c.bf16 %v2117_v34, %v2116_v4  ;;  %v9290_v4 = vpack.c.bf16 %v1936_v18, %v1935_v19  ;;  %v1939_v26 = vld [vmem:[#allocation2 + $0x329] sm:$0xff]  ;;  %v1942_v16 = vld [vmem:[#allocation2 + $0x351] sm:$0xff] }
 0x301   :  { %2616 = vrot.lane.b32.xlu0 %v8987_v30, %s7291_s20  ;;  %3633 = vmatmul.mubr.bf16.gmra.mrb[52].mxu1 %v2686_v7  ;;  %v2423_v30 = vpop.permute.xlu0 %2422  ;;  %v7086_v7 = vld [vmem:[%s12983_s2 + $0xe0] sm:$0xff]   ;;  %v1444_v19 = vld [vmem:[#allocation2 + $0x1cf] sm:$0xff] }
 0x302   :  { %2520 = vrot.lane.b32.xlu1 %v9190_v6, %s7291_s20  ;;  %3640 = vmatprep.mubr.bf16.mxu1 %v2818_v50  ;;  %v2822_v61 = vsel %vm660_vm0, %v1965_v17, %v2423_v30  ;;  %v1922_v17 = vld [vmem:[#allocation2 + $0x1d1] sm:$0xff]  ;;  %v9256_v30 = vpack.c.bf16 %v1928_v9, %v1927_v57  ;;  %v1941_v9 = vld [vmem:[#allocation2 + $0x349] sm:$0xff] }
 0x303   :  { %3870 = vmatpush1.bf16.msra.mxu1 %v7084_v14  ;;  %v1926_v14 = vld [vmem:[#allocation2 + $0x211] sm:$0xff] }
 0x304   :  { %3871 = vmatprep.subr.bf16.mxu1 %v13170_v59  ;;  %v1974_v50 = vpack.c.bf16 %v1926_v14, %v1925_v60  ;;  %v1439_v60 = vld [vmem:[#allocation2 + $0x187] sm:$0xff]  ;;  %v1440_v14 = vld [vmem:[#allocation2 + $0x18f] sm:$0xff] }
 0x305   :  { %2618 = vrot.lane.b32.xlu0 %v8994_v35, %s7291_s20  ;;  %v7085_v35 = vld [vmem:[%s12983_s2 + $0xd8] sm:$0xff]   ;;  %v2425_v10 = vpop.permute.xlu0 %2424 }
 0x306   :  { %2522 = vrot.lane.b32.xlu1 %v9202_v63, %s7291_s20  ;;  %v2826_v51 = vsel %vm660_vm0, %v9180_v45, %v2425_v10  ;;  %v1487_v45 = vpack.c.bf16 %v1432_v47, %v1431_v2  ;;  %v1437_v2 = vld [vmem:[#allocation2 + $0x167] sm:$0xff]  ;;  %v1438_v47 = vld [vmem:[#allocation2 + $0x16f] sm:$0xff] }
 0x307   :  { %3872 = vmatpush1.bf16.msra.mxu1 %v7085_v35  ;;  %v9265_v35 = vpack.c.bf16 %v1930_v32, %v1929_v8  ;;  %v1490_v34 = vpack.c.bf16 %v1438_v47, %v1437_v2  ;;  %v1944_v8 = vld [vmem:[#allocation2 + $0x371] sm:$0xff]  ;;  %v1441_v32 = vld [vmem:[#allocation2 + $0x1a7] sm:$0xff] }
 0x308   :  { %3873 = vmatprep.subr.bf16.mxu1 %v13170_v59 }
 0x309   :  { %2620 = vrot.lane.b32.xlu0 %v8999_v40, %s7291_s20  ;;  %3641 = vmatmul.mubr.bf16.gmra.mrb[56].mxu1 %v2690_v5  ;;  %v2327_v40 = vpop.permute.xlu1 %2326 }
 0x30a   :  { %2524 = vrot.lane.b32.xlu1 %v9209_v20, %s7291_s20  ;;  %3648 = vmatprep.mubr.bf16.mxu1 %v2822_v61  ;;  %v2694_v44 = vsel %vm660_vm0, %v1486_v1, %v2327_v40  ;;  %v1489_v1 = vpack.c.bf16 %v1436_v22, %v1435_v3 }
 0x30b   :  { %3874 = vmatpush1.bf16.msra.mxu1 %v7086_v7 }
 0x30c   :  { %3875 = vmatprep.subr.bf16.mxu1 %v13170_v59 }
 0x30d   :  { %2622 = vrot.lane.b32.xlu0 %v9006_v24, %s7291_s20  ;;  %v9236_v24 = vpack.c.bf16 %v1922_v17, %v1921_v46  ;;  %v2329_v38 = vpop.permute.xlu1 %2328  ;;  %v1933_v46 = vld [vmem:[#allocation2 + $0x2c9] sm:$0xff] }
 0x30e   :  { %2526 = vrot.lane.b32.xlu1 %v9220_v31, %s7291_s20  ;;  %v2698_v23 = vsel %vm660_vm0, %v1487_v45, %v2329_v38  ;;  %v1937_v38 = vld [vmem:[#allocation2 + $0x309] sm:$0xff] }
 0x311   :  { %2624 = vrot.lane.b32.xlu0 %v9011_v42, %s7291_s20  ;;  %3649 = vmatmul.mubr.bf16.gmra.mrb[60].mxu1 %v2694_v44  ;;  %v2427_v42 = vpop.permute.xlu0 %2426  ;;  %v2331_v29 = vpop.permute.xlu1 %2330 }
 0x312   :  { %2528 = vrot.lane.b32.xlu1 %v9227_v37, %s7291_s20  ;;  %3656 = vmatprep.mubr.bf16.mxu1 %v2826_v51  ;;  %v2702_v5 = vsel %vm660_vm0, %v1488_v49, %v2331_v29  ;;  %v7088_v29 = vld [vmem:[%s12983_s2 + $0xf0] sm:$0xff]  }
 0x313   :  { %v1943_v49 = vld [vmem:[#allocation2 + $0x369] sm:$0xff] }
 0x314   :  { %v9338_v3 = vpack.c.bf16 %v1944_v8, %v1943_v49  ;;  %v1953_v8 = vld [vmem:[#allocation2 + $0x409] sm:$0xff] }
 0x315   :  { %2626 = vrot.lane.b32.xlu0 %v9018_v48, %s7291_s20  ;;  %v2830_v48 = vsel %vm660_vm0, %v9190_v6, %v2427_v42  ;;  %v2429_v6 = vpop.permute.xlu0 %2428  ;;  %v2333_v40 = vpop.permute.xlu1 %2332  ;;  %v1938_v42 = vld [vmem:[#allocation2 + $0x311] sm:$0xff] }
 0x316   :  { %2530 = vrot.lane.b32.xlu1 %v9236_v24, %s7291_s20  ;;  %v2834_v61 = vsel %vm660_vm0, %v9202_v63, %v2429_v6  ;;  %v1934_v63 = vld [vmem:[#allocation2 + $0x2d1] sm:$0xff]  ;;  %v2706_v17 = vsel %vm660_vm0, %v1489_v1, %v2333_v40  ;;  %v9325_v6 = vpack.c.bf16 %v1942_v16, %v1941_v9 }
 0x317   :  { %v9283_v51 = vpack.c.bf16 %v1934_v63, %v1933_v46  ;;  %v1946_v1 = vld [vmem:[#allocation2 + $0x391] sm:$0xff] }
 0x319   :  { %2628 = vrot.lane.b32.xlu0 %v2166_v55, %s7291_s20  ;;  %3657 = vmatmul.mubr.bf16.gmra.mrb[64].mxu1 %v2698_v23  ;;  %v2431_v10 = vpop.permute.xlu0 %2430  ;;  %v1940_v55 = vld [vmem:[#allocation2 + $0x331] sm:$0xff] }
 0x31a   :  { %2532 = vrot.lane.b32.xlu1 %v9242_v28, %s7291_s20  ;;  %3664 = vmatprep.mubr.bf16.mxu1 %v2830_v48  ;;  %v2838_v44 = vsel %vm660_vm0, %v9209_v20, %v2431_v10  ;;  %v9311_v7 = vpack.c.bf16 %v1940_v55, %v1939_v26  ;;  %v1945_v10 = vld [vmem:[#allocation2 + $0x389] sm:$0xff] }
 0x31b   :  { %v9349_v63 = vpack.c.bf16 %v1946_v1, %v1945_v10  ;;  %v1951_v55 = vld [vmem:[#allocation2 + $0x3e9] sm:$0xff] }
 0x31d   :  { %2630 = vrot.lane.b32.xlu0 %v2167_v13, %s7291_s20  ;;  %v2433_v20 = vpop.permute.xlu0 %2432 }
 0x31e   :  { %2534 = vrot.lane.b32.xlu1 %v1974_v50, %s7291_s20  ;;  %v2842_v0 = vsel %vm660_vm0, %v9220_v31, %v2433_v20  ;;  %v1491_v50 = vpack.c.bf16 %v1440_v14, %v1439_v60  ;;  %v1639_v60 = vld [vmem:[#allocation2 + $0x249] sm:$0xff]  ;;  %v1640_v14 = vld [vmem:[#allocation2 + $0x251] sm:$0xff] }
 0x31f   :  { %v1687_v16 = vpack.c.bf16 %v1640_v14, %v1639_v60  ;;  %v1449_v14 = vld [vmem:[#allocation2 + $0x267] sm:$0xff] }
 0x321   :  { %2632 = vrot.lane.b32.xlu0 %v9029_v25, %s7291_s20  ;;  %3665 = vmatmul.mubr.bf16.gmra.mrb[68].mxu1 %v2702_v5  ;;  %v9271_v25 = vpack.c.bf16 %v1932_v33, %v1931_v21  ;;  %v2435_v13 = vpop.permute.xlu0 %2434  ;;  %v1442_v5 = vld [vmem:[#allocation2 + $0x1af] sm:$0xff] }
 0x322   :  { %2536 = vrot.lane.b32.xlu1 %v9256_v30, %s7291_s20  ;;  %3672 = vmatprep.mubr.bf16.mxu1 %v2834_v61  ;;  %v1492_v22 = vpack.c.bf16 %v1442_v5, %v1441_v32  ;;  %v1954_v5 = vld [vmem:[#allocation2 + $0x411] sm:$0xff] }
 0x323   :  { %v9403_v10 = vpack.c.bf16 %v1954_v5, %v1953_v8 }
 0x325   :  { %2634 = vrot.lane.b32.xlu0 %v9036_v36, %s7291_s20  ;;  %v7087_v36 = vld [vmem:[%s12983_s2 + $0xe8] sm:$0xff]   ;;  %v2437_v21 = vpop.permute.xlu0 %2436 }
 0x326   :  { %2538 = vrot.lane.b32.xlu1 %v9265_v35, %s7291_s20  ;;  %3876 = vmatpush1.bf16.msra.mxu1 %v7087_v36  ;;  %v1443_v36 = vld [vmem:[#allocation2 + $0x1c7] sm:$0xff] }
 0x327   :  { %3877 = vmatprep.subr.bf16.mxu1 %v13170_v59  ;;  %v9363_v20 = vpack.c.bf16 %v1444_v19, %v1443_v36  ;;  %v2149_v36 = vld [vmem:[#allocation2 + $0x450] sm:$0xff] }
 0x329   :  { %2636 = vrot.lane.b32.xlu0 %v9041_v54, %s7291_s20  ;;  %3673 = vmatmul.mubr.bf16.gmra.mrb[72].mxu1 %v2706_v17  ;;  %v2335_v54 = vpop.permute.xlu1 %2334  ;;  %v1947_v17 = vld [vmem:[#allocation2 + $0x3a9] sm:$0xff]  ;;  %v2439_v47 = vpop.permute.xlu0 %2438 }
 0x32a   :  { %2540 = vrot.lane.b32.xlu1 %v9271_v25, %s7291_s20  ;;  %3680 = vmatprep.mubr.bf16.mxu1 %v2838_v44  ;;  %v2710_v45 = vsel %vm660_vm0, %v1490_v34, %v2335_v54  ;;  %v1948_v44 = vld [vmem:[#allocation2 + $0x3b1] sm:$0xff] }
 0x32b   :  { %3878 = vmatpush1.bf16.msra.mxu1 %v7088_v29  ;;  %v9361_v54 = vpack.c.bf16 %v1948_v44, %v1947_v17  ;;  %v2148_v44 = vld [vmem:[#allocation2 + $0x448] sm:$0xff] }
 0x32c   :  { %3879 = vmatprep.subr.bf16.mxu1 %v13170_v59 }
 0x32d   :  { %2638 = vrot.lane.b32.xlu0 %v9048_v15, %s7291_s20  ;;  %v9299_v15 = vpack.c.bf16 %v1938_v42, %v1937_v38  ;;  %v2337_v48 = vpop.permute.xlu1 %2336  ;;  %v1949_v38 = vld [vmem:[#allocation2 + $0x3c9] sm:$0xff]  ;;  %v1950_v42 = vld [vmem:[#allocation2 + $0x3d1] sm:$0xff] }
 0x32e   :  { %2542 = vrot.lane.b32.xlu1 %v9283_v51, %s7291_s20  ;;  %v2714_v39 = vsel %vm660_vm0, %v1491_v50, %v2337_v48  ;;  %v9378_v26 = vpack.c.bf16 %v1950_v42, %v1949_v38  ;;  %v1952_v48 = vld [vmem:[#allocation2 + $0x3f1] sm:$0xff] }
 0x32f   :  { %v1446_v50 = vld [vmem:[#allocation2 + $0x1ef] sm:$0xff]  ;;  %v9390_v29 = vpack.c.bf16 %v1952_v48, %v1951_v55 }
 0x330   :  { %v1958_v55 = vld [vmem:[#allocation2 + $0x451] sm:$0xff] }
 0x331   :  { %2640 = vrot.lane.b32.xlu0 %v9053_v53, %s7291_s20  ;;  %3681 = vmatmul.mubr.bf16.gmra.mrb[76].mxu1 %v2710_v45  ;;  %v1450_v48 = vld [vmem:[#allocation2 + $0x26f] sm:$0xff] }
 0x332   :  { %2544 = vrot.lane.b32.xlu1 %v9290_v4, %s7291_s20  ;;  %3688 = vmatprep.mubr.bf16.mxu1 %v2842_v0  ;;  %v7089_v0 = vld [vmem:[%s12983_s2 + $0xf8] sm:$0xff]   ;;  %v1496_v8 = vpack.c.bf16 %v1450_v48, %v1449_v14 }
 0x333   :  { %v9303_v23 = vpop.f32.mrb[96].mxu0  ;;  %3880 = vmatpush1.bf16.msra.mxu1 %v7089_v0  ;;  %v1957_v0 = vld [vmem:[#allocation2 + $0x449] sm:$0xff] }
 0x334   :  { %v9307_v53 = vpop.f32.mrb[97].mxu0  ;;  %v1990_v60 = vpack.c.bf16 %v1958_v55, %v1957_v0 }
 0x335   :  { %2642 = vrot.lane.b32.xlu0 %v9060_v27, %s7291_s20  ;;  %v9309_v31 = vpop.f32.mrb[98].mxu0  ;;  %v2846_v27 = vsel %vm660_vm0, %v9227_v37, %v2435_v13  ;;  %v2339_v37 = vpop.permute.xlu1 %2338  ;;  %v1445_v13 = vld [vmem:[#allocation2 + $0x1e7] sm:$0xff] }
 0x336   :  { %2546 = vrot.lane.b32.xlu1 %v9299_v15, %s7291_s20  ;;  %v9313_v57 = vpop.f32.mrb[99].mxu0  ;;  %v2718_v46 = vsel %vm660_vm0, %v1492_v22, %v2339_v37  ;;  %v9392_v49 = vpack.c.bf16 %v1446_v50, %v1445_v13  ;;  %v1447_v37 = vld [vmem:[#allocation2 + $0x247] sm:$0xff] }
 0x339   :  { %2644 = vrot.lane.b32.xlu0 %v9065_v43, %s7291_s20  ;;  %3689 = vmatmul.mubr.bf16.gmra.mrb[80].mxu1 %v2714_v39  ;;  %v2341_v2 = vpop.permute.xlu1 %2340  ;;  %v2441_v39 = vpop.permute.xlu0 %2440 }
 0x33a   :  { %2548 = vrot.lane.b32.xlu1 %v9311_v7, %s7291_s20  ;;  %3696 = vmatprep.mubr.bf16.mxu1 %v2846_v27  ;;  %v2722_v45 = vsel %vm660_vm0, %v9363_v20, %v2341_v2  ;;  %v2858_v22 = vsel %vm660_vm0, %v1687_v16, %v2441_v39 }
 0x33c   :  { %v9329_v43 = vpop.f32.mrb[100].mxu0 }
 0x33d   :  { %2646 = vrot.lane.b32.xlu0 %v9072_v41, %s7291_s20  ;;  %v9334_v61 = vpop.f32.mrb[101].mxu0  ;;  %v2850_v41 = vsel %vm660_vm0, %v9236_v24, %v2437_v21  ;;  %v1448_v21 = vld [vmem:[#allocation2 + $0x24f] sm:$0xff]  ;;  %v2443_v2 = vpop.permute.xlu0 %2442 }
 0x33e   :  { %2550 = vrot.lane.b32.xlu1 %v9325_v6, %s7291_s20  ;;  %v9336_v33 = vpop.f32.mrb[102].mxu0  ;;  %v1495_v1 = vpack.c.bf16 %v1448_v21, %v1447_v37  ;;  %v1451_v21 = vld [vmem:[#allocation2 + $0x287] sm:$0xff] }
 0x33f   :  { %v9340_v40 = vpop.f32.mrb[103].mxu0 }
 0x341   :  { %2648 = vrot.lane.b32.xlu0 %v9077_v11, %s7291_s20  ;;  %3697 = vmatmul.mubr.bf16.gmra.mrb[84].mxu1 %v2718_v46  ;;  %v1955_v46 = vld [vmem:[#allocation2 + $0x429] sm:$0xff]  ;;  %v2445_v16 = vpop.permute.xlu0 %2444 }
 0x342   :  { %2552 = vrot.lane.b32.xlu1 %v9338_v3, %s7291_s20  ;;  %3704 = vmatprep.mubr.bf16.mxu1 %v2850_v41  ;;  %v1956_v41 = vld [vmem:[#allocation2 + $0x431] sm:$0xff] }
 0x343   :  { %v9415_v38 = vpack.c.bf16 %v1956_v41, %v1955_v46 }
 0x344   :  { %v9353_v18 = vpop.f32.mrb[104].mxu0 }
 0x345   :  { %2650 = vrot.lane.b32.xlu0 %v9084_v56, %s7291_s20  ;;  %v9357_v11 = vpop.f32.mrb[105].mxu0  ;;  %v2854_v56 = vsel %vm660_vm0, %v9242_v28, %v2439_v47  ;;  %v2343_v28 = vpop.permute.xlu1 %2342 }
 0x346   :  { %2554 = vrot.lane.b32.xlu1 %v9349_v63, %s7291_s20  ;;  %v9359_v24 = vpop.f32.mrb[106].mxu0  ;;  %v2447_v41 = vpop.permute.xlu0 %2446 }
 0x347   :  { %v9365_v34 = vpop.f32.mrb[107].mxu0 }
 0x349   :  { %2652 = vrot.lane.b32.xlu0 %v9089_v52, %s7291_s20  ;;  %3705 = vmatmul.mubr.bf16.gmra.mrb[88].mxu1 %v2722_v45  ;;  %v2345_v19 = vpop.permute.xlu1 %2344 }
 0x34a   :  { %2556 = vrot.lane.b32.xlu1 %v9361_v54, %s7291_s20  ;;  %3712 = vmatprep.mubr.bf16.mxu1 %v2854_v56  ;;  %v2730_v42 = vsel %vm660_vm0, %v1495_v1, %v2345_v19  ;;  %v2182_v56 = vpack.c.bf16 %v2149_v36, %v2148_v44 }
 0x34c   :  { %v9382_v52 = vpop.f32.mrb[108].mxu0 }
 0x34d   :  { %2654 = vrot.lane.b32.xlu0 %v9096_v62, %s7291_s20  ;;  %v9386_v9 = vpop.f32.mrb[109].mxu0  ;;  %v2726_v62 = vsel %vm660_vm0, %v9392_v49, %v2343_v28  ;;  %v2347_v50 = vpop.permute.xlu1 %2346 }
 0x34e   :  { %2558 = vrot.lane.b32.xlu1 %v9378_v26, %s7291_s20  ;;  %v9388_v27 = vpop.f32.mrb[110].mxu0  ;;  %v2734_v37 = vsel %vm660_vm0, %v1496_v8, %v2347_v50  ;;  %v1455_v8 = vld [vmem:[#allocation2 + $0x2c7] sm:$0xff] }
 0x34f   :  { %v9394_v32 = vpop.f32.mrb[111].mxu0 }
 0x351   :  { %2656 = vrot.lane.b32.xlu0 %v9105_v58, %s7291_s20  ;;  %3713 = vmatmul.mubr.bf16.gmra.mrb[92].mxu1 %v2726_v62  ;;  %v1452_v62 = vld [vmem:[#allocation2 + $0x28f] sm:$0xff]  ;;  %v2349_v1 = vpop.permute.xlu1 %2348 }
 0x352   :  { %2560 = vrot.lane.b32.xlu1 %v9390_v29, %s7291_s20  ;;  %3720 = vmatprep.mubr.bf16.mxu1 %v2858_v22  ;;  %v9443_v36 = vpack.c.bf16 %v1452_v62, %v1451_v21 }
 0x354   :  { %v9407_v17 = vpop.f32.mrb[112].mxu0 }
 0x355   :  { %2658 = vrot.lane.b32.xlu0 %v9112_v12, %s7291_s20  ;;  %v9411_v58 = vpop.f32.mrb[113].mxu0  ;;  %v2862_v12 = vsel %vm660_vm0, %v9256_v30, %v2443_v2  ;;  %v2866_v30 = vsel %vm660_vm0, %v9265_v35, %v2445_v16  ;;  %v2738_v2 = vsel %vm660_vm0, %v9443_v36, %v2349_v1  ;;  %v2870_v35 = vsel %vm660_vm0, %v9271_v25, %v2447_v41  ;;  %v2351_v55 = vpop.permute.xlu1 %2350 }
 0x356   :  { %2562 = vrot.lane.b32.xlu1 %v9403_v10, %s7291_s20  ;;  %v9413_v47 = vpop.f32.mrb[114].mxu0 }
 0x357   :  { %v9418_v45 = vpop.f32.mrb[115].mxu0 }
 0x359   :  { %2660 = vrot.lane.b32.xlu0 %v2182_v56, %s7291_s20  ;;  %3721 = vmatmul.mubr.bf16.gmra.mrb[96].mxu1 %v2730_v42  ;;  %v1453_v42 = vld [vmem:[#allocation2 + $0x2a7] sm:$0xff]  ;;  %v1454_v56 = vld [vmem:[#allocation2 + $0x2af] sm:$0xff]  ;;  %v2353_v21 = vpop.permute.xlu1 %2352 }
 0x35a   :  { %2564 = vrot.lane.b32.xlu1 %v9415_v38, %s7291_s20  ;;  %3728 = vmatprep.mubr.bf16.mxu1 %v2862_v12  ;;  %v9455_v14 = vpack.c.bf16 %v1454_v56, %v1453_v42  ;;  %v1457_v56 = vld [vmem:[#allocation2 + $0x2e7] sm:$0xff] }
 0x35c   :  { %v9426_v13 = vpop.f32.mrb[116].mxu0  ;;  %v2742_v16 = vsel %vm660_vm0, %v9455_v14, %v2351_v55  ;;  %v1458_v55 = vld [vmem:[#allocation2 + $0x2ef] sm:$0xff] }
 0x35d   :  { %v9428_v28 = vpop.f32.mrb[117].mxu0 }
 0x35e   :  { %2566 = vrot.lane.b32.xlu1 %v1990_v60, %s7291_s20  ;;  %v9430_v39 = vpop.f32.mrb[118].mxu0  ;;  %v2449_v60 = vpop.permute.xlu0 %2448 }
 0x35f   :  { %v9432_v5 = vpop.f32.mrb[119].mxu0  ;;  %v2874_v25 = vsel %vm660_vm0, %v9283_v51, %v2449_v60 }
 0x361   :  { %3729 = vmatmul.mubr.bf16.gmra.mrb[100].mxu1 %v2734_v37  ;;  %v1456_v37 = vld [vmem:[#allocation2 + $0x2cf] sm:$0xff] }
 0x362   :  { %3736 = vmatprep.mubr.bf16.mxu1 %v2866_v30  ;;  %v2451_v1 = vpop.permute.xlu0 %2450 }
 0x363   :  { %v2878_v51 = vsel %vm660_vm0, %v9290_v4, %v2451_v1  ;;  %v1459_v1 = vld [vmem:[#allocation2 + $0x307] sm:$0xff] }
 0x364   :  { %v9437_v22 = vpop.f32.mrb[120].mxu0 }
 0x365   :  { %v9439_v46 = vpop.f32.mrb[121].mxu0 }
 0x366   :  { %v9441_v44 = vpop.f32.mrb[122].mxu0 }
 0x367   :  { %13236 = vst [vmem:[#allocation12_spill] sm:$0xff] %v9441_v44  ;;  %v9445_v19 = vpop.f32.mrb[123].mxu0 }
 0x369   :  { %3737 = vmatmul.mubr.bf16.gmra.mrb[104].mxu1 %v2738_v2  ;;  %v9471_v2 = vpack.c.bf16 %v1456_v37, %v1455_v8  ;;  %v9485_v37 = vpack.c.bf16 %v1458_v55, %v1457_v56 }
 0x36a   :  { %3744 = vmatprep.mubr.bf16.mxu1 %v2870_v35 }
 0x36b   :  { %v2746_v42 = vsel %vm660_vm0, %v9471_v2, %v2353_v21 }
 0x36c   :  { %v9451_v0 = vpop.f32.mrb[124].mxu0 }
 0x36d   :  { %13237 = vst [vmem:[#allocation13_spill] sm:$0xff] %v9451_v0  ;;  %v9453_v12 = vpop.f32.mrb[125].mxu0 }
 0x36e   :  { %13238 = vst [vmem:[#allocation14_spill] sm:$0xff] %v9453_v12  ;;  %v9457_v48 = vpop.f32.mrb[126].mxu0 }
 0x36f   :  { %13239 = vst [vmem:[#allocation15_spill] sm:$0xff] %v9457_v48  ;;  %v9459_v50 = vpop.f32.mrb[127].mxu0 }
 0x370   :  { %13240 = vst [vmem:[#allocation16_spill] sm:$0xff] %v9459_v50 }
 0x371   :  { %3745 = vmatmul.mubr.bf16.gmra.mrb[108].mxu1 %v2742_v16  ;;  %v2355_v16 = vpop.permute.xlu1 %2354 }
 0x372   :  { %3752 = vmatprep.mubr.bf16.mxu1 %v2874_v25  ;;  %v2750_v21 = vsel %vm660_vm0, %v9485_v37, %v2355_v16 }
 0x374   :  { %v9465_v30 = vpop.f32.mrb[128].mxu0 }
 0x375   :  { %13241 = vst [vmem:[#allocation17_spill] sm:$0xff] %v9465_v30  ;;  %v9467_v62 = vpop.f32.mrb[129].mxu0 }
 0x376   :  { %13242 = vst [vmem:[#allocation18_spill] sm:$0xff] %v9467_v62  ;;  %v9469_v41 = vpop.f32.mrb[130].mxu0 }
 0x377   :  { %13243 = vst [vmem:[#allocation19_spill] sm:$0xff] %v9469_v41  ;;  %v9473_v35 = vpop.f32.mrb[131].mxu0  ;;  %v2453_v41 = vpop.permute.xlu0 %2452 }
 0x378   :  { %13244 = vst [vmem:[#allocation20_spill] sm:$0xff] %v9473_v35  ;;  %v2882_v4 = vsel %vm660_vm0, %v9299_v15, %v2453_v41  ;;  %v1461_v41 = vld [vmem:[#allocation2 + $0x327] sm:$0xff] }
 0x379   :  { %3753 = vmatmul.mubr.bf16.gmra.mrb[112].mxu1 %v2746_v42  ;;  %v1460_v42 = vld [vmem:[#allocation2 + $0x30f] sm:$0xff] }
 0x37a   :  { %3760 = vmatprep.mubr.bf16.mxu1 %v2878_v51  ;;  %v9499_v55 = vpack.c.bf16 %v1460_v42, %v1459_v1 }
 0x37c   :  { %v9479_v60 = vpop.f32.mrb[132].mxu0 }
 0x37d   :  { %13245 = vst [vmem:[#allocation21_spill] sm:$0xff] %v9479_v60  ;;  %v9481_v25 = vpop.f32.mrb[133].mxu0  ;;  %v2357_v60 = vpop.permute.xlu1 %2356 }
 0x37e   :  { %13246 = vst [vmem:[#allocation22_spill] sm:$0xff] %v9481_v25  ;;  %v9483_v8 = vpop.f32.mrb[134].mxu0  ;;  %v2754_v16 = vsel %vm660_vm0, %v9499_v55, %v2357_v60 }
 0x37f   :  { %13247 = vst [vmem:[#allocation23_spill] sm:$0xff] %v9483_v8  ;;  %v9487_v30 = vpop.f32.mrb[135].mxu0  ;;  %v2455_v8 = vpop.permute.xlu0 %2454 }
 0x380   :  { %13248 = vst [vmem:[#allocation24_spill] sm:$0xff] %v9487_v30  ;;  %v2886_v15 = vsel %vm660_vm0, %v9311_v7, %v2455_v8  ;;  %v1463_v8 = vld [vmem:[#allocation2 + $0x347] sm:$0xff] }
 0x381   :  { %3761 = vmatmul.mubr.bf16.gmra.mrb[116].mxu1 %v2750_v21  ;;  %v1462_v21 = vld [vmem:[#allocation2 + $0x32f] sm:$0xff] }
 0x382   :  { %3768 = vmatprep.mubr.bf16.mxu1 %v2882_v4  ;;  %v9513_v42 = vpack.c.bf16 %v1462_v21, %v1461_v41 }
 0x384   :  { %v9493_v51 = vpop.f32.mrb[136].mxu0 }
 0x385   :  { %13249 = vst [vmem:[#allocation25_spill] sm:$0xff] %v9493_v51  ;;  %v9495_v25 = vpop.f32.mrb[137].mxu0  ;;  %v2359_v51 = vpop.permute.xlu1 %2358 }
 0x386   :  { %13250 = vst [vmem:[#allocation26_spill] sm:$0xff] %v9495_v25  ;;  %v9497_v56 = vpop.f32.mrb[138].mxu0  ;;  %v2758_v60 = vsel %vm660_vm0, %v9513_v42, %v2359_v51 }
 0x387   :  { %13251 = vst [vmem:[#allocation27_spill] sm:$0xff] %v9497_v56  ;;  %v9501_v30 = vpop.f32.mrb[139].mxu0  ;;  %v2457_v56 = vpop.permute.xlu0 %2456 }
 0x388   :  { %13252 = vst [vmem:[#allocation28_spill] sm:$0xff] %v9501_v30  ;;  %v2890_v7 = vsel %vm660_vm0, %v9325_v6, %v2457_v56  ;;  %v1465_v56 = vld [vmem:[#allocation2 + $0x367] sm:$0xff] }
 0x389   :  { %3769 = vmatmul.mubr.bf16.gmra.mrb[120].mxu1 %v2754_v16  ;;  %v1464_v16 = vld [vmem:[#allocation2 + $0x34f] sm:$0xff] }
 0x38a   :  { %3776 = vmatprep.mubr.bf16.mxu1 %v2886_v15  ;;  %v9527_v21 = vpack.c.bf16 %v1464_v16, %v1463_v8 }
 0x38c   :  { %v9507_v4 = vpop.f32.mrb[140].mxu0 }
 0x38d   :  { %13253 = vst [vmem:[#allocation29_spill] sm:$0xff] %v9507_v4  ;;  %v9509_v25 = vpop.f32.mrb[141].mxu0  ;;  %v2361_v4 = vpop.permute.xlu1 %2360 }
 0x38e   :  { %13254 = vst [vmem:[#allocation30_spill] sm:$0xff] %v9509_v25  ;;  %v9511_v1 = vpop.f32.mrb[142].mxu0  ;;  %v2762_v51 = vsel %vm660_vm0, %v9527_v21, %v2361_v4 }
 0x38f   :  { %13255 = vst [vmem:[#allocation31_spill] sm:$0xff] %v9511_v1  ;;  %v9515_v30 = vpop.f32.mrb[143].mxu0  ;;  %v2459_v1 = vpop.permute.xlu0 %2458 }
 0x390   :  { %13256 = vst [vmem:[#allocation9_spill] sm:$0xff] %v9515_v30  ;;  %v2894_v6 = vsel %vm660_vm0, %v9338_v3, %v2459_v1  ;;  %v1467_v1 = vld [vmem:[#allocation2 + $0x387] sm:$0xff] }
 0x391   :  { %3777 = vmatmul.mubr.bf16.gmra.mrb[124].mxu1 %v2758_v60  ;;  %v1466_v60 = vld [vmem:[#allocation2 + $0x36f] sm:$0xff] }
 0x392   :  { %3784 = vmatprep.mubr.bf16.mxu1 %v2890_v7  ;;  %v9541_v16 = vpack.c.bf16 %v1466_v60, %v1465_v56 }
 0x394   :  { %v9521_v15 = vpop.f32.mrb[144].mxu0 }
 0x395   :  { %13257 = vst [vmem:[#allocation10_spill] sm:$0xff] %v9521_v15  ;;  %v9523_v25 = vpop.f32.mrb[145].mxu0  ;;  %v2363_v15 = vpop.permute.xlu1 %2362 }
 0x396   :  { %13258 = vst [vmem:[#allocation11_spill] sm:$0xff] %v9523_v25  ;;  %v9525_v41 = vpop.f32.mrb[146].mxu0  ;;  %v2766_v4 = vsel %vm660_vm0, %v9541_v16, %v2363_v15 }
 0x397   :  { %13259 = vst [vmem:[#allocation34_spill] sm:$0xff] %v9525_v41  ;;  %v9529_v30 = vpop.f32.mrb[147].mxu0  ;;  %v2461_v41 = vpop.permute.xlu0 %2460 }
 0x398   :  { %13260 = vst [vmem:[#allocation35_spill] sm:$0xff] %v9529_v30  ;;  %v2898_v3 = vsel %vm660_vm0, %v9349_v63, %v2461_v41  ;;  %v1469_v41 = vld [vmem:[#allocation2 + $0x3a7] sm:$0xff] }
 0x399   :  { %3785 = vmatmul.mubr.bf16.gmra.mrb[128].mxu1 %v2762_v51  ;;  %v1468_v51 = vld [vmem:[#allocation2 + $0x38f] sm:$0xff] }
 0x39a   :  { %3792 = vmatprep.mubr.bf16.mxu1 %v2894_v6  ;;  %v9555_v60 = vpack.c.bf16 %v1468_v51, %v1467_v1 }
 0x39c   :  { %v9535_v7 = vpop.f32.mrb[148].mxu0 }
 0x39d   :  { %13261 = vst [vmem:[#allocation36_spill] sm:$0xff] %v9535_v7  ;;  %v9537_v25 = vpop.f32.mrb[149].mxu0  ;;  %v2365_v7 = vpop.permute.xlu1 %2364 }
 0x39e   :  { %13262 = vst [vmem:[#allocation37_spill] sm:$0xff] %v9537_v25  ;;  %v9539_v8 = vpop.f32.mrb[150].mxu0  ;;  %v2770_v15 = vsel %vm660_vm0, %v9555_v60, %v2365_v7  ;;  %v1471_v7 = vld [vmem:[#allocation2 + $0x3c7] sm:$0xff] }
 0x39f   :  { %13263 = vst [vmem:[#allocation38_spill] sm:$0xff] %v9539_v8  ;;  %v9543_v30 = vpop.f32.mrb[151].mxu0  ;;  %v2463_v8 = vpop.permute.xlu0 %2462 }
 0x3a0   :  { %13264 = vst [vmem:[#allocation39_spill] sm:$0xff] %v9543_v30  ;;  %v2902_v63 = vsel %vm660_vm0, %v9361_v54, %v2463_v8 }
 0x3a1   :  { %3793 = vmatmul.mubr.bf16.gmra.mrb[132].mxu1 %v2766_v4  ;;  %v1470_v4 = vld [vmem:[#allocation2 + $0x3af] sm:$0xff] }
 0x3a2   :  { %3800 = vmatprep.mubr.bf16.mxu1 %v2898_v3  ;;  %v2367_v3 = vpop.permute.xlu1 %2366 }
 0x3a4   :  { %v9549_v6 = vpop.f32.mrb[152].mxu0 }
 0x3a5   :  { %13265 = vst [vmem:[#allocation40_spill] sm:$0xff] %v9549_v6  ;;  %v9551_v25 = vpop.f32.mrb[153].mxu0  ;;  %v2465_v6 = vpop.permute.xlu0 %2464 }
 0x3a6   :  { %13266 = vst [vmem:[#allocation41_spill] sm:$0xff] %v9551_v25  ;;  %v9553_v56 = vpop.f32.mrb[154].mxu0  ;;  %v9563_v25 = vpack.c.bf16 %v1470_v4, %v1469_v41  ;;  %v2906_v51 = vsel %vm660_vm0, %v9378_v26, %v2465_v6  ;;  %v1473_v41 = vld [vmem:[#allocation2 + $0x3e7] sm:$0xff]  ;;  %v1474_v4 = vld [vmem:[#allocation2 + $0x3ef] sm:$0xff] }
 0x3a7   :  { %13267 = vst [vmem:[#allocation42_spill] sm:$0xff] %v9553_v56  ;;  %v9557_v30 = vpop.f32.mrb[155].mxu0  ;;  %v2369_v56 = vpop.permute.xlu1 %2368  ;;  %v9575_v26 = vpack.c.bf16 %v1474_v4, %v1473_v41  ;;  %v1477_v41 = vld [vmem:[#allocation2 + $0x427] sm:$0xff]  ;;  %v1478_v4 = vld [vmem:[#allocation2 + $0x42f] sm:$0xff] }
 0x3a8   :  { %13268 = vst [vmem:[#allocation43_spill] sm:$0xff] %v9557_v30  ;;  %v2774_v1 = vsel %vm660_vm0, %v9563_v25, %v2367_v3 }
 0x3a9   :  { %3801 = vmatmul.mubr.bf16.gmra.mrb[136].mxu1 %v2770_v15  ;;  %v1472_v15 = vld [vmem:[#allocation2 + $0x3cf] sm:$0xff]  ;;  %v2467_v30 = vpop.permute.xlu0 %2466 }
 0x3aa   :  { %3808 = vmatprep.mubr.bf16.mxu1 %v2902_v63  ;;  %v9569_v54 = vpack.c.bf16 %v1472_v15, %v1471_v7  ;;  %v2910_v63 = vsel %vm660_vm0, %v9390_v29, %v2467_v30  ;;  %v1476_v7 = vld [vmem:[#allocation2 + $0x40f] sm:$0xff] }
 0x3ab   :  { %v2371_v3 = vpop.permute.xlu1 %2370 }
 0x3ac   :  { %v2778_v8 = vsel %vm660_vm0, %v9569_v54, %v2369_v56  ;;  %v2782_v6 = vsel %vm660_vm0, %v9575_v26, %v2371_v3  ;;  %v1475_v56 = vld [vmem:[#allocation2 + $0x407] sm:$0xff] }
 0x3ad   :  { %v9581_v29 = vpack.c.bf16 %v1476_v7, %v1475_v56  ;;  %v1992_v3 = vld [vmem:[#allocation2 + $0x47] sm:$0xff] }
 0x3af   :  { %v2373_v15 = vpop.permute.xlu1 %2372 }
 0x3b0   :  { %v2786_v30 = vsel %vm660_vm0, %v9581_v29, %v2373_v15  ;;  %v1799_v15 = vld [vmem:[#allocation2 + $0x28] sm:$0xff] }
 0x3b1   :  { %3809 = vmatmul.mubr.bf16.gmra.mrb[140].mxu1 %v2774_v1  ;;  %v2469_v1 = vpop.permute.xlu0 %2468 }
 0x3b2   :  { %3816 = vmatprep.mubr.bf16.mxu1 %v2906_v51  ;;  %v2914_v51 = vsel %vm660_vm0, %v9403_v10, %v2469_v1 }
 0x3b3   :  { %v2375_v10 = vpop.permute.xlu1 %2374 }
 0x3b9   :  { %3817 = vmatmul.mubr.bf16.gmra.mrb[144].mxu1 %v2778_v8  ;;  %v2471_v8 = vpop.permute.xlu0 %2470 }
 0x3ba   :  { %3824 = vmatprep.mubr.bf16.mxu1 %v2910_v63  ;;  %v2918_v63 = vsel %vm660_vm0, %v9415_v38, %v2471_v8  ;;  %v1994_v38 = vld [vmem:[#allocation2 + $0x67] sm:$0xff]  ;;  %v1995_v8 = vld [vmem:[#allocation2 + $0x6f] sm:$0xff] }
 0x3bb   :  { %v2057_v0 = vpack.c.bf16 %v1995_v8, %v1994_v38  ;;  %v1999_v8 = vld [vmem:[#allocation2 + $0xaf] sm:$0xff] }
 0x3bd   :  { %v2601_v1 = vpop.permute.xlu0 %2600 }
 0x3c1   :  { %3825 = vmatmul.mubr.bf16.gmra.mrb[148].mxu1 %v2782_v6  ;;  %v1993_v6 = vld [vmem:[#allocation2 + $0x4f] sm:$0xff]  ;;  %v2603_v48 = vpop.permute.xlu0 %2602 }
 0x3c2   :  { %3832 = vmatprep.mubr.bf16.mxu1 %v2914_v51  ;;  %v9587_v51 = vpack.c.bf16 %v1478_v4, %v1477_v41  ;;  %v2056_v35 = vpack.c.bf16 %v1993_v6, %v1992_v3  ;;  %v3054_v41 = vsel %vm660_vm0, %v2057_v0, %v2603_v48  ;;  %v2150_v4 = vld [vmem:[#allocation2 + $0x468] sm:$0xff]  ;;  %v2151_v3 = vld [vmem:[#allocation2 + $0x470] sm:$0xff] }
 0x3c3   :  { %v1801_v6 = vld [vmem:[#allocation2 + $0x48] sm:$0xff]  ;;  %v1804_v48 = vld [vmem:[#allocation2 + $0x70] sm:$0xff] }
 0x3c4   :  { %v2790_v56 = vsel %vm660_vm0, %v9587_v51, %v2375_v10  ;;  %v3050_v7 = vsel %vm660_vm0, %v2056_v35, %v2601_v1  ;;  %v1802_v10 = vld [vmem:[#allocation2 + $0x50] sm:$0xff]  ;;  %v2183_v35 = vpack.c.bf16 %v2151_v3, %v2150_v4  ;;  %v1996_v1 = vld [vmem:[#allocation2 + $0x87] sm:$0xff] }
 0x3c5   :  { %v2605_v12 = vpop.permute.xlu0 %2604  ;;  %v1803_v0 = vld [vmem:[#allocation2 + $0x68] sm:$0xff] }
 0x3c6   :  { %2662 = vrot.lane.b32.xlu0 %v2183_v35, %s7291_s20  ;;  %v1865_v4 = vpack.c.bf16 %v1804_v48, %v1803_v0  ;;  %v1806_v35 = vld [vmem:[#allocation2 + $0x90] sm:$0xff]  ;;  %v1807_v0 = vld [vmem:[#allocation2 + $0xa8] sm:$0xff] }
 0x3c7   :  { %v1808_v48 = vld [vmem:[#allocation2 + $0xb0] sm:$0xff] }
 0x3c9   :  { %3833 = vmatmul.mubr.bf16.gmra.mrb[152].mxu1 %v2786_v30  ;;  %v1800_v30 = vld [vmem:[#allocation2 + $0x30] sm:$0xff] }
 0x3ca   :  { %3840 = vmatprep.mubr.bf16.mxu1 %v2918_v63  ;;  %v2505_v63 = vpop.permute.xlu1 %2504  ;;  %v1863_v62 = vpack.c.bf16 %v1800_v30, %v1799_v15  ;;  %v1864_v15 = vpack.c.bf16 %v1802_v10, %v1801_v6  ;;  %v1805_v10 = vld [vmem:[#allocation2 + $0x88] sm:$0xff] }
 0x3cc   :  { %v2922_v50 = vsel %vm660_vm0, %v1863_v62, %v2505_v63  ;;  %v1998_v62 = vld [vmem:[#allocation2 + $0xa7] sm:$0xff] }
 0x3cd   :  { %v2059_v3 = vpack.c.bf16 %v1999_v8, %v1998_v62  ;;  %v2003_v62 = vld [vmem:[#allocation2 + $0xef] sm:$0xff] }
 0x3d1   :  { %3841 = vmatmul.mubr.bf16.gmra.mrb[156].mxu1 %v2790_v56  ;;  %v1997_v56 = vld [vmem:[#allocation2 + $0x8f] sm:$0xff] }
 0x3d2   :  { %3881 = vmatprep.mubr.bf16.mxu1 %v3050_v7  ;;  %v2507_v7 = vpop.permute.xlu1 %2506  ;;  %v2058_v30 = vpack.c.bf16 %v1997_v56, %v1996_v1  ;;  %v2000_v1 = vld [vmem:[#allocation2 + $0xc7] sm:$0xff]  ;;  %v2001_v56 = vld [vmem:[#allocation2 + $0xcf] sm:$0xff] }
 0x3d3   :  { %v2926_v38 = vsel %vm660_vm0, %v1864_v15, %v2507_v7  ;;  %v1866_v15 = vpack.c.bf16 %v1806_v35, %v1805_v10  ;;  %v1809_v10 = vld [vmem:[#allocation2 + $0xc8] sm:$0xff]  ;;  %v1810_v35 = vld [vmem:[#allocation2 + $0xd0] sm:$0xff] }
 0x3d6   :  { %v2509_v63 = vpop.permute.xlu1 %2508 }
 0x3d7   :  { %v2930_v44 = vsel %vm660_vm0, %v1865_v4, %v2509_v63 }
 0x3d9   :  { %3882 = vmatmul.mubr.bf16.vlgmr.msra.gmra.mrb[32].mxu1 %v2922_v50  ;;  %v3058_v50 = vsel %vm660_vm0, %v2058_v30, %v2605_v12  ;;  %v2060_v30 = vpack.c.bf16 %v2001_v56, %v2000_v1  ;;  %v2004_v1 = vld [vmem:[#allocation2 + $0x107] sm:$0xff]  ;;  %v2005_v56 = vld [vmem:[#allocation2 + $0x10f] sm:$0xff] }
 0x3da   :  { %3889 = vmatprep.mubr.bf16.mxu1 %v3054_v41  ;;  %v2607_v41 = vpop.permute.xlu0 %2606  ;;  %v2511_v12 = vpop.permute.xlu1 %2510 }
 0x3db   :  { %v3062_v6 = vsel %vm660_vm0, %v2059_v3, %v2607_v41  ;;  %v1867_v41 = vpack.c.bf16 %v1808_v48, %v1807_v0  ;;  %v1811_v0 = vld [vmem:[#allocation2 + $0xe8] sm:$0xff]  ;;  %v1812_v48 = vld [vmem:[#allocation2 + $0xf0] sm:$0xff] }
 0x3de   :  { %v2609_v7 = vpop.permute.xlu0 %2608  ;;  %v2513_v8 = vpop.permute.xlu1 %2512 }
 0x3df   :  { %v2938_v3 = vsel %vm660_vm0, %v1867_v41, %v2513_v8  ;;  %v1869_v41 = vpack.c.bf16 %v1812_v48, %v1811_v0  ;;  %v1815_v0 = vld [vmem:[#allocation2 + $0x128] sm:$0xff]  ;;  %v1816_v48 = vld [vmem:[#allocation2 + $0x130] sm:$0xff] }
 0x3e1   :  { %3890 = vmatmul.mubr.bf16.gmra.mrb[36].mxu1 %v2926_v38  ;;  %v2934_v38 = vsel %vm660_vm0, %v1866_v15, %v2511_v12  ;;  %v1868_v15 = vpack.c.bf16 %v1810_v35, %v1809_v10  ;;  %v1813_v10 = vld [vmem:[#allocation2 + $0x108] sm:$0xff]  ;;  %v1814_v35 = vld [vmem:[#allocation2 + $0x110] sm:$0xff] }
 0x3e2   :  { %3897 = vmatprep.mubr.bf16.mxu1 %v3058_v50  ;;  %v3066_v50 = vsel %vm660_vm0, %v2060_v30, %v2609_v7  ;;  %v2611_v63 = vpop.permute.xlu0 %2610  ;;  %v2515_v12 = vpop.permute.xlu1 %2514  ;;  %v2062_v30 = vpack.c.bf16 %v2005_v56, %v2004_v1  ;;  %v2008_v1 = vld [vmem:[#allocation2 + $0x147] sm:$0xff]  ;;  %v2009_v56 = vld [vmem:[#allocation2 + $0x14f] sm:$0xff] }
 0x3e6   :  { %v2613_v7 = vpop.permute.xlu0 %2612  ;;  %v2517_v8 = vpop.permute.xlu1 %2516 }
 0x3e9   :  { %3898 = vmatmul.mubr.bf16.gmra.mrb[40].mxu1 %v2930_v44  ;;  %v2002_v44 = vld [vmem:[#allocation2 + $0xe7] sm:$0xff] }
 0x3ea   :  { %3905 = vmatprep.mubr.bf16.mxu1 %v3062_v6  ;;  %v2061_v4 = vpack.c.bf16 %v2003_v62, %v2002_v44  ;;  %v2006_v44 = vld [vmem:[#allocation2 + $0x127] sm:$0xff]  ;;  %v2007_v62 = vld [vmem:[#allocation2 + $0x12f] sm:$0xff] }
 0x3ec   :  { %v3070_v6 = vsel %vm660_vm0, %v2061_v4, %v2611_v63  ;;  %v2615_v63 = vpop.permute.xlu0 %2614  ;;  %v2063_v4 = vpack.c.bf16 %v2007_v62, %v2006_v44  ;;  %v2010_v44 = vld [vmem:[#allocation2 + $0x167] sm:$0xff]  ;;  %v2011_v62 = vld [vmem:[#allocation2 + $0x16f] sm:$0xff] }
 0x3f1   :  { %3906 = vmatmul.mubr.bf16.gmra.mrb[44].mxu1 %v2934_v38  ;;  %v2942_v38 = vsel %vm660_vm0, %v1868_v15, %v2515_v12  ;;  %v2519_v12 = vpop.permute.xlu1 %2518  ;;  %v1870_v15 = vpack.c.bf16 %v1814_v35, %v1813_v10  ;;  %v1817_v10 = vld [vmem:[#allocation2 + $0x148] sm:$0xff]  ;;  %v1818_v35 = vld [vmem:[#allocation2 + $0x150] sm:$0xff] }
 0x3f2   :  { %3913 = vmatprep.mubr.bf16.mxu1 %v3066_v50  ;;  %v3074_v50 = vsel %vm660_vm0, %v2062_v30, %v2613_v7  ;;  %v2617_v7 = vpop.permute.xlu0 %2616  ;;  %v2064_v30 = vpack.c.bf16 %v2009_v56, %v2008_v1  ;;  %v2012_v1 = vld [vmem:[#allocation2 + $0x187] sm:$0xff]  ;;  %v2013_v56 = vld [vmem:[#allocation2 + $0x18f] sm:$0xff] }
 0x3f9   :  { %3914 = vmatmul.mubr.bf16.gmra.mrb[48].mxu1 %v2938_v3  ;;  %v2946_v3 = vsel %vm660_vm0, %v1869_v41, %v2517_v8  ;;  %v2521_v8 = vpop.permute.xlu1 %2520  ;;  %v1871_v41 = vpack.c.bf16 %v1816_v48, %v1815_v0  ;;  %v1819_v0 = vld [vmem:[#allocation2 + $0x168] sm:$0xff]  ;;  %v1820_v48 = vld [vmem:[#allocation2 + $0x170] sm:$0xff] }
 0x3fa   :  { %3921 = vmatprep.mubr.bf16.mxu1 %v3070_v6  ;;  %v3078_v6 = vsel %vm660_vm0, %v2063_v4, %v2615_v63  ;;  %v2619_v63 = vpop.permute.xlu0 %2618  ;;  %v2065_v4 = vpack.c.bf16 %v2011_v62, %v2010_v44  ;;  %v2014_v44 = vld [vmem:[#allocation2 + $0x1a7] sm:$0xff]  ;;  %v2015_v62 = vld [vmem:[#allocation2 + $0x1af] sm:$0xff] }
 0x401   :  { %3922 = vmatmul.mubr.bf16.gmra.mrb[52].mxu1 %v2942_v38  ;;  %v2950_v38 = vsel %vm660_vm0, %v1870_v15, %v2519_v12  ;;  %v2523_v12 = vpop.permute.xlu1 %2522  ;;  %v1872_v15 = vpack.c.bf16 %v1818_v35, %v1817_v10  ;;  %v1821_v10 = vld [vmem:[#allocation2 + $0x188] sm:$0xff]  ;;  %v1822_v35 = vld [vmem:[#allocation2 + $0x190] sm:$0xff] }
 0x402   :  { %3929 = vmatprep.mubr.bf16.mxu1 %v3074_v50  ;;  %v3082_v50 = vsel %vm660_vm0, %v2064_v30, %v2617_v7  ;;  %v2621_v7 = vpop.permute.xlu0 %2620  ;;  %v2066_v30 = vpack.c.bf16 %v2013_v56, %v2012_v1 }
 0x409   :  { %3930 = vmatmul.mubr.bf16.gmra.mrb[56].mxu1 %v2946_v3  ;;  %v2954_v3 = vsel %vm660_vm0, %v1871_v41, %v2521_v8  ;;  %v2525_v8 = vpop.permute.xlu1 %2524  ;;  %v1873_v41 = vpack.c.bf16 %v1820_v48, %v1819_v0 }
 0x40a   :  { %3937 = vmatprep.mubr.bf16.mxu1 %v3078_v6  ;;  %v3086_v6 = vsel %vm660_vm0, %v2065_v4, %v2619_v63  ;;  %v2623_v63 = vpop.permute.xlu0 %2622  ;;  %v2067_v4 = vpack.c.bf16 %v2015_v62, %v2014_v44 }
 0x40d   :  { %v2527_v1 = vpop.permute.xlu1 %2526 }
 0x40e   :  { %v2625_v56 = vpop.permute.xlu0 %2624 }
 0x411   :  { %3938 = vmatmul.mubr.bf16.gmra.mrb[60].mxu1 %v2950_v38  ;;  %v2958_v38 = vsel %vm660_vm0, %v1872_v15, %v2523_v12  ;;  %v1874_v12 = vpack.c.bf16 %v1822_v35, %v1821_v10  ;;  %v3098_v15 = vsel %vm660_vm0, %v9363_v20, %v2625_v56  ;;  %v2023_v56 = vld [vmem:[#allocation2 + $0x22f] sm:$0xff] }
 0x412   :  { %3945 = vmatprep.mubr.bf16.mxu1 %v3082_v50  ;;  %v3090_v50 = vsel %vm660_vm0, %v2066_v30, %v2621_v7  ;;  %v1823_v30 = vld [vmem:[#allocation2 + $0x1a8] sm:$0xff]  ;;  %v2627_v0 = vpop.permute.xlu0 %2626 }
 0x413   :  { %v2966_v7 = vsel %vm660_vm0, %v1874_v12, %v2527_v1  ;;  %v3102_v62 = vsel %vm660_vm0, %v9392_v49, %v2627_v0  ;;  %v2022_v1 = vld [vmem:[#allocation2 + $0x227] sm:$0xff] }
 0x414   :  { %v2071_v49 = vpack.c.bf16 %v2023_v56, %v2022_v1  ;;  %v1832_v1 = vld [vmem:[#allocation2 + $0x270] sm:$0xff] }
 0x419   :  { %3946 = vmatmul.mubr.bf16.gmra.mrb[64].mxu1 %v2954_v3  ;;  %v2962_v3 = vsel %vm660_vm0, %v1873_v41, %v2525_v8  ;;  %v1825_v8 = vld [vmem:[#allocation2 + $0x1c8] sm:$0xff] }
 0x41a   :  { %3953 = vmatprep.mubr.bf16.mxu1 %v3086_v6  ;;  %v3094_v6 = vsel %vm660_vm0, %v2067_v4, %v2623_v63  ;;  %v1826_v63 = vld [vmem:[#allocation2 + $0x1d0] sm:$0xff]  ;;  %v2020_v41 = vld [vmem:[#allocation2 + $0x207] sm:$0xff] }
 0x41b   :  { %v2021_v4 = vld [vmem:[#allocation2 + $0x20f] sm:$0xff]  ;;  %v1876_v20 = vpack.c.bf16 %v1826_v63, %v1825_v8 }
 0x41c   :  { %v2070_v10 = vpack.c.bf16 %v2021_v4, %v2020_v41  ;;  %v2246_v8 = vld [vmem:[#allocation2 + $0x469] sm:$0xff]  ;;  %v2247_v63 = vld [vmem:[#allocation2 + $0x471] sm:$0xff] }
 0x41d   :  { %v2279_v4 = vpack.c.bf16 %v2247_v63, %v2246_v8  ;;  %v1836_v8 = vld [vmem:[#allocation2 + $0x2b0] sm:$0xff] }
 0x41f   :  { %6867 = vmatmul.mubr.msk.bf16.gmra.mrb[156].mxu0 %vm660_vm0, %v2279_v4 }
 0x420   :  { %5180 = vmatprep.mubr.bf16.mxu0 %v13170_v59 }
 0x421   :  { %3954 = vmatmul.mubr.bf16.gmra.mrb[68].mxu1 %v2958_v38  ;;  %v1824_v38 = vld [vmem:[#allocation2 + $0x1b0] sm:$0xff] }
 0x422   :  { %3961 = vmatprep.mubr.bf16.mxu1 %v3090_v50  ;;  %v2529_v50 = vpop.permute.xlu1 %2528  ;;  %v1875_v48 = vpack.c.bf16 %v1824_v38, %v1823_v30 }
 0x424   :  { %v2970_v44 = vsel %vm660_vm0, %v1875_v48, %v2529_v50 }
 0x429   :  { %3962 = vmatmul.mubr.bf16.gmra.mrb[72].mxu1 %v2962_v3  ;;  %v2531_v3 = vpop.permute.xlu1 %2530 }
 0x42a   :  { %3969 = vmatprep.mubr.bf16.mxu1 %v3094_v6  ;;  %v2629_v6 = vpop.permute.xlu0 %2628  ;;  %v2974_v35 = vsel %vm660_vm0, %v1876_v20, %v2531_v3 }
 0x42b   :  { %v3106_v12 = vsel %vm660_vm0, %v2070_v10, %v2629_v6 }
 0x42d   :  { %v2533_v30 = vpop.permute.xlu1 %2532 }
 0x42e   :  { %v2631_v38 = vpop.permute.xlu0 %2630 }
 0x42f   :  { %v3110_v0 = vsel %vm660_vm0, %v2071_v49, %v2631_v38  ;;  %v1834_v38 = vld [vmem:[#allocation2 + $0x290] sm:$0xff] }
 0x431   :  { %3970 = vmatmul.mubr.bf16.gmra.mrb[76].mxu1 %v2966_v7  ;;  %v1827_v7 = vld [vmem:[#allocation2 + $0x1e8] sm:$0xff]  ;;  %v2535_v41 = vpop.permute.xlu1 %2534 }
 0x432   :  { %3977 = vmatprep.mubr.bf16.mxu1 %v3098_v15  ;;  %v1828_v15 = vld [vmem:[#allocation2 + $0x1f0] sm:$0xff]  ;;  %v2633_v3 = vpop.permute.xlu0 %2632 }
 0x433   :  { %v1877_v50 = vpack.c.bf16 %v1828_v15, %v1827_v7  ;;  %v3114_v10 = vsel %vm660_vm0, %v9443_v36, %v2633_v3 }
 0x435   :  { %v2978_v48 = vsel %vm660_vm0, %v1877_v50, %v2533_v30  ;;  %v2537_v56 = vpop.permute.xlu1 %2536  ;;  %v1833_v30 = vld [vmem:[#allocation2 + $0x288] sm:$0xff] }
 0x439   :  { %3978 = vmatmul.mubr.bf16.gmra.mrb[80].mxu1 %v2970_v44  ;;  %v1829_v44 = vld [vmem:[#allocation2 + $0x208] sm:$0xff]  ;;  %v2539_v50 = vpop.permute.xlu1 %2538 }
 0x43a   :  { %3985 = vmatprep.mubr.bf16.mxu1 %v3102_v62  ;;  %v1830_v62 = vld [vmem:[#allocation2 + $0x210] sm:$0xff] }
 0x43b   :  { %v1878_v6 = vpack.c.bf16 %v1830_v62, %v1829_v44  ;;  %v1835_v62 = vld [vmem:[#allocation2 + $0x2a8] sm:$0xff] }
 0x43c   :  { %v1881_v4 = vpack.c.bf16 %v1836_v8, %v1835_v62  ;;  %v1843_v8 = vld [vmem:[#allocation2 + $0x328] sm:$0xff] }
 0x43d   :  { %v2982_v20 = vsel %vm660_vm0, %v1878_v6, %v2535_v41  ;;  %v2541_v63 = vpop.permute.xlu1 %2540  ;;  %v1837_v6 = vld [vmem:[#allocation2 + $0x2c8] sm:$0xff] }
 0x441   :  { %3986 = vmatmul.mubr.bf16.gmra.mrb[84].mxu1 %v2974_v35  ;;  %v1831_v35 = vld [vmem:[#allocation2 + $0x268] sm:$0xff] }
 0x442   :  { %3993 = vmatprep.mubr.bf16.mxu1 %v3106_v12  ;;  %v2635_v12 = vpop.permute.xlu0 %2634  ;;  %v1879_v7 = vpack.c.bf16 %v1832_v1, %v1831_v35 }
 0x443   :  { %v3118_v49 = vsel %vm660_vm0, %v9455_v14, %v2635_v12  ;;  %v2994_v14 = vsel %vm660_vm0, %v1881_v4, %v2541_v63  ;;  %v1839_v12 = vld [vmem:[#allocation2 + $0x2e8] sm:$0xff]  ;;  %v1844_v63 = vld [vmem:[#allocation2 + $0x330] sm:$0xff] }
 0x444   :  { %v2986_v15 = vsel %vm660_vm0, %v1879_v7, %v2537_v56  ;;  %v1840_v7 = vld [vmem:[#allocation2 + $0x2f0] sm:$0xff] }
 0x449   :  { %3994 = vmatmul.mubr.bf16.gmra.mrb[88].mxu1 %v2978_v48  ;;  %v1880_v48 = vpack.c.bf16 %v1834_v38, %v1833_v30  ;;  %v1883_v30 = vpack.c.bf16 %v1840_v7, %v1839_v12  ;;  %v1848_v12 = vld [vmem:[#allocation2 + $0x370] sm:$0xff] }
 0x44a   :  { %4001 = vmatprep.mubr.bf16.mxu1 %v3110_v0  ;;  %v2637_v0 = vpop.permute.xlu0 %2636 }
 0x44b   :  { %v2990_v36 = vsel %vm660_vm0, %v1880_v48, %v2539_v50  ;;  %v3122_v44 = vsel %vm660_vm0, %v9471_v2, %v2637_v0  ;;  %v1841_v50 = vld [vmem:[#allocation2 + $0x308] sm:$0xff]  ;;  %v1842_v0 = vld [vmem:[#allocation2 + $0x310] sm:$0xff] }
 0x44e   :  { %v2639_v41 = vpop.permute.xlu0 %2638 }
 0x44f   :  { %v3126_v3 = vsel %vm660_vm0, %v9485_v37, %v2639_v41 }
 0x451   :  { %4002 = vmatmul.mubr.bf16.gmra.mrb[92].mxu1 %v2982_v20  ;;  %v1838_v20 = vld [vmem:[#allocation2 + $0x2d0] sm:$0xff] }
 0x452   :  { %4009 = vmatprep.mubr.bf16.mxu1 %v3114_v10  ;;  %v2543_v10 = vpop.permute.xlu1 %2542  ;;  %v2641_v35 = vpop.permute.xlu0 %2640  ;;  %v1882_v1 = vpack.c.bf16 %v1838_v20, %v1837_v6  ;;  %v1845_v6 = vld [vmem:[#allocation2 + $0x348] sm:$0xff]  ;;  %v1846_v20 = vld [vmem:[#allocation2 + $0x350] sm:$0xff] }
 0x453   :  { %v3130_v56 = vsel %vm660_vm0, %v9499_v55, %v2641_v35 }
 0x454   :  { %v2998_v2 = vsel %vm660_vm0, %v1882_v1, %v2543_v10  ;;  %v1886_v1 = vpack.c.bf16 %v1846_v20, %v1845_v6 }
 0x459   :  { %4010 = vmatmul.mubr.bf16.gmra.mrb[96].mxu1 %v2986_v15  ;;  %v2545_v15 = vpop.permute.xlu1 %2544 }
 0x45a   :  { %4017 = vmatprep.mubr.bf16.mxu1 %v3118_v49  ;;  %v2643_v49 = vpop.permute.xlu0 %2642  ;;  %v3002_v37 = vsel %vm660_vm0, %v1883_v30, %v2545_v15 }
 0x45b   :  { %v3134_v38 = vsel %vm660_vm0, %v9513_v42, %v2643_v49 }
 0x45d   :  { %v2547_v48 = vpop.permute.xlu1 %2546 }
 0x461   :  { %4018 = vmatmul.mubr.bf16.gmra.mrb[100].mxu1 %v2990_v36  ;;  %v2645_v36 = vpop.permute.xlu0 %2644  ;;  %v2549_v41 = vpop.permute.xlu1 %2548 }
 0x462   :  { %4025 = vmatprep.mubr.bf16.mxu1 %v3122_v44  ;;  %v1884_v44 = vpack.c.bf16 %v1842_v0, %v1841_v50  ;;  %v3138_v62 = vsel %vm660_vm0, %v9527_v21, %v2645_v36 }
 0x464   :  { %v3006_v55 = vsel %vm660_vm0, %v1884_v44, %v2547_v48  ;;  %v1851_v44 = vld [vmem:[#allocation2 + $0x3a8] sm:$0xff] }
 0x465   :  { %v2647_v4 = vpop.permute.xlu0 %2646  ;;  %v2551_v10 = vpop.permute.xlu1 %2550 }
 0x466   :  { %v3014_v21 = vsel %vm660_vm0, %v1886_v1, %v2551_v10 }
 0x469   :  { %4026 = vmatmul.mubr.bf16.gmra.mrb[104].mxu1 %v2994_v14  ;;  %v1885_v14 = vpack.c.bf16 %v1844_v63, %v1843_v8  ;;  %v2649_v35 = vpop.permute.xlu0 %2648  ;;  %v2553_v7 = vpop.permute.xlu1 %2552 }
 0x46a   :  { %4033 = vmatprep.mubr.bf16.mxu1 %v3126_v3  ;;  %v3142_v3 = vsel %vm660_vm0, %v9541_v16, %v2647_v4  ;;  %v1853_v4 = vld [vmem:[#allocation2 + $0x3c8] sm:$0xff] }
 0x46b   :  { %v3010_v42 = vsel %vm660_vm0, %v1885_v14, %v2549_v41  ;;  %v1854_v14 = vld [vmem:[#allocation2 + $0x3d0] sm:$0xff] }
 0x46d   :  { %v2651_v15 = vpop.permute.xlu0 %2650  ;;  %v2555_v50 = vpop.permute.xlu1 %2554 }
 0x46e   :  { %v3150_v30 = vsel %vm660_vm0, %v9563_v25, %v2651_v15 }
 0x471   :  { %4034 = vmatmul.mubr.bf16.gmra.mrb[108].mxu1 %v2998_v2  ;;  %v3146_v2 = vsel %vm660_vm0, %v9555_v60, %v2649_v35  ;;  %v2653_v0 = vpop.permute.xlu0 %2652  ;;  %v1890_v35 = vpack.c.bf16 %v1854_v14, %v1853_v4  ;;  %v2054_v14 = vld [vmem:[#allocation2 + $0x467] sm:$0xff] }
 0x472   :  { %4041 = vmatprep.mubr.bf16.mxu1 %v3130_v56  ;;  %v1847_v56 = vld [vmem:[#allocation2 + $0x368] sm:$0xff]  ;;  %v3154_v36 = vsel %vm660_vm0, %v9569_v54, %v2653_v0 }
 0x473   :  { %v1887_v49 = vpack.c.bf16 %v1848_v12, %v1847_v56  ;;  %v1855_v56 = vld [vmem:[#allocation2 + $0x3e8] sm:$0xff]  ;;  %v1856_v12 = vld [vmem:[#allocation2 + $0x3f0] sm:$0xff] }
 0x474   :  { %v1857_v0 = vld [vmem:[#allocation2 + $0x408] sm:$0xff] }
 0x475   :  { %v3018_v16 = vsel %vm660_vm0, %v1887_v49, %v2553_v7  ;;  %v2655_v8 = vpop.permute.xlu0 %2654 }
 0x476   :  { %v3158_v41 = vsel %vm660_vm0, %v9575_v26, %v2655_v8 }
 0x479   :  { %4042 = vmatmul.mubr.bf16.gmra.mrb[112].mxu1 %v3002_v37  ;;  %v1849_v37 = vld [vmem:[#allocation2 + $0x388] sm:$0xff]  ;;  %v2657_v20 = vpop.permute.xlu0 %2656 }
 0x47a   :  { %4049 = vmatprep.mubr.bf16.mxu1 %v3134_v38  ;;  %v1850_v38 = vld [vmem:[#allocation2 + $0x390] sm:$0xff]  ;;  %v3162_v26 = vsel %vm660_vm0, %v9581_v29, %v2657_v20 }
 0x47b   :  { %v1888_v48 = vpack.c.bf16 %v1850_v38, %v1849_v37 }
 0x47d   :  { %v3022_v60 = vsel %vm660_vm0, %v1888_v48, %v2555_v50  ;;  %v1858_v48 = vld [vmem:[#allocation2 + $0x410] sm:$0xff] }
 0x481   :  { %4050 = vmatmul.mubr.bf16.gmra.mrb[116].mxu1 %v3006_v55  ;;  %v1852_v55 = vld [vmem:[#allocation2 + $0x3b0] sm:$0xff] }
 0x482   :  { %4057 = vmatprep.mubr.bf16.mxu1 %v3138_v62  ;;  %v2557_v62 = vpop.permute.xlu1 %2556  ;;  %v1889_v63 = vpack.c.bf16 %v1852_v55, %v1851_v44 }
 0x484   :  { %v3026_v25 = vsel %vm660_vm0, %v1889_v63, %v2557_v62  ;;  %v1892_v63 = vpack.c.bf16 %v1858_v48, %v1857_v0 }
 0x489   :  { %4058 = vmatmul.mubr.bf16.gmra.mrb[120].mxu1 %v3010_v42 }
 0x48a   :  { %4065 = vmatprep.mubr.bf16.mxu1 %v3142_v3  ;;  %v2559_v3 = vpop.permute.xlu1 %2558 }
 0x491   :  { %4066 = vmatmul.mubr.bf16.gmra.mrb[124].mxu1 %v3014_v21 }
 0x492   :  { %4073 = vmatprep.mubr.bf16.mxu1 %v3146_v2  ;;  %v3030_v2 = vsel %vm660_vm0, %v1890_v35, %v2559_v3 }
 0x499   :  { %4074 = vmatmul.mubr.bf16.gmra.mrb[128].mxu1 %v3018_v16  ;;  %v2659_v16 = vpop.permute.xlu0 %2658 }
 0x49a   :  { %4081 = vmatprep.mubr.bf16.mxu1 %v3150_v30  ;;  %v3166_v29 = vsel %vm660_vm0, %v9587_v51, %v2659_v16  ;;  %v1861_v16 = vld [vmem:[#allocation2 + $0x448] sm:$0xff] }
 0x4a1   :  { %4082 = vmatmul.mubr.bf16.gmra.mrb[132].mxu1 %v3022_v60 }
 0x4a2   :  { %4089 = vmatprep.mubr.bf16.mxu1 %v3154_v36  ;;  %v2053_v36 = vld [vmem:[#allocation2 + $0x44f] sm:$0xff] }
 0x4a9   :  { %4090 = vmatmul.mubr.bf16.gmra.mrb[136].mxu1 %v3026_v25 }
 0x4aa   :  { %4097 = vmatprep.mubr.bf16.mxu1 %v3158_v41 }
 0x4ac   :  { %v3883_v42 = vpop.f32.mrb[32].mxu1 }
 0x4ad   :  { %v9664_v6 = vadd.f32 %v9307_v53, %v3883_v42  ;;  %v3885_v54 = vpop.f32.mrb[33].mxu1  ;;  %v2561_v53 = vpop.permute.xlu1 %2560  ;;  %v2055_v42 = vld [vmem:[#allocation2 + $0x46f] sm:$0xff] }
 0x4ae   :  { %v3886_v10 = vpop.f32.mrb[34].mxu1  ;;  %v1859_v54 = vld [vmem:[#allocation2 + $0x428] sm:$0xff]  ;;  %v2087_v20 = vpack.c.bf16 %v2055_v42, %v2054_v14 }
 0x4af   :  { %v9667_v1 = vadd.f32 %v9313_v57, %v3886_v10  ;;  %v3888_v21 = vpop.f32.mrb[35].mxu1  ;;  %v1891_v57 = vpack.c.bf16 %v1856_v12, %v1855_v56 }
 0x4b1   :  { %4098 = vmatmul.mubr.bf16.gmra.mrb[140].mxu1 %v3030_v2  ;;  %v3034_v50 = vsel %vm660_vm0, %v1891_v57, %v2561_v53  ;;  %v2563_v44 = vpop.permute.xlu1 %2562 }
 0x4b2   :  { %4105 = vmatprep.mubr.bf16.mxu1 %v3162_v26  ;;  %v3038_v51 = vsel %vm660_vm0, %v1892_v63, %v2563_v44  ;;  %v7092_v63 = vld [vmem:[%s12984_s3 + $0x4] ss:$8 sps:$4 sm:$0xff]  }
 0x4b3   :  { %5148 = vmatprep.subr.bf16.mxu0 %v7092_v63 }
 0x4b4   :  { %v3891_v7 = vpop.f32.mrb[36].mxu1 }
 0x4b5   :  { %v9673_v15 = vadd.f32 %v9303_v23, %v3891_v7  ;;  %v3893_v49 = vpop.f32.mrb[37].mxu1  ;;  %v2052_v23 = vld [vmem:[#allocation2 + $0x447] sm:$0xff]  ;;  %v2565_v21 = vpop.permute.xlu1 %2564 }
 0x4b6   :  { %v3894_v30 = vpop.f32.mrb[38].mxu1  ;;  %v2086_v4 = vpack.c.bf16 %v2053_v36, %v2052_v23 }
 0x4b7   :  { %v9676_v37 = vadd.f32 %v9309_v31, %v3894_v30  ;;  %v3896_v38 = vpop.f32.mrb[39].mxu1  ;;  %v2661_v31 = vpop.permute.xlu0 %2660  ;;  %v1862_v30 = vld [vmem:[#allocation2 + $0x450] sm:$0xff] }
 0x4b8   :  { %v3170_v3 = vsel %vm660_vm0, %v2086_v4, %v2661_v31  ;;  %v1894_v0 = vpack.c.bf16 %v1862_v30, %v1861_v16 }
 0x4b9   :  { %4106 = vmatmul.mubr.bf16.gmra.mrb[144].mxu1 %v3034_v50  ;;  %v2567_v38 = vpop.permute.xlu1 %2566 }
 0x4ba   :  { %4113 = vmatprep.mubr.bf16.mxu1 %v3166_v29 }
 0x4bb   :  { %v2663_v35 = vpop.permute.xlu0 %2662 }
 0x4bc   :  { %v3899_v60 = vpop.f32.mrb[40].mxu1  ;;  %v3174_v53 = vsel %vm660_vm0, %v2087_v20, %v2663_v35 }
 0x4bd   :  { %v9682_v55 = vadd.f32 %v9334_v61, %v3899_v60  ;;  %v3901_v62 = vpop.f32.mrb[41].mxu1  ;;  %v1860_v61 = vld [vmem:[#allocation2 + $0x430] sm:$0xff]  ;;  %v3046_v60 = vsel %vm660_vm0, %v1894_v0, %v2567_v38 }
 0x4be   :  { %v3902_v8 = vpop.f32.mrb[42].mxu1  ;;  %v1893_v56 = vpack.c.bf16 %v1860_v61, %v1859_v54 }
 0x4bf   :  { %v9685_v25 = vadd.f32 %v9340_v40, %v3902_v8  ;;  %v3904_v41 = vpop.f32.mrb[43].mxu1  ;;  %v4565_v0 = vmul.f32 %v9682_v55, %v9682_v55 }
 0x4c0   :  { %v3042_v49 = vsel %vm660_vm0, %v1893_v56, %v2565_v21 }
 0x4c1   :  { %4114 = vmatmul.mubr.bf16.gmra.mrb[148].mxu1 %v3038_v51 }
 0x4c2   :  { %4121 = vmatprep.mubr.bf16.mxu1 %v3170_v3 }
 0x4c4   :  { %v3907_v10 = vpop.f32.mrb[44].mxu1 }
 0x4c5   :  { %v9690_v2 = vadd.f32 %v9329_v43, %v3907_v10  ;;  %v3909_v40 = vpop.f32.mrb[45].mxu1  ;;  %v4562_v10 = vmul.f32 %v9667_v1, %v9667_v1 }
 0x4c6   :  { %v3910_v26 = vpop.f32.mrb[46].mxu1  ;;  %v4561_v40 = vmul.f32 %v9664_v6, %v9664_v6 }
 0x4c7   :  { %v9693_v12 = vadd.f32 %v9336_v33, %v3910_v26  ;;  %v3912_v7 = vpop.f32.mrb[47].mxu1 }
 0x4c8   :  { %v4427_v7 = vsel %vm660_vm0, %v9664_v6, 0.0  ;;  %v4625_v16 = vsel %vm660_vm0, %v4561_v40, 0.0 }
 0x4c9   :  { %4122 = vmatmul.mubr.bf16.gmra.mrb[152].mxu1 %v3042_v49 }
 0x4ca   :  { %4129 = vmatprep.mubr.bf16.mxu1 %v3174_v53  ;;  %v4430_v53 = vsel %vm660_vm0, %v9673_v15, 0.0 }
 0x4cc   :  { %v3915_v57 = vpop.f32.mrb[48].mxu1 }
 0x4cd   :  { %v9698_v43 = vadd.f32 %v9357_v11, %v3915_v57  ;;  %v3917_v50 = vpop.f32.mrb[49].mxu1  ;;  %v4564_v57 = vmul.f32 %v9676_v37, %v9676_v37 }
 0x4ce   :  { %v3918_v29 = vpop.f32.mrb[50].mxu1 }
 0x4cf   :  { %v9701_v33 = vadd.f32 %v9365_v34, %v3918_v29  ;;  %v3920_v48 = vpop.f32.mrb[51].mxu1  ;;  %v7090_v34 = vld [vmem:[%s12984_s3] ss:$8 sps:$4 sm:$0xff]   ;;  %v4432_v29 = vsel %vm660_vm0, %v9676_v37, 0.0 }
 0x4d0   :  { %5149 = vmatpush1.bf16.msra.mxu0 %v7090_v34 }
 0x4d1   :  { %4130 = vmatmul.mubr.bf16.gmra.mrb[156].mxu1 %v3046_v60 }
 0x4d4   :  { %v3923_v23 = vpop.f32.mrb[52].mxu1 }
 0x4d5   :  { %v9705_v36 = vadd.f32 %v9353_v18, %v3923_v23  ;;  %v3925_v44 = vpop.f32.mrb[53].mxu1 }
 0x4d6   :  { %v3926_v62 = vpop.f32.mrb[54].mxu1 }
 0x4d7   :  { %v9708_v31 = vadd.f32 %v9359_v24, %v3926_v62  ;;  %v3928_v11 = vpop.f32.mrb[55].mxu1  ;;  %v4630_v62 = vsel %vm660_vm0, %v4564_v57, 0.0 }
 0x4d8   :  { %v4434_v11 = vsel %vm660_vm0, %v9682_v55, 0.0 }
 0x4dc   :  { %v3931_v8 = vpop.f32.mrb[56].mxu1 }
 0x4dd   :  { %v9717_v41 = vadd.f32 %v9386_v9, %v3931_v8  ;;  %v3933_v18 = vpop.f32.mrb[57].mxu1 }
 0x4de   :  { %v3934_v4 = vpop.f32.mrb[58].mxu1  ;;  %v4632_v18 = vsel %vm660_vm0, %v4565_v0, 0.0  ;;  %v4570_v0 = vmul.f32 %v9701_v33, %v9701_v33 }
 0x4df   :  { %v9720_v51 = vadd.f32 %v9394_v32, %v3934_v4  ;;  %v3936_v24 = vpop.f32.mrb[59].mxu1  ;;  %v4566_v4 = vmul.f32 %v9685_v25, %v9685_v25 }
 0x4e4   :  { %v3939_v14 = vpop.f32.mrb[60].mxu1 }
 0x4e5   :  { %v9723_v42 = vadd.f32 %v9382_v52, %v3939_v14  ;;  %v3941_v3 = vpop.f32.mrb[61].mxu1  ;;  %v4428_v52 = vsel %vm660_vm0, %v9667_v1, 0.0  ;;  %v4436_v14 = vsel %vm660_vm0, %v9685_v25, 0.0 }
 0x4e6   :  { %v3942_v54 = vpop.f32.mrb[62].mxu1  ;;  %v4429_v49 = vadd.f32 %v4428_v52, %v4427_v7  ;;  %v4567_v3 = vmul.f32 %v9690_v2, %v9690_v2  ;;  %v4568_v7 = vmul.f32 %v9693_v12, %v9693_v12 }
 0x4e7   :  { %v9726_v61 = vadd.f32 %v9388_v27, %v3942_v54  ;;  %v3944_v20 = vpop.f32.mrb[63].mxu1  ;;  %v4563_v27 = vmul.f32 %v9673_v15, %v9673_v15 }
 0x4e9   :  { %v4628_v30 = vsel %vm660_vm0, %v4563_v27, 0.0 }
 0x4ec   :  { %v3947_v9 = vpop.f32.mrb[64].mxu1 }
 0x4ed   :  { %v9731_v35 = vadd.f32 %v9411_v58, %v3947_v9  ;;  %v3949_v32 = vpop.f32.mrb[65].mxu1  ;;  %v4626_v58 = vsel %vm660_vm0, %v4562_v10, 0.0  ;;  %v7095_v9 = vld [vmem:[%s12984_s3 + $0x14] ss:$8 sps:$4 sm:$0xff]   ;;  %v4634_v10 = vsel %vm660_vm0, %v4566_v4, 0.0 }
 0x4ee   :  { %v3950_v21 = vpop.f32.mrb[66].mxu1  ;;  %v4627_v38 = vadd.f32 %v4626_v58, %v4625_v16  ;;  %v4438_v32 = vsel %vm660_vm0, %v9690_v2, 0.0  ;;  %5150 = vmatprep.subr.bf16.mxu0 %v7095_v9 }
 0x4ef   :  { %v9740_v26 = vadd.f32 %v9418_v45, %v3950_v21  ;;  %v3952_v56 = vpop.f32.mrb[67].mxu1  ;;  %v4431_v45 = vadd.f32 %v4430_v53, %v4429_v49 }
 0x4f0   :  { %v4629_v23 = vadd.f32 %v4628_v30, %v4627_v38  ;;  %v4636_v56 = vsel %vm660_vm0, %v4567_v3, 0.0  ;;  %v4569_v30 = vmul.f32 %v9698_v43, %v9698_v43  ;;  %v4638_v38 = vsel %vm660_vm0, %v4568_v7, 0.0 }
 0x4f1   :  { %v4433_v63 = vadd.f32 %v4432_v29, %v4431_v45  ;;  %v4442_v45 = vsel %vm660_vm0, %v9698_v43, 0.0  ;;  %v4450_v7 = vsel %vm660_vm0, %v9717_v41, 0.0 }
 0x4f3   :  { %v4435_v24 = vadd.f32 %v4434_v11, %v4433_v63  ;;  %v4571_v63 = vmul.f32 %v9705_v36, %v9705_v36 }
 0x4f4   :  { %v3955_v50 = vpop.f32.mrb[68].mxu1 }
 0x4f5   :  { %v9756_v48 = vadd.f32 %v9407_v17, %v3955_v50  ;;  %v3957_v60 = vpop.f32.mrb[69].mxu1  ;;  %v4631_v17 = vadd.f32 %v4630_v62, %v4629_v23  ;;  %v4437_v52 = vadd.f32 %v4436_v14, %v4435_v24  ;;  %v4642_v24 = vsel %vm660_vm0, %v4570_v0, 0.0 }
 0x4f6   :  { %v3958_v44 = vpop.f32.mrb[70].mxu1  ;;  %v4644_v3 = vsel %vm660_vm0, %v4571_v63, 0.0  ;;  %v13269_v63 = vld [vmem:[#allocation12_spill] sm:$0xff] }
 0x4f7   :  { %v9762_v8 = vadd.f32 %v9413_v47, %v3958_v44  ;;  %v3960_v34 = vpop.f32.mrb[71].mxu1  ;;  %v4633_v54 = vadd.f32 %v4632_v18, %v4631_v17  ;;  %v7093_v47 = vld [vmem:[%s12984_s3 + $0x10] ss:$8 sps:$4 sm:$0xff]   ;;  %v4439_v16 = vadd.f32 %v4438_v32, %v4437_v52 }
 0x4f8   :  { %5151 = vmatpush1.bf16.msra.mxu0 %v7093_v47  ;;  %v4444_v34 = vsel %vm660_vm0, %v9701_v33, 0.0 }
 0x4f9   :  { %v4635_v49 = vadd.f32 %v4634_v10, %v4633_v54  ;;  %v4572_v54 = vmul.f32 %v9708_v31, %v9708_v31  ;;  %v4573_v10 = vmul.f32 %v9717_v41, %v9717_v41 }
 0x4fb   :  { %v4637_v57 = vadd.f32 %v4636_v56, %v4635_v49  ;;  %v4646_v56 = vsel %vm660_vm0, %v4572_v54, 0.0 }
 0x4fc   :  { %v3963_v20 = vpop.f32.mrb[72].mxu1 }
 0x4fd   :  { %v9781_v21 = vadd.f32 %v9428_v28, %v3963_v20  ;;  %v3965_v40 = vpop.f32.mrb[73].mxu1  ;;  %v4440_v28 = vsel %vm660_vm0, %v9693_v12, 0.0  ;;  %v4639_v44 = vadd.f32 %v4638_v38, %v4637_v57  ;;  %v4452_v38 = vsel %vm660_vm0, %v9720_v51, 0.0 }
 0x4fe   :  { %v3966_v27 = vpop.f32.mrb[74].mxu1  ;;  %v4441_v50 = vadd.f32 %v4440_v28, %v4439_v16  ;;  %v4648_v28 = vsel %vm660_vm0, %v4573_v10, 0.0  ;;  %v7098_v10 = vld [vmem:[%s12984_s3 + $0x24] ss:$8 sps:$4 sm:$0xff]  }
 0x4ff   :  { %v9787_v58 = vadd.f32 %v9432_v5, %v3966_v27  ;;  %v3968_v53 = vpop.f32.mrb[75].mxu1  ;;  %v4640_v5 = vsel %vm660_vm0, %v4569_v30, 0.0  ;;  %v4574_v30 = vmul.f32 %v9720_v51, %v9720_v51  ;;  %5152 = vmatprep.subr.bf16.mxu0 %v7098_v10  ;;  %v4466_v10 = vsel %vm660_vm0, %v9781_v21, 0.0 }
 0x500   :  { %v4443_v62 = vadd.f32 %v4442_v45, %v4441_v50  ;;  %v4641_v17 = vadd.f32 %v4640_v5, %v4639_v44  ;;  %v4575_v45 = vmul.f32 %v9723_v42, %v9723_v42  ;;  %v4454_v5 = vsel %vm660_vm0, %v9723_v42, 0.0 }
 0x502   :  { %v4445_v14 = vadd.f32 %v4444_v34, %v4443_v62  ;;  %v4643_v20 = vadd.f32 %v4642_v24, %v4641_v17  ;;  %v4576_v34 = vmul.f32 %v9726_v61, %v9726_v61 }
 0x504   :  { %v3971_v29 = vpop.f32.mrb[76].mxu1  ;;  %v4645_v52 = vadd.f32 %v4644_v3, %v4643_v20  ;;  %v4654_v54 = vsel %vm660_vm0, %v4576_v34, 0.0  ;;  %v4458_v20 = vsel %vm660_vm0, %v9731_v35, 0.0 }
 0x505   :  { %v9800_v60 = vadd.f32 %v9426_v13, %v3971_v29  ;;  %v3973_v23 = vpop.f32.mrb[77].mxu1  ;;  %v4446_v13 = vsel %vm660_vm0, %v9705_v36, 0.0 }
 0x506   :  { %v3974_v11 = vpop.f32.mrb[78].mxu1  ;;  %v4447_v47 = vadd.f32 %v4446_v13, %v4445_v14  ;;  %v4456_v14 = vsel %vm660_vm0, %v9726_v61, 0.0 }
 0x507   :  { %v9807_v18 = vadd.f32 %v9430_v39, %v3974_v11  ;;  %v3976_v4 = vpop.f32.mrb[79].mxu1  ;;  %v4448_v39 = vsel %vm660_vm0, %v9708_v31, 0.0  ;;  %v4652_v11 = vsel %vm660_vm0, %v4575_v45, 0.0 }
 0x508   :  { %v4449_v16 = vadd.f32 %v4448_v39, %v4447_v47  ;;  %v7096_v39 = vld [vmem:[%s12984_s3 + $0x20] ss:$8 sps:$4 sm:$0xff]  }
 0x509   :  { %5153 = vmatpush1.bf16.msra.mxu0 %v7096_v39 }
 0x50a   :  { %v4451_v57 = vadd.f32 %v4450_v7, %v4449_v16 }
 0x50c   :  { %v3979_v9 = vpop.f32.mrb[80].mxu1  ;;  %v4453_v44 = vadd.f32 %v4452_v38, %v4451_v57  ;;  %v13271_v57 = vld [vmem:[#allocation16_spill] sm:$0xff] }
 0x50d   :  { %v9820_v32 = vadd.f32 %v9439_v46, %v3979_v9  ;;  %v3981_v40 = vpop.f32.mrb[81].mxu1  ;;  %v4647_v46 = vadd.f32 %v4646_v56, %v4645_v52  ;;  %v4578_v52 = vmul.f32 %v9740_v26, %v9740_v26 }
 0x50e   :  { %v3982_v27 = vpop.f32.mrb[82].mxu1  ;;  %v4455_v13 = vadd.f32 %v4454_v5, %v4453_v44 }
 0x50f   :  { %v9826_v53 = vadd.f32 %v9445_v19, %v3982_v27  ;;  %v3984_v49 = vpop.f32.mrb[83].mxu1  ;;  %v4649_v50 = vadd.f32 %v4648_v28, %v4647_v46  ;;  %v4650_v19 = vsel %vm660_vm0, %v4574_v30, 0.0  ;;  %v13270_v27 = vld [vmem:[#allocation14_spill] sm:$0xff]  ;;  %v4460_v30 = vsel %vm660_vm0, %v9740_v26, 0.0 }
 0x510   :  { %v4457_v47 = vadd.f32 %v4456_v14, %v4455_v13  ;;  %v4579_v46 = vmul.f32 %v9756_v48, %v9756_v48  ;;  %v4464_v13 = vsel %vm660_vm0, %v9762_v8, 0.0  ;;  %v4581_v14 = vmul.f32 %v9781_v21, %v9781_v21 }
 0x511   :  { %v4651_v24 = vadd.f32 %v4650_v19, %v4649_v50  ;;  %v4462_v19 = vsel %vm660_vm0, %v9756_v48, 0.0 }
 0x512   :  { %v4459_v16 = vadd.f32 %v4458_v20, %v4457_v47  ;;  %v4660_v44 = vsel %vm660_vm0, %v4579_v46, 0.0  ;;  %v4468_v46 = vsel %vm660_vm0, %v9787_v58, 0.0 }
 0x513   :  { %v4653_v3 = vadd.f32 %v4652_v11, %v4651_v24 }
 0x514   :  { %v3987_v29 = vpop.f32.mrb[84].mxu1  ;;  %v4461_v5 = vadd.f32 %v4460_v30, %v4459_v16  ;;  %v4582_v16 = vmul.f32 %v9787_v58, %v9787_v58 }
 0x515   :  { %v9839_v0 = vadd.f32 %v9437_v22, %v3987_v29  ;;  %v3989_v23 = vpop.f32.mrb[85].mxu1  ;;  %v4577_v22 = vmul.f32 %v9731_v35, %v9731_v35  ;;  %v4655_v49 = vadd.f32 %v4654_v54, %v4653_v3  ;;  %v4658_v29 = vsel %vm660_vm0, %v4578_v52, 0.0 }
 0x516   :  { %v3990_v62 = vpop.f32.mrb[86].mxu1  ;;  %v9876_v23 = vpop.f32.mrb[156].mxu0 }
 0x517   :  { %v9845_v4 = vadd.f32 %v13269_v63, %v3990_v62  ;;  %v3992_v17 = vpop.f32.mrb[87].mxu1  ;;  %v4656_v40 = vsel %vm660_vm0, %v4577_v22, 0.0  ;;  %v4580_v62 = vmul.f32 %v9762_v8, %v9762_v8  ;;  %v9881_v11 = vpop.f32.mrb[157].mxu0  ;;  %v4463_v63 = vadd.f32 %v4462_v19, %v4461_v5  ;;  %v13272_v22 = vld [vmem:[#allocation13_spill] sm:$0xff]  ;;  %v13274_v5 = vld [vmem:[#allocation18_spill] sm:$0xff] }
 0x518   :  { %v4657_v50 = vadd.f32 %v4656_v40, %v4655_v49  ;;  %v9883_v24 = vpop.f32.mrb[158].mxu0  ;;  %v13273_v40 = vld [vmem:[#allocation15_spill] sm:$0xff]  ;;  %v4664_v49 = vsel %vm660_vm0, %v4581_v14, 0.0  ;;  %v4470_v19 = vsel %vm660_vm0, %v9800_v60, 0.0  ;;  %v13275_v14 = vld [vmem:[#allocation20_spill] sm:$0xff] }
 0x519   :  { %v9892_v20 = vpop.f32.mrb[159].mxu0  ;;  %v4662_v39 = vsel %vm660_vm0, %v4580_v62, 0.0 }
 0x51a   :  { %v4659_v34 = vadd.f32 %v4658_v29, %v4657_v50  ;;  %v4666_v29 = vsel %vm660_vm0, %v4582_v16, 0.0 }
 0x51c   :  { %v3995_v9 = vpop.f32.mrb[88].mxu1  ;;  %v4661_v47 = vadd.f32 %v4660_v44, %v4659_v34 }
 0x51d   :  { %v9864_v56 = vadd.f32 %v13270_v27, %v3995_v9  ;;  %v3997_v7 = vpop.f32.mrb[89].mxu1 }
 0x51e   :  { %v3998_v28 = vpop.f32.mrb[90].mxu1  ;;  %v4465_v7 = vadd.f32 %v4464_v13, %v4463_v63  ;;  %v4584_v13 = vmul.f32 %v9807_v18, %v9807_v18 }
 0x51f   :  { %v9871_v38 = vadd.f32 %v13271_v57, %v3998_v28  ;;  %v4000_v45 = vpop.f32.mrb[91].mxu1  ;;  %v4663_v28 = vadd.f32 %v4662_v39, %v4661_v47  ;;  %v4583_v57 = vmul.f32 %v9800_v60, %v9800_v60  ;;  %v4472_v39 = vsel %vm660_vm0, %v9807_v18, 0.0 }
 0x520   :  { %v4467_v30 = vadd.f32 %v4466_v10, %v4465_v7  ;;  %v4585_v10 = vmul.f32 %v9820_v32, %v9820_v32  ;;  %v4474_v7 = vsel %vm660_vm0, %v9820_v32, 0.0 }
 0x521   :  { %v4665_v45 = vadd.f32 %v4664_v49, %v4663_v28 }
 0x522   :  { %v4469_v34 = vadd.f32 %v4468_v46, %v4467_v30  ;;  %v4672_v28 = vsel %vm660_vm0, %v4585_v10, 0.0  ;;  %v4586_v30 = vmul.f32 %v9826_v53, %v9826_v53  ;;  %v13276_v46 = vld [vmem:[#allocation17_spill] sm:$0xff] }
 0x523   :  { %v4667_v47 = vadd.f32 %v4666_v29, %v4665_v45 }
 0x524   :  { %v4003_v17 = vpop.f32.mrb[92].mxu1 }
 0x525   :  { %v9890_v3 = vadd.f32 %v13272_v22, %v4003_v17  ;;  %v4005_v54 = vpop.f32.mrb[93].mxu1  ;;  %v4668_v17 = vsel %vm660_vm0, %v4583_v57, 0.0 }
 0x526   :  { %v4006_v9 = vpop.f32.mrb[94].mxu1 }
 0x527   :  { %v9898_v52 = vadd.f32 %v13273_v40, %v4006_v9  ;;  %v4008_v27 = vpop.f32.mrb[95].mxu1  ;;  %v4471_v9 = vadd.f32 %v4470_v19, %v4469_v34  ;;  %v4669_v40 = vadd.f32 %v4668_v17, %v4667_v47  ;;  %v13278_v34 = vld [vmem:[#allocation19_spill] sm:$0xff] }
 0x528   :  { %v4670_v27 = vsel %vm660_vm0, %v4584_v13, 0.0 }
 0x529   :  { %v4473_v49 = vadd.f32 %v4472_v39, %v4471_v9  ;;  %v4588_v39 = vmul.f32 %v9845_v4, %v9845_v4 }
 0x52b   :  { %v4475_v29 = vadd.f32 %v4474_v7, %v4473_v49  ;;  %v4480_v7 = vsel %vm660_vm0, %v9845_v4, 0.0  ;;  %v4589_v49 = vmul.f32 %v9864_v56, %v9864_v56 }
 0x52c   :  { %v4011_v50 = vpop.f32.mrb[96].mxu1 }
 0x52d   :  { %v9911_v44 = vadd.f32 %v13274_v5, %v4011_v50  ;;  %v4013_v62 = vpop.f32.mrb[97].mxu1  ;;  %v4671_v50 = vadd.f32 %v4670_v27, %v4669_v40  ;;  %v4476_v5 = vsel %vm660_vm0, %v9826_v53, 0.0 }
 0x52e   :  { %v4014_v63 = vpop.f32.mrb[98].mxu1  ;;  %v4587_v62 = vmul.f32 %v9839_v0, %v9839_v0  ;;  %v4477_v47 = vadd.f32 %v4476_v5, %v4475_v29  ;;  %v4482_v29 = vsel %vm660_vm0, %v9864_v56, 0.0 }
 0x52f   :  { %v9917_v22 = vadd.f32 %v13275_v14, %v4014_v63  ;;  %v4016_v54 = vpop.f32.mrb[99].mxu1  ;;  %v4673_v13 = vadd.f32 %v4672_v28, %v4671_v50  ;;  %v4674_v14 = vsel %vm660_vm0, %v4586_v30, 0.0  ;;  %v4678_v50 = vsel %vm660_vm0, %v4588_v39, 0.0 }
 0x530   :  { %v4478_v54 = vsel %vm660_vm0, %v9839_v0, 0.0  ;;  %v4676_v9 = vsel %vm660_vm0, %v4587_v62, 0.0 }
 0x531   :  { %v4675_v10 = vadd.f32 %v4674_v14, %v4673_v13  ;;  %v4479_v40 = vadd.f32 %v4478_v54, %v4477_v47  ;;  %v4590_v13 = vmul.f32 %v9871_v38, %v9871_v38  ;;  %v4484_v47 = vsel %vm660_vm0, %v9871_v38, 0.0 }
 0x534   :  { %v4019_v16 = vpop.f32.mrb[100].mxu1 }
 0x535   :  { %v9930_v57 = vadd.f32 %v13276_v46, %v4019_v16  ;;  %v4021_v45 = vpop.f32.mrb[101].mxu1  ;;  %v13280_v16 = vld [vmem:[#allocation22_spill] sm:$0xff]  ;;  %v4677_v46 = vadd.f32 %v4676_v9, %v4675_v10  ;;  %v4591_v9 = vmul.f32 %v9890_v3, %v9890_v3 }
 0x536   :  { %v4022_v19 = vpop.f32.mrb[102].mxu1 }
 0x537   :  { %13277 = vst [vmem:[#allocation12_spill] sm:$0xff] %v9930_v57  ;;  %v9937_v63 = vadd.f32 %v13278_v34, %v4022_v19  ;;  %v4024_v17 = vpop.f32.mrb[103].mxu1  ;;  %v13281_v19 = vld [vmem:[#allocation24_spill] sm:$0xff]  ;;  %v4481_v34 = vadd.f32 %v4480_v7, %v4479_v40  ;;  %v4679_v14 = vadd.f32 %v4678_v50, %v4677_v46  ;;  %v4486_v40 = vsel %vm660_vm0, %v9890_v3, 0.0  ;;  %v13283_v7 = vld [vmem:[#allocation21_spill] sm:$0xff] }
 0x538   :  { %v4680_v17 = vsel %vm660_vm0, %v4589_v49, 0.0  ;;  %v4592_v50 = vmul.f32 %v9898_v52, %v9898_v52 }
 0x539   :  { %13279 = vst [vmem:[#allocation14_spill] sm:$0xff] %v9937_v63  ;;  %v4483_v54 = vadd.f32 %v4482_v29, %v4481_v34  ;;  %v4681_v39 = vadd.f32 %v4680_v17, %v4679_v14  ;;  %v13285_v29 = vld [vmem:[#allocation23_spill] sm:$0xff]  ;;  %v4593_v14 = vmul.f32 %v9911_v44, %v9911_v44 }
 0x53c   :  { %v4027_v27 = vpop.f32.mrb[104].mxu1 }
 0x53d   :  { %v9950_v28 = vadd.f32 %v13280_v16, %v4027_v27  ;;  %v4029_v30 = vpop.f32.mrb[105].mxu1  ;;  %v4682_v27 = vsel %vm660_vm0, %v4590_v13, 0.0  ;;  %v4488_v13 = vsel %vm660_vm0, %v9898_v52, 0.0 }
 0x53e   :  { %v4030_v45 = vpop.f32.mrb[106].mxu1  ;;  %v4485_v30 = vadd.f32 %v4484_v47, %v4483_v54  ;;  %v4683_v34 = vadd.f32 %v4682_v27, %v4681_v39  ;;  %v4686_v54 = vsel %vm660_vm0, %v4592_v50, 0.0  ;;  %v4490_v47 = vsel %vm660_vm0, %v9911_v44, 0.0  ;;  %v13287_v27 = vld [vmem:[#allocation26_spill] sm:$0xff] }
 0x53f   :  { %v9956_v5 = vadd.f32 %v13281_v19, %v4030_v45  ;;  %v4032_v62 = vpop.f32.mrb[107].mxu1  ;;  %v4684_v45 = vsel %vm660_vm0, %v4591_v9, 0.0  ;;  %v4594_v39 = vmul.f32 %v9917_v22, %v9917_v22  ;;  %v4595_v50 = vmul.f32 %v9930_v57, %v9930_v57 }
 0x540   :  { %v4487_v17 = vadd.f32 %v4486_v40, %v4485_v30 }
 0x541   :  { %13282 = vst [vmem:[#allocation16_spill] sm:$0xff] %v9956_v5  ;;  %v4690_v59 = vsel %vm660_vm0, %v4594_v39, 0.0 }
 0x542   :  { %v4489_v9 = vadd.f32 %v4488_v13, %v4487_v17 }
 0x544   :  { %v4035_v10 = vpop.f32.mrb[108].mxu1 }
 0x545   :  { %v9969_v49 = vadd.f32 %v13283_v7, %v4035_v10  ;;  %v4037_v16 = vpop.f32.mrb[109].mxu1  ;;  %v4685_v10 = vadd.f32 %v4684_v45, %v4683_v34  ;;  %v4492_v45 = vsel %vm660_vm0, %v9917_v22, 0.0  ;;  %v13289_v34 = vld [vmem:[#allocation28_spill] sm:$0xff] }
 0x546   :  { %v4038_v46 = vpop.f32.mrb[110].mxu1  ;;  %v4688_v16 = vsel %vm660_vm0, %v4593_v14, 0.0 }
 0x547   :  { %13284 = vst [vmem:[#allocation13_spill] sm:$0xff] %v9969_v49  ;;  %v9975_v19 = vadd.f32 %v13285_v29, %v4038_v46  ;;  %v4040_v62 = vpop.f32.mrb[111].mxu1  ;;  %v4687_v46 = vadd.f32 %v4686_v54, %v4685_v10  ;;  %v4491_v29 = vadd.f32 %v4490_v47, %v4489_v9  ;;  %v4692_v10 = vsel %vm660_vm0, %v4595_v50, 0.0 }
 0x548   :  { %v4596_v54 = vmul.f32 %v9937_v63, %v9937_v63  ;;  %v4498_v50 = vsel %vm660_vm0, %v9950_v28, 0.0 }
 0x549   :  { %13286 = vst [vmem:[#allocation15_spill] sm:$0xff] %v9975_v19  ;;  %v4689_v14 = vadd.f32 %v4688_v16, %v4687_v46  ;;  %v4597_v16 = vmul.f32 %v9950_v28, %v9950_v28  ;;  %v13290_v46 = vld [vmem:[#allocation25_spill] sm:$0xff] }
 0x54b   :  { %v4691_v47 = vadd.f32 %v4690_v59, %v4689_v14  ;;  %v13292_v59 = vld [vmem:[#allocation27_spill] sm:$0xff] }
 0x54c   :  { %v4043_v7 = vpop.f32.mrb[112].mxu1 }
 0x54d   :  { %v9988_v40 = vadd.f32 %v13287_v27, %v4043_v7  ;;  %v4045_v30 = vpop.f32.mrb[113].mxu1  ;;  %v4494_v7 = vsel %vm660_vm0, %v9930_v57, 0.0  ;;  %v4493_v27 = vadd.f32 %v4492_v45, %v4491_v29  ;;  %v4694_v45 = vsel %vm660_vm0, %v4596_v54, 0.0 }
 0x54e   :  { %v4046_v62 = vpop.f32.mrb[114].mxu1  ;;  %v4598_v57 = vmul.f32 %v9956_v5, %v9956_v5  ;;  %v4599_v54 = vmul.f32 %v9969_v49, %v9969_v49 }
 0x54f   :  { %13288 = vst [vmem:[#allocation18_spill] sm:$0xff] %v9988_v40  ;;  %v9995_v17 = vadd.f32 %v13289_v34, %v4046_v62  ;;  %v4048_v13 = vpop.f32.mrb[115].mxu1  ;;  %v4495_v9 = vadd.f32 %v4494_v7, %v4493_v27  ;;  %v4496_v62 = vsel %vm660_vm0, %v9937_v63, 0.0  ;;  %v4696_v63 = vsel %vm660_vm0, %v4597_v16, 0.0 }
 0x550   :  { %v4693_v13 = vadd.f32 %v4692_v10, %v4691_v47  ;;  %v4500_v10 = vsel %vm660_vm0, %v9956_v5, 0.0 }
 0x551   :  { %v4497_v27 = vadd.f32 %v4496_v62, %v4495_v9  ;;  %v4502_v9 = vsel %vm660_vm0, %v9969_v49, 0.0  ;;  %v13294_v62 = vld [vmem:[#allocation30_spill] sm:$0xff]  ;;  %v4504_v49 = vsel %vm660_vm0, %v9975_v19, 0.0 }
 0x554   :  { %v4051_v30 = vpop.f32.mrb[116].mxu1 }
 0x555   :  { %v10008_v39 = vadd.f32 %v13290_v46, %v4051_v30  ;;  %v4053_v34 = vpop.f32.mrb[117].mxu1  ;;  %v4695_v30 = vadd.f32 %v4694_v45, %v4693_v13  ;;  %v4499_v46 = vadd.f32 %v4498_v50, %v4497_v27  ;;  %v4700_v45 = vsel %vm660_vm0, %v4599_v54, 0.0  ;;  %v13295_v27 = vld [vmem:[#allocation9_spill] sm:$0xff] }
 0x556   :  { %v4054_v29 = vpop.f32.mrb[118].mxu1  ;;  %v4600_v50 = vmul.f32 %v9975_v19, %v9975_v19 }
 0x557   :  { %13291 = vst [vmem:[#allocation20_spill] sm:$0xff] %v10008_v39  ;;  %v10014_v14 = vadd.f32 %v13292_v59, %v4054_v29  ;;  %v4056_v7 = vpop.f32.mrb[119].mxu1  ;;  %v4697_v47 = vadd.f32 %v4696_v63, %v4695_v30  ;;  %v4698_v29 = vsel %vm660_vm0, %v4598_v57, 0.0 }
 0x558   :  { %v4501_v7 = vadd.f32 %v4500_v10, %v4499_v46  ;;  %v4702_v46 = vsel %vm660_vm0, %v4600_v50, 0.0  ;;  %v4506_v10 = vsel %vm660_vm0, %v9988_v40, 0.0  ;;  %v4603_v50 = vmul.f32 %v10008_v39, %v10008_v39 }
 0x559   :  { %13293 = vst [vmem:[#allocation17_spill] sm:$0xff] %v10014_v14  ;;  %v4699_v30 = vadd.f32 %v4698_v29, %v4697_v47  ;;  %v4602_v47 = vmul.f32 %v9995_v17, %v9995_v17  ;;  %v13297_v29 = vld [vmem:[#allocation29_spill] sm:$0xff] }
 0x55a   :  { %v4503_v57 = vadd.f32 %v4502_v9, %v4501_v7 }
 0x55c   :  { %v4059_v34 = vpop.f32.mrb[120].mxu1  ;;  %v4505_v54 = vadd.f32 %v4504_v49, %v4503_v57  ;;  %v13299_v49 = vld [vmem:[#allocation31_spill] sm:$0xff] }
 0x55d   :  { %v10027_v16 = vadd.f32 %v13294_v62, %v4059_v34  ;;  %v4061_v59 = vpop.f32.mrb[121].mxu1  ;;  %v4601_v34 = vmul.f32 %v9988_v40, %v9988_v40  ;;  %v4701_v62 = vadd.f32 %v4700_v45, %v4699_v30  ;;  %v4508_v45 = vsel %vm660_vm0, %v9995_v17, 0.0 }
 0x55e   :  { %v4062_v13 = vpop.f32.mrb[122].mxu1  ;;  %v4706_v40 = vsel %vm660_vm0, %v4602_v47, 0.0 }
 0x55f   :  { %v10033_v5 = vadd.f32 %v13295_v27, %v4062_v13  ;;  %v4064_v63 = vpop.f32.mrb[123].mxu1  ;;  %v4704_v13 = vsel %vm660_vm0, %v4601_v34, 0.0  ;;  %v4703_v27 = vadd.f32 %v4702_v46, %v4701_v62  ;;  %v4708_v62 = vsel %vm660_vm0, %v4603_v50, 0.0 }
 0x560   :  { %v4507_v63 = vadd.f32 %v4506_v10, %v4505_v54  ;;  %v4604_v46 = vmul.f32 %v10014_v14, %v10014_v14  ;;  %v4514_v50 = vsel %vm660_vm0, %v10027_v16, 0.0 }
 0x561   :  { %13296 = vst [vmem:[#allocation19_spill] sm:$0xff] %v10033_v5  ;;  %v4705_v34 = vadd.f32 %v4704_v13, %v4703_v27  ;;  %v4605_v13 = vmul.f32 %v10027_v16, %v10027_v16  ;;  %v13301_v27 = vld [vmem:[#allocation11_spill] sm:$0xff] }
 0x563   :  { %v4707_v10 = vadd.f32 %v4706_v40, %v4705_v34  ;;  %v13303_v40 = vld [vmem:[#allocation35_spill] sm:$0xff] }
 0x564   :  { %v4067_v59 = vpop.f32.mrb[124].mxu1 }
 0x565   :  { %v10046_v9 = vadd.f32 %v13297_v29, %v4067_v59  ;;  %v4069_v7 = vpop.f32.mrb[125].mxu1  ;;  %v4510_v59 = vsel %vm660_vm0, %v10008_v39, 0.0  ;;  %v4509_v29 = vadd.f32 %v4508_v45, %v4507_v63  ;;  %v4710_v45 = vsel %vm660_vm0, %v4604_v46, 0.0 }
 0x566   :  { %v4070_v19 = vpop.f32.mrb[126].mxu1  ;;  %v4606_v39 = vmul.f32 %v10033_v5, %v10033_v5 }
 0x567   :  { %13298 = vst [vmem:[#allocation22_spill] sm:$0xff] %v10046_v9  ;;  %v10053_v30 = vadd.f32 %v13299_v49, %v4070_v19  ;;  %v4072_v57 = vpop.f32.mrb[127].mxu1  ;;  %v4511_v54 = vadd.f32 %v4510_v59, %v4509_v29  ;;  %v4512_v19 = vsel %vm660_vm0, %v10014_v14, 0.0  ;;  %v4712_v14 = vsel %vm660_vm0, %v4605_v13, 0.0 }
 0x568   :  { %v4709_v57 = vadd.f32 %v4708_v62, %v4707_v10  ;;  %v4516_v62 = vsel %vm660_vm0, %v10033_v5, 0.0  ;;  %v4607_v46 = vmul.f32 %v10046_v9, %v10046_v9 }
 0x569   :  { %13300 = vst [vmem:[#allocation24_spill] sm:$0xff] %v10053_v30  ;;  %v4513_v29 = vadd.f32 %v4512_v19, %v4511_v54  ;;  %v4518_v54 = vsel %vm660_vm0, %v10046_v9, 0.0  ;;  %v13304_v19 = vld [vmem:[#allocation10_spill] sm:$0xff]  ;;  %v4520_v9 = vsel %vm660_vm0, %v10053_v30, 0.0 }
 0x56c   :  { %v4075_v7 = vpop.f32.mrb[128].mxu1 }
 0x56d   :  { %v10066_v47 = vadd.f32 %v13301_v27, %v4075_v7  ;;  %v4077_v49 = vpop.f32.mrb[129].mxu1  ;;  %v4711_v7 = vadd.f32 %v4710_v45, %v4709_v57  ;;  %v4515_v27 = vadd.f32 %v4514_v50, %v4513_v29  ;;  %v4716_v45 = vsel %vm660_vm0, %v4607_v46, 0.0  ;;  %v13306_v29 = vld [vmem:[#allocation34_spill] sm:$0xff] }
 0x56e   :  { %v4078_v63 = vpop.f32.mrb[130].mxu1  ;;  %v4608_v50 = vmul.f32 %v10053_v30, %v10053_v30 }
 0x56f   :  { %13302 = vst [vmem:[#allocation21_spill] sm:$0xff] %v10066_v47  ;;  %v10072_v34 = vadd.f32 %v13303_v40, %v4078_v63  ;;  %v4080_v59 = vpop.f32.mrb[131].mxu1  ;;  %v4713_v10 = vadd.f32 %v4712_v14, %v4711_v7  ;;  %v4714_v63 = vsel %vm660_vm0, %v4606_v39, 0.0 }
 0x570   :  { %v4517_v59 = vadd.f32 %v4516_v62, %v4515_v27  ;;  %v4718_v27 = vsel %vm660_vm0, %v4608_v50, 0.0  ;;  %v4522_v62 = vsel %vm660_vm0, %v10066_v47, 0.0 }
 0x571   :  { %v4715_v7 = vadd.f32 %v4714_v63, %v4713_v10  ;;  %v4610_v10 = vmul.f32 %v10072_v34, %v10072_v34  ;;  %v13308_v63 = vld [vmem:[#allocation37_spill] sm:$0xff] }
 0x572   :  { %v4519_v39 = vadd.f32 %v4518_v54, %v4517_v59 }
 0x574   :  { %v4083_v49 = vpop.f32.mrb[132].mxu1  ;;  %v4521_v46 = vadd.f32 %v4520_v9, %v4519_v39  ;;  %v13310_v9 = vld [vmem:[#allocation39_spill] sm:$0xff] }
 0x575   :  { %v10085_v13 = vadd.f32 %v13304_v19, %v4083_v49  ;;  %v4085_v40 = vpop.f32.mrb[133].mxu1  ;;  %v4609_v49 = vmul.f32 %v10066_v47, %v10066_v47  ;;  %v4717_v19 = vadd.f32 %v4716_v45, %v4715_v7  ;;  %v4524_v45 = vsel %vm660_vm0, %v10072_v34, 0.0 }
 0x576   :  { %v4086_v57 = vpop.f32.mrb[134].mxu1  ;;  %v4722_v47 = vsel %vm660_vm0, %v4610_v10, 0.0 }
 0x577   :  { %13305 = vst [vmem:[#allocation23_spill] sm:$0xff] %v10085_v13  ;;  %v10091_v5 = vadd.f32 %v13306_v29, %v4086_v57  ;;  %v4088_v14 = vpop.f32.mrb[135].mxu1  ;;  %v4720_v57 = vsel %vm660_vm0, %v4609_v49, 0.0  ;;  %v4719_v29 = vadd.f32 %v4718_v27, %v4717_v19  ;;  %v4611_v50 = vmul.f32 %v10085_v13, %v10085_v13  ;;  %v7099_v19 = vld [vmem:[%s12984_s3 + $0x30] ss:$8 sps:$4 sm:$0xff]  }
 0x578   :  { %v4523_v14 = vadd.f32 %v4522_v62, %v4521_v46  ;;  %v7101_v27 = vld [vmem:[%s12984_s3 + $0x34] ss:$8 sps:$4 sm:$0xff]  }
 0x579   :  { %13307 = vst [vmem:[#allocation26_spill] sm:$0xff] %v10091_v5  ;;  %v4721_v49 = vadd.f32 %v4720_v57, %v4719_v29  ;;  %v4724_v46 = vsel %vm660_vm0, %v4611_v50, 0.0  ;;  %5154 = vmatprep.subr.bf16.mxu0 %v7101_v27 }
 0x57a   :  { %v4525_v62 = vadd.f32 %v4524_v45, %v4523_v14  ;;  %5155 = vmatpush1.bf16.msra.mxu0 %v7099_v19 }
 0x57b   :  { %v4723_v57 = vadd.f32 %v4722_v47, %v4721_v49  ;;  %v13314_v49 = vld [vmem:[#allocation38_spill] sm:$0xff] }
 0x57c   :  { %v4091_v40 = vpop.f32.mrb[136].mxu1 }
 0x57d   :  { %v10104_v54 = vadd.f32 %v13308_v63, %v4091_v40  ;;  %v4093_v59 = vpop.f32.mrb[137].mxu1  ;;  %v4526_v40 = vsel %vm660_vm0, %v10085_v13, 0.0  ;;  %v4725_v45 = vadd.f32 %v4724_v46, %v4723_v57 }
 0x57e   :  { %v4094_v30 = vpop.f32.mrb[138].mxu1  ;;  %v4527_v10 = vadd.f32 %v4526_v40, %v4525_v62  ;;  %v4528_v59 = vsel %vm660_vm0, %v10091_v5, 0.0 }
 0x57f   :  { %13309 = vst [vmem:[#allocation28_spill] sm:$0xff] %v10104_v54  ;;  %v10111_v7 = vadd.f32 %v13310_v9, %v4094_v30  ;;  %v4096_v39 = vpop.f32.mrb[139].mxu1  ;;  %v4612_v30 = vmul.f32 %v10091_v5, %v10091_v5  ;;  %v4613_v29 = vmul.f32 %v10104_v54, %v10104_v54  ;;  %v13312_v9 = vld [vmem:[#allocation36_spill] sm:$0xff]  ;;  %v4530_v47 = vsel %vm660_vm0, %v10104_v54, 0.0 }
 0x580   :  { %v4529_v27 = vadd.f32 %v4528_v59, %v4527_v10  ;;  %v13316_v59 = vld [vmem:[#allocation41_spill] sm:$0xff] }
 0x581   :  { %13311 = vst [vmem:[#allocation25_spill] sm:$0xff] %v10111_v7  ;;  %v4726_v13 = vsel %vm660_vm0, %v4612_v30, 0.0  ;;  %v4728_v62 = vsel %vm660_vm0, %v4613_v29, 0.0  ;;  %v4614_v5 = vmul.f32 %v10111_v7, %v10111_v7  ;;  %v4532_v46 = vsel %vm660_vm0, %v10111_v7, 0.0 }
 0x584   :  { %v4099_v63 = vpop.f32.mrb[140].mxu1 }
 0x585   :  { %v10130_v39 = vadd.f32 %v13312_v9, %v4099_v63  ;;  %v4101_v14 = vpop.f32.mrb[141].mxu1  ;;  %v4727_v63 = vadd.f32 %v4726_v13, %v4725_v45  ;;  %v4531_v9 = vadd.f32 %v4530_v47, %v4529_v27  ;;  %v13318_v27 = vld [vmem:[#allocation43_spill] sm:$0xff] }
 0x586   :  { %v4102_v50 = vpop.f32.mrb[142].mxu1 }
 0x587   :  { %13313 = vst [vmem:[#allocation27_spill] sm:$0xff] %v10130_v39  ;;  %v10136_v40 = vadd.f32 %v13314_v49, %v4102_v50  ;;  %v4104_v19 = vpop.f32.mrb[143].mxu1  ;;  %v4615_v30 = vmul.f32 %v10130_v39, %v10130_v39  ;;  %v4729_v57 = vadd.f32 %v4728_v62, %v4727_v63  ;;  %v4730_v50 = vsel %vm660_vm0, %v4614_v5, 0.0 }
 0x588   :  { %v4534_v10 = vsel %vm660_vm0, %v10130_v39, 0.0  ;;  %v4533_v19 = vadd.f32 %v4532_v46, %v4531_v9 }
 0x589   :  { %13315 = vst [vmem:[#allocation30_spill] sm:$0xff] %v10136_v40  ;;  %v4732_v45 = vsel %vm660_vm0, %v4615_v30, 0.0  ;;  %v4616_v47 = vmul.f32 %v10136_v40, %v10136_v40  ;;  %v4731_v63 = vadd.f32 %v4730_v50, %v4729_v57  ;;  %v4536_v39 = vsel %vm660_vm0, %v10136_v40, 0.0  ;;  %v13320_v50 = vld [vmem:[#allocation40_spill] sm:$0xff] }
 0x58a   :  { %v4535_v5 = vadd.f32 %v4534_v10, %v4533_v19 }
 0x58b   :  { %v4734_v9 = vsel %vm660_vm0, %v4616_v47, 0.0 }
 0x58c   :  { %v4107_v14 = vpop.f32.mrb[144].mxu1  ;;  %v4537_v30 = vadd.f32 %v4536_v39, %v4535_v5  ;;  %v13322_v39 = vld [vmem:[#allocation42_spill] sm:$0xff] }
 0x58d   :  { %v10149_v29 = vadd.f32 %v13316_v59, %v4107_v14  ;;  %v4109_v49 = vpop.f32.mrb[145].mxu1  ;;  %v4733_v59 = vadd.f32 %v4732_v45, %v4731_v63 }
 0x58e   :  { %v4110_v13 = vpop.f32.mrb[146].mxu1 }
 0x58f   :  { %13317 = vst [vmem:[#allocation9_spill] sm:$0xff] %v10149_v29  ;;  %v10155_v7 = vadd.f32 %v13318_v27, %v4110_v13  ;;  %v4112_v62 = vpop.f32.mrb[147].mxu1  ;;  %v4617_v14 = vmul.f32 %v10149_v29, %v10149_v29  ;;  %v4538_v46 = vsel %vm660_vm0, %v10149_v29, 0.0  ;;  %v4735_v27 = vadd.f32 %v4734_v9, %v4733_v59 }
 0x590   :  { %v4539_v62 = vadd.f32 %v4538_v46, %v4537_v30 }
 0x591   :  { %13319 = vst [vmem:[#allocation29_spill] sm:$0xff] %v10155_v7  ;;  %v4736_v13 = vsel %vm660_vm0, %v4617_v14, 0.0  ;;  %v4618_v57 = vmul.f32 %v10155_v7, %v10155_v7  ;;  %v4540_v45 = vsel %vm660_vm0, %v10155_v7, 0.0 }
 0x592   :  { %v4737_v14 = vadd.f32 %v4736_v13, %v4735_v27 }
 0x593   :  { %v4738_v29 = vsel %vm660_vm0, %v4618_v57, 0.0 }
 0x594   :  { %v4115_v49 = vpop.f32.mrb[148].mxu1  ;;  %v4739_v46 = vadd.f32 %v4738_v29, %v4737_v14 }
 0x595   :  { %v10168_v10 = vadd.f32 %v13320_v50, %v4115_v49  ;;  %v4117_v19 = vpop.f32.mrb[149].mxu1  ;;  %v4541_v50 = vadd.f32 %v4540_v45, %v4539_v62 }
 0x596   :  { %v4118_v40 = vpop.f32.mrb[150].mxu1 }
 0x597   :  { %13321 = vst [vmem:[#allocation31_spill] sm:$0xff] %v10168_v10  ;;  %v4619_v47 = vmul.f32 %v10168_v10, %v10168_v10  ;;  %v10175_v63 = vadd.f32 %v13322_v39, %v4118_v40  ;;  %v4120_v5 = vpop.f32.mrb[151].mxu1  ;;  %v4542_v49 = vsel %vm660_vm0, %v10168_v10, 0.0 }
 0x598   :  { %v4543_v30 = vadd.f32 %v4542_v49, %v4541_v50 }
 0x599   :  { %13323 = vst [vmem:[#allocation11_spill] sm:$0xff] %v10175_v63  ;;  %v4740_v59 = vsel %vm660_vm0, %v4619_v47, 0.0  ;;  %v4620_v9 = vmul.f32 %v10175_v63, %v10175_v63  ;;  %v4544_v40 = vsel %vm660_vm0, %v10175_v63, 0.0 }
 0x59a   :  { %v4741_v57 = vadd.f32 %v4740_v59, %v4739_v46  ;;  %v4545_v14 = vadd.f32 %v4544_v40, %v4543_v30 }
 0x59b   :  { %v4742_v5 = vsel %vm660_vm0, %v4620_v9, 0.0 }
 0x59c   :  { %v4123_v19 = vpop.f32.mrb[152].mxu1  ;;  %v4743_v50 = vadd.f32 %v4742_v5, %v4741_v57 }
 0x59d   :  { %v10186_v39 = vadd.f32 %v9881_v11, %v4123_v19  ;;  %v4125_v13 = vpop.f32.mrb[153].mxu1 }
 0x59e   :  { %v4126_v27 = vpop.f32.mrb[154].mxu1 }
 0x59f   :  { %13324 = vst [vmem:[#allocation35_spill] sm:$0xff] %v10186_v39  ;;  %v4546_v62 = vsel %vm660_vm0, %v10186_v39, 0.0  ;;  %v4621_v45 = vmul.f32 %v10186_v39, %v10186_v39  ;;  %v10194_v29 = vadd.f32 %v9892_v20, %v4126_v27  ;;  %v4128_v47 = vpop.f32.mrb[155].mxu1 }
 0x5a0   :  { %v4547_v59 = vadd.f32 %v4546_v62, %v4545_v14 }
 0x5a1   :  { %13325 = vst [vmem:[#allocation10_spill] sm:$0xff] %v10194_v29  ;;  %v4744_v49 = vsel %vm660_vm0, %v4621_v45, 0.0  ;;  %v4622_v11 = vmul.f32 %v10194_v29, %v10194_v29  ;;  %v4548_v9 = vsel %vm660_vm0, %v10194_v29, 0.0 }
 0x5a2   :  { %v4745_v46 = vadd.f32 %v4744_v49, %v4743_v50  ;;  %v4549_v27 = vadd.f32 %v4548_v9, %v4547_v59 }
 0x5a3   :  { %v4746_v13 = vsel %vm660_vm0, %v4622_v11, 0.0 }
 0x5a4   :  { %v4131_v19 = vpop.f32.mrb[156].mxu1  ;;  %v4747_v57 = vadd.f32 %v4746_v13, %v4745_v46 }
 0x5a5   :  { %v4421_v39 = vadd.f32 %v9876_v23, %v4131_v19  ;;  %v4133_v20 = vpop.f32.mrb[157].mxu1 }
 0x5a6   :  { %v4134_v47 = vpop.f32.mrb[158].mxu1 }
 0x5a7   :  { %v4550_v30 = vsel %vm660_vm0, %v4421_v39, 0.0  ;;  %v4623_v40 = vmul.f32 %v4421_v39, %v4421_v39  ;;  %v4424_v45 = vadd.f32 %v9883_v24, %v4134_v47  ;;  %v4136_v63 = vpop.f32.mrb[159].mxu1 }
 0x5a8   :  { %v4551_v5 = vadd.f32 %v4550_v30, %v4549_v27 }
 0x5a9   :  { %v4748_v62 = vsel %vm660_vm0, %v4623_v40, 0.0  ;;  %v4552_v14 = vsel %vm660_vm0, %v4424_v45, 0.0  ;;  %v4624_v49 = vmul.f32 %v4424_v45, %v4424_v45 }
 0x5aa   :  { %v4749_v50 = vadd.f32 %v4748_v62, %v4747_v57  ;;  %v4553_v11 = vadd.f32 %v4552_v14, %v4551_v5  ;;  %v4761_v62 = vld [vmem:[%s12987_s6] sm:$0x1] }
 0x5ab   :  { %v4750_v23 = vsel %vm660_vm0, %v4624_v49, 0.0 }
 0x5ac   :  { %v4554_v19 = vrot.slane %v4553_v11, 4  ;;  %v4751_v59 = vadd.f32 %v4750_v23, %v4749_v50 }
 0x5ae   :  { %v4555_v9 = vadd.f32 %v4554_v19, %v4553_v11  ;;  %v4752_v20 = vrot.slane %v4751_v59, 4 }
 0x5b0   :  { %v4556_v29 = vrot.slane %v4555_v9, 2  ;;  %v4753_v10 = vadd.f32 %v4752_v20, %v4751_v59 }
 0x5b2   :  { %v4557_v7 = vadd.f32 %v4556_v29, %v4555_v9  ;;  %v4754_v24 = vrot.slane %v4753_v10, 2  ;;  %v4835_v29 = vld [vmem:[%s12988_s7] sm:$0x1] }
 0x5b4   :  { %v4558_v63 = vrot.slane %v4557_v7, 1  ;;  %v4755_v46 = vadd.f32 %v4754_v24, %v4753_v10  ;;  %v13326_v10 = vld [vmem:[#allocation33_spill] sm:$0xff] }
 0x5b6   :  { %v4559_v13 = vadd.f32 %v4558_v63, %v4557_v7  ;;  %v4756_v27 = vrot.slane %v4755_v46, 1 }
 0x5b8   :  { %v4560_v47 = vmul.f32 0.001953125, %v4559_v13  ;;  %v4757_v30 = vadd.f32 %v4756_v27, %v4755_v46 }
 0x5ba   :  { %v4758_v40 = vmul.f32 0.001953125, %v4757_v30  ;;  %v4759_v54 = vmul.f32 %v4560_v47, %v4560_v47 }
 0x5bc   :  { %v4760_v57 = vsub.f32 %v4758_v40, %v4759_v54  ;;  %v13335_v40 = vld [vmem:[#allocation12_spill] sm:$0xff] }
 0x5be   :  { %v4762_v5 = vadd.f32 1e-05, %v4760_v57  ;;  %v13336_v57 = vld [vmem:[#allocation14_spill] sm:$0xff] }
 0x5c0   :  { %7104 = vrsqrt.f32 %v4762_v5  ;;  %v13337_v5 = vld [vmem:[#allocation16_spill] sm:$0xff] }
 0x5ca   :  { %v7105_v14 = vpop.eup %7104 }
 0x5cb   :  { %v4764_v49 = vmul.f32 %v7105_v14, %v4761_v62  ;;  %v13338_v62 = vld [vmem:[#allocation13_spill] sm:$0xff]  ;;  %v13339_v14 = vld [vmem:[#allocation15_spill] sm:$0xff] }
 0x5cd   :  { %v10215_v7 = vrot.slane %v4764_v49, %v13326_v10  ;;  %v4836_v50 = vmul.f32 %v4764_v49, %v4560_v47  ;;  %v13340_v49 = vld [vmem:[#allocation18_spill] sm:$0xff] }
 0x5cf   :  { %v4833_v11 = vmul.f32 %v10215_v7, %v4421_v39  ;;  %v4834_v54 = vmul.f32 %v10215_v7, %v4424_v45  ;;  %v4837_v23 = vsub.f32 %v4835_v29, %v4836_v50  ;;  %v10221_v19 = vmul.f32 %v10215_v7, %v9664_v6  ;;  %v13341_v50 = vld [vmem:[#allocation20_spill] sm:$0xff] }
 0x5d0   :  { %v10225_v59 = vmul.f32 %v10215_v7, %v9667_v1  ;;  %v10229_v9 = vmul.f32 %v10215_v7, %v9673_v15  ;;  %v10233_v20 = vmul.f32 %v10215_v7, %v9676_v37  ;;  %v10237_v39 = vmul.f32 %v10215_v7, %v9682_v55 }
 0x5d1   :  { %v10240_v45 = vrot.slane %v4837_v23, %v13326_v10  ;;  %v10244_v6 = vmul.f32 %v10215_v7, %v9685_v25  ;;  %v10248_v1 = vmul.f32 %v10215_v7, %v9690_v2  ;;  %v10252_v15 = vmul.f32 %v10215_v7, %v9693_v12  ;;  %v13350_v10 = vld [vmem:[#allocation25_spill] sm:$0xff] }
 0x5d2   :  { %v10256_v37 = vmul.f32 %v10215_v7, %v9698_v43  ;;  %v10260_v55 = vmul.f32 %v10215_v7, %v9701_v33  ;;  %v10264_v25 = vmul.f32 %v10215_v7, %v9705_v36  ;;  %v10268_v2 = vmul.f32 %v10215_v7, %v9708_v31 }
 0x5d3   :  { %v4906_v24 = vadd.f32 %v10240_v45, %v4833_v11  ;;  %v4907_v12 = vadd.f32 %v10240_v45, %v4834_v54  ;;  %v10274_v43 = vmul.f32 %v10215_v7, %v9717_v41  ;;  %v10278_v33 = vmul.f32 %v10215_v7, %v9720_v51  ;;  %v13342_v54 = vld [vmem:[#allocation17_spill] sm:$0xff] }
 0x5d4   :  { %v10282_v36 = vmul.f32 %v10215_v7, %v9723_v42  ;;  %v10286_v31 = vmul.f32 %v10215_v7, %v9726_v61  ;;  %v10290_v63 = vmul.f32 %v10215_v7, %v9731_v35  ;;  %v10294_v41 = vmul.f32 %v10215_v7, %v9740_v26 }
 0x5d5   :  { %v4970_v46 = vmax.f32 %v4906_v24, 0.0  ;;  %v4971_v13 = vmax.f32 %v4907_v12, 0.0  ;;  %v10298_v51 = vmul.f32 %v10215_v7, %v9756_v48  ;;  %v10302_v42 = vmul.f32 %v10215_v7, %v9762_v8  ;;  %v13343_v24 = vld [vmem:[#allocation19_spill] sm:$0xff] }
 0x5d6   :  { %13327 = vst [vmem:[#allocation34_spill] sm:$0xff] %v10294_v41  ;;  %v10306_v61 = vmul.f32 %v10215_v7, %v9781_v21  ;;  %v10310_v35 = vmul.f32 %v10215_v7, %v9787_v58  ;;  %v10314_v26 = vmul.f32 %v10215_v7, %v9800_v60  ;;  %v10318_v48 = vmul.f32 %v10215_v7, %v9807_v18  ;;  %v13358_v41 = vld [vmem:[#allocation10_spill] sm:$0xff] }
 0x5d7   :  { %13328 = vst [vmem:[#allocation37_spill] sm:$0xff] %v10298_v51  ;;  %13329 = vst [vmem:[#allocation39_spill] sm:$0xff] %v10302_v42  ;;  %v10320_v27 = vpack.c.bf16 %v4971_v13, %v4970_v46  ;;  %v4795_v8 = vmul.f32 %v10215_v7, %v9820_v32  ;;  %v4796_v21 = vmul.f32 %v10215_v7, %v9826_v53  ;;  %v13344_v46 = vld [vmem:[#allocation22_spill] sm:$0xff]  ;;  %v13356_v42 = vld [vmem:[#allocation11_spill] sm:$0xff] }
 0x5d8   :  { %13330 = vst [vmem:[#allocation36_spill] sm:$0xff] %v10306_v61  ;;  %13331 = vst [vmem:[#allocation38_spill] sm:$0xff] %v10310_v35  ;;  %v4797_v58 = vmul.f32 %v10215_v7, %v9839_v0  ;;  %v4798_v47 = vmul.f32 %v10215_v7, %v9845_v4  ;;  %v4799_v60 = vmul.f32 %v10215_v7, %v9864_v56  ;;  %v13354_v35 = vld [vmem:[#allocation29_spill] sm:$0xff]  ;;  %v13355_v61 = vld [vmem:[#allocation31_spill] sm:$0xff] }
 0x5d9   :  { %13332 = vst [vmem:[#allocation41_spill] sm:$0xff] %v10314_v26  ;;  %13333 = vst [vmem:[#allocation43_spill] sm:$0xff] %v10318_v48  ;;  %v4800_v18 = vmul.f32 %v10215_v7, %v9871_v38  ;;  %v4801_v30 = vmul.f32 %v10215_v7, %v9890_v3  ;;  %v4802_v32 = vmul.f32 %v10215_v7, %v9898_v52  ;;  %v13352_v48 = vld [vmem:[#allocation30_spill] sm:$0xff]  ;;  %v13353_v26 = vld [vmem:[#allocation9_spill] sm:$0xff] }
 0x5da   :  { %13334 = vst [vmem:[#allocation40_spill] sm:$0xff] %v10320_v27  ;;  %v4803_v53 = vmul.f32 %v10215_v7, %v9911_v44  ;;  %v4804_v0 = vmul.f32 %v10215_v7, %v9917_v22  ;;  %v4805_v4 = vmul.f32 %v10215_v7, %v13335_v40  ;;  %v4806_v56 = vmul.f32 %v10215_v7, %v13336_v57  ;;  %v13345_v40 = vld [vmem:[#allocation24_spill] sm:$0xff]  ;;  %v13351_v27 = vld [vmem:[#allocation27_spill] sm:$0xff] }
 0x5db   :  { %v4807_v38 = vmul.f32 %v10215_v7, %v9950_v28  ;;  %v4808_v3 = vmul.f32 %v10215_v7, %v13337_v5  ;;  %v4809_v52 = vmul.f32 %v10215_v7, %v13338_v62  ;;  %v4810_v44 = vmul.f32 %v10215_v7, %v13339_v14  ;;  %v13346_v5 = vld [vmem:[#allocation21_spill] sm:$0xff]  ;;  %v13347_v14 = vld [vmem:[#allocation23_spill] sm:$0xff] }
 0x5dc   :  { %v4811_v22 = vmul.f32 %v10215_v7, %v13340_v49  ;;  %v4812_v29 = vmul.f32 %v10215_v7, %v9995_v17  ;;  %v4813_v11 = vmul.f32 %v10215_v7, %v13341_v50  ;;  %v4814_v28 = vmul.f32 %v10215_v7, %v13342_v54  ;;  %v13348_v50 = vld [vmem:[#allocation26_spill] sm:$0xff]  ;;  %v13349_v54 = vld [vmem:[#allocation28_spill] sm:$0xff]  ;;  %v13357_v51 = vld [vmem:[#allocation35_spill] sm:$0xff] }
 0x5dd   :  { %v4815_v23 = vmul.f32 %v10215_v7, %v10027_v16  ;;  %v4816_v12 = vmul.f32 %v10215_v7, %v13343_v24  ;;  %v4817_v13 = vmul.f32 %v10215_v7, %v13344_v46  ;;  %v4818_v57 = vmul.f32 %v10215_v7, %v13345_v40 }
 0x5de   :  { %v4819_v17 = vmul.f32 %v10215_v7, %v13346_v5  ;;  %v4820_v62 = vmul.f32 %v10215_v7, %v10072_v34  ;;  %v4821_v49 = vmul.f32 %v10215_v7, %v13347_v14  ;;  %v4822_v16 = vmul.f32 %v10215_v7, %v13348_v50 }
 0x5df   :  { %v4823_v24 = vmul.f32 %v10215_v7, %v13349_v54  ;;  %v4824_v46 = vmul.f32 %v10215_v7, %v13350_v10  ;;  %v4825_v40 = vmul.f32 %v10215_v7, %v13351_v27  ;;  %v4826_v5 = vmul.f32 %v10215_v7, %v13352_v48 }
 0x5e0   :  { %v4827_v34 = vmul.f32 %v10215_v7, %v13353_v26  ;;  %v4828_v14 = vmul.f32 %v10215_v7, %v13354_v35  ;;  %v4829_v50 = vmul.f32 %v10215_v7, %v13355_v61  ;;  %v4830_v54 = vmul.f32 %v10215_v7, %v13356_v42  ;;  %v13372_v35 = vld [vmem:[#allocation39_spill] sm:$0xff] }
 0x5e1   :  { %v4831_v10 = vmul.f32 %v10215_v7, %v13357_v51  ;;  %v4832_v27 = vmul.f32 %v10215_v7, %v13358_v41  ;;  %v10400_v48 = vadd.f32 %v10240_v45, %v10221_v19  ;;  %v10404_v26 = vadd.f32 %v10240_v45, %v10225_v59  ;;  %v13370_v41 = vld [vmem:[#allocation37_spill] sm:$0xff] }
 0x5e2   :  { %v10408_v61 = vadd.f32 %v10240_v45, %v10229_v9  ;;  %v10412_v42 = vadd.f32 %v10240_v45, %v10233_v20  ;;  %v10416_v51 = vadd.f32 %v10240_v45, %v10237_v39  ;;  %v10420_v7 = vadd.f32 %v10240_v45, %v10244_v6 }
 0x5e3   :  { %v10424_v19 = vadd.f32 %v10240_v45, %v10248_v1  ;;  %v10428_v59 = vadd.f32 %v10240_v45, %v10252_v15  ;;  %v10432_v9 = vadd.f32 %v10240_v45, %v10256_v37  ;;  %v10436_v20 = vadd.f32 %v10240_v45, %v10260_v55 }
 0x5e4   :  { %13359 = vst [vmem:[#allocation42_spill] sm:$0xff] %v10416_v51  ;;  %13360 = vst [vmem:[#allocation12_spill] sm:$0xff] %v10420_v7  ;;  %v10440_v39 = vadd.f32 %v10240_v45, %v10264_v25  ;;  %v10444_v6 = vadd.f32 %v10240_v45, %v10268_v2  ;;  %v10448_v1 = vadd.f32 %v10240_v45, %v10274_v43  ;;  %v13368_v2 = vld [vmem:[#allocation34_spill] sm:$0xff] }
 0x5e5   :  { %13361 = vst [vmem:[#allocation14_spill] sm:$0xff] %v10424_v19  ;;  %13362 = vst [vmem:[#allocation16_spill] sm:$0xff] %v10428_v59  ;;  %v10452_v15 = vadd.f32 %v10240_v45, %v10278_v33  ;;  %v10456_v37 = vadd.f32 %v10240_v45, %v10282_v36  ;;  %v10460_v55 = vadd.f32 %v10240_v45, %v10286_v31 }
 0x5e6   :  { %13363 = vst [vmem:[#allocation13_spill] sm:$0xff] %v10440_v39  ;;  %v10464_v25 = vadd.f32 %v10240_v45, %v10290_v63  ;;  %v10468_v43 = vadd.f32 %v10240_v45, %v13368_v2  ;;  %v10472_v33 = vadd.f32 %v10240_v45, %v13370_v41  ;;  %v10476_v36 = vadd.f32 %v10240_v45, %v13372_v35 }
 0x5e7   :  { %13364 = vst [vmem:[#allocation15_spill] sm:$0xff] %v10452_v15  ;;  %13365 = vst [vmem:[#allocation18_spill] sm:$0xff] %v10456_v37  ;;  %v13373_v37 = vld [vmem:[#allocation36_spill] sm:$0xff]  ;;  %v10498_v35 = vadd.f32 %v10240_v45, %v4796_v21  ;;  %v10519_v21 = vadd.f32 %v10240_v45, %v4803_v53  ;;  %v10540_v53 = vadd.f32 %v10240_v45, %v4810_v44 }
 0x5e8   :  { %13366 = vst [vmem:[#allocation20_spill] sm:$0xff] %v10460_v55  ;;  %13367 = vst [vmem:[#allocation17_spill] sm:$0xff] %v10464_v25  ;;  %v10480_v31 = vadd.f32 %v10240_v45, %v13373_v37  ;;  %v13374_v55 = vld [vmem:[#allocation38_spill] sm:$0xff]  ;;  %v13376_v25 = vld [vmem:[#allocation41_spill] sm:$0xff]  ;;  %v10501_v37 = vadd.f32 %v10240_v45, %v4797_v58  ;;  %v10522_v58 = vadd.f32 %v10240_v45, %v4804_v0 }
 0x5e9   :  { %13369 = vst [vmem:[#allocation19_spill] sm:$0xff] %v10468_v43  ;;  %13371 = vst [vmem:[#allocation22_spill] sm:$0xff] %v10472_v33  ;;  %v10484_v63 = vadd.f32 %v10240_v45, %v13374_v55  ;;  %v10488_v2 = vadd.f32 %v10240_v45, %v13376_v25  ;;  %v13377_v43 = vld [vmem:[#allocation43_spill] sm:$0xff]  ;;  %v10495_v33 = vadd.f32 %v10240_v45, %v4795_v8 }
 0x5ea   :  { %v10492_v41 = vadd.f32 %v10240_v45, %v13377_v43  ;;  %v10504_v55 = vadd.f32 %v10240_v45, %v4798_v47  ;;  %v10510_v25 = vadd.f32 %v10240_v45, %v4800_v18  ;;  %v10513_v43 = vadd.f32 %v10240_v45, %v4801_v30 }
 0x5eb   :  { %13375 = vst [vmem:[#allocation24_spill] sm:$0xff] %v10484_v63  ;;  %v10507_v63 = vadd.f32 %v10240_v45, %v4799_v60  ;;  %v10516_v8 = vadd.f32 %v10240_v45, %v4802_v32  ;;  %v10525_v47 = vadd.f32 %v10240_v45, %v4805_v4  ;;  %v10528_v60 = vadd.f32 %v10240_v45, %v4806_v56 }
 0x5ec   :  { %v10531_v18 = vadd.f32 %v10240_v45, %v4807_v38  ;;  %v10534_v30 = vadd.f32 %v10240_v45, %v4808_v3  ;;  %v10537_v32 = vadd.f32 %v10240_v45, %v4809_v52  ;;  %v10543_v0 = vadd.f32 %v10240_v45, %v4811_v22 }
 0x5ed   :  { %v10546_v4 = vadd.f32 %v10240_v45, %v4812_v29  ;;  %v10549_v56 = vadd.f32 %v10240_v45, %v4813_v11  ;;  %v10552_v38 = vadd.f32 %v10240_v45, %v4814_v28  ;;  %v10555_v3 = vadd.f32 %v10240_v45, %v4815_v23 }
 0x5ee   :  { %v10558_v52 = vadd.f32 %v10240_v45, %v4816_v12  ;;  %v10561_v44 = vadd.f32 %v10240_v45, %v4817_v13  ;;  %v10564_v22 = vadd.f32 %v10240_v45, %v4818_v57  ;;  %v10567_v29 = vadd.f32 %v10240_v45, %v4819_v17 }
 0x5ef   :  { %v10570_v11 = vadd.f32 %v10240_v45, %v4820_v62  ;;  %v10573_v28 = vadd.f32 %v10240_v45, %v4821_v49  ;;  %v10576_v23 = vadd.f32 %v10240_v45, %v4822_v16  ;;  %v10579_v12 = vadd.f32 %v10240_v45, %v4823_v24 }
 0x5f0   :  { %v10582_v13 = vadd.f32 %v10240_v45, %v4824_v46  ;;  %v10585_v57 = vadd.f32 %v10240_v45, %v4825_v40  ;;  %v10588_v17 = vadd.f32 %v10240_v45, %v4826_v5  ;;  %v10591_v62 = vadd.f32 %v10240_v45, %v4827_v34  ;;  %v13384_v19 = vld [vmem:[#allocation19_spill] sm:$0xff]  ;;  %v13385_v59 = vld [vmem:[#allocation22_spill] sm:$0xff] }
 0x5f1   :  { %v10594_v49 = vadd.f32 %v10240_v45, %v4828_v14  ;;  %v10597_v16 = vadd.f32 %v10240_v45, %v4829_v50  ;;  %v10600_v24 = vadd.f32 %v10240_v45, %v4830_v54  ;;  %v10603_v46 = vadd.f32 %v10240_v45, %v4831_v10 }
 0x5f2   :  { %13378 = vst [vmem:[#allocation21_spill] sm:$0xff] %v10591_v62  ;;  %v10606_v40 = vadd.f32 %v10240_v45, %v4832_v27  ;;  %v4908_v5 = vmax.f32 %v10400_v48, 0.0  ;;  %v4909_v34 = vmax.f32 %v10404_v26, 0.0  ;;  %v4925_v10 = vmax.f32 %v13384_v19, 0.0  ;;  %v13386_v39 = vld [vmem:[#allocation24_spill] sm:$0xff] }
 0x5f3   :  { %13379 = vst [vmem:[#allocation23_spill] sm:$0xff] %v10597_v16  ;;  %13380 = vst [vmem:[#allocation26_spill] sm:$0xff] %v10603_v46  ;;  %v4926_v46 = vmax.f32 %v13385_v59, 0.0  ;;  %v4927_v45 = vmax.f32 %v10476_v36, 0.0  ;;  %v4928_v27 = vmax.f32 %v10480_v31, 0.0  ;;  %v4929_v48 = vmax.f32 %v13386_v39, 0.0 }
 0x5f4   :  { %v4930_v26 = vmax.f32 %v10488_v2, 0.0  ;;  %v4931_v14 = vmax.f32 %v10492_v41, 0.0  ;;  %v4932_v50 = vmax.f32 %v10495_v33, 0.0  ;;  %v4933_v16 = vmax.f32 %v10498_v35, 0.0 }
 0x5f5   :  { %v4934_v54 = vmax.f32 %v10501_v37, 0.0  ;;  %v4935_v19 = vmax.f32 %v10504_v55, 0.0  ;;  %v4936_v59 = vmax.f32 %v10507_v63, 0.0  ;;  %v4937_v36 = vmax.f32 %v10510_v25, 0.0 }
 0x5f6   :  { %v4938_v31 = vmax.f32 %v10513_v43, 0.0  ;;  %v4939_v39 = vmax.f32 %v10516_v8, 0.0  ;;  %v4940_v2 = vmax.f32 %v10519_v21, 0.0  ;;  %v4941_v41 = vmax.f32 %v10522_v58, 0.0 }
 0x5f7   :  { %v4942_v33 = vmax.f32 %v10525_v47, 0.0  ;;  %v4943_v35 = vmax.f32 %v10528_v60, 0.0  ;;  %v4944_v37 = vmax.f32 %v10531_v18, 0.0  ;;  %v4945_v55 = vmax.f32 %v10534_v30, 0.0 }
 0x5f8   :  { %v4946_v63 = vmax.f32 %v10537_v32, 0.0  ;;  %v4947_v25 = vmax.f32 %v10540_v53, 0.0  ;;  %v4948_v43 = vmax.f32 %v10543_v0, 0.0  ;;  %v4949_v8 = vmax.f32 %v10546_v4, 0.0 }
 0x5f9   :  { %v4950_v21 = vmax.f32 %v10549_v56, 0.0  ;;  %v4951_v58 = vmax.f32 %v10552_v38, 0.0  ;;  %v4952_v47 = vmax.f32 %v10555_v3, 0.0  ;;  %v4953_v60 = vmax.f32 %v10558_v52, 0.0  ;;  %v13387_v7 = vld [vmem:[#allocation21_spill] sm:$0xff] }
 0x5fa   :  { %v4954_v18 = vmax.f32 %v10561_v44, 0.0  ;;  %v4955_v30 = vmax.f32 %v10564_v22, 0.0  ;;  %v4956_v32 = vmax.f32 %v10567_v29, 0.0  ;;  %v4957_v53 = vmax.f32 %v10570_v11, 0.0  ;;  %v13388_v51 = vld [vmem:[#allocation23_spill] sm:$0xff]  ;;  %v13389_v62 = vld [vmem:[#allocation26_spill] sm:$0xff] }
 0x5fb   :  { %v4958_v0 = vmax.f32 %v10573_v28, 0.0  ;;  %v4959_v4 = vmax.f32 %v10576_v23, 0.0  ;;  %v4960_v56 = vmax.f32 %v10579_v12, 0.0  ;;  %v4961_v38 = vmax.f32 %v10582_v13, 0.0 }
 0x5fc   :  { %v4962_v3 = vmax.f32 %v10585_v57, 0.0  ;;  %v4963_v52 = vmax.f32 %v10588_v17, 0.0  ;;  %v4964_v44 = vmax.f32 %v13387_v7, 0.0  ;;  %v4965_v22 = vmax.f32 %v10594_v49, 0.0 }
 0x5fd   :  { %v4966_v29 = vmax.f32 %v13388_v51, 0.0  ;;  %v4967_v11 = vmax.f32 %v10600_v24, 0.0  ;;  %v4968_v28 = vmax.f32 %v13389_v62, 0.0  ;;  %v4969_v23 = vmax.f32 %v10606_v40, 0.0 }
 0x5fe   :  { %v4972_v15 = vpack.c.bf16 %v4909_v34, %v4908_v5  ;;  %v10670_v12 = vpack.c.bf16 %v4957_v53, %v4956_v32  ;;  %v10672_v13 = vpack.c.bf16 %v4959_v4, %v4958_v0  ;;  %v10674_v57 = vpack.c.bf16 %v4961_v38, %v4960_v56  ;;  %v13396_v34 = vld [vmem:[#allocation42_spill] sm:$0xff]  ;;  %v13398_v53 = vld [vmem:[#allocation12_spill] sm:$0xff] }
 0x5ff   :  { %v10676_v17 = vpack.c.bf16 %v4963_v52, %v4962_v3  ;;  %v10678_v7 = vpack.c.bf16 %v4965_v22, %v4964_v44  ;;  %v10680_v49 = vpack.c.bf16 %v4967_v11, %v4966_v29  ;;  %v10682_v51 = vpack.c.bf16 %v4969_v23, %v4968_v28  ;;  %v13400_v56 = vld [vmem:[#allocation14_spill] sm:$0xff]  ;;  %v13402_v3 = vld [vmem:[#allocation16_spill] sm:$0xff]  ;;  %v13406_v29 = vld [vmem:[#allocation13_spill] sm:$0xff] }
 0x600   :  { %6730 = vmatmul.mubr.msk.bf16.vlgmr.msra.gmra.mrb[160].mxu0 %vm660_vm0, %v4972_v15  ;;  %v13393_v62 = vmax.f32 %v10408_v61, 0.0  ;;  %v13394_v24 = vmax.f32 %v10412_v42, 0.0  ;;  %v13395_v5 = vmov 0   ;;  %v13397_v32 = vmax.f32 %v13396_v34, 0.0 }
 0x601   :  { %13390 = vst [vmem:[#allocation28_spill] sm:$0xff] %v10678_v7  ;;  %13391 = vst [vmem:[#allocation25_spill] sm:$0xff] %v10680_v49  ;;  %5190 = vmatprep.mubr.bf16.mxu0 %v13395_v5  ;;  %v13399_v0 = vmax.f32 %v13398_v53, 0.0  ;;  %v13401_v38 = vmax.f32 %v13400_v56, 0.0  ;;  %v13403_v52 = vmax.f32 %v13402_v3, 0.0  ;;  %v13404_v22 = vmax.f32 %v10432_v9, 0.0 }
 0x602   :  { %13392 = vst [vmem:[#allocation27_spill] sm:$0xff] %v10682_v51  ;;  %v4973_v40 = vpack.c.bf16 %v13394_v24, %v13393_v62  ;;  %v13405_v15 = vmax.f32 %v10436_v20, 0.0  ;;  %v13407_v42 = vmax.f32 %v13406_v29, 0.0  ;;  %v13408_v11 = vmax.f32 %v10444_v6, 0.0  ;;  %v13410_v62 = vld [vmem:[#allocation15_spill] sm:$0xff]  ;;  %v13416_v3 = vld [vmem:[#allocation17_spill] sm:$0xff] }
 0x603   :  { %v4974_v4 = vpack.c.bf16 %v13399_v0, %v13397_v32  ;;  %v4975_v44 = vpack.c.bf16 %v13403_v52, %v13401_v38  ;;  %v13409_v23 = vmax.f32 %v10448_v1, 0.0  ;;  %v13411_v24 = vmax.f32 %v13410_v62, 0.0  ;;  %v13412_v32 = vld [vmem:[#allocation18_spill] sm:$0xff]  ;;  %v13414_v0 = vld [vmem:[#allocation20_spill] sm:$0xff] }
 0x604   :  { %v4976_v61 = vpack.c.bf16 %v13405_v15, %v13404_v22  ;;  %v4977_v28 = vpack.c.bf16 %v13408_v11, %v13407_v42  ;;  %v13413_v53 = vmax.f32 %v13412_v32, 0.0  ;;  %v13415_v56 = vmax.f32 %v13414_v0, 0.0 }
 0x605   :  { %v4978_v34 = vpack.c.bf16 %v13411_v24, %v13409_v23  ;;  %v13417_v9 = vmax.f32 %v13416_v3, 0.0  ;;  %v4981_v20 = vpack.c.bf16 %v4927_v45, %v4926_v46  ;;  %v4982_v22 = vpack.c.bf16 %v4929_v48, %v4928_v27 }
 0x606   :  { %v4979_v38 = vpack.c.bf16 %v13415_v56, %v13413_v53  ;;  %v4983_v15 = vpack.c.bf16 %v4931_v14, %v4930_v26  ;;  %v4984_v29 = vpack.c.bf16 %v4933_v16, %v4932_v50  ;;  %v4985_v51 = vpack.c.bf16 %v4935_v19, %v4934_v54 }
 0x607   :  { %v4980_v52 = vpack.c.bf16 %v4925_v10, %v13417_v9  ;;  %v4986_v6 = vpack.c.bf16 %v4937_v36, %v4936_v59  ;;  %v4987_v42 = vpack.c.bf16 %v4939_v39, %v4938_v31  ;;  %v4988_v11 = vpack.c.bf16 %v4941_v41, %v4940_v2 }
 0x608   :  { %v4989_v1 = vpack.c.bf16 %v4943_v35, %v4942_v33  ;;  %v4990_v49 = vpack.c.bf16 %v4945_v55, %v4944_v37  ;;  %v4991_v62 = vpack.c.bf16 %v4947_v25, %v4946_v63  ;;  %v4992_v23 = vpack.c.bf16 %v4949_v8, %v4948_v43  ;;  %6731 = vmatmul.mubr.msk.bf16.gmra.mrb[164].mxu0 %vm660_vm0, %v4973_v40  ;;  %v13419_v53 = vld [vmem:[#allocation25_spill] sm:$0xff] }
 0x609   :  { %v4993_v24 = vpack.c.bf16 %v4951_v58, %v4950_v21  ;;  %v4994_v32 = vpack.c.bf16 %v4953_v60, %v4952_v47  ;;  %v4995_v7 = vpack.c.bf16 %v4955_v30, %v4954_v18  ;;  %5200 = vmatprep.mubr.bf16.mxu0 %v13395_v5  ;;  %v13418_v47 = vld [vmem:[#allocation28_spill] sm:$0xff] }
 0x610   :  { %6732 = vmatmul.mubr.msk.bf16.gmra.mrb[168].mxu0 %vm660_vm0, %v4974_v4 }
 0x611   :  { %5210 = vmatprep.mubr.bf16.mxu0 %v13395_v5 }
 0x618   :  { %6733 = vmatmul.mubr.msk.bf16.gmra.mrb[172].mxu0 %vm660_vm0, %v4975_v44 }
 0x619   :  { %5220 = vmatprep.mubr.bf16.mxu0 %v13395_v5 }
 0x620   :  { %6734 = vmatmul.mubr.msk.bf16.gmra.mrb[176].mxu0 %vm660_vm0, %v4976_v61 }
 0x621   :  { %5230 = vmatprep.mubr.bf16.mxu0 %v13395_v5 }
 0x628   :  { %6735 = vmatmul.mubr.msk.bf16.gmra.mrb[180].mxu0 %vm660_vm0, %v4977_v28 }
 0x629   :  { %5240 = vmatprep.mubr.bf16.mxu0 %v13395_v5 }
 0x630   :  { %6736 = vmatmul.mubr.msk.bf16.gmra.mrb[184].mxu0 %vm660_vm0, %v4978_v34 }
 0x631   :  { %5250 = vmatprep.mubr.bf16.mxu0 %v13395_v5 }
 0x638   :  { %6737 = vmatmul.mubr.msk.bf16.gmra.mrb[188].mxu0 %vm660_vm0, %v4979_v38 }
 0x639   :  { %5260 = vmatprep.mubr.bf16.mxu0 %v13395_v5 }
 0x640   :  { %6738 = vmatmul.mubr.msk.bf16.gmra.mrb[192].mxu0 %vm660_vm0, %v4980_v52 }
 0x641   :  { %5270 = vmatprep.mubr.bf16.mxu0 %v13395_v5 }
 0x648   :  { %6739 = vmatmul.mubr.msk.bf16.gmra.mrb[196].mxu0 %vm660_vm0, %v4981_v20 }
 0x649   :  { %5280 = vmatprep.mubr.bf16.mxu0 %v13395_v5 }
 0x650   :  { %6740 = vmatmul.mubr.msk.bf16.gmra.mrb[200].mxu0 %vm660_vm0, %v4982_v22 }
 0x651   :  { %5290 = vmatprep.mubr.bf16.mxu0 %v13395_v5 }
 0x658   :  { %6741 = vmatmul.mubr.msk.bf16.gmra.mrb[204].mxu0 %vm660_vm0, %v4983_v15 }
 0x659   :  { %5300 = vmatprep.mubr.bf16.mxu0 %v13395_v5 }
 0x660   :  { %6742 = vmatmul.mubr.msk.bf16.gmra.mrb[208].mxu0 %vm660_vm0, %v4984_v29 }
 0x661   :  { %5310 = vmatprep.mubr.bf16.mxu0 %v13395_v5 }
 0x668   :  { %6743 = vmatmul.mubr.msk.bf16.gmra.mrb[212].mxu0 %vm660_vm0, %v4985_v51 }
 0x669   :  { %5320 = vmatprep.mubr.bf16.mxu0 %v13395_v5 }
 0x670   :  { %6744 = vmatmul.mubr.msk.bf16.gmra.mrb[216].mxu0 %vm660_vm0, %v4986_v6 }
 0x671   :  { %5330 = vmatprep.mubr.bf16.mxu0 %v13395_v5 }
 0x678   :  { %6745 = vmatmul.mubr.msk.bf16.gmra.mrb[220].mxu0 %vm660_vm0, %v4987_v42 }
 0x679   :  { %5340 = vmatprep.mubr.bf16.mxu0 %v13395_v5 }
 0x680   :  { %6746 = vmatmul.mubr.msk.bf16.gmra.mrb[224].mxu0 %vm660_vm0, %v4988_v11 }
 0x681   :  { %5350 = vmatprep.mubr.bf16.mxu0 %v13395_v5 }
 0x688   :  { %6747 = vmatmul.mubr.msk.bf16.gmra.mrb[228].mxu0 %vm660_vm0, %v4989_v1 }
 0x689   :  { %5360 = vmatprep.mubr.bf16.mxu0 %v13395_v5 }
 0x690   :  { %6748 = vmatmul.mubr.msk.bf16.gmra.mrb[232].mxu0 %vm660_vm0, %v4990_v49 }
 0x691   :  { %5370 = vmatprep.mubr.bf16.mxu0 %v13395_v5 }
 0x698   :  { %6749 = vmatmul.mubr.msk.bf16.gmra.mrb[236].mxu0 %vm660_vm0, %v4991_v62 }
 0x699   :  { %5380 = vmatprep.mubr.bf16.mxu0 %v13395_v5 }
 0x6a0   :  { %6750 = vmatmul.mubr.msk.bf16.gmra.mrb[240].mxu0 %vm660_vm0, %v4992_v23 }
 0x6a1   :  { %5390 = vmatprep.mubr.bf16.mxu0 %v13395_v5 }
 0x6a8   :  { %6751 = vmatmul.mubr.msk.bf16.gmra.mrb[244].mxu0 %vm660_vm0, %v4993_v24  ;;  %v13420_v24 = vld [vmem:[#allocation27_spill] sm:$0xff] }
 0x6a9   :  { %5400 = vmatprep.mubr.bf16.mxu0 %v13395_v5 }
 0x6b0   :  { %6752 = vmatmul.mubr.msk.bf16.gmra.mrb[248].mxu0 %vm660_vm0, %v4994_v32 }
 0x6b1   :  { %5410 = vmatprep.mubr.bf16.mxu0 %v13395_v5 }
 0x6b8   :  { %6753 = vmatmul.mubr.msk.bf16.gmra.mrb[252].mxu0 %vm660_vm0, %v4995_v7 }
 0x6b9   :  { %5420 = vmatprep.mubr.bf16.mxu0 %v13395_v5 }
 0x6c0   :  { %6754 = vmatmul.mubr.msk.bf16.gmra.mrb[0].mxu0 %vm660_vm0, %v10670_v12 }
 0x6c1   :  { %5430 = vmatprep.mubr.bf16.mxu0 %v13395_v5 }
 0x6c8   :  { %6755 = vmatmul.mubr.msk.bf16.gmra.mrb[4].mxu0 %vm660_vm0, %v10672_v13 }
 0x6c9   :  { %5440 = vmatprep.mubr.bf16.mxu0 %v13395_v5 }
 0x6d0   :  { %6756 = vmatmul.mubr.msk.bf16.gmra.mrb[8].mxu0 %vm660_vm0, %v10674_v57 }
 0x6d1   :  { %5450 = vmatprep.mubr.bf16.mxu0 %v13395_v5 }
 0x6d3   :  { %v10771_v16 = vpop.f32.mrb[160].mxu0 }
 0x6d4   :  { %v10773_v46 = vpop.f32.mrb[161].mxu0  ;;  %v5641_v50 = vmul.f32 %v10771_v16, %v10771_v16 }
 0x6d5   :  { %v10775_v14 = vpop.f32.mrb[162].mxu0  ;;  %v5642_v27 = vmul.f32 %v10773_v46, %v10773_v46 }
 0x6d6   :  { %v5501_v54 = vadd.f32 %v10775_v14, %v10771_v16  ;;  %v5643_v10 = vmul.f32 %v10775_v14, %v10775_v14  ;;  %v10783_v45 = vpop.f32.mrb[163].mxu0 }
 0x6d7   :  { %v5570_v48 = vadd.f32 %v10783_v45, %v10773_v46  ;;  %v5644_v26 = vmul.f32 %v10783_v45, %v10783_v45 }
 0x6d8   :  { %v5769_v19 = vadd.f32 %v5643_v10, %v5641_v50  ;;  %6757 = vmatmul.mubr.msk.bf16.gmra.mrb[12].mxu0 %vm660_vm0, %v10676_v17 }
 0x6d9   :  { %v5838_v59 = vadd.f32 %v5644_v26, %v5642_v27  ;;  %5460 = vmatprep.mubr.bf16.mxu0 %v13395_v5 }
 0x6db   :  { %v10794_v36 = vpop.f32.mrb[164].mxu0 }
 0x6dc   :  { %v5502_v31 = vadd.f32 %v5501_v54, %v10794_v36  ;;  %v5645_v39 = vmul.f32 %v10794_v36, %v10794_v36  ;;  %v10799_v2 = vpop.f32.mrb[165].mxu0 }
 0x6dd   :  { %v5571_v41 = vadd.f32 %v5570_v48, %v10799_v2  ;;  %v5646_v33 = vmul.f32 %v10799_v2, %v10799_v2  ;;  %v10804_v35 = vpop.f32.mrb[166].mxu0 }
 0x6de   :  { %v5770_v37 = vadd.f32 %v5769_v19, %v5645_v39  ;;  %v5503_v55 = vadd.f32 %v5502_v31, %v10804_v35  ;;  %v5647_v63 = vmul.f32 %v10804_v35, %v10804_v35  ;;  %v10809_v25 = vpop.f32.mrb[167].mxu0 }
 0x6df   :  { %v5839_v43 = vadd.f32 %v5838_v59, %v5646_v33  ;;  %v5572_v8 = vadd.f32 %v5571_v41, %v10809_v25  ;;  %v5648_v21 = vmul.f32 %v10809_v25, %v10809_v25 }
 0x6e0   :  { %v5771_v58 = vadd.f32 %v5770_v37, %v5647_v63  ;;  %6758 = vmatmul.mubr.msk.bf16.gmra.mrb[16].mxu0 %vm660_vm0, %v13418_v47  ;;  %v13421_v63 = vld [vmem:[#allocation40_spill] sm:$0xff] }
 0x6e1   :  { %v5840_v60 = vadd.f32 %v5839_v43, %v5648_v21  ;;  %5470 = vmatprep.mubr.bf16.mxu0 %v13395_v5 }
 0x6e3   :  { %v10817_v18 = vpop.f32.mrb[168].mxu0 }
 0x6e4   :  { %v5504_v30 = vadd.f32 %v5503_v55, %v10817_v18  ;;  %v5649_v12 = vmul.f32 %v10817_v18, %v10817_v18  ;;  %v10822_v13 = vpop.f32.mrb[169].mxu0 }
 0x6e5   :  { %v5573_v57 = vadd.f32 %v5572_v8, %v10822_v13  ;;  %v5650_v17 = vmul.f32 %v10822_v13, %v10822_v13  ;;  %v10827_v7 = vpop.f32.mrb[170].mxu0 }
 0x6e6   :  { %v5772_v49 = vadd.f32 %v5771_v58, %v5649_v12  ;;  %v5505_v51 = vadd.f32 %v5504_v30, %v10827_v7  ;;  %v5651_v40 = vmul.f32 %v10827_v7, %v10827_v7  ;;  %v10832_v4 = vpop.f32.mrb[171].mxu0 }
 0x6e7   :  { %v5841_v44 = vadd.f32 %v5840_v60, %v5650_v17  ;;  %v5574_v61 = vadd.f32 %v5573_v57, %v10832_v4  ;;  %v5652_v28 = vmul.f32 %v10832_v4, %v10832_v4 }
 0x6e8   :  { %v5773_v34 = vadd.f32 %v5772_v49, %v5651_v40  ;;  %6759 = vmatmul.mubr.msk.bf16.gmra.mrb[20].mxu0 %vm660_vm0, %v13419_v53 }
 0x6e9   :  { %v5842_v0 = vadd.f32 %v5841_v44, %v5652_v28  ;;  %5480 = vmatprep.mubr.bf16.mxu0 %v13395_v5 }
 0x6eb   :  { %v10840_v56 = vpop.f32.mrb[172].mxu0 }
 0x6ec   :  { %v5506_v38 = vadd.f32 %v5505_v51, %v10840_v56  ;;  %v5653_v3 = vmul.f32 %v10840_v56, %v10840_v56  ;;  %v10845_v9 = vpop.f32.mrb[173].mxu0 }
 0x6ed   :  { %v5575_v52 = vadd.f32 %v5574_v61, %v10845_v9  ;;  %v5654_v20 = vmul.f32 %v10845_v9, %v10845_v9  ;;  %v10850_v22 = vpop.f32.mrb[174].mxu0 }
 0x6ee   :  { %v5774_v15 = vadd.f32 %v5773_v34, %v5653_v3  ;;  %v5507_v29 = vadd.f32 %v5506_v38, %v10850_v22  ;;  %v5655_v6 = vmul.f32 %v10850_v22, %v10850_v22  ;;  %v10855_v42 = vpop.f32.mrb[175].mxu0 }
 0x6ef   :  { %v5843_v11 = vadd.f32 %v5842_v0, %v5654_v20  ;;  %v5576_v1 = vadd.f32 %v5575_v52, %v10855_v42  ;;  %v5656_v62 = vmul.f32 %v10855_v42, %v10855_v42 }
 0x6f0   :  { %v5775_v23 = vadd.f32 %v5774_v15, %v5655_v6  ;;  %6760 = vmatmul.mubr.msk.bf16.gmra.mrb[24].mxu0 %vm660_vm0, %v13420_v24 }
 0x6f1   :  { %v5844_v32 = vadd.f32 %v5843_v11, %v5656_v62  ;;  %5490 = vmatprep.mubr.bf16.mxu0 %v13395_v5 }
 0x6f3   :  { %v10863_v50 = vpop.f32.mrb[176].mxu0 }
 0x6f4   :  { %v5508_v54 = vadd.f32 %v5507_v29, %v10863_v50  ;;  %v5657_v10 = vmul.f32 %v10863_v50, %v10863_v50  ;;  %v10868_v27 = vpop.f32.mrb[177].mxu0 }
 0x6f5   :  { %v5577_v48 = vadd.f32 %v5576_v1, %v10868_v27  ;;  %v5658_v26 = vmul.f32 %v10868_v27, %v10868_v27  ;;  %v10873_v19 = vpop.f32.mrb[178].mxu0 }
 0x6f6   :  { %v5776_v59 = vadd.f32 %v5775_v23, %v5657_v10  ;;  %v5509_v31 = vadd.f32 %v5508_v54, %v10873_v19  ;;  %v5659_v5 = vmul.f32 %v10873_v19, %v10873_v19  ;;  %v10878_v39 = vpop.f32.mrb[179].mxu0 }
 0x6f7   :  { %v5845_v41 = vadd.f32 %v5844_v32, %v5658_v26  ;;  %v5578_v33 = vadd.f32 %v5577_v48, %v10878_v39  ;;  %v5660_v37 = vmul.f32 %v10878_v39, %v10878_v39 }
 0x6f8   :  { %v5777_v55 = vadd.f32 %v5776_v59, %v5659_v5  ;;  %6761 = vmatmul.mubr.msk.bf16.gmra.mrb[28].mxu0 %vm660_vm0, %v13421_v63 }
 0x6f9   :  { %v5846_v43 = vadd.f32 %v5845_v41, %v5660_v37 }
 0x6fb   :  { %v10885_v8 = vpop.f32.mrb[180].mxu0 }
 0x6fc   :  { %v5510_v21 = vadd.f32 %v5509_v31, %v10885_v8  ;;  %v5661_v58 = vmul.f32 %v10885_v8, %v10885_v8  ;;  %v10890_v47 = vpop.f32.mrb[181].mxu0 }
 0x6fd   :  { %v5579_v60 = vadd.f32 %v5578_v33, %v10890_v47  ;;  %v5662_v30 = vmul.f32 %v10890_v47, %v10890_v47  ;;  %v10895_v12 = vpop.f32.mrb[182].mxu0 }
 0x6fe   :  { %v5778_v57 = vadd.f32 %v5777_v55, %v5661_v58  ;;  %v5511_v17 = vadd.f32 %v5510_v21, %v10895_v12  ;;  %v5663_v49 = vmul.f32 %v10895_v12, %v10895_v12  ;;  %v10900_v51 = vpop.f32.mrb[183].mxu0 }
 0x6ff   :  { %v5847_v40 = vadd.f32 %v5846_v43, %v5662_v30  ;;  %v5580_v44 = vadd.f32 %v5579_v60, %v10900_v51  ;;  %v5664_v61 = vmul.f32 %v10900_v51, %v10900_v51 }
 0x700   :  { %v5779_v28 = vadd.f32 %v5778_v57, %v5663_v49 }
 0x701   :  { %v5848_v34 = vadd.f32 %v5847_v40, %v5664_v61 }
 0x703   :  { %v10905_v53 = vpop.f32.mrb[184].mxu0 }
 0x704   :  { %v5512_v0 = vadd.f32 %v5511_v17, %v10905_v53  ;;  %v5665_v38 = vmul.f32 %v10905_v53, %v10905_v53  ;;  %v10910_v3 = vpop.f32.mrb[185].mxu0 }
 0x705   :  { %v5581_v52 = vadd.f32 %v5580_v44, %v10910_v3  ;;  %v5666_v20 = vmul.f32 %v10910_v3, %v10910_v3  ;;  %v10915_v15 = vpop.f32.mrb[186].mxu0 }
 0x706   :  { %v5780_v29 = vadd.f32 %v5779_v28, %v5665_v38  ;;  %v5513_v6 = vadd.f32 %v5512_v0, %v10915_v15  ;;  %v5667_v11 = vmul.f32 %v10915_v15, %v10915_v15  ;;  %v10920_v1 = vpop.f32.mrb[187].mxu0 }
 0x707   :  { %v5849_v62 = vadd.f32 %v5848_v34, %v5666_v20  ;;  %v5582_v23 = vadd.f32 %v5581_v52, %v10920_v1  ;;  %v5668_v24 = vmul.f32 %v10920_v1, %v10920_v1 }
 0x708   :  { %v5781_v32 = vadd.f32 %v5780_v29, %v5667_v11 }
 0x709   :  { %v5850_v54 = vadd.f32 %v5849_v62, %v5668_v24 }
 0x70b   :  { %v10925_v10 = vpop.f32.mrb[188].mxu0 }
 0x70c   :  { %v5514_v48 = vadd.f32 %v5513_v6, %v10925_v10  ;;  %v5669_v26 = vmul.f32 %v10925_v10, %v10925_v10  ;;  %v10930_v59 = vpop.f32.mrb[189].mxu0 }
 0x70d   :  { %v5583_v31 = vadd.f32 %v5582_v23, %v10930_v59  ;;  %v5670_v5 = vmul.f32 %v10930_v59, %v10930_v59  ;;  %v10935_v41 = vpop.f32.mrb[190].mxu0 }
 0x70e   :  { %v5782_v33 = vadd.f32 %v5781_v32, %v5669_v26  ;;  %v5515_v37 = vadd.f32 %v5514_v48, %v10935_v41  ;;  %v5671_v55 = vmul.f32 %v10935_v41, %v10935_v41  ;;  %v10940_v63 = vpop.f32.mrb[191].mxu0 }
 0x70f   :  { %v5851_v43 = vadd.f32 %v5850_v54, %v5670_v5  ;;  %v5584_v21 = vadd.f32 %v5583_v31, %v10940_v63  ;;  %v5672_v58 = vmul.f32 %v10940_v63, %v10940_v63 }
 0x710   :  { %v5783_v60 = vadd.f32 %v5782_v33, %v5671_v55 }
 0x711   :  { %v5852_v30 = vadd.f32 %v5851_v43, %v5672_v58 }
 0x713   :  { %v10945_v57 = vpop.f32.mrb[192].mxu0 }
 0x714   :  { %v5516_v17 = vadd.f32 %v5515_v37, %v10945_v57  ;;  %v5673_v49 = vmul.f32 %v10945_v57, %v10945_v57  ;;  %v10950_v40 = vpop.f32.mrb[193].mxu0 }
 0x715   :  { %v5585_v44 = vadd.f32 %v5584_v21, %v10950_v40  ;;  %v5674_v61 = vmul.f32 %v10950_v40, %v10950_v40  ;;  %v10955_v28 = vpop.f32.mrb[194].mxu0 }
 0x716   :  { %v5784_v34 = vadd.f32 %v5783_v60, %v5673_v49  ;;  %v5517_v0 = vadd.f32 %v5516_v17, %v10955_v28  ;;  %v5675_v38 = vmul.f32 %v10955_v28, %v10955_v28  ;;  %v10960_v52 = vpop.f32.mrb[195].mxu0 }
 0x717   :  { %v5853_v20 = vadd.f32 %v5852_v30, %v5674_v61  ;;  %v5586_v29 = vadd.f32 %v5585_v44, %v10960_v52  ;;  %v5676_v6 = vmul.f32 %v10960_v52, %v10960_v52 }
 0x718   :  { %v5785_v11 = vadd.f32 %v5784_v34, %v5675_v38 }
 0x719   :  { %v5854_v62 = vadd.f32 %v5853_v20, %v5676_v6 }
 0x71b   :  { %v10965_v23 = vpop.f32.mrb[196].mxu0 }
 0x71c   :  { %13422 = vst [vmem:[#allocation30_spill] sm:$0xff] %v10965_v23  ;;  %v5518_v24 = vadd.f32 %v5517_v0, %v10965_v23  ;;  %v5677_v32 = vmul.f32 %v10965_v23, %v10965_v23  ;;  %v10970_v54 = vpop.f32.mrb[197].mxu0 }
 0x71d   :  { %13423 = vst [vmem:[#allocation9_spill] sm:$0xff] %v10970_v54  ;;  %v5587_v48 = vadd.f32 %v5586_v29, %v10970_v54  ;;  %v5678_v26 = vmul.f32 %v10970_v54, %v10970_v54  ;;  %v10975_v31 = vpop.f32.mrb[198].mxu0 }
 0x71e   :  { %13424 = vst [vmem:[#allocation29_spill] sm:$0xff] %v10975_v31  ;;  %v5786_v5 = vadd.f32 %v5785_v11, %v5677_v32  ;;  %v5519_v33 = vadd.f32 %v5518_v24, %v10975_v31  ;;  %v5679_v37 = vmul.f32 %v10975_v31, %v10975_v31  ;;  %v10980_v55 = vpop.f32.mrb[199].mxu0 }
 0x71f   :  { %13425 = vst [vmem:[#allocation31_spill] sm:$0xff] %v10980_v55  ;;  %v5855_v43 = vadd.f32 %v5854_v62, %v5678_v26  ;;  %v5588_v21 = vadd.f32 %v5587_v48, %v10980_v55  ;;  %v5680_v58 = vmul.f32 %v10980_v55, %v10980_v55 }
 0x720   :  { %v5787_v60 = vadd.f32 %v5786_v5, %v5679_v37 }
 0x721   :  { %v5856_v30 = vadd.f32 %v5855_v43, %v5680_v58 }
 0x723   :  { %v10985_v17 = vpop.f32.mrb[200].mxu0 }
 0x724   :  { %13426 = vst [vmem:[#allocation11_spill] sm:$0xff] %v10985_v17  ;;  %v5520_v49 = vadd.f32 %v5519_v33, %v10985_v17  ;;  %v5681_v44 = vmul.f32 %v10985_v17, %v10985_v17  ;;  %v10990_v61 = vpop.f32.mrb[201].mxu0 }
 0x725   :  { %13427 = vst [vmem:[#allocation35_spill] sm:$0xff] %v10990_v61  ;;  %v5589_v34 = vadd.f32 %v5588_v21, %v10990_v61  ;;  %v5682_v0 = vmul.f32 %v10990_v61, %v10990_v61  ;;  %v10995_v38 = vpop.f32.mrb[202].mxu0 }
 0x726   :  { %13428 = vst [vmem:[#allocation10_spill] sm:$0xff] %v10995_v38  ;;  %v5788_v20 = vadd.f32 %v5787_v60, %v5681_v44  ;;  %v5521_v29 = vadd.f32 %v5520_v49, %v10995_v38  ;;  %v5683_v6 = vmul.f32 %v10995_v38, %v10995_v38  ;;  %v11000_v11 = vpop.f32.mrb[203].mxu0 }
 0x727   :  { %13429 = vst [vmem:[#allocation34_spill] sm:$0xff] %v11000_v11  ;;  %v5857_v62 = vadd.f32 %v5856_v30, %v5682_v0  ;;  %v5590_v24 = vadd.f32 %v5589_v34, %v11000_v11  ;;  %v5684_v32 = vmul.f32 %v11000_v11, %v11000_v11 }
 0x728   :  { %v5789_v48 = vadd.f32 %v5788_v20, %v5683_v6 }
 0x729   :  { %v5858_v26 = vadd.f32 %v5857_v62, %v5684_v32 }
 0x72b   :  { %v11005_v5 = vpop.f32.mrb[204].mxu0 }
 0x72c   :  { %13430 = vst [vmem:[#allocation37_spill] sm:$0xff] %v11005_v5  ;;  %v5522_v33 = vadd.f32 %v5521_v29, %v11005_v5  ;;  %v5685_v37 = vmul.f32 %v11005_v5, %v11005_v5  ;;  %v11010_v43 = vpop.f32.mrb[205].mxu0 }
 0x72d   :  { %13431 = vst [vmem:[#allocation39_spill] sm:$0xff] %v11010_v43  ;;  %v5591_v21 = vadd.f32 %v5590_v24, %v11010_v43  ;;  %v5686_v58 = vmul.f32 %v11010_v43, %v11010_v43  ;;  %v11015_v60 = vpop.f32.mrb[206].mxu0 }
 0x72e   :  { %13432 = vst [vmem:[#allocation36_spill] sm:$0xff] %v11015_v60  ;;  %v5790_v30 = vadd.f32 %v5789_v48, %v5685_v37  ;;  %v5523_v49 = vadd.f32 %v5522_v33, %v11015_v60  ;;  %v5687_v44 = vmul.f32 %v11015_v60, %v11015_v60  ;;  %v11020_v34 = vpop.f32.mrb[207].mxu0 }
 0x72f   :  { %13433 = vst [vmem:[#allocation38_spill] sm:$0xff] %v11020_v34  ;;  %v5859_v0 = vadd.f32 %v5858_v26, %v5686_v58  ;;  %v5592_v20 = vadd.f32 %v5591_v21, %v11020_v34  ;;  %v5688_v29 = vmul.f32 %v11020_v34, %v11020_v34 }
 0x730   :  { %v5791_v6 = vadd.f32 %v5790_v30, %v5687_v44 }
 0x731   :  { %v5860_v62 = vadd.f32 %v5859_v0, %v5688_v29 }
 0x733   :  { %v11025_v24 = vpop.f32.mrb[208].mxu0 }
 0x734   :  { %13434 = vst [vmem:[#allocation41_spill] sm:$0xff] %v11025_v24  ;;  %v5524_v32 = vadd.f32 %v5523_v49, %v11025_v24  ;;  %v5689_v48 = vmul.f32 %v11025_v24, %v11025_v24  ;;  %v11030_v33 = vpop.f32.mrb[209].mxu0 }
 0x735   :  { %13435 = vst [vmem:[#allocation43_spill] sm:$0xff] %v11030_v33  ;;  %v5593_v37 = vadd.f32 %v5592_v20, %v11030_v33  ;;  %v5690_v26 = vmul.f32 %v11030_v33, %v11030_v33  ;;  %v11035_v21 = vpop.f32.mrb[210].mxu0 }
 0x736   :  { %13436 = vst [vmem:[#allocation19_spill] sm:$0xff] %v11035_v21  ;;  %v5792_v58 = vadd.f32 %v5791_v6, %v5689_v48  ;;  %v5525_v30 = vadd.f32 %v5524_v32, %v11035_v21  ;;  %v5691_v44 = vmul.f32 %v11035_v21, %v11035_v21  ;;  %v11040_v0 = vpop.f32.mrb[211].mxu0 }
 0x737   :  { %13437 = vst [vmem:[#allocation22_spill] sm:$0xff] %v11040_v0  ;;  %v5861_v49 = vadd.f32 %v5860_v62, %v5690_v26  ;;  %v5594_v29 = vadd.f32 %v5593_v37, %v11040_v0  ;;  %v5692_v24 = vmul.f32 %v11040_v0, %v11040_v0 }
 0x738   :  { %v5793_v20 = vadd.f32 %v5792_v58, %v5691_v44 }
 0x739   :  { %v5862_v34 = vadd.f32 %v5861_v49, %v5692_v24 }
 0x73b   :  { %v11045_v60 = vpop.f32.mrb[212].mxu0 }
 0x73c   :  { %13438 = vst [vmem:[#allocation24_spill] sm:$0xff] %v11045_v60  ;;  %v5526_v33 = vadd.f32 %v5525_v30, %v11045_v60  ;;  %v5693_v6 = vmul.f32 %v11045_v60, %v11045_v60  ;;  %v11050_v32 = vpop.f32.mrb[213].mxu0 }
 0x73d   :  { %13439 = vst [vmem:[#allocation21_spill] sm:$0xff] %v11050_v32  ;;  %v5595_v48 = vadd.f32 %v5594_v29, %v11050_v32  ;;  %v5694_v62 = vmul.f32 %v11050_v32, %v11050_v32  ;;  %v11055_v37 = vpop.f32.mrb[214].mxu0 }
 0x73e   :  { %13440 = vst [vmem:[#allocation23_spill] sm:$0xff] %v11055_v37  ;;  %v5794_v26 = vadd.f32 %v5793_v20, %v5693_v6  ;;  %v5527_v58 = vadd.f32 %v5526_v33, %v11055_v37  ;;  %v5695_v24 = vmul.f32 %v11055_v37, %v11055_v37  ;;  %v11060_v44 = vpop.f32.mrb[215].mxu0 }
 0x73f   :  { %13441 = vst [vmem:[#allocation26_spill] sm:$0xff] %v11060_v44  ;;  %v5863_v30 = vadd.f32 %v5862_v34, %v5694_v62  ;;  %v5596_v49 = vadd.f32 %v5595_v48, %v11060_v44  ;;  %v5696_v60 = vmul.f32 %v11060_v44, %v11060_v44 }
 0x740   :  { %v5795_v29 = vadd.f32 %v5794_v26, %v5695_v24 }
 0x741   :  { %v5864_v0 = vadd.f32 %v5863_v30, %v5696_v60 }
 0x743   :  { %v11065_v21 = vpop.f32.mrb[216].mxu0 }
 0x744   :  { %13442 = vst [vmem:[#allocation42_spill] sm:$0xff] %v11065_v21  ;;  %v5528_v32 = vadd.f32 %v5527_v58, %v11065_v21  ;;  %v5697_v33 = vmul.f32 %v11065_v21, %v11065_v21  ;;  %v11070_v20 = vpop.f32.mrb[217].mxu0 }
 0x745   :  { %13443 = vst [vmem:[#allocation12_spill] sm:$0xff] %v11070_v20  ;;  %v5597_v6 = vadd.f32 %v5596_v49, %v11070_v20  ;;  %v5698_v34 = vmul.f32 %v11070_v20, %v11070_v20  ;;  %v11075_v48 = vpop.f32.mrb[218].mxu0 }
 0x746   :  { %13444 = vst [vmem:[#allocation14_spill] sm:$0xff] %v11075_v48  ;;  %v5796_v62 = vadd.f32 %v5795_v29, %v5697_v33  ;;  %v5529_v26 = vadd.f32 %v5528_v32, %v11075_v48  ;;  %v5699_v60 = vmul.f32 %v11075_v48, %v11075_v48  ;;  %v11080_v24 = vpop.f32.mrb[219].mxu0 }
 0x747   :  { %13445 = vst [vmem:[#allocation16_spill] sm:$0xff] %v11080_v24  ;;  %v5865_v58 = vadd.f32 %v5864_v0, %v5698_v34  ;;  %v5598_v30 = vadd.f32 %v5597_v6, %v11080_v24  ;;  %v5700_v21 = vmul.f32 %v11080_v24, %v11080_v24 }
 0x748   :  { %v5797_v49 = vadd.f32 %v5796_v62, %v5699_v60 }
 0x749   :  { %v5866_v44 = vadd.f32 %v5865_v58, %v5700_v21 }
 0x74b   :  { %v11085_v37 = vpop.f32.mrb[220].mxu0 }
 0x74c   :  { %13446 = vst [vmem:[#allocation13_spill] sm:$0xff] %v11085_v37  ;;  %v5530_v20 = vadd.f32 %v5529_v26, %v11085_v37  ;;  %v5701_v32 = vmul.f32 %v11085_v37, %v11085_v37  ;;  %v11090_v29 = vpop.f32.mrb[221].mxu0 }
 0x74d   :  { %13447 = vst [vmem:[#allocation15_spill] sm:$0xff] %v11090_v29  ;;  %v5599_v33 = vadd.f32 %v5598_v30, %v11090_v29  ;;  %v5702_v0 = vmul.f32 %v11090_v29, %v11090_v29  ;;  %v11095_v6 = vpop.f32.mrb[222].mxu0 }
 0x74e   :  { %13448 = vst [vmem:[#allocation18_spill] sm:$0xff] %v11095_v6  ;;  %v5798_v34 = vadd.f32 %v5797_v49, %v5701_v32  ;;  %v5531_v62 = vadd.f32 %v5530_v20, %v11095_v6  ;;  %v5703_v21 = vmul.f32 %v11095_v6, %v11095_v6  ;;  %v11100_v60 = vpop.f32.mrb[223].mxu0 }
 0x74f   :  { %13449 = vst [vmem:[#allocation20_spill] sm:$0xff] %v11100_v60  ;;  %v5867_v26 = vadd.f32 %v5866_v44, %v5702_v0  ;;  %v5600_v58 = vadd.f32 %v5599_v33, %v11100_v60  ;;  %v5704_v37 = vmul.f32 %v11100_v60, %v11100_v60 }
 0x750   :  { %v5799_v30 = vadd.f32 %v5798_v34, %v5703_v21 }
 0x751   :  { %v5868_v24 = vadd.f32 %v5867_v26, %v5704_v37 }
 0x753   :  { %v11105_v48 = vpop.f32.mrb[224].mxu0 }
 0x754   :  { %13450 = vst [vmem:[#allocation17_spill] sm:$0xff] %v11105_v48  ;;  %v5532_v29 = vadd.f32 %v5531_v62, %v11105_v48  ;;  %v5705_v20 = vmul.f32 %v11105_v48, %v11105_v48  ;;  %v11110_v49 = vpop.f32.mrb[225].mxu0 }
 0x755   :  { %13451 = vst [vmem:[#allocation28_spill] sm:$0xff] %v11110_v49  ;;  %v5601_v32 = vadd.f32 %v5600_v58, %v11110_v49  ;;  %v5706_v44 = vmul.f32 %v11110_v49, %v11110_v49  ;;  %v11115_v33 = vpop.f32.mrb[226].mxu0 }
 0x756   :  { %13452 = vst [vmem:[#allocation25_spill] sm:$0xff] %v11115_v33  ;;  %v5800_v0 = vadd.f32 %v5799_v30, %v5705_v20  ;;  %v5533_v34 = vadd.f32 %v5532_v29, %v11115_v33  ;;  %v5707_v37 = vmul.f32 %v11115_v33, %v11115_v33  ;;  %v11120_v21 = vpop.f32.mrb[227].mxu0 }
 0x757   :  { %13453 = vst [vmem:[#allocation27_spill] sm:$0xff] %v11120_v21  ;;  %v5869_v62 = vadd.f32 %v5868_v24, %v5706_v44  ;;  %v5602_v26 = vadd.f32 %v5601_v32, %v11120_v21  ;;  %v5708_v48 = vmul.f32 %v11120_v21, %v11120_v21 }
 0x758   :  { %v5801_v58 = vadd.f32 %v5800_v0, %v5707_v37 }
 0x759   :  { %v5870_v60 = vadd.f32 %v5869_v62, %v5708_v48 }
 0x75b   :  { %v11125_v6 = vpop.f32.mrb[228].mxu0 }
 0x75c   :  { %13454 = vst [vmem:[#allocation40_spill] sm:$0xff] %v11125_v6  ;;  %v5534_v49 = vadd.f32 %v5533_v34, %v11125_v6  ;;  %v5709_v29 = vmul.f32 %v11125_v6, %v11125_v6  ;;  %v11130_v30 = vpop.f32.mrb[229].mxu0 }
 0x75d   :  { %13455 = vst [vmem:[#allocation44_spill] sm:$0xff] %v11130_v30  ;;  %v5603_v20 = vadd.f32 %v5602_v26, %v11130_v30  ;;  %v5710_v24 = vmul.f32 %v11130_v30, %v11130_v30  ;;  %v11135_v32 = vpop.f32.mrb[230].mxu0 }
 0x75e   :  { %13456 = vst [vmem:[#allocation45_spill] sm:$0xff] %v11135_v32  ;;  %v5802_v44 = vadd.f32 %v5801_v58, %v5709_v29  ;;  %v5535_v0 = vadd.f32 %v5534_v49, %v11135_v32  ;;  %v5711_v48 = vmul.f32 %v11135_v32, %v11135_v32  ;;  %v11140_v37 = vpop.f32.mrb[231].mxu0 }
 0x75f   :  { %13457 = vst [vmem:[#allocation46_spill] sm:$0xff] %v11140_v37  ;;  %v5871_v34 = vadd.f32 %v5870_v60, %v5710_v24  ;;  %v5604_v62 = vadd.f32 %v5603_v20, %v11140_v37  ;;  %v5712_v6 = vmul.f32 %v11140_v37, %v11140_v37 }
 0x760   :  { %v5803_v26 = vadd.f32 %v5802_v44, %v5711_v48 }
 0x761   :  { %v5872_v21 = vadd.f32 %v5871_v34, %v5712_v6 }
 0x763   :  { %v11145_v33 = vpop.f32.mrb[232].mxu0 }
 0x764   :  { %13458 = vst [vmem:[#allocation47_spill] sm:$0xff] %v11145_v33  ;;  %v5536_v30 = vadd.f32 %v5535_v0, %v11145_v33  ;;  %v5713_v49 = vmul.f32 %v11145_v33, %v11145_v33  ;;  %v11150_v58 = vpop.f32.mrb[233].mxu0 }
 0x765   :  { %13459 = vst [vmem:[#allocation48_spill] sm:$0xff] %v11150_v58  ;;  %v5605_v29 = vadd.f32 %v5604_v62, %v11150_v58  ;;  %v5714_v60 = vmul.f32 %v11150_v58, %v11150_v58  ;;  %v11155_v20 = vpop.f32.mrb[234].mxu0 }
 0x766   :  { %13460 = vst [vmem:[#allocation49_spill] sm:$0xff] %v11155_v20  ;;  %v5804_v24 = vadd.f32 %v5803_v26, %v5713_v49  ;;  %v5537_v44 = vadd.f32 %v5536_v30, %v11155_v20  ;;  %v5715_v6 = vmul.f32 %v11155_v20, %v11155_v20  ;;  %v11160_v48 = vpop.f32.mrb[235].mxu0 }
 0x767   :  { %13461 = vst [vmem:[#allocation50_spill] sm:$0xff] %v11160_v48  ;;  %v5873_v0 = vadd.f32 %v5872_v21, %v5714_v60  ;;  %v5606_v34 = vadd.f32 %v5605_v29, %v11160_v48  ;;  %v5716_v33 = vmul.f32 %v11160_v48, %v11160_v48 }
 0x768   :  { %v5805_v62 = vadd.f32 %v5804_v24, %v5715_v6 }
 0x769   :  { %v5874_v37 = vadd.f32 %v5873_v0, %v5716_v33 }
 0x76b   :  { %v11165_v32 = vpop.f32.mrb[236].mxu0 }
 0x76c   :  { %13462 = vst [vmem:[#allocation51_spill] sm:$0xff] %v11165_v32  ;;  %v5538_v58 = vadd.f32 %v5537_v44, %v11165_v32  ;;  %v5717_v30 = vmul.f32 %v11165_v32, %v11165_v32  ;;  %v11170_v26 = vpop.f32.mrb[237].mxu0 }
 0x76d   :  { %13463 = vst [vmem:[#allocation52_spill] sm:$0xff] %v11170_v26  ;;  %v5607_v49 = vadd.f32 %v5606_v34, %v11170_v26  ;;  %v5718_v21 = vmul.f32 %v11170_v26, %v11170_v26  ;;  %v11175_v29 = vpop.f32.mrb[238].mxu0 }
 0x76e   :  { %13464 = vst [vmem:[#allocation53_spill] sm:$0xff] %v11175_v29  ;;  %v5806_v60 = vadd.f32 %v5805_v62, %v5717_v30  ;;  %v5539_v24 = vadd.f32 %v5538_v58, %v11175_v29  ;;  %v5719_v33 = vmul.f32 %v11175_v29, %v11175_v29  ;;  %v11180_v6 = vpop.f32.mrb[239].mxu0 }
 0x76f   :  { %13465 = vst [vmem:[#allocation54_spill] sm:$0xff] %v11180_v6  ;;  %v5875_v44 = vadd.f32 %v5874_v37, %v5718_v21  ;;  %v5608_v0 = vadd.f32 %v5607_v49, %v11180_v6  ;;  %v5720_v32 = vmul.f32 %v11180_v6, %v11180_v6 }
 0x770   :  { %v5807_v34 = vadd.f32 %v5806_v60, %v5719_v33 }
 0x771   :  { %v5876_v48 = vadd.f32 %v5875_v44, %v5720_v32 }
 0x773   :  { %v11185_v20 = vpop.f32.mrb[240].mxu0 }
 0x774   :  { %13466 = vst [vmem:[#allocation55_spill] sm:$0xff] %v11185_v20  ;;  %v5540_v26 = vadd.f32 %v5539_v24, %v11185_v20  ;;  %v5721_v58 = vmul.f32 %v11185_v20, %v11185_v20  ;;  %v11190_v62 = vpop.f32.mrb[241].mxu0 }
 0x775   :  { %13467 = vst [vmem:[#allocation56_spill] sm:$0xff] %v11190_v62  ;;  %v5609_v30 = vadd.f32 %v5608_v0, %v11190_v62  ;;  %v5722_v37 = vmul.f32 %v11190_v62, %v11190_v62  ;;  %v11195_v49 = vpop.f32.mrb[242].mxu0 }
 0x776   :  { %13468 = vst [vmem:[#allocation57_spill] sm:$0xff] %v11195_v49  ;;  %v5808_v21 = vadd.f32 %v5807_v34, %v5721_v58  ;;  %v5541_v60 = vadd.f32 %v5540_v26, %v11195_v49  ;;  %v5723_v32 = vmul.f32 %v11195_v49, %v11195_v49  ;;  %v11200_v33 = vpop.f32.mrb[243].mxu0 }
 0x777   :  { %13469 = vst [vmem:[#allocation58_spill] sm:$0xff] %v11200_v33  ;;  %v5877_v24 = vadd.f32 %v5876_v48, %v5722_v37  ;;  %v5610_v44 = vadd.f32 %v5609_v30, %v11200_v33  ;;  %v5724_v20 = vmul.f32 %v11200_v33, %v11200_v33 }
 0x778   :  { %v5809_v0 = vadd.f32 %v5808_v21, %v5723_v32 }
 0x779   :  { %v5878_v6 = vadd.f32 %v5877_v24, %v5724_v20 }
 0x77b   :  { %v11205_v29 = vpop.f32.mrb[244].mxu0 }
 0x77c   :  { %13470 = vst [vmem:[#allocation59_spill] sm:$0xff] %v11205_v29  ;;  %v5542_v62 = vadd.f32 %v5541_v60, %v11205_v29  ;;  %v5725_v26 = vmul.f32 %v11205_v29, %v11205_v29  ;;  %v11210_v34 = vpop.f32.mrb[245].mxu0 }
 0x77d   :  { %13471 = vst [vmem:[#allocation60_spill] sm:$0xff] %v11210_v34  ;;  %v5611_v58 = vadd.f32 %v5610_v44, %v11210_v34  ;;  %v5726_v48 = vmul.f32 %v11210_v34, %v11210_v34  ;;  %v11215_v30 = vpop.f32.mrb[246].mxu0 }
 0x77e   :  { %13472 = vst [vmem:[#allocation61_spill] sm:$0xff] %v11215_v30  ;;  %v5810_v37 = vadd.f32 %v5809_v0, %v5725_v26  ;;  %v5543_v21 = vadd.f32 %v5542_v62, %v11215_v30  ;;  %v5727_v20 = vmul.f32 %v11215_v30, %v11215_v30  ;;  %v11220_v32 = vpop.f32.mrb[247].mxu0 }
 0x77f   :  { %13473 = vst [vmem:[#allocation62_spill] sm:$0xff] %v11220_v32  ;;  %v5879_v60 = vadd.f32 %v5878_v6, %v5726_v48  ;;  %v5612_v24 = vadd.f32 %v5611_v58, %v11220_v32  ;;  %v5728_v29 = vmul.f32 %v11220_v32, %v11220_v32 }
 0x780   :  { %v5811_v44 = vadd.f32 %v5810_v37, %v5727_v20 }
 0x781   :  { %v5880_v33 = vadd.f32 %v5879_v60, %v5728_v29 }
 0x783   :  { %v11225_v49 = vpop.f32.mrb[248].mxu0 }
 0x784   :  { %13474 = vst [vmem:[#allocation63_spill] sm:$0xff] %v11225_v49  ;;  %v5544_v34 = vadd.f32 %v5543_v21, %v11225_v49  ;;  %v5729_v62 = vmul.f32 %v11225_v49, %v11225_v49  ;;  %v11230_v0 = vpop.f32.mrb[249].mxu0 }
 0x785   :  { %13475 = vst [vmem:[#allocation64_spill] sm:$0xff] %v11230_v0  ;;  %v5613_v26 = vadd.f32 %v5612_v24, %v11230_v0  ;;  %v5730_v6 = vmul.f32 %v11230_v0, %v11230_v0  ;;  %v11235_v58 = vpop.f32.mrb[250].mxu0 }
 0x786   :  { %13476 = vst [vmem:[#allocation65_spill] sm:$0xff] %v11235_v58  ;;  %v5812_v48 = vadd.f32 %v5811_v44, %v5729_v62  ;;  %v5545_v37 = vadd.f32 %v5544_v34, %v11235_v58  ;;  %v5731_v29 = vmul.f32 %v11235_v58, %v11235_v58  ;;  %v11240_v20 = vpop.f32.mrb[251].mxu0 }
 0x787   :  { %13477 = vst [vmem:[#allocation66_spill] sm:$0xff] %v11240_v20  ;;  %v5881_v21 = vadd.f32 %v5880_v33, %v5730_v6  ;;  %v5614_v60 = vadd.f32 %v5613_v26, %v11240_v20  ;;  %v5732_v49 = vmul.f32 %v11240_v20, %v11240_v20 }
 0x788   :  { %v5813_v24 = vadd.f32 %v5812_v48, %v5731_v29 }
 0x789   :  { %v5882_v32 = vadd.f32 %v5881_v21, %v5732_v49 }
 0x78b   :  { %v11245_v30 = vpop.f32.mrb[252].mxu0 }
 0x78c   :  { %13478 = vst [vmem:[#allocation67_spill] sm:$0xff] %v11245_v30  ;;  %v5546_v0 = vadd.f32 %v5545_v37, %v11245_v30  ;;  %v5733_v34 = vmul.f32 %v11245_v30, %v11245_v30  ;;  %v11250_v44 = vpop.f32.mrb[253].mxu0 }
 0x78d   :  { %13479 = vst [vmem:[#allocation68_spill] sm:$0xff] %v11250_v44  ;;  %v5615_v62 = vadd.f32 %v5614_v60, %v11250_v44  ;;  %v5734_v33 = vmul.f32 %v11250_v44, %v11250_v44  ;;  %v11255_v26 = vpop.f32.mrb[254].mxu0 }
 0x78e   :  { %13480 = vst [vmem:[#allocation69_spill] sm:$0xff] %v11255_v26  ;;  %v5814_v6 = vadd.f32 %v5813_v24, %v5733_v34  ;;  %v5547_v48 = vadd.f32 %v5546_v0, %v11255_v26  ;;  %v5735_v49 = vmul.f32 %v11255_v26, %v11255_v26  ;;  %v11260_v29 = vpop.f32.mrb[255].mxu0 }
 0x78f   :  { %13481 = vst [vmem:[#allocation70_spill] sm:$0xff] %v11260_v29  ;;  %v5883_v37 = vadd.f32 %v5882_v32, %v5734_v33  ;;  %v5616_v21 = vadd.f32 %v5615_v62, %v11260_v29  ;;  %v5736_v30 = vmul.f32 %v11260_v29, %v11260_v29 }
 0x790   :  { %v5815_v60 = vadd.f32 %v5814_v6, %v5735_v49 }
 0x791   :  { %v5884_v20 = vadd.f32 %v5883_v37, %v5736_v30 }
 0x793   :  { %v11265_v58 = vpop.f32.mrb[0].mxu0 }
 0x794   :  { %13482 = vst [vmem:[#allocation71_spill] sm:$0xff] %v11265_v58  ;;  %v5548_v44 = vadd.f32 %v5547_v48, %v11265_v58  ;;  %v5737_v0 = vmul.f32 %v11265_v58, %v11265_v58  ;;  %v11270_v24 = vpop.f32.mrb[1].mxu0 }
 0x795   :  { %13483 = vst [vmem:[#allocation72_spill] sm:$0xff] %v11270_v24  ;;  %v5617_v34 = vadd.f32 %v5616_v21, %v11270_v24  ;;  %v5738_v32 = vmul.f32 %v11270_v24, %v11270_v24  ;;  %v11275_v62 = vpop.f32.mrb[2].mxu0 }
 0x796   :  { %13484 = vst [vmem:[#allocation73_spill] sm:$0xff] %v11275_v62  ;;  %v5816_v33 = vadd.f32 %v5815_v60, %v5737_v0  ;;  %v5549_v6 = vadd.f32 %v5548_v44, %v11275_v62  ;;  %v5739_v30 = vmul.f32 %v11275_v62, %v11275_v62  ;;  %v11280_v49 = vpop.f32.mrb[3].mxu0 }
 0x797   :  { %13485 = vst [vmem:[#allocation74_spill] sm:$0xff] %v11280_v49  ;;  %v5885_v48 = vadd.f32 %v5884_v20, %v5738_v32  ;;  %v5618_v37 = vadd.f32 %v5617_v34, %v11280_v49  ;;  %v5740_v58 = vmul.f32 %v11280_v49, %v11280_v49 }
 0x798   :  { %v5817_v21 = vadd.f32 %v5816_v33, %v5739_v30 }
 0x799   :  { %v5886_v29 = vadd.f32 %v5885_v48, %v5740_v58 }
 0x79b   :  { %v11285_v26 = vpop.f32.mrb[4].mxu0 }
 0x79c   :  { %13486 = vst [vmem:[#allocation75_spill] sm:$0xff] %v11285_v26  ;;  %v5550_v24 = vadd.f32 %v5549_v6, %v11285_v26  ;;  %v5741_v44 = vmul.f32 %v11285_v26, %v11285_v26  ;;  %v11290_v60 = vpop.f32.mrb[5].mxu0 }
 0x79d   :  { %13487 = vst [vmem:[#allocation76_spill] sm:$0xff] %v11290_v60  ;;  %v5619_v0 = vadd.f32 %v5618_v37, %v11290_v60  ;;  %v5742_v20 = vmul.f32 %v11290_v60, %v11290_v60  ;;  %v11295_v34 = vpop.f32.mrb[6].mxu0 }
 0x79e   :  { %13488 = vst [vmem:[#allocation77_spill] sm:$0xff] %v11295_v34  ;;  %v5818_v32 = vadd.f32 %v5817_v21, %v5741_v44  ;;  %v5551_v33 = vadd.f32 %v5550_v24, %v11295_v34  ;;  %v5743_v58 = vmul.f32 %v11295_v34, %v11295_v34  ;;  %v11300_v30 = vpop.f32.mrb[7].mxu0 }
 0x79f   :  { %13489 = vst [vmem:[#allocation78_spill] sm:$0xff] %v11300_v30  ;;  %v5887_v6 = vadd.f32 %v5886_v29, %v5742_v20  ;;  %v5620_v48 = vadd.f32 %v5619_v0, %v11300_v30  ;;  %v5744_v26 = vmul.f32 %v11300_v30, %v11300_v30 }
 0x7a0   :  { %v5819_v37 = vadd.f32 %v5818_v32, %v5743_v58 }
 0x7a1   :  { %v5888_v49 = vadd.f32 %v5887_v6, %v5744_v26 }
 0x7a3   :  { %v11305_v62 = vpop.f32.mrb[8].mxu0 }
 0x7a4   :  { %13490 = vst [vmem:[#allocation79_spill] sm:$0xff] %v11305_v62  ;;  %v5552_v60 = vadd.f32 %v5551_v33, %v11305_v62  ;;  %v5745_v24 = vmul.f32 %v11305_v62, %v11305_v62  ;;  %v11310_v21 = vpop.f32.mrb[9].mxu0 }
 0x7a5   :  { %13491 = vst [vmem:[#allocation80_spill] sm:$0xff] %v11310_v21  ;;  %v5621_v44 = vadd.f32 %v5620_v48, %v11310_v21  ;;  %v5746_v29 = vmul.f32 %v11310_v21, %v11310_v21  ;;  %v11315_v0 = vpop.f32.mrb[10].mxu0 }
 0x7a6   :  { %13492 = vst [vmem:[#allocation81_spill] sm:$0xff] %v11315_v0  ;;  %v5820_v20 = vadd.f32 %v5819_v37, %v5745_v24  ;;  %v5553_v32 = vadd.f32 %v5552_v60, %v11315_v0  ;;  %v5747_v26 = vmul.f32 %v11315_v0, %v11315_v0  ;;  %v11320_v58 = vpop.f32.mrb[11].mxu0 }
 0x7a7   :  { %13493 = vst [vmem:[#allocation82_spill] sm:$0xff] %v11320_v58  ;;  %v5889_v33 = vadd.f32 %v5888_v49, %v5746_v29  ;;  %v5622_v6 = vadd.f32 %v5621_v44, %v11320_v58  ;;  %v5748_v62 = vmul.f32 %v11320_v58, %v11320_v58 }
 0x7a8   :  { %v5821_v48 = vadd.f32 %v5820_v20, %v5747_v26 }
 0x7a9   :  { %v5890_v30 = vadd.f32 %v5889_v33, %v5748_v62 }
 0x7ab   :  { %v11325_v34 = vpop.f32.mrb[12].mxu0 }
 0x7ac   :  { %13494 = vst [vmem:[#allocation83_spill] sm:$0xff] %v11325_v34  ;;  %v5554_v21 = vadd.f32 %v5553_v32, %v11325_v34  ;;  %v5749_v60 = vmul.f32 %v11325_v34, %v11325_v34  ;;  %v11330_v37 = vpop.f32.mrb[13].mxu0 }
 0x7ad   :  { %13495 = vst [vmem:[#allocation84_spill] sm:$0xff] %v11330_v37  ;;  %v5623_v24 = vadd.f32 %v5622_v6, %v11330_v37  ;;  %v5750_v49 = vmul.f32 %v11330_v37, %v11330_v37  ;;  %v11335_v44 = vpop.f32.mrb[14].mxu0 }
 0x7ae   :  { %13496 = vst [vmem:[#allocation85_spill] sm:$0xff] %v11335_v44  ;;  %v5822_v29 = vadd.f32 %v5821_v48, %v5749_v60  ;;  %v5555_v20 = vadd.f32 %v5554_v21, %v11335_v44  ;;  %v5751_v62 = vmul.f32 %v11335_v44, %v11335_v44  ;;  %v11340_v26 = vpop.f32.mrb[15].mxu0 }
 0x7af   :  { %13497 = vst [vmem:[#allocation86_spill] sm:$0xff] %v11340_v26  ;;  %v5891_v32 = vadd.f32 %v5890_v30, %v5750_v49  ;;  %v5624_v33 = vadd.f32 %v5623_v24, %v11340_v26  ;;  %v5752_v34 = vmul.f32 %v11340_v26, %v11340_v26 }
 0x7b0   :  { %v5823_v6 = vadd.f32 %v5822_v29, %v5751_v62 }
 0x7b1   :  { %v5892_v58 = vadd.f32 %v5891_v32, %v5752_v34 }
 0x7b3   :  { %v11345_v0 = vpop.f32.mrb[16].mxu0 }
 0x7b4   :  { %13498 = vst [vmem:[#allocation87_spill] sm:$0xff] %v11345_v0  ;;  %v5556_v37 = vadd.f32 %v5555_v20, %v11345_v0  ;;  %v5753_v21 = vmul.f32 %v11345_v0, %v11345_v0  ;;  %v11350_v48 = vpop.f32.mrb[17].mxu0 }
 0x7b5   :  { %13499 = vst [vmem:[#allocation88_spill] sm:$0xff] %v11350_v48  ;;  %v5625_v60 = vadd.f32 %v5624_v33, %v11350_v48  ;;  %v5754_v30 = vmul.f32 %v11350_v48, %v11350_v48  ;;  %v11355_v24 = vpop.f32.mrb[18].mxu0 }
 0x7b6   :  { %13500 = vst [vmem:[#allocation89_spill] sm:$0xff] %v11355_v24  ;;  %v5824_v49 = vadd.f32 %v5823_v6, %v5753_v21  ;;  %v5557_v29 = vadd.f32 %v5556_v37, %v11355_v24  ;;  %v5755_v34 = vmul.f32 %v11355_v24, %v11355_v24  ;;  %v11360_v62 = vpop.f32.mrb[19].mxu0 }
 0x7b7   :  { %13501 = vst [vmem:[#allocation90_spill] sm:$0xff] %v11360_v62  ;;  %v5893_v20 = vadd.f32 %v5892_v58, %v5754_v30  ;;  %v5626_v32 = vadd.f32 %v5625_v60, %v11360_v62  ;;  %v5756_v0 = vmul.f32 %v11360_v62, %v11360_v62 }
 0x7b8   :  { %v5825_v33 = vadd.f32 %v5824_v49, %v5755_v34 }
 0x7b9   :  { %v5894_v26 = vadd.f32 %v5893_v20, %v5756_v0 }
 0x7bb   :  { %v11365_v44 = vpop.f32.mrb[20].mxu0 }
 0x7bc   :  { %13502 = vst [vmem:[#allocation91_spill] sm:$0xff] %v11365_v44  ;;  %v5558_v48 = vadd.f32 %v5557_v29, %v11365_v44  ;;  %v5757_v37 = vmul.f32 %v11365_v44, %v11365_v44  ;;  %v11370_v6 = vpop.f32.mrb[21].mxu0 }
 0x7bd   :  { %13503 = vst [vmem:[#allocation92_spill] sm:$0xff] %v11370_v6  ;;  %v5627_v21 = vadd.f32 %v5626_v32, %v11370_v6  ;;  %v5758_v58 = vmul.f32 %v11370_v6, %v11370_v6  ;;  %v11375_v60 = vpop.f32.mrb[22].mxu0 }
 0x7be   :  { %13504 = vst [vmem:[#allocation93_spill] sm:$0xff] %v11375_v60  ;;  %v5826_v30 = vadd.f32 %v5825_v33, %v5757_v37  ;;  %v5559_v49 = vadd.f32 %v5558_v48, %v11375_v60  ;;  %v5759_v0 = vmul.f32 %v11375_v60, %v11375_v60  ;;  %v11380_v34 = vpop.f32.mrb[23].mxu0 }
 0x7bf   :  { %13505 = vst [vmem:[#allocation94_spill] sm:$0xff] %v11380_v34  ;;  %v5895_v29 = vadd.f32 %v5894_v26, %v5758_v58  ;;  %v5628_v20 = vadd.f32 %v5627_v21, %v11380_v34  ;;  %v5760_v44 = vmul.f32 %v11380_v34, %v11380_v34 }
 0x7c0   :  { %v5827_v32 = vadd.f32 %v5826_v30, %v5759_v0 }
 0x7c1   :  { %v5896_v62 = vadd.f32 %v5895_v29, %v5760_v44 }
 0x7c3   :  { %v11385_v24 = vpop.f32.mrb[24].mxu0 }
 0x7c4   :  { %13506 = vst [vmem:[#allocation95_spill] sm:$0xff] %v11385_v24  ;;  %v5560_v6 = vadd.f32 %v5559_v49, %v11385_v24  ;;  %v5761_v48 = vmul.f32 %v11385_v24, %v11385_v24  ;;  %v11390_v33 = vpop.f32.mrb[25].mxu0 }
 0x7c5   :  { %13507 = vst [vmem:[#allocation96_spill] sm:$0xff] %v11390_v33  ;;  %v5629_v37 = vadd.f32 %v5628_v20, %v11390_v33  ;;  %v5762_v26 = vmul.f32 %v11390_v33, %v11390_v33  ;;  %v11395_v21 = vpop.f32.mrb[26].mxu0 }
 0x7c6   :  { %13508 = vst [vmem:[#allocation97_spill] sm:$0xff] %v11395_v21  ;;  %v5828_v58 = vadd.f32 %v5827_v32, %v5761_v48  ;;  %v5561_v30 = vadd.f32 %v5560_v6, %v11395_v21  ;;  %v5763_v44 = vmul.f32 %v11395_v21, %v11395_v21  ;;  %v11400_v0 = vpop.f32.mrb[27].mxu0 }
 0x7c7   :  { %13509 = vst [vmem:[#allocation98_spill] sm:$0xff] %v11400_v0  ;;  %v5897_v49 = vadd.f32 %v5896_v62, %v5762_v26  ;;  %v5630_v29 = vadd.f32 %v5629_v37, %v11400_v0  ;;  %v5764_v24 = vmul.f32 %v11400_v0, %v11400_v0 }
 0x7c8   :  { %v5829_v20 = vadd.f32 %v5828_v58, %v5763_v44 }
 0x7c9   :  { %v5898_v34 = vadd.f32 %v5897_v49, %v5764_v24 }
 0x7cb   :  { %v11405_v60 = vpop.f32.mrb[28].mxu0 }
 0x7cc   :  { %13510 = vst [vmem:[#allocation99_spill] sm:$0xff] %v11405_v60  ;;  %v5562_v33 = vadd.f32 %v5561_v30, %v11405_v60  ;;  %v5765_v6 = vmul.f32 %v11405_v60, %v11405_v60  ;;  %v11410_v32 = vpop.f32.mrb[29].mxu0 }
 0x7cd   :  { %13511 = vst [vmem:[#allocation100_spill] sm:$0xff] %v11410_v32  ;;  %v5631_v48 = vadd.f32 %v5630_v29, %v11410_v32  ;;  %v5766_v62 = vmul.f32 %v11410_v32, %v11410_v32  ;;  %v11415_v37 = vpop.f32.mrb[30].mxu0 }
 0x7ce   :  { %13512 = vst [vmem:[#allocation101_spill] sm:$0xff] %v11415_v37  ;;  %v5830_v26 = vadd.f32 %v5829_v20, %v5765_v6  ;;  %v5563_v58 = vadd.f32 %v5562_v33, %v11415_v37  ;;  %v5767_v24 = vmul.f32 %v11415_v37, %v11415_v37  ;;  %v5498_v44 = vpop.f32.mrb[31].mxu0 }
 0x7cf   :  { %v5899_v30 = vadd.f32 %v5898_v34, %v5766_v62  ;;  %v5632_v49 = vadd.f32 %v5631_v48, %v5498_v44  ;;  %v5768_v0 = vmul.f32 %v5498_v44, %v5498_v44 }
 0x7d0   :  { %v5564_v60 = vrot.slane %v5563_v58, 4  ;;  %v5831_v21 = vadd.f32 %v5830_v26, %v5767_v24 }
 0x7d1   :  { %v5633_v43 = vrot.slane %v5632_v49, 4  ;;  %v5900_v5 = vadd.f32 %v5899_v30, %v5768_v0 }
 0x7d2   :  { %v5565_v29 = vadd.f32 %v5564_v60, %v5563_v58  ;;  %v5832_v11 = vrot.slane %v5831_v21, 4 }
 0x7d3   :  { %v5634_v38 = vadd.f32 %v5633_v43, %v5632_v49  ;;  %v5901_v32 = vrot.slane %v5900_v5, 4 }
 0x7d4   :  { %v5566_v61 = vrot.slane %v5565_v29, 2  ;;  %v5833_v17 = vadd.f32 %v5832_v11, %v5831_v21 }
 0x7d5   :  { %v5635_v20 = vrot.slane %v5634_v38, 2  ;;  %v5902_v6 = vadd.f32 %v5901_v32, %v5900_v5 }
 0x7d6   :  { %v5567_v33 = vadd.f32 %v5566_v61, %v5565_v29  ;;  %v5834_v55 = vrot.slane %v5833_v17, 2 }
 0x7d7   :  { %v5636_v31 = vadd.f32 %v5635_v20, %v5634_v38  ;;  %v5903_v37 = vrot.slane %v5902_v6, 2 }
 0x7d8   :  { %v5568_v54 = vrot.slane %v5567_v33, 1  ;;  %v5835_v34 = vadd.f32 %v5834_v55, %v5833_v17  ;;  %v7292_v55 = vmov 1966171168  }
 0x7d9   :  { %v5637_v48 = vrot.slane %v5636_v31, 1  ;;  %v5904_v62 = vadd.f32 %v5903_v37, %v5902_v6  ;;  %v5922_v17 = vunpack.c.l.s4 %v7292_v55 }
 0x7da   :  { %v5569_v23 = vadd.f32 %v5568_v54, %v5567_v33  ;;  %v5836_v26 = vrot.slane %v5835_v34, 1 }
 0x7db   :  { %v5638_v24 = vadd.f32 %v5637_v48, %v5636_v31  ;;  %v5905_v0 = vrot.slane %v5904_v62, 1  ;;  %v5923_v54 = vunpack.c.0.s8 %v5922_v17  ;;  %v13513_v31 = vld [vmem:[#allocation32_spill] sm:$0xff] }
 0x7dc   :  { %v5639_v60 = vmul.f32 0.001953125, %v5569_v23  ;;  %v5837_v58 = vadd.f32 %v5836_v26, %v5835_v34  ;;  %v5913_v34 = vld [vmem:[%s12989_s8] sm:$0x3]  ;;  %v5944_v48 = vsub.s32 1, %v13513_v31 }
 0x7dd   :  { %v5640_v43 = vmul.f32 0.001953125, %v5638_v24  ;;  %v5906_v30 = vadd.f32 %v5905_v0, %v5904_v62  ;;  %v5926_v20 = vsub.s32 %v5923_v54, %v13513_v31  ;;  %v13514_v24 = vld [vmem:[#allocation33_spill] sm:$0xff]  ;;  %v13515_v54 = vld [vmem:[#allocation30_spill] sm:$0xff] }
 0x7de   :  { %v5907_v49 = vmul.f32 0.001953125, %v5837_v58  ;;  %v5909_v11 = vmul.f32 %v5639_v60, %v5639_v60 }
 0x7df   :  { %v5908_v21 = vmul.f32 0.001953125, %v5906_v30  ;;  %v5910_v5 = vmul.f32 %v5640_v43, %v5640_v43 }
 0x7e0   :  { %v5911_v61 = vsub.f32 %v5907_v49, %v5909_v11 }
 0x7e1   :  { %v5912_v32 = vsub.f32 %v5908_v21, %v5910_v5 }
 0x7e2   :  { %v5914_v38 = vadd.f32 1e-05, %v5911_v61 }
 0x7e3   :  { %v5915_v29 = vadd.f32 1e-05, %v5912_v32 }
 0x7e4   :  { %7106 = vrsqrt.f32 %v5914_v38 }
 0x7e5   :  { %7108 = vrsqrt.f32 %v5915_v29 }
 0x7ee   :  { %v7107_v37 = vpop.eup %7106 }
 0x7ef   :  { %v7109_v23 = vpop.eup %7108 }
 0x7f0   :  { %v5920_v6 = vcombine.low %v7107_v37, %v7109_v23  ;;  %v13516_v37 = vld [vmem:[#allocation9_spill] sm:$0xff] }
 0x7f2   :  { %v5927_v33 = vrot.slane %v5920_v6, %v5926_v20 }
 0x7f4   :  { %v5934_v62 = vrot.slane %v5927_v33, %v5926_v20 }
 0x7f6   :  { %v5936_v26 = vmul.f32 %v5934_v62, %v5913_v34  ;;  %v13520_v34 = vld [vmem:[#allocation35_spill] sm:$0xff]  ;;  %v13521_v62 = vld [vmem:[#allocation10_spill] sm:$0xff] }
 0x7f8   :  { %v11426_v0 = vrot.slane %v5936_v26, %v13514_v24  ;;  %v11428_v58 = vrot.slane %v5936_v26, %v5944_v48 }
 0x7fa   :  { %v6075_v30 = vmul.f32 %v11428_v58, %v5498_v44  ;;  %v6077_v49 = vmul.f32 %v11426_v0, %v5639_v60  ;;  %v6078_v11 = vmul.f32 %v11428_v58, %v5640_v43  ;;  %v11435_v21 = vmul.f32 %v11426_v0, %v10771_v16 }
 0x7fb   :  { %v11439_v5 = vmul.f32 %v11428_v58, %v10773_v46  ;;  %v11443_v61 = vmul.f32 %v11426_v0, %v10775_v14  ;;  %v11447_v32 = vmul.f32 %v11428_v58, %v10783_v45  ;;  %v11451_v44 = vmul.f32 %v11426_v0, %v10794_v36 }
 0x7fc   :  { %v6081_v60 = vcombine.low %v6077_v49, %v6078_v11  ;;  %v11455_v16 = vmul.f32 %v11428_v58, %v10799_v2  ;;  %v11459_v46 = vmul.f32 %v11426_v0, %v10804_v35  ;;  %v11463_v14 = vmul.f32 %v11428_v58, %v10809_v25 }
 0x7fd   :  { %v11467_v45 = vmul.f32 %v11426_v0, %v10817_v18  ;;  %v11471_v36 = vmul.f32 %v11428_v58, %v10822_v13  ;;  %v11475_v2 = vmul.f32 %v11426_v0, %v10827_v7  ;;  %v11479_v35 = vmul.f32 %v11428_v58, %v10832_v4  ;;  %v6076_v7 = vld [vmem:[%s12990_s9] sm:$0x3]  ;;  %s7293_s9 = smov [#allocation6]  }
 0x7fe   :  { %v6088_v43 = vrot.slane %v6081_v60, %v5926_v20  ;;  %v11483_v25 = vmul.f32 %v11426_v0, %v10840_v56  ;;  %v11487_v18 = vmul.f32 %v11428_v58, %v10845_v9  ;;  %v11491_v13 = vmul.f32 %v11426_v0, %v10850_v22  ;;  %v13524_v60 = vld [vmem:[#allocation39_spill] sm:$0xff]  ;;  %s6626_s29 = sshll.u32 %s7293_s9, 4  ;;  %s6627_s29 = int_to_ptr.vmem [resolvable:$true] %s6626_s29 }
 0x7ff   :  { %v11498_v4 = vmul.f32 %v11428_v58, %v10855_v42  ;;  %v11502_v56 = vmul.f32 %v11426_v0, %v10863_v50  ;;  %v11506_v9 = vmul.f32 %v11428_v58, %v10868_v27  ;;  %v11510_v22 = vmul.f32 %v11426_v0, %v10873_v19  ;;  %s7260_s30 = scalar_lea.vmem %s6627_s29, 16384  ;;  %p7265_p9 = scmp.lt.s32.totalorder %s6627_s29, %s6627_s29 }
 0x800   :  { %v6095_v38 = vrot.slane %v6088_v43, %v5926_v20  ;;  %v11514_v29 = vmul.f32 %v11428_v58, %v10878_v39  ;;  %v11518_v42 = vmul.f32 %v11426_v0, %v10885_v8  ;;  %v11522_v50 = vmul.f32 %v11428_v58, %v10890_v47  ;;  %v13517_v20 = vld [vmem:[#allocation29_spill] sm:$0xff]  ;;  %p7261_p8 = scmp.ne.s32.totalorder %s6627_s29, %s7260_s30  ;;  %p7266_p10 = scmp.lt.s32.totalorder %s7260_s30, %s7260_s30 }
 0x801   :  { %v11526_v27 = vmul.f32 %v11426_v0, %v10895_v12  ;;  %v11530_v19 = vmul.f32 %v11428_v58, %v10900_v51  ;;  %v11534_v39 = vmul.f32 %v11426_v0, %v10905_v53  ;;  %v11538_v8 = vmul.f32 %v11428_v58, %v10910_v3 }
 0x802   :  { %v6097_v55 = vsub.f32 %v6076_v7, %v6095_v38  ;;  %v11542_v47 = vmul.f32 %v11426_v0, %v10915_v15  ;;  %v11546_v12 = vmul.f32 %v11428_v58, %v10920_v1  ;;  %v11550_v51 = vmul.f32 %v11426_v0, %v10925_v10  ;;  %v7110_v7 = vld [vmem:[#allocation3 + $0x3f8] sm:$0xff]  ;;  %p7267_p11 = por %p7266_p10, %p7265_p9 }
 0x803   :  { %v11554_v53 = vmul.f32 %v11428_v58, %v10930_v59  ;;  %v11558_v3 = vmul.f32 %v11426_v0, %v10935_v41  ;;  %v11562_v15 = vmul.f32 %v11428_v58, %v10940_v63  ;;  %v11566_v1 = vmul.f32 %v11426_v0, %v10945_v57 }
 0x804   :  { %v11569_v17 = vrot.slane %v6097_v55, %v13514_v24  ;;  %v11571_v10 = vrot.slane %v6097_v55, %v5944_v48  ;;  %v11575_v59 = vmul.f32 %v11428_v58, %v10950_v40  ;;  %v11579_v41 = vmul.f32 %v11426_v0, %v10955_v28  ;;  %v13518_v28 = vld [vmem:[#allocation31_spill] sm:$0xff]  ;;  %v13522_v24 = vld [vmem:[#allocation34_spill] sm:$0xff]  ;;  %v13525_v55 = vld [vmem:[#allocation36_spill] sm:$0xff]  ;;  %p7268_p12 = pnand %p7267_p11, %p7261_p8 }
 0x805   :  { %v11583_v63 = vmul.f32 %v11428_v58, %v10960_v52  ;;  %v11587_v57 = vmul.f32 %v11426_v0, %v13515_v54  ;;  %v11591_v31 = vmul.f32 %v11428_v58, %v13516_v37  ;;  %v11595_v40 = vmul.f32 %v11426_v0, %v13517_v20  ;;  %v13519_v52 = vld [vmem:[#allocation11_spill] sm:$0xff]  ;;  %v13526_v37 = vld [vmem:[#allocation38_spill] sm:$0xff] }
 0x806   :  { %v6236_v23 = vadd.f32 %v11571_v10, %v6075_v30  ;;  %v11600_v6 = vmul.f32 %v11428_v58, %v13518_v28  ;;  %v11604_v33 = vmul.f32 %v11426_v0, %v13519_v52  ;;  %v11608_v48 = vmul.f32 %v11428_v58, %v13520_v34  ;;  %v13523_v30 = vld [vmem:[#allocation37_spill] sm:$0xff]  ;;  %v13530_v34 = vld [vmem:[#allocation43_spill] sm:$0xff] }
 0x807   :  { %v11612_v26 = vmul.f32 %v11426_v0, %v13521_v62  ;;  %v11616_v49 = vmul.f32 %v11428_v58, %v13522_v24  ;;  %v11620_v11 = vmul.f32 %v11426_v0, %v13523_v30  ;;  %v11624_v43 = vmul.f32 %v11428_v58, %v13524_v60  ;;  %v13528_v28 = vld [vmem:[#allocation41_spill] sm:$0xff]  ;;  %v13532_v24 = vld [vmem:[#allocation19_spill] sm:$0xff] }
 0x808   :  { %v6364_v38 = vadd.f32 %v7110_v7, %v6236_v23  ;;  %v11628_v54 = vmul.f32 %v11426_v0, %v13525_v55  ;;  %v11632_v20 = vmul.f32 %v11428_v58, %v13526_v37  ;;  %v11636_v52 = vmul.f32 %v11426_v0, %v13528_v28  ;;  %v13534_v23 = vld [vmem:[#allocation22_spill] sm:$0xff]  ;;  %v13536_v7 = vld [vmem:[#allocation24_spill] sm:$0xff] }
 0x809   :  { %v11640_v62 = vmul.f32 %v11428_v58, %v13530_v34  ;;  %v11644_v30 = vmul.f32 %v11426_v0, %v13532_v24  ;;  %v11648_v60 = vmul.f32 %v11428_v58, %v13534_v23  ;;  %v11652_v55 = vmul.f32 %v11426_v0, %v13536_v7 }
 0x80a   :  { %13527 = vst [vmem:[#allocation32_spill] sm:$0xff] %v11632_v20  ;;  %13529 = vst [vmem:[#allocation33_spill] sm:$0xff] %v11636_v52  ;;  %v6492_v37 = vmax.f32 %v6364_v38, 0.0  ;;  %v13537_v20 = vld [vmem:[#allocation21_spill] sm:$0xff]  ;;  %v13539_v52 = vld [vmem:[#allocation23_spill] sm:$0xff] }
 0x80b   :  { %13531 = vst [vmem:[#allocation30_spill] sm:$0xff] %v11640_v62  ;;  %13533 = vst [vmem:[#allocation9_spill] sm:$0xff] %v11644_v30  ;;  %v11656_v28 = vmul.f32 %v11428_v58, %v13537_v20  ;;  %v11660_v34 = vmul.f32 %v11426_v0, %v13539_v52  ;;  %v13541_v62 = vld [vmem:[#allocation26_spill] sm:$0xff] }
 0x80c   :  { %13535 = vst [vmem:[#allocation29_spill] sm:$0xff] %v11648_v60  ;;  %v11664_v24 = vmul.f32 %v11428_v58, %v13541_v62  ;;  %v13543_v30 = vld [vmem:[#allocation42_spill] sm:$0xff]  ;;  %v13545_v60 = vld [vmem:[#allocation12_spill] sm:$0xff]  ;;  %6620 = vst [vmem:[#allocation6 + $0x3f8] sm:$0xff] %v6492_v37 }
 0x80d   :  { %13538 = vst [vmem:[#allocation31_spill] sm:$0xff] %v11656_v28  ;;  %13540 = vst [vmem:[#allocation11_spill] sm:$0xff] %v11660_v34  ;;  %v11668_v23 = vmul.f32 %v11426_v0, %v13543_v30  ;;  %v11672_v7 = vmul.f32 %v11428_v58, %v13545_v60  ;;  %v13547_v38 = vld [vmem:[#allocation14_spill] sm:$0xff]  ;;  %v13549_v28 = vld [vmem:[#allocation16_spill] sm:$0xff] }
 0x80e   :  { %13542 = vst [vmem:[#allocation35_spill] sm:$0xff] %v11664_v24  ;;  %v11676_v20 = vmul.f32 %v11426_v0, %v13547_v38  ;;  %v11680_v52 = vmul.f32 %v11428_v58, %v13549_v28  ;;  %v13550_v34 = vld [vmem:[#allocation13_spill] sm:$0xff]  ;;  %v13552_v24 = vld [vmem:[#allocation15_spill] sm:$0xff]  ;;  %v13560_v37 = vld [vmem:[#allocation28_spill] sm:$0xff] }
 0x80f   :  { %13544 = vst [vmem:[#allocation10_spill] sm:$0xff] %v11668_v23  ;;  %13546 = vst [vmem:[#allocation34_spill] sm:$0xff] %v11672_v7  ;;  %v11684_v62 = vmul.f32 %v11426_v0, %v13550_v34  ;;  %v11688_v30 = vmul.f32 %v11428_v58, %v13552_v24  ;;  %v13554_v23 = vld [vmem:[#allocation18_spill] sm:$0xff]  ;;  %v13556_v7 = vld [vmem:[#allocation20_spill] sm:$0xff]  ;;  %v11704_v34 = vmul.f32 %v11428_v58, %v13560_v37 }
 0x810   :  { %13548 = vst [vmem:[#allocation37_spill] sm:$0xff] %v11676_v20  ;;  %v11692_v60 = vmul.f32 %v11426_v0, %v13554_v23  ;;  %v11696_v38 = vmul.f32 %v11428_v58, %v13556_v7  ;;  %v13558_v20 = vld [vmem:[#allocation17_spill] sm:$0xff] }
 0x811   :  { %13551 = vst [vmem:[#allocation39_spill] sm:$0xff] %v11684_v62  ;;  %13553 = vst [vmem:[#allocation36_spill] sm:$0xff] %v11688_v30  ;;  %v11700_v28 = vmul.f32 %v11426_v0, %v13558_v20  ;;  %v13562_v62 = vld [vmem:[#allocation25_spill] sm:$0xff]  ;;  %v13564_v30 = vld [vmem:[#allocation27_spill] sm:$0xff] }
 0x812   :  { %13555 = vst [vmem:[#allocation38_spill] sm:$0xff] %v11692_v60  ;;  %13557 = vst [vmem:[#allocation41_spill] sm:$0xff] %v11696_v38  ;;  %v11708_v24 = vmul.f32 %v11426_v0, %v13562_v62  ;;  %v11712_v23 = vmul.f32 %v11428_v58, %v13564_v30  ;;  %v13566_v60 = vld [vmem:[#allocation40_spill] sm:$0xff] }
 0x813   :  { %13559 = vst [vmem:[#allocation43_spill] sm:$0xff] %v11700_v28  ;;  %13561 = vst [vmem:[#allocation19_spill] sm:$0xff] %v11704_v34  ;;  %v11716_v7 = vmul.f32 %v11426_v0, %v13566_v60  ;;  %v13568_v38 = vld [vmem:[#allocation44_spill] sm:$0xff]  ;;  %v13570_v28 = vld [vmem:[#allocation45_spill] sm:$0xff] }
 0x814   :  { %13563 = vst [vmem:[#allocation22_spill] sm:$0xff] %v11708_v24  ;;  %13565 = vst [vmem:[#allocation24_spill] sm:$0xff] %v11712_v23  ;;  %v11720_v20 = vmul.f32 %v11428_v58, %v13568_v38  ;;  %v11724_v37 = vmul.f32 %v11426_v0, %v13570_v28  ;;  %v13572_v34 = vld [vmem:[#allocation46_spill] sm:$0xff]  ;;  %v13574_v24 = vld [vmem:[#allocation47_spill] sm:$0xff] }
 0x815   :  { %13567 = vst [vmem:[#allocation21_spill] sm:$0xff] %v11716_v7  ;;  %v11728_v62 = vmul.f32 %v11428_v58, %v13572_v34  ;;  %v11732_v30 = vmul.f32 %v11426_v0, %v13574_v24  ;;  %v13576_v23 = vld [vmem:[#allocation48_spill] sm:$0xff]  ;;  %v13578_v7 = vld [vmem:[#allocation49_spill] sm:$0xff] }
 0x816   :  { %13569 = vst [vmem:[#allocation23_spill] sm:$0xff] %v11720_v20  ;;  %13571 = vst [vmem:[#allocation26_spill] sm:$0xff] %v11724_v37  ;;  %v11736_v60 = vmul.f32 %v11428_v58, %v13576_v23  ;;  %v11740_v38 = vmul.f32 %v11426_v0, %v13578_v7  ;;  %v13580_v20 = vld [vmem:[#allocation50_spill] sm:$0xff]  ;;  %v13582_v37 = vld [vmem:[#allocation51_spill] sm:$0xff] }
 0x817   :  { %13573 = vst [vmem:[#allocation42_spill] sm:$0xff] %v11728_v62  ;;  %13575 = vst [vmem:[#allocation12_spill] sm:$0xff] %v11732_v30  ;;  %v11744_v28 = vmul.f32 %v11428_v58, %v13580_v20  ;;  %v11748_v34 = vmul.f32 %v11426_v0, %v13582_v37  ;;  %v13584_v62 = vld [vmem:[#allocation52_spill] sm:$0xff]  ;;  %v13586_v30 = vld [vmem:[#allocation53_spill] sm:$0xff] }
 0x818   :  { %13577 = vst [vmem:[#allocation14_spill] sm:$0xff] %v11736_v60  ;;  %13579 = vst [vmem:[#allocation16_spill] sm:$0xff] %v11740_v38  ;;  %v11752_v24 = vmul.f32 %v11428_v58, %v13584_v62  ;;  %v11756_v23 = vmul.f32 %v11426_v0, %v13586_v30  ;;  %v13588_v60 = vld [vmem:[#allocation54_spill] sm:$0xff]  ;;  %v13590_v38 = vld [vmem:[#allocation55_spill] sm:$0xff] }
 0x819   :  { %13581 = vst [vmem:[#allocation13_spill] sm:$0xff] %v11744_v28  ;;  %13583 = vst [vmem:[#allocation15_spill] sm:$0xff] %v11748_v34  ;;  %v11760_v7 = vmul.f32 %v11428_v58, %v13588_v60  ;;  %v11764_v20 = vmul.f32 %v11426_v0, %v13590_v38  ;;  %v13592_v28 = vld [vmem:[#allocation56_spill] sm:$0xff]  ;;  %v13594_v34 = vld [vmem:[#allocation57_spill] sm:$0xff] }
 0x81a   :  { %13585 = vst [vmem:[#allocation18_spill] sm:$0xff] %v11752_v24  ;;  %13587 = vst [vmem:[#allocation20_spill] sm:$0xff] %v11756_v23  ;;  %v11768_v37 = vmul.f32 %v11428_v58, %v13592_v28  ;;  %v11772_v62 = vmul.f32 %v11426_v0, %v13594_v34  ;;  %v13596_v24 = vld [vmem:[#allocation58_spill] sm:$0xff]  ;;  %v13598_v23 = vld [vmem:[#allocation59_spill] sm:$0xff] }
 0x81b   :  { %13589 = vst [vmem:[#allocation17_spill] sm:$0xff] %v11760_v7  ;;  %13591 = vst [vmem:[#allocation28_spill] sm:$0xff] %v11764_v20  ;;  %v11776_v30 = vmul.f32 %v11428_v58, %v13596_v24  ;;  %v11780_v60 = vmul.f32 %v11426_v0, %v13598_v23  ;;  %v13600_v7 = vld [vmem:[#allocation60_spill] sm:$0xff]  ;;  %v13602_v20 = vld [vmem:[#allocation61_spill] sm:$0xff] }
 0x81c   :  { %13593 = vst [vmem:[#allocation25_spill] sm:$0xff] %v11768_v37  ;;  %13595 = vst [vmem:[#allocation27_spill] sm:$0xff] %v11772_v62  ;;  %v11784_v38 = vmul.f32 %v11428_v58, %v13600_v7  ;;  %v11788_v28 = vmul.f32 %v11426_v0, %v13602_v20  ;;  %v13604_v37 = vld [vmem:[#allocation62_spill] sm:$0xff]  ;;  %v13606_v62 = vld [vmem:[#allocation63_spill] sm:$0xff] }
 0x81d   :  { %13597 = vst [vmem:[#allocation40_spill] sm:$0xff] %v11776_v30  ;;  %13599 = vst [vmem:[#allocation44_spill] sm:$0xff] %v11780_v60  ;;  %v11792_v34 = vmul.f32 %v11428_v58, %v13604_v37  ;;  %v11796_v24 = vmul.f32 %v11426_v0, %v13606_v62  ;;  %v13608_v30 = vld [vmem:[#allocation64_spill] sm:$0xff]  ;;  %v13610_v60 = vld [vmem:[#allocation65_spill] sm:$0xff] }
 0x81e   :  { %13601 = vst [vmem:[#allocation45_spill] sm:$0xff] %v11784_v38  ;;  %13603 = vst [vmem:[#allocation46_spill] sm:$0xff] %v11788_v28  ;;  %v11800_v23 = vmul.f32 %v11428_v58, %v13608_v30  ;;  %v11804_v7 = vmul.f32 %v11426_v0, %v13610_v60  ;;  %v13612_v38 = vld [vmem:[#allocation66_spill] sm:$0xff]  ;;  %v13614_v28 = vld [vmem:[#allocation67_spill] sm:$0xff] }
 0x81f   :  { %13605 = vst [vmem:[#allocation47_spill] sm:$0xff] %v11792_v34  ;;  %13607 = vst [vmem:[#allocation48_spill] sm:$0xff] %v11796_v24  ;;  %v11808_v20 = vmul.f32 %v11428_v58, %v13612_v38  ;;  %v11812_v37 = vmul.f32 %v11426_v0, %v13614_v28  ;;  %v13616_v34 = vld [vmem:[#allocation68_spill] sm:$0xff]  ;;  %v13618_v24 = vld [vmem:[#allocation69_spill] sm:$0xff] }
 0x820   :  { %13609 = vst [vmem:[#allocation49_spill] sm:$0xff] %v11800_v23  ;;  %13611 = vst [vmem:[#allocation50_spill] sm:$0xff] %v11804_v7  ;;  %v11816_v62 = vmul.f32 %v11428_v58, %v13616_v34  ;;  %v11820_v30 = vmul.f32 %v11426_v0, %v13618_v24  ;;  %v13620_v23 = vld [vmem:[#allocation70_spill] sm:$0xff]  ;;  %v13622_v7 = vld [vmem:[#allocation71_spill] sm:$0xff] }
 0x821   :  { %13613 = vst [vmem:[#allocation51_spill] sm:$0xff] %v11808_v20  ;;  %13615 = vst [vmem:[#allocation52_spill] sm:$0xff] %v11812_v37  ;;  %v11824_v60 = vmul.f32 %v11428_v58, %v13620_v23  ;;  %v11828_v38 = vmul.f32 %v11426_v0, %v13622_v7  ;;  %v13624_v20 = vld [vmem:[#allocation72_spill] sm:$0xff]  ;;  %v13626_v37 = vld [vmem:[#allocation73_spill] sm:$0xff] }
 0x822   :  { %13617 = vst [vmem:[#allocation53_spill] sm:$0xff] %v11816_v62  ;;  %13619 = vst [vmem:[#allocation54_spill] sm:$0xff] %v11820_v30  ;;  %v11832_v28 = vmul.f32 %v11428_v58, %v13624_v20  ;;  %v11836_v34 = vmul.f32 %v11426_v0, %v13626_v37  ;;  %v13628_v62 = vld [vmem:[#allocation74_spill] sm:$0xff]  ;;  %v13630_v30 = vld [vmem:[#allocation75_spill] sm:$0xff] }
 0x823   :  { %13621 = vst [vmem:[#allocation55_spill] sm:$0xff] %v11824_v60  ;;  %13623 = vst [vmem:[#allocation56_spill] sm:$0xff] %v11828_v38  ;;  %v11840_v24 = vmul.f32 %v11428_v58, %v13628_v62  ;;  %v11844_v23 = vmul.f32 %v11426_v0, %v13630_v30  ;;  %v13632_v60 = vld [vmem:[#allocation76_spill] sm:$0xff]  ;;  %v13634_v38 = vld [vmem:[#allocation77_spill] sm:$0xff] }
 0x824   :  { %13625 = vst [vmem:[#allocation57_spill] sm:$0xff] %v11832_v28  ;;  %13627 = vst [vmem:[#allocation58_spill] sm:$0xff] %v11836_v34  ;;  %v11848_v7 = vmul.f32 %v11428_v58, %v13632_v60  ;;  %v11852_v20 = vmul.f32 %v11426_v0, %v13634_v38  ;;  %v13636_v28 = vld [vmem:[#allocation78_spill] sm:$0xff]  ;;  %v13638_v34 = vld [vmem:[#allocation79_spill] sm:$0xff] }
 0x825   :  { %13629 = vst [vmem:[#allocation59_spill] sm:$0xff] %v11840_v24  ;;  %13631 = vst [vmem:[#allocation60_spill] sm:$0xff] %v11844_v23  ;;  %v11856_v37 = vmul.f32 %v11428_v58, %v13636_v28  ;;  %v11860_v62 = vmul.f32 %v11426_v0, %v13638_v34  ;;  %v13640_v24 = vld [vmem:[#allocation80_spill] sm:$0xff]  ;;  %v13642_v23 = vld [vmem:[#allocation81_spill] sm:$0xff] }
 0x826   :  { %13633 = vst [vmem:[#allocation61_spill] sm:$0xff] %v11848_v7  ;;  %13635 = vst [vmem:[#allocation62_spill] sm:$0xff] %v11852_v20  ;;  %v11864_v30 = vmul.f32 %v11428_v58, %v13640_v24  ;;  %v11868_v60 = vmul.f32 %v11426_v0, %v13642_v23  ;;  %v13644_v7 = vld [vmem:[#allocation82_spill] sm:$0xff]  ;;  %v13646_v20 = vld [vmem:[#allocation83_spill] sm:$0xff] }
 0x827   :  { %13637 = vst [vmem:[#allocation63_spill] sm:$0xff] %v11856_v37  ;;  %13639 = vst [vmem:[#allocation64_spill] sm:$0xff] %v11860_v62  ;;  %v11872_v38 = vmul.f32 %v11428_v58, %v13644_v7  ;;  %v11876_v28 = vmul.f32 %v11426_v0, %v13646_v20  ;;  %v13648_v37 = vld [vmem:[#allocation84_spill] sm:$0xff]  ;;  %v13650_v62 = vld [vmem:[#allocation85_spill] sm:$0xff] }
 0x828   :  { %13641 = vst [vmem:[#allocation65_spill] sm:$0xff] %v11864_v30  ;;  %13643 = vst [vmem:[#allocation66_spill] sm:$0xff] %v11868_v60  ;;  %v11880_v34 = vmul.f32 %v11428_v58, %v13648_v37  ;;  %v11884_v24 = vmul.f32 %v11426_v0, %v13650_v62  ;;  %v13652_v30 = vld [vmem:[#allocation86_spill] sm:$0xff]  ;;  %v13654_v60 = vld [vmem:[#allocation87_spill] sm:$0xff] }
 0x829   :  { %13645 = vst [vmem:[#allocation67_spill] sm:$0xff] %v11872_v38  ;;  %13647 = vst [vmem:[#allocation68_spill] sm:$0xff] %v11876_v28  ;;  %v11888_v23 = vmul.f32 %v11428_v58, %v13652_v30  ;;  %v11892_v7 = vmul.f32 %v11426_v0, %v13654_v60  ;;  %v13656_v38 = vld [vmem:[#allocation88_spill] sm:$0xff]  ;;  %v13658_v28 = vld [vmem:[#allocation89_spill] sm:$0xff] }
 0x82a   :  { %13649 = vst [vmem:[#allocation69_spill] sm:$0xff] %v11880_v34  ;;  %13651 = vst [vmem:[#allocation70_spill] sm:$0xff] %v11884_v24  ;;  %v11896_v20 = vmul.f32 %v11428_v58, %v13656_v38  ;;  %v11900_v37 = vmul.f32 %v11426_v0, %v13658_v28  ;;  %v13660_v34 = vld [vmem:[#allocation90_spill] sm:$0xff]  ;;  %v13662_v24 = vld [vmem:[#allocation91_spill] sm:$0xff] }
 0x82b   :  { %13653 = vst [vmem:[#allocation71_spill] sm:$0xff] %v11888_v23  ;;  %13655 = vst [vmem:[#allocation72_spill] sm:$0xff] %v11892_v7  ;;  %v11904_v62 = vmul.f32 %v11428_v58, %v13660_v34  ;;  %v11908_v30 = vmul.f32 %v11426_v0, %v13662_v24  ;;  %v13664_v23 = vld [vmem:[#allocation92_spill] sm:$0xff]  ;;  %v13666_v7 = vld [vmem:[#allocation93_spill] sm:$0xff] }
 0x82c   :  { %13657 = vst [vmem:[#allocation73_spill] sm:$0xff] %v11896_v20  ;;  %13659 = vst [vmem:[#allocation74_spill] sm:$0xff] %v11900_v37  ;;  %v11912_v60 = vmul.f32 %v11428_v58, %v13664_v23  ;;  %v11916_v38 = vmul.f32 %v11426_v0, %v13666_v7  ;;  %v13668_v20 = vld [vmem:[#allocation94_spill] sm:$0xff]  ;;  %v13670_v37 = vld [vmem:[#allocation95_spill] sm:$0xff] }
 0x82d   :  { %13661 = vst [vmem:[#allocation75_spill] sm:$0xff] %v11904_v62  ;;  %13663 = vst [vmem:[#allocation76_spill] sm:$0xff] %v11908_v30  ;;  %v11920_v28 = vmul.f32 %v11428_v58, %v13668_v20  ;;  %v11924_v34 = vmul.f32 %v11426_v0, %v13670_v37  ;;  %v13672_v62 = vld [vmem:[#allocation96_spill] sm:$0xff]  ;;  %v13673_v30 = vld [vmem:[#allocation97_spill] sm:$0xff] }
 0x82e   :  { %13665 = vst [vmem:[#allocation77_spill] sm:$0xff] %v11912_v60  ;;  %13667 = vst [vmem:[#allocation78_spill] sm:$0xff] %v11916_v38  ;;  %v11928_v24 = vmul.f32 %v11428_v58, %v13672_v62  ;;  %v11932_v23 = vmul.f32 %v11426_v0, %v13673_v30  ;;  %v13674_v60 = vld [vmem:[#allocation98_spill] sm:$0xff]  ;;  %v13675_v38 = vld [vmem:[#allocation99_spill] sm:$0xff]  ;;  %v11952_v30 = vadd.f32 %v11569_v17, %v11435_v21 }
 0x82f   :  { %13669 = vst [vmem:[#allocation79_spill] sm:$0xff] %v11920_v28  ;;  %13671 = vst [vmem:[#allocation80_spill] sm:$0xff] %v11924_v34  ;;  %v11936_v7 = vmul.f32 %v11428_v58, %v13674_v60  ;;  %v11940_v20 = vmul.f32 %v11426_v0, %v13675_v38  ;;  %v13676_v28 = vld [vmem:[#allocation100_spill] sm:$0xff]  ;;  %v13677_v34 = vld [vmem:[#allocation101_spill] sm:$0xff]  ;;  %v11956_v60 = vadd.f32 %v11571_v10, %v11439_v5 }
 0x830   :  { %v11944_v37 = vmul.f32 %v11428_v58, %v13676_v28  ;;  %v11948_v62 = vmul.f32 %v11426_v0, %v13677_v34  ;;  %v11960_v38 = vadd.f32 %v11569_v17, %v11443_v61  ;;  %v11964_v58 = vadd.f32 %v11571_v10, %v11447_v32  ;;  %v13681_v28 = vld [vmem:[#allocation32_spill] sm:$0xff]  ;;  %v13683_v34 = vld [vmem:[#allocation33_spill] sm:$0xff] }
 0x831   :  { %v11968_v0 = vadd.f32 %v11569_v17, %v11451_v44  ;;  %v11972_v21 = vadd.f32 %v11571_v10, %v11455_v16  ;;  %v11976_v5 = vadd.f32 %v11569_v17, %v11459_v46  ;;  %v11980_v61 = vadd.f32 %v11571_v10, %v11463_v14 }
 0x832   :  { %v11984_v32 = vadd.f32 %v11569_v17, %v11467_v45  ;;  %v11988_v44 = vadd.f32 %v11571_v10, %v11471_v36  ;;  %v11992_v16 = vadd.f32 %v11569_v17, %v11475_v2  ;;  %v11996_v46 = vadd.f32 %v11571_v10, %v11479_v35 }
 0x833   :  { %v12000_v14 = vadd.f32 %v11569_v17, %v11483_v25  ;;  %v12004_v45 = vadd.f32 %v11571_v10, %v11487_v18  ;;  %v12008_v36 = vadd.f32 %v11569_v17, %v11491_v13  ;;  %v12012_v2 = vadd.f32 %v11571_v10, %v11498_v4 }
 0x834   :  { %v12016_v35 = vadd.f32 %v11569_v17, %v11502_v56  ;;  %v12020_v25 = vadd.f32 %v11571_v10, %v11506_v9  ;;  %v12024_v18 = vadd.f32 %v11569_v17, %v11510_v22  ;;  %v12028_v13 = vadd.f32 %v11571_v10, %v11514_v29 }
 0x835   :  { %v12032_v4 = vadd.f32 %v11569_v17, %v11518_v42  ;;  %v12036_v56 = vadd.f32 %v11571_v10, %v11522_v50  ;;  %v12040_v9 = vadd.f32 %v11569_v17, %v11526_v27  ;;  %v12044_v22 = vadd.f32 %v11571_v10, %v11530_v19 }
 0x836   :  { %v12048_v29 = vadd.f32 %v11569_v17, %v11534_v39  ;;  %v12052_v42 = vadd.f32 %v11571_v10, %v11538_v8  ;;  %v12056_v50 = vadd.f32 %v11569_v17, %v11542_v47  ;;  %v12060_v27 = vadd.f32 %v11571_v10, %v11546_v12 }
 0x837   :  { %v12064_v19 = vadd.f32 %v11569_v17, %v11550_v51  ;;  %v12068_v39 = vadd.f32 %v11571_v10, %v11554_v53  ;;  %v12072_v8 = vadd.f32 %v11569_v17, %v11558_v3  ;;  %v12076_v47 = vadd.f32 %v11571_v10, %v11562_v15 }
 0x838   :  { %v12080_v12 = vadd.f32 %v11569_v17, %v11566_v1  ;;  %v12084_v51 = vadd.f32 %v11571_v10, %v11575_v59  ;;  %v12088_v53 = vadd.f32 %v11569_v17, %v11579_v41  ;;  %v12092_v3 = vadd.f32 %v11571_v10, %v11583_v63 }
 0x839   :  { %v12096_v15 = vadd.f32 %v11569_v17, %v11587_v57  ;;  %v12100_v1 = vadd.f32 %v11571_v10, %v11591_v31  ;;  %v12104_v59 = vadd.f32 %v11569_v17, %v11595_v40  ;;  %v12108_v41 = vadd.f32 %v11571_v10, %v11600_v6 }
 0x83a   :  { %v12112_v63 = vadd.f32 %v11569_v17, %v11604_v33  ;;  %v12116_v57 = vadd.f32 %v11571_v10, %v11608_v48  ;;  %v12120_v31 = vadd.f32 %v11569_v17, %v11612_v26  ;;  %v12124_v40 = vadd.f32 %v11571_v10, %v11616_v49 }
 0x83b   :  { %v12128_v6 = vadd.f32 %v11569_v17, %v11620_v11  ;;  %v12132_v33 = vadd.f32 %v11571_v10, %v11624_v43  ;;  %v12136_v48 = vadd.f32 %v11569_v17, %v11628_v54  ;;  %v12140_v26 = vadd.f32 %v11571_v10, %v13681_v28 }
 0x83c   :  { %13678 = vst [vmem:[#allocation81_spill] sm:$0xff] %v12124_v40  ;;  %v12144_v49 = vadd.f32 %v11569_v17, %v13683_v34  ;;  %v13685_v40 = vld [vmem:[#allocation30_spill] sm:$0xff]  ;;  %v12160_v28 = vadd.f32 %v11569_v17, %v11652_v55 }
 0x83d   :  { %13679 = vst [vmem:[#allocation82_spill] sm:$0xff] %v12128_v6  ;;  %13680 = vst [vmem:[#allocation83_spill] sm:$0xff] %v12132_v33  ;;  %v12148_v11 = vadd.f32 %v11571_v10, %v13685_v40  ;;  %v13687_v6 = vld [vmem:[#allocation9_spill] sm:$0xff] }
 0x83e   :  { %13682 = vst [vmem:[#allocation84_spill] sm:$0xff] %v12140_v26  ;;  %13684 = vst [vmem:[#allocation85_spill] sm:$0xff] %v12144_v49  ;;  %v12152_v43 = vadd.f32 %v11569_v17, %v13687_v6  ;;  %v13689_v33 = vld [vmem:[#allocation29_spill] sm:$0xff]  ;;  %v13692_v26 = vld [vmem:[#allocation31_spill] sm:$0xff] }
 0x83f   :  { %13686 = vst [vmem:[#allocation86_spill] sm:$0xff] %v12148_v11  ;;  %v12156_v54 = vadd.f32 %v11571_v10, %v13689_v33  ;;  %13691 = vst [vmem:[#allocation89_spill] sm:$0xff] %v12160_v28  ;;  %v12164_v34 = vadd.f32 %v11571_v10, %v13692_v26  ;;  %v13693_v49 = vld [vmem:[#allocation11_spill] sm:$0xff]  ;;  %v13701_v28 = vld [vmem:[#allocation37_spill] sm:$0xff] }
 0x840   :  { %13688 = vst [vmem:[#allocation87_spill] sm:$0xff] %v12152_v43  ;;  %v12168_v40 = vadd.f32 %v11569_v17, %v13693_v49  ;;  %v13695_v11 = vld [vmem:[#allocation35_spill] sm:$0xff]  ;;  %v13697_v43 = vld [vmem:[#allocation10_spill] sm:$0xff]  ;;  %v12184_v26 = vadd.f32 %v11569_v17, %v13701_v28  ;;  %v12188_v49 = vadd.f32 %v11571_v10, %v11680_v52 }
 0x841   :  { %13690 = vst [vmem:[#allocation88_spill] sm:$0xff] %v12156_v54  ;;  %v12172_v6 = vadd.f32 %v11571_v10, %v13695_v11  ;;  %v12176_v33 = vadd.f32 %v11569_v17, %v13697_v43  ;;  %v13699_v54 = vld [vmem:[#allocation34_spill] sm:$0xff] }
 0x842   :  { %13694 = vst [vmem:[#allocation90_spill] sm:$0xff] %v12168_v40  ;;  %v12180_v55 = vadd.f32 %v11571_v10, %v13699_v54  ;;  %13702 = vst [vmem:[#allocation94_spill] sm:$0xff] %v12184_v26  ;;  %v13704_v40 = vld [vmem:[#allocation39_spill] sm:$0xff] }
 0x843   :  { %13696 = vst [vmem:[#allocation91_spill] sm:$0xff] %v12172_v6  ;;  %13698 = vst [vmem:[#allocation92_spill] sm:$0xff] %v12176_v33  ;;  %v12192_v11 = vadd.f32 %v11569_v17, %v13704_v40  ;;  %v13706_v6 = vld [vmem:[#allocation36_spill] sm:$0xff]  ;;  %v13708_v33 = vld [vmem:[#allocation38_spill] sm:$0xff] }
 0x844   :  { %13700 = vst [vmem:[#allocation93_spill] sm:$0xff] %v12180_v55  ;;  %13703 = vst [vmem:[#allocation95_spill] sm:$0xff] %v12188_v49  ;;  %v12196_v43 = vadd.f32 %v11571_v10, %v13706_v6  ;;  %v12200_v54 = vadd.f32 %v11569_v17, %v13708_v33  ;;  %v13710_v55 = vld [vmem:[#allocation41_spill] sm:$0xff]  ;;  %v13712_v26 = vld [vmem:[#allocation43_spill] sm:$0xff] }
 0x845   :  { %13705 = vst [vmem:[#allocation96_spill] sm:$0xff] %v12192_v11  ;;  %v12204_v28 = vadd.f32 %v11571_v10, %v13710_v55  ;;  %v12208_v52 = vadd.f32 %v11569_v17, %v13712_v26  ;;  %v13714_v49 = vld [vmem:[#allocation19_spill] sm:$0xff]  ;;  %v13716_v11 = vld [vmem:[#allocation22_spill] sm:$0xff] }
 0x846   :  { %13707 = vst [vmem:[#allocation97_spill] sm:$0xff] %v12196_v43  ;;  %13709 = vst [vmem:[#allocation98_spill] sm:$0xff] %v12200_v54  ;;  %v12212_v40 = vadd.f32 %v11571_v10, %v13714_v49  ;;  %v12216_v6 = vadd.f32 %v11569_v17, %v13716_v11  ;;  %v13718_v43 = vld [vmem:[#allocation24_spill] sm:$0xff]  ;;  %v13720_v54 = vld [vmem:[#allocation21_spill] sm:$0xff] }
 0x847   :  { %13711 = vst [vmem:[#allocation99_spill] sm:$0xff] %v12204_v28  ;;  %13713 = vst [vmem:[#allocation100_spill] sm:$0xff] %v12208_v52  ;;  %v12220_v33 = vadd.f32 %v11571_v10, %v13718_v43  ;;  %v12224_v55 = vadd.f32 %v11569_v17, %v13720_v54  ;;  %v13722_v28 = vld [vmem:[#allocation23_spill] sm:$0xff]  ;;  %v13724_v52 = vld [vmem:[#allocation26_spill] sm:$0xff] }
 0x848   :  { %13715 = vst [vmem:[#allocation101_spill] sm:$0xff] %v12212_v40  ;;  %13717 = vst [vmem:[#allocation32_spill] sm:$0xff] %v12216_v6  ;;  %v12228_v26 = vadd.f32 %v11571_v10, %v13722_v28  ;;  %v12232_v49 = vadd.f32 %v11569_v17, %v13724_v52  ;;  %v13726_v40 = vld [vmem:[#allocation42_spill] sm:$0xff]  ;;  %v13728_v6 = vld [vmem:[#allocation12_spill] sm:$0xff] }
 0x849   :  { %13719 = vst [vmem:[#allocation33_spill] sm:$0xff] %v12220_v33  ;;  %13721 = vst [vmem:[#allocation30_spill] sm:$0xff] %v12224_v55  ;;  %v12236_v11 = vadd.f32 %v11571_v10, %v13726_v40  ;;  %v12240_v43 = vadd.f32 %v11569_v17, %v13728_v6  ;;  %v13730_v33 = vld [vmem:[#allocation14_spill] sm:$0xff]  ;;  %v13732_v55 = vld [vmem:[#allocation16_spill] sm:$0xff] }
 0x84a   :  { %13723 = vst [vmem:[#allocation9_spill] sm:$0xff] %v12228_v26  ;;  %13725 = vst [vmem:[#allocation29_spill] sm:$0xff] %v12232_v49  ;;  %v12244_v54 = vadd.f32 %v11571_v10, %v13730_v33  ;;  %v12248_v28 = vadd.f32 %v11569_v17, %v13732_v55  ;;  %v13734_v26 = vld [vmem:[#allocation13_spill] sm:$0xff]  ;;  %v13736_v49 = vld [vmem:[#allocation15_spill] sm:$0xff] }
 0x84b   :  { %13727 = vst [vmem:[#allocation31_spill] sm:$0xff] %v12236_v11  ;;  %13729 = vst [vmem:[#allocation11_spill] sm:$0xff] %v12240_v43  ;;  %v12252_v52 = vadd.f32 %v11571_v10, %v13734_v26  ;;  %v12256_v40 = vadd.f32 %v11569_v17, %v13736_v49  ;;  %v13738_v11 = vld [vmem:[#allocation18_spill] sm:$0xff]  ;;  %v13740_v43 = vld [vmem:[#allocation20_spill] sm:$0xff] }
 0x84c   :  { %13731 = vst [vmem:[#allocation35_spill] sm:$0xff] %v12244_v54  ;;  %13733 = vst [vmem:[#allocation10_spill] sm:$0xff] %v12248_v28  ;;  %v12260_v6 = vadd.f32 %v11571_v10, %v13738_v11  ;;  %v12264_v33 = vadd.f32 %v11569_v17, %v13740_v43  ;;  %v13742_v54 = vld [vmem:[#allocation17_spill] sm:$0xff]  ;;  %v13744_v28 = vld [vmem:[#allocation28_spill] sm:$0xff] }
 0x84d   :  { %13735 = vst [vmem:[#allocation34_spill] sm:$0xff] %v12252_v52  ;;  %13737 = vst [vmem:[#allocation37_spill] sm:$0xff] %v12256_v40  ;;  %v12268_v55 = vadd.f32 %v11571_v10, %v13742_v54  ;;  %v12272_v26 = vadd.f32 %v11569_v17, %v13744_v28  ;;  %v13746_v52 = vld [vmem:[#allocation25_spill] sm:$0xff]  ;;  %v13748_v40 = vld [vmem:[#allocation27_spill] sm:$0xff] }
 0x84e   :  { %13739 = vst [vmem:[#allocation39_spill] sm:$0xff] %v12260_v6  ;;  %13741 = vst [vmem:[#allocation36_spill] sm:$0xff] %v12264_v33  ;;  %v12276_v49 = vadd.f32 %v11571_v10, %v13746_v52  ;;  %v12280_v11 = vadd.f32 %v11569_v17, %v13748_v40  ;;  %v13750_v6 = vld [vmem:[#allocation40_spill] sm:$0xff] }
 0x84f   :  { %13743 = vst [vmem:[#allocation38_spill] sm:$0xff] %v12268_v55  ;;  %13745 = vst [vmem:[#allocation41_spill] sm:$0xff] %v12272_v26  ;;  %v12284_v43 = vadd.f32 %v11571_v10, %v13750_v6  ;;  %v13752_v33 = vld [vmem:[#allocation44_spill] sm:$0xff]  ;;  %v13754_v55 = vld [vmem:[#allocation45_spill] sm:$0xff] }
 0x850   :  { %13747 = vst [vmem:[#allocation43_spill] sm:$0xff] %v12276_v49  ;;  %13749 = vst [vmem:[#allocation19_spill] sm:$0xff] %v12280_v11  ;;  %v12288_v54 = vadd.f32 %v11569_v17, %v13752_v33  ;;  %v12292_v28 = vadd.f32 %v11571_v10, %v13754_v55  ;;  %v13756_v26 = vld [vmem:[#allocation46_spill] sm:$0xff]  ;;  %v13758_v49 = vld [vmem:[#allocation47_spill] sm:$0xff] }
 0x851   :  { %13751 = vst [vmem:[#allocation22_spill] sm:$0xff] %v12284_v43  ;;  %v12296_v52 = vadd.f32 %v11569_v17, %v13756_v26  ;;  %v12300_v40 = vadd.f32 %v11571_v10, %v13758_v49  ;;  %v13760_v11 = vld [vmem:[#allocation48_spill] sm:$0xff]  ;;  %v13762_v43 = vld [vmem:[#allocation49_spill] sm:$0xff] }
 0x852   :  { %13753 = vst [vmem:[#allocation24_spill] sm:$0xff] %v12288_v54  ;;  %13755 = vst [vmem:[#allocation21_spill] sm:$0xff] %v12292_v28  ;;  %v12304_v6 = vadd.f32 %v11569_v17, %v13760_v11  ;;  %v12308_v33 = vadd.f32 %v11571_v10, %v13762_v43  ;;  %v13764_v54 = vld [vmem:[#allocation50_spill] sm:$0xff]  ;;  %v13766_v28 = vld [vmem:[#allocation51_spill] sm:$0xff] }
 0x853   :  { %13757 = vst [vmem:[#allocation23_spill] sm:$0xff] %v12296_v52  ;;  %13759 = vst [vmem:[#allocation26_spill] sm:$0xff] %v12300_v40  ;;  %v12312_v55 = vadd.f32 %v11569_v17, %v13764_v54  ;;  %v12316_v26 = vadd.f32 %v11571_v10, %v13766_v28  ;;  %v13768_v52 = vld [vmem:[#allocation52_spill] sm:$0xff]  ;;  %v13770_v40 = vld [vmem:[#allocation53_spill] sm:$0xff] }
 0x854   :  { %13761 = vst [vmem:[#allocation42_spill] sm:$0xff] %v12304_v6  ;;  %13763 = vst [vmem:[#allocation12_spill] sm:$0xff] %v12308_v33  ;;  %v12320_v49 = vadd.f32 %v11569_v17, %v13768_v52  ;;  %v12324_v11 = vadd.f32 %v11571_v10, %v13770_v40  ;;  %v13772_v6 = vld [vmem:[#allocation54_spill] sm:$0xff]  ;;  %v13774_v33 = vld [vmem:[#allocation55_spill] sm:$0xff] }
 0x855   :  { %13765 = vst [vmem:[#allocation14_spill] sm:$0xff] %v12312_v55  ;;  %13767 = vst [vmem:[#allocation16_spill] sm:$0xff] %v12316_v26  ;;  %v12328_v43 = vadd.f32 %v11569_v17, %v13772_v6  ;;  %v12332_v54 = vadd.f32 %v11571_v10, %v13774_v33  ;;  %v13776_v55 = vld [vmem:[#allocation56_spill] sm:$0xff]  ;;  %v13778_v26 = vld [vmem:[#allocation57_spill] sm:$0xff] }
 0x856   :  { %13769 = vst [vmem:[#allocation13_spill] sm:$0xff] %v12320_v49  ;;  %13771 = vst [vmem:[#allocation15_spill] sm:$0xff] %v12324_v11  ;;  %v12336_v28 = vadd.f32 %v11569_v17, %v13776_v55  ;;  %v12340_v52 = vadd.f32 %v11571_v10, %v13778_v26  ;;  %v13780_v49 = vld [vmem:[#allocation58_spill] sm:$0xff]  ;;  %v13782_v11 = vld [vmem:[#allocation59_spill] sm:$0xff] }
 0x857   :  { %13773 = vst [vmem:[#allocation18_spill] sm:$0xff] %v12328_v43  ;;  %13775 = vst [vmem:[#allocation20_spill] sm:$0xff] %v12332_v54  ;;  %v12344_v40 = vadd.f32 %v11569_v17, %v13780_v49  ;;  %v12348_v6 = vadd.f32 %v11571_v10, %v13782_v11  ;;  %v13784_v43 = vld [vmem:[#allocation60_spill] sm:$0xff]  ;;  %v13786_v54 = vld [vmem:[#allocation61_spill] sm:$0xff] }
 0x858   :  { %13777 = vst [vmem:[#allocation17_spill] sm:$0xff] %v12336_v28  ;;  %13779 = vst [vmem:[#allocation28_spill] sm:$0xff] %v12340_v52  ;;  %v12352_v33 = vadd.f32 %v11569_v17, %v13784_v43  ;;  %v12356_v55 = vadd.f32 %v11571_v10, %v13786_v54  ;;  %v13788_v28 = vld [vmem:[#allocation62_spill] sm:$0xff]  ;;  %v13790_v52 = vld [vmem:[#allocation63_spill] sm:$0xff] }
 0x859   :  { %13781 = vst [vmem:[#allocation25_spill] sm:$0xff] %v12344_v40  ;;  %13783 = vst [vmem:[#allocation27_spill] sm:$0xff] %v12348_v6  ;;  %v12360_v26 = vadd.f32 %v11569_v17, %v13788_v28  ;;  %v12364_v49 = vadd.f32 %v11571_v10, %v13790_v52  ;;  %v13792_v40 = vld [vmem:[#allocation64_spill] sm:$0xff]  ;;  %v13794_v6 = vld [vmem:[#allocation65_spill] sm:$0xff] }
 0x85a   :  { %13785 = vst [vmem:[#allocation40_spill] sm:$0xff] %v12352_v33  ;;  %13787 = vst [vmem:[#allocation44_spill] sm:$0xff] %v12356_v55  ;;  %v12368_v11 = vadd.f32 %v11569_v17, %v13792_v40  ;;  %v12372_v43 = vadd.f32 %v11571_v10, %v13794_v6  ;;  %v13796_v33 = vld [vmem:[#allocation66_spill] sm:$0xff]  ;;  %v13798_v55 = vld [vmem:[#allocation67_spill] sm:$0xff] }
 0x85b   :  { %13789 = vst [vmem:[#allocation45_spill] sm:$0xff] %v12360_v26  ;;  %13791 = vst [vmem:[#allocation46_spill] sm:$0xff] %v12364_v49  ;;  %v12376_v54 = vadd.f32 %v11569_v17, %v13796_v33  ;;  %v12380_v28 = vadd.f32 %v11571_v10, %v13798_v55  ;;  %v13800_v26 = vld [vmem:[#allocation68_spill] sm:$0xff]  ;;  %v13802_v49 = vld [vmem:[#allocation69_spill] sm:$0xff] }
 0x85c   :  { %13793 = vst [vmem:[#allocation47_spill] sm:$0xff] %v12368_v11  ;;  %13795 = vst [vmem:[#allocation48_spill] sm:$0xff] %v12372_v43  ;;  %v12384_v52 = vadd.f32 %v11569_v17, %v13800_v26  ;;  %v12388_v40 = vadd.f32 %v11571_v10, %v13802_v49  ;;  %v13804_v11 = vld [vmem:[#allocation70_spill] sm:$0xff]  ;;  %v13806_v43 = vld [vmem:[#allocation71_spill] sm:$0xff] }
 0x85d   :  { %13797 = vst [vmem:[#allocation49_spill] sm:$0xff] %v12376_v54  ;;  %13799 = vst [vmem:[#allocation50_spill] sm:$0xff] %v12380_v28  ;;  %v12392_v6 = vadd.f32 %v11569_v17, %v13804_v11  ;;  %v12396_v33 = vadd.f32 %v11571_v10, %v13806_v43  ;;  %v13808_v54 = vld [vmem:[#allocation72_spill] sm:$0xff]  ;;  %v13810_v28 = vld [vmem:[#allocation73_spill] sm:$0xff] }
 0x85e   :  { %13801 = vst [vmem:[#allocation51_spill] sm:$0xff] %v12384_v52  ;;  %13803 = vst [vmem:[#allocation52_spill] sm:$0xff] %v12388_v40  ;;  %v12400_v55 = vadd.f32 %v11569_v17, %v13808_v54  ;;  %v12404_v26 = vadd.f32 %v11571_v10, %v13810_v28  ;;  %v13812_v52 = vld [vmem:[#allocation74_spill] sm:$0xff]  ;;  %v13814_v40 = vld [vmem:[#allocation75_spill] sm:$0xff] }
 0x85f   :  { %13805 = vst [vmem:[#allocation53_spill] sm:$0xff] %v12392_v6  ;;  %13807 = vst [vmem:[#allocation54_spill] sm:$0xff] %v12396_v33  ;;  %v12408_v49 = vadd.f32 %v11569_v17, %v13812_v52  ;;  %v12412_v11 = vadd.f32 %v11571_v10, %v13814_v40  ;;  %v13815_v6 = vld [vmem:[#allocation76_spill] sm:$0xff]  ;;  %v13816_v33 = vld [vmem:[#allocation77_spill] sm:$0xff] }
 0x860   :  { %13809 = vst [vmem:[#allocation55_spill] sm:$0xff] %v12400_v55  ;;  %13811 = vst [vmem:[#allocation56_spill] sm:$0xff] %v12404_v26  ;;  %v12416_v43 = vadd.f32 %v11569_v17, %v13815_v6  ;;  %v12420_v54 = vadd.f32 %v11571_v10, %v13816_v33  ;;  %v13817_v55 = vld [vmem:[#allocation78_spill] sm:$0xff]  ;;  %v13818_v26 = vld [vmem:[#allocation79_spill] sm:$0xff]  ;;  %v12436_v6 = vadd.f32 %v11571_v10, %v11928_v24 }
 0x861   :  { %13813 = vst [vmem:[#allocation57_spill] sm:$0xff] %v12408_v49  ;;  %v12424_v28 = vadd.f32 %v11569_v17, %v13817_v55  ;;  %v12428_v52 = vadd.f32 %v11571_v10, %v13818_v26  ;;  %v13819_v49 = vld [vmem:[#allocation80_spill] sm:$0xff]  ;;  %v12440_v33 = vadd.f32 %v11569_v17, %v11932_v23  ;;  %v12444_v55 = vadd.f32 %v11571_v10, %v11936_v7 }
 0x862   :  { %v12432_v40 = vadd.f32 %v11569_v17, %v13819_v49  ;;  %13820 = vst [vmem:[#allocation58_spill] sm:$0xff] %v12436_v6  ;;  %v12448_v26 = vadd.f32 %v11569_v17, %v11940_v20  ;;  %v12452_v49 = vadd.f32 %v11571_v10, %v11944_v37  ;;  %v12456_v24 = vadd.f32 %v11569_v17, %v11948_v62  ;;  %v7111_v6 = vld [vmem:[#allocation3] sm:$0xff]  ;;  %v7116_v62 = vld [vmem:[#allocation3 + $0x28] sm:$0xff] }
 0x863   :  { %13821 = vst [vmem:[#allocation59_spill] sm:$0xff] %v12440_v33  ;;  %13822 = vst [vmem:[#allocation60_spill] sm:$0xff] %v12444_v55  ;;  %v12459_v23 = vadd.f32 %v7111_v6, %v11952_v30  ;;  %v7112_v33 = vld [vmem:[#allocation3 + $0x8] sm:$0xff]  ;;  %v7113_v55 = vld [vmem:[#allocation3 + $0x10] sm:$0xff]  ;;  %v12474_v30 = vadd.f32 %v7116_v62, %v11972_v21 }
 0x864   :  { %13823 = vst [vmem:[#allocation61_spill] sm:$0xff] %v12448_v26  ;;  %v12462_v7 = vadd.f32 %v7112_v33, %v11956_v60  ;;  %v12465_v20 = vadd.f32 %v7113_v55, %v11960_v38  ;;  %v7114_v26 = vld [vmem:[#allocation3 + $0x18] sm:$0xff]  ;;  %v7115_v37 = vld [vmem:[#allocation3 + $0x20] sm:$0xff]  ;;  %v7117_v6 = vld [vmem:[#allocation3 + $0x30] sm:$0xff] }
 0x865   :  { %v12468_v10 = vadd.f32 %v7114_v26, %v11964_v58  ;;  %v12471_v17 = vadd.f32 %v7115_v37, %v11968_v0  ;;  %v12477_v60 = vadd.f32 %v7117_v6, %v11976_v5  ;;  %v7118_v33 = vld [vmem:[#allocation3 + $0x38] sm:$0xff]  ;;  %v7119_v55 = vld [vmem:[#allocation3 + $0x40] sm:$0xff]  ;;  %v7120_v26 = vld [vmem:[#allocation3 + $0x48] sm:$0xff] }
 0x866   :  { %v12480_v38 = vadd.f32 %v7118_v33, %v11980_v61  ;;  %v12483_v58 = vadd.f32 %v7119_v55, %v11984_v32  ;;  %v12486_v0 = vadd.f32 %v7120_v26, %v11988_v44  ;;  %v7121_v37 = vld [vmem:[#allocation3 + $0x50] sm:$0xff]  ;;  %v7122_v62 = vld [vmem:[#allocation3 + $0x58] sm:$0xff]  ;;  %v7123_v6 = vld [vmem:[#allocation3 + $0x60] sm:$0xff] }
 0x867   :  { %v12489_v21 = vadd.f32 %v7121_v37, %v11992_v16  ;;  %v12492_v5 = vadd.f32 %v7122_v62, %v11996_v46  ;;  %v12495_v61 = vadd.f32 %v7123_v6, %v12000_v14  ;;  %v7124_v33 = vld [vmem:[#allocation3 + $0x68] sm:$0xff]  ;;  %v7125_v55 = vld [vmem:[#allocation3 + $0x70] sm:$0xff]  ;;  %v7126_v26 = vld [vmem:[#allocation3 + $0x78] sm:$0xff] }
 0x868   :  { %v12498_v32 = vadd.f32 %v7124_v33, %v12004_v45  ;;  %v12501_v44 = vadd.f32 %v7125_v55, %v12008_v36  ;;  %v12504_v16 = vadd.f32 %v7126_v26, %v12012_v2  ;;  %v7127_v37 = vld [vmem:[#allocation3 + $0x80] sm:$0xff]  ;;  %v7128_v62 = vld [vmem:[#allocation3 + $0x88] sm:$0xff]  ;;  %v7129_v6 = vld [vmem:[#allocation3 + $0x90] sm:$0xff] }
 0x869   :  { %v12507_v46 = vadd.f32 %v7127_v37, %v12016_v35  ;;  %v12510_v14 = vadd.f32 %v7128_v62, %v12020_v25  ;;  %v12513_v45 = vadd.f32 %v7129_v6, %v12024_v18  ;;  %v7130_v33 = vld [vmem:[#allocation3 + $0x98] sm:$0xff]  ;;  %v7131_v55 = vld [vmem:[#allocation3 + $0xa0] sm:$0xff]  ;;  %v7132_v26 = vld [vmem:[#allocation3 + $0xa8] sm:$0xff] }
 0x86a   :  { %v12516_v36 = vadd.f32 %v7130_v33, %v12028_v13  ;;  %v12519_v2 = vadd.f32 %v7131_v55, %v12032_v4  ;;  %v12522_v35 = vadd.f32 %v7132_v26, %v12036_v56  ;;  %v7133_v37 = vld [vmem:[#allocation3 + $0xb0] sm:$0xff]  ;;  %v7134_v62 = vld [vmem:[#allocation3 + $0xb8] sm:$0xff]  ;;  %v7135_v6 = vld [vmem:[#allocation3 + $0xc0] sm:$0xff] }
 0x86b   :  { %v12525_v25 = vadd.f32 %v7133_v37, %v12040_v9  ;;  %v12528_v18 = vadd.f32 %v7134_v62, %v12044_v22  ;;  %v12531_v13 = vadd.f32 %v7135_v6, %v12048_v29  ;;  %v7136_v33 = vld [vmem:[#allocation3 + $0xc8] sm:$0xff]  ;;  %v7137_v55 = vld [vmem:[#allocation3 + $0xd0] sm:$0xff]  ;;  %v7138_v26 = vld [vmem:[#allocation3 + $0xd8] sm:$0xff] }
 0x86c   :  { %v12534_v4 = vadd.f32 %v7136_v33, %v12052_v42  ;;  %v12537_v56 = vadd.f32 %v7137_v55, %v12056_v50  ;;  %v12540_v9 = vadd.f32 %v7138_v26, %v12060_v27  ;;  %v7139_v37 = vld [vmem:[#allocation3 + $0xe0] sm:$0xff]  ;;  %v7140_v62 = vld [vmem:[#allocation3 + $0xe8] sm:$0xff]  ;;  %v7141_v6 = vld [vmem:[#allocation3 + $0xf0] sm:$0xff] }
 0x86d   :  { %v12543_v22 = vadd.f32 %v7139_v37, %v12064_v19  ;;  %v12546_v29 = vadd.f32 %v7140_v62, %v12068_v39  ;;  %v12549_v42 = vadd.f32 %v7141_v6, %v12072_v8  ;;  %v7142_v33 = vld [vmem:[#allocation3 + $0xf8] sm:$0xff]  ;;  %v7143_v55 = vld [vmem:[#allocation3 + $0x100] sm:$0xff]  ;;  %v7144_v26 = vld [vmem:[#allocation3 + $0x108] sm:$0xff] }
 0x86e   :  { %v12552_v50 = vadd.f32 %v7142_v33, %v12076_v47  ;;  %v12555_v27 = vadd.f32 %v7143_v55, %v12080_v12  ;;  %v12558_v19 = vadd.f32 %v7144_v26, %v12084_v51  ;;  %v7145_v37 = vld [vmem:[#allocation3 + $0x110] sm:$0xff]  ;;  %v7146_v62 = vld [vmem:[#allocation3 + $0x118] sm:$0xff]  ;;  %v7147_v6 = vld [vmem:[#allocation3 + $0x120] sm:$0xff] }
 0x86f   :  { %v12561_v39 = vadd.f32 %v7145_v37, %v12088_v53  ;;  %v12564_v8 = vadd.f32 %v7146_v62, %v12092_v3  ;;  %v12567_v47 = vadd.f32 %v7147_v6, %v12096_v15  ;;  %v7148_v33 = vld [vmem:[#allocation3 + $0x128] sm:$0xff]  ;;  %v7149_v55 = vld [vmem:[#allocation3 + $0x130] sm:$0xff]  ;;  %v7150_v26 = vld [vmem:[#allocation3 + $0x138] sm:$0xff] }
 0x870   :  { %v12570_v12 = vadd.f32 %v7148_v33, %v12100_v1  ;;  %v12573_v51 = vadd.f32 %v7149_v55, %v12104_v59  ;;  %v12576_v53 = vadd.f32 %v7150_v26, %v12108_v41  ;;  %v7151_v37 = vld [vmem:[#allocation3 + $0x140] sm:$0xff]  ;;  %v7152_v62 = vld [vmem:[#allocation3 + $0x148] sm:$0xff]  ;;  %v7153_v6 = vld [vmem:[#allocation3 + $0x150] sm:$0xff] }
 0x871   :  { %v12579_v3 = vadd.f32 %v7151_v37, %v12112_v63  ;;  %v12582_v15 = vadd.f32 %v7152_v62, %v12116_v57  ;;  %v12585_v1 = vadd.f32 %v7153_v6, %v12120_v31  ;;  %v7154_v33 = vld [vmem:[#allocation3 + $0x158] sm:$0xff]  ;;  %v7155_v55 = vld [vmem:[#allocation3 + $0x160] sm:$0xff]  ;;  %v7156_v26 = vld [vmem:[#allocation3 + $0x168] sm:$0xff] }
 0x872   :  { %13824 = vst [vmem:[#allocation62_spill] sm:$0xff] %v12570_v12  ;;  %13825 = vst [vmem:[#allocation63_spill] sm:$0xff] %v12573_v51  ;;  %v13829_v12 = vld [vmem:[#allocation81_spill] sm:$0xff]  ;;  %v13831_v51 = vld [vmem:[#allocation82_spill] sm:$0xff] }
 0x873   :  { %13826 = vst [vmem:[#allocation64_spill] sm:$0xff] %v12576_v53  ;;  %13827 = vst [vmem:[#allocation65_spill] sm:$0xff] %v12582_v15  ;;  %v12588_v59 = vadd.f32 %v7154_v33, %v13829_v12  ;;  %v12591_v41 = vadd.f32 %v7155_v55, %v13831_v51  ;;  %v13833_v53 = vld [vmem:[#allocation83_spill] sm:$0xff]  ;;  %v7158_v62 = vld [vmem:[#allocation3 + $0x178] sm:$0xff] }
 0x874   :  { %13828 = vst [vmem:[#allocation66_spill] sm:$0xff] %v12585_v1  ;;  %v12594_v63 = vadd.f32 %v7156_v26, %v13833_v53  ;;  %v7157_v37 = vld [vmem:[#allocation3 + $0x170] sm:$0xff]  ;;  %v13836_v15 = vld [vmem:[#allocation84_spill] sm:$0xff]  ;;  %v7159_v6 = vld [vmem:[#allocation3 + $0x180] sm:$0xff] }
 0x875   :  { %13830 = vst [vmem:[#allocation67_spill] sm:$0xff] %v12588_v59  ;;  %13832 = vst [vmem:[#allocation68_spill] sm:$0xff] %v12591_v41  ;;  %v12597_v57 = vadd.f32 %v7157_v37, %v12136_v48  ;;  %v12600_v31 = vadd.f32 %v7158_v62, %v13836_v15  ;;  %v13837_v1 = vld [vmem:[#allocation85_spill] sm:$0xff]  ;;  %v7160_v33 = vld [vmem:[#allocation3 + $0x188] sm:$0xff] }
 0x876   :  { %13834 = vst [vmem:[#allocation69_spill] sm:$0xff] %v12594_v63  ;;  %v12603_v12 = vadd.f32 %v7159_v6, %v13837_v1  ;;  %v13839_v59 = vld [vmem:[#allocation86_spill] sm:$0xff]  ;;  %v7161_v55 = vld [vmem:[#allocation3 + $0x190] sm:$0xff]  ;;  %v7162_v26 = vld [vmem:[#allocation3 + $0x198] sm:$0xff] }
 0x877   :  { %13835 = vst [vmem:[#allocation70_spill] sm:$0xff] %v12597_v57  ;;  %v12606_v51 = vadd.f32 %v7160_v33, %v13839_v59  ;;  %v13841_v41 = vld [vmem:[#allocation87_spill] sm:$0xff]  ;;  %v13843_v63 = vld [vmem:[#allocation88_spill] sm:$0xff]  ;;  %v7163_v37 = vld [vmem:[#allocation3 + $0x1a0] sm:$0xff] }
 0x878   :  { %13838 = vst [vmem:[#allocation71_spill] sm:$0xff] %v12603_v12  ;;  %v12609_v53 = vadd.f32 %v7161_v55, %v13841_v41  ;;  %v12612_v48 = vadd.f32 %v7162_v26, %v13843_v63  ;;  %v13845_v57 = vld [vmem:[#allocation89_spill] sm:$0xff]  ;;  %v7164_v62 = vld [vmem:[#allocation3 + $0x1a8] sm:$0xff]  ;;  %v7165_v6 = vld [vmem:[#allocation3 + $0x1b0] sm:$0xff] }
 0x879   :  { %13840 = vst [vmem:[#allocation72_spill] sm:$0xff] %v12606_v51  ;;  %v12615_v15 = vadd.f32 %v7163_v37, %v13845_v57  ;;  %v12618_v1 = vadd.f32 %v7164_v62, %v12164_v34  ;;  %v13848_v12 = vld [vmem:[#allocation90_spill] sm:$0xff]  ;;  %v7166_v33 = vld [vmem:[#allocation3 + $0x1b8] sm:$0xff]  ;;  %v13850_v51 = vld [vmem:[#allocation91_spill] sm:$0xff] }
 0x87a   :  { %13842 = vst [vmem:[#allocation73_spill] sm:$0xff] %v12609_v53  ;;  %13844 = vst [vmem:[#allocation74_spill] sm:$0xff] %v12612_v48  ;;  %v12621_v59 = vadd.f32 %v7165_v6, %v13848_v12  ;;  %v12624_v41 = vadd.f32 %v7166_v33, %v13850_v51  ;;  %v7167_v55 = vld [vmem:[#allocation3 + $0x1c0] sm:$0xff]  ;;  %v13852_v53 = vld [vmem:[#allocation92_spill] sm:$0xff] }
 0x87b   :  { %13846 = vst [vmem:[#allocation75_spill] sm:$0xff] %v12615_v15  ;;  %13847 = vst [vmem:[#allocation76_spill] sm:$0xff] %v12618_v1  ;;  %v12627_v63 = vadd.f32 %v7167_v55, %v13852_v53  ;;  %v7168_v26 = vld [vmem:[#allocation3 + $0x1c8] sm:$0xff]  ;;  %v13854_v48 = vld [vmem:[#allocation93_spill] sm:$0xff] }
 0x87c   :  { %13849 = vst [vmem:[#allocation77_spill] sm:$0xff] %v12621_v59  ;;  %13851 = vst [vmem:[#allocation78_spill] sm:$0xff] %v12624_v41  ;;  %v12630_v57 = vadd.f32 %v7168_v26, %v13854_v48  ;;  %v7169_v37 = vld [vmem:[#allocation3 + $0x1d0] sm:$0xff]  ;;  %v13856_v15 = vld [vmem:[#allocation94_spill] sm:$0xff] }
 0x87d   :  { %13853 = vst [vmem:[#allocation79_spill] sm:$0xff] %v12627_v63  ;;  %v12633_v34 = vadd.f32 %v7169_v37, %v13856_v15  ;;  %v7170_v62 = vld [vmem:[#allocation3 + $0x1d8] sm:$0xff]  ;;  %v13858_v1 = vld [vmem:[#allocation95_spill] sm:$0xff]  ;;  %v7171_v6 = vld [vmem:[#allocation3 + $0x1e0] sm:$0xff] }
 0x87e   :  { %13855 = vst [vmem:[#allocation80_spill] sm:$0xff] %v12630_v57  ;;  %v12636_v12 = vadd.f32 %v7170_v62, %v13858_v1  ;;  %v13860_v59 = vld [vmem:[#allocation96_spill] sm:$0xff]  ;;  %v7172_v33 = vld [vmem:[#allocation3 + $0x1e8] sm:$0xff]  ;;  %v13862_v41 = vld [vmem:[#allocation97_spill] sm:$0xff] }
 0x87f   :  { %13857 = vst [vmem:[#allocation81_spill] sm:$0xff] %v12633_v34  ;;  %v12639_v51 = vadd.f32 %v7171_v6, %v13860_v59  ;;  %v12642_v53 = vadd.f32 %v7172_v33, %v13862_v41  ;;  %v7173_v55 = vld [vmem:[#allocation3 + $0x1f0] sm:$0xff]  ;;  %v13864_v63 = vld [vmem:[#allocation98_spill] sm:$0xff]  ;;  %v7174_v26 = vld [vmem:[#allocation3 + $0x1f8] sm:$0xff] }
 0x880   :  { %13859 = vst [vmem:[#allocation82_spill] sm:$0xff] %v12636_v12  ;;  %v12645_v48 = vadd.f32 %v7173_v55, %v13864_v63  ;;  %v13866_v57 = vld [vmem:[#allocation99_spill] sm:$0xff]  ;;  %v7175_v37 = vld [vmem:[#allocation3 + $0x200] sm:$0xff]  ;;  %v13868_v34 = vld [vmem:[#allocation100_spill] sm:$0xff] }
 0x881   :  { %13861 = vst [vmem:[#allocation83_spill] sm:$0xff] %v12639_v51  ;;  %13863 = vst [vmem:[#allocation84_spill] sm:$0xff] %v12642_v53  ;;  %v12648_v15 = vadd.f32 %v7174_v26, %v13866_v57  ;;  %v12651_v1 = vadd.f32 %v7175_v37, %v13868_v34  ;;  %v7176_v62 = vld [vmem:[#allocation3 + $0x208] sm:$0xff]  ;;  %v13870_v12 = vld [vmem:[#allocation101_spill] sm:$0xff] }
 0x882   :  { %13865 = vst [vmem:[#allocation85_spill] sm:$0xff] %v12645_v48  ;;  %v12654_v59 = vadd.f32 %v7176_v62, %v13870_v12  ;;  %v7177_v6 = vld [vmem:[#allocation3 + $0x210] sm:$0xff]  ;;  %v13872_v51 = vld [vmem:[#allocation32_spill] sm:$0xff]  ;;  %v13874_v53 = vld [vmem:[#allocation33_spill] sm:$0xff] }
 0x883   :  { %13867 = vst [vmem:[#allocation86_spill] sm:$0xff] %v12648_v15  ;;  %13869 = vst [vmem:[#allocation87_spill] sm:$0xff] %v12651_v1  ;;  %v12657_v41 = vadd.f32 %v7177_v6, %v13872_v51  ;;  %v7178_v33 = vld [vmem:[#allocation3 + $0x218] sm:$0xff]  ;;  %v7179_v55 = vld [vmem:[#allocation3 + $0x220] sm:$0xff] }
 0x884   :  { %13871 = vst [vmem:[#allocation88_spill] sm:$0xff] %v12654_v59  ;;  %v12660_v63 = vadd.f32 %v7178_v33, %v13874_v53  ;;  %v13876_v48 = vld [vmem:[#allocation30_spill] sm:$0xff]  ;;  %v13878_v15 = vld [vmem:[#allocation9_spill] sm:$0xff]  ;;  %v7181_v37 = vld [vmem:[#allocation3 + $0x230] sm:$0xff] }
 0x885   :  { %13873 = vst [vmem:[#allocation89_spill] sm:$0xff] %v12657_v41  ;;  %v12663_v57 = vadd.f32 %v7179_v55, %v13876_v48  ;;  %v7180_v26 = vld [vmem:[#allocation3 + $0x228] sm:$0xff]  ;;  %v13880_v1 = vld [vmem:[#allocation29_spill] sm:$0xff]  ;;  %v7182_v62 = vld [vmem:[#allocation3 + $0x238] sm:$0xff] }
 0x886   :  { %13875 = vst [vmem:[#allocation90_spill] sm:$0xff] %v12660_v63  ;;  %v12666_v34 = vadd.f32 %v7180_v26, %v13878_v15  ;;  %v12669_v12 = vadd.f32 %v7181_v37, %v13880_v1  ;;  %v13882_v59 = vld [vmem:[#allocation31_spill] sm:$0xff]  ;;  %v7183_v6 = vld [vmem:[#allocation3 + $0x240] sm:$0xff]  ;;  %v7184_v33 = vld [vmem:[#allocation3 + $0x248] sm:$0xff] }
 0x887   :  { %13877 = vst [vmem:[#allocation91_spill] sm:$0xff] %v12663_v57  ;;  %v12672_v51 = vadd.f32 %v7182_v62, %v13882_v59  ;;  %v13884_v41 = vld [vmem:[#allocation11_spill] sm:$0xff]  ;;  %v13888_v57 = vld [vmem:[#allocation10_spill] sm:$0xff]  ;;  %v7186_v26 = vld [vmem:[#allocation3 + $0x258] sm:$0xff] }
 0x888   :  { %13879 = vst [vmem:[#allocation92_spill] sm:$0xff] %v12666_v34  ;;  %13881 = vst [vmem:[#allocation93_spill] sm:$0xff] %v12669_v12  ;;  %v12675_v53 = vadd.f32 %v7183_v6, %v13884_v41  ;;  %v13886_v63 = vld [vmem:[#allocation35_spill] sm:$0xff]  ;;  %v13890_v34 = vld [vmem:[#allocation34_spill] sm:$0xff] }
 0x889   :  { %13883 = vst [vmem:[#allocation94_spill] sm:$0xff] %v12672_v51  ;;  %v12678_v48 = vadd.f32 %v7184_v33, %v13886_v63  ;;  %v7185_v55 = vld [vmem:[#allocation3 + $0x250] sm:$0xff]  ;;  %v12684_v1 = vadd.f32 %v7186_v26, %v13890_v34  ;;  %v7187_v37 = vld [vmem:[#allocation3 + $0x260] sm:$0xff]  ;;  %v7188_v62 = vld [vmem:[#allocation3 + $0x268] sm:$0xff] }
 0x88a   :  { %13885 = vst [vmem:[#allocation95_spill] sm:$0xff] %v12675_v53  ;;  %v12681_v15 = vadd.f32 %v7185_v55, %v13888_v57  ;;  %v13892_v12 = vld [vmem:[#allocation37_spill] sm:$0xff]  ;;  %v13894_v51 = vld [vmem:[#allocation39_spill] sm:$0xff]  ;;  %v13896_v53 = vld [vmem:[#allocation36_spill] sm:$0xff] }
 0x88b   :  { %13887 = vst [vmem:[#allocation96_spill] sm:$0xff] %v12678_v48  ;;  %13891 = vst [vmem:[#allocation98_spill] sm:$0xff] %v12684_v1  ;;  %v12687_v59 = vadd.f32 %v7187_v37, %v13892_v12  ;;  %v12690_v41 = vadd.f32 %v7188_v62, %v13894_v51  ;;  %v7189_v6 = vld [vmem:[#allocation3 + $0x270] sm:$0xff]  ;;  %v7190_v33 = vld [vmem:[#allocation3 + $0x278] sm:$0xff] }
 0x88c   :  { %13889 = vst [vmem:[#allocation97_spill] sm:$0xff] %v12681_v15  ;;  %v12693_v63 = vadd.f32 %v7189_v6, %v13896_v53  ;;  %v13898_v48 = vld [vmem:[#allocation38_spill] sm:$0xff]  ;;  %v7191_v55 = vld [vmem:[#allocation3 + $0x280] sm:$0xff]  ;;  %v13902_v1 = vld [vmem:[#allocation43_spill] sm:$0xff] }
 0x88d   :  { %13893 = vst [vmem:[#allocation99_spill] sm:$0xff] %v12687_v59  ;;  %13895 = vst [vmem:[#allocation100_spill] sm:$0xff] %v12690_v41  ;;  %v12696_v57 = vadd.f32 %v7190_v33, %v13898_v48  ;;  %v13900_v15 = vld [vmem:[#allocation41_spill] sm:$0xff]  ;;  %v7192_v26 = vld [vmem:[#allocation3 + $0x288] sm:$0xff] }
 0x88e   :  { %13897 = vst [vmem:[#allocation101_spill] sm:$0xff] %v12693_v63  ;;  %v12699_v34 = vadd.f32 %v7191_v55, %v13900_v15  ;;  %v12702_v12 = vadd.f32 %v7192_v26, %v13902_v1  ;;  %v7193_v37 = vld [vmem:[#allocation3 + $0x290] sm:$0xff]  ;;  %v7194_v62 = vld [vmem:[#allocation3 + $0x298] sm:$0xff]  ;;  %v13906_v41 = vld [vmem:[#allocation22_spill] sm:$0xff] }
 0x88f   :  { %13899 = vst [vmem:[#allocation32_spill] sm:$0xff] %v12696_v57  ;;  %v13904_v59 = vld [vmem:[#allocation19_spill] sm:$0xff]  ;;  %v12708_v53 = vadd.f32 %v7194_v62, %v13906_v41  ;;  %v7195_v6 = vld [vmem:[#allocation3 + $0x2a0] sm:$0xff]  ;;  %v13908_v63 = vld [vmem:[#allocation24_spill] sm:$0xff] }
 0x890   :  { %13901 = vst [vmem:[#allocation33_spill] sm:$0xff] %v12699_v34  ;;  %13903 = vst [vmem:[#allocation30_spill] sm:$0xff] %v12702_v12  ;;  %v12705_v51 = vadd.f32 %v7193_v37, %v13904_v59  ;;  %v12711_v48 = vadd.f32 %v7195_v6, %v13908_v63  ;;  %v7196_v33 = vld [vmem:[#allocation3 + $0x2a8] sm:$0xff]  ;;  %v13910_v57 = vld [vmem:[#allocation21_spill] sm:$0xff] }
 0x891   :  { %13907 = vst [vmem:[#allocation29_spill] sm:$0xff] %v12708_v53  ;;  %v12714_v15 = vadd.f32 %v7196_v33, %v13910_v57  ;;  %v7197_v55 = vld [vmem:[#allocation3 + $0x2b0] sm:$0xff]  ;;  %v7198_v26 = vld [vmem:[#allocation3 + $0x2b8] sm:$0xff]  ;;  %v13914_v12 = vld [vmem:[#allocation26_spill] sm:$0xff] }
 0x892   :  { %13905 = vst [vmem:[#allocation9_spill] sm:$0xff] %v12705_v51  ;;  %13909 = vst [vmem:[#allocation31_spill] sm:$0xff] %v12711_v48  ;;  %v13912_v34 = vld [vmem:[#allocation23_spill] sm:$0xff]  ;;  %v12720_v59 = vadd.f32 %v7198_v26, %v13914_v12  ;;  %v7199_v37 = vld [vmem:[#allocation3 + $0x2c0] sm:$0xff] }
 0x893   :  { %13911 = vst [vmem:[#allocation11_spill] sm:$0xff] %v12714_v15  ;;  %v12717_v1 = vadd.f32 %v7197_v55, %v13912_v34  ;;  %v13916_v51 = vld [vmem:[#allocation42_spill] sm:$0xff]  ;;  %v13918_v53 = vld [vmem:[#allocation12_spill] sm:$0xff]  ;;  %v7201_v6 = vld [vmem:[#allocation3 + $0x2d0] sm:$0xff] }
 0x894   :  { %13915 = vst [vmem:[#allocation10_spill] sm:$0xff] %v12720_v59  ;;  %v12723_v41 = vadd.f32 %v7199_v37, %v13916_v51  ;;  %v7200_v62 = vld [vmem:[#allocation3 + $0x2c8] sm:$0xff]  ;;  %v7202_v33 = vld [vmem:[#allocation3 + $0x2d8] sm:$0xff]  ;;  %v7203_v55 = vld [vmem:[#allocation3 + $0x2e0] sm:$0xff] }
 0x895   :  { %13913 = vst [vmem:[#allocation35_spill] sm:$0xff] %v12717_v1  ;;  %v12726_v63 = vadd.f32 %v7200_v62, %v13918_v53  ;;  %v13920_v48 = vld [vmem:[#allocation14_spill] sm:$0xff]  ;;  %v13922_v15 = vld [vmem:[#allocation16_spill] sm:$0xff]  ;;  %v13924_v1 = vld [vmem:[#allocation13_spill] sm:$0xff] }
 0x896   :  { %13917 = vst [vmem:[#allocation34_spill] sm:$0xff] %v12723_v41  ;;  %v12729_v57 = vadd.f32 %v7201_v6, %v13920_v48  ;;  %v12732_v34 = vadd.f32 %v7202_v33, %v13922_v15  ;;  %v12735_v12 = vadd.f32 %v7203_v55, %v13924_v1  ;;  %v7204_v26 = vld [vmem:[#allocation3 + $0x2e8] sm:$0xff]  ;;  %v13926_v59 = vld [vmem:[#allocation15_spill] sm:$0xff]  ;;  %v7206_v62 = vld [vmem:[#allocation3 + $0x2f8] sm:$0xff] }
 0x897   :  { %13919 = vst [vmem:[#allocation37_spill] sm:$0xff] %v12726_v63  ;;  %v12738_v51 = vadd.f32 %v7204_v26, %v13926_v59  ;;  %v7205_v37 = vld [vmem:[#allocation3 + $0x2f0] sm:$0xff]  ;;  %v13928_v41 = vld [vmem:[#allocation18_spill] sm:$0xff]  ;;  %v13930_v63 = vld [vmem:[#allocation20_spill] sm:$0xff] }
 0x898   :  { %13921 = vst [vmem:[#allocation39_spill] sm:$0xff] %v12729_v57  ;;  %13923 = vst [vmem:[#allocation36_spill] sm:$0xff] %v12732_v34  ;;  %v12741_v53 = vadd.f32 %v7205_v37, %v13928_v41  ;;  %v12744_v48 = vadd.f32 %v7206_v62, %v13930_v63  ;;  %v7207_v6 = vld [vmem:[#allocation3 + $0x300] sm:$0xff]  ;;  %v7208_v33 = vld [vmem:[#allocation3 + $0x308] sm:$0xff] }
 0x899   :  { %13925 = vst [vmem:[#allocation38_spill] sm:$0xff] %v12735_v12  ;;  %13927 = vst [vmem:[#allocation41_spill] sm:$0xff] %v12738_v51  ;;  %v13932_v57 = vld [vmem:[#allocation17_spill] sm:$0xff]  ;;  %v13934_v34 = vld [vmem:[#allocation28_spill] sm:$0xff] }
 0x89a   :  { %13929 = vst [vmem:[#allocation43_spill] sm:$0xff] %v12741_v53  ;;  %13931 = vst [vmem:[#allocation19_spill] sm:$0xff] %v12744_v48  ;;  %v12747_v15 = vadd.f32 %v7207_v6, %v13932_v57  ;;  %v12750_v1 = vadd.f32 %v7208_v33, %v13934_v34  ;;  %v7209_v55 = vld [vmem:[#allocation3 + $0x310] sm:$0xff]  ;;  %v13936_v12 = vld [vmem:[#allocation25_spill] sm:$0xff] }
 0x89b   :  { %v12753_v59 = vadd.f32 %v7209_v55, %v13936_v12  ;;  %v7210_v26 = vld [vmem:[#allocation3 + $0x318] sm:$0xff]  ;;  %v13938_v51 = vld [vmem:[#allocation27_spill] sm:$0xff]  ;;  %v7211_v37 = vld [vmem:[#allocation3 + $0x320] sm:$0xff] }
 0x89c   :  { %13933 = vst [vmem:[#allocation22_spill] sm:$0xff] %v12747_v15  ;;  %13935 = vst [vmem:[#allocation24_spill] sm:$0xff] %v12750_v1  ;;  %v12756_v41 = vadd.f32 %v7210_v26, %v13938_v51  ;;  %v13940_v53 = vld [vmem:[#allocation40_spill] sm:$0xff]  ;;  %v7212_v62 = vld [vmem:[#allocation3 + $0x328] sm:$0xff] }
 0x89d   :  { %13937 = vst [vmem:[#allocation21_spill] sm:$0xff] %v12753_v59  ;;  %v12759_v63 = vadd.f32 %v7211_v37, %v13940_v53  ;;  %v13942_v48 = vld [vmem:[#allocation44_spill] sm:$0xff]  ;;  %v7213_v6 = vld [vmem:[#allocation3 + $0x330] sm:$0xff]  ;;  %v13944_v15 = vld [vmem:[#allocation45_spill] sm:$0xff] }
 0x89e   :  { %13939 = vst [vmem:[#allocation23_spill] sm:$0xff] %v12756_v41  ;;  %v12762_v57 = vadd.f32 %v7212_v62, %v13942_v48  ;;  %v12765_v34 = vadd.f32 %v7213_v6, %v13944_v15  ;;  %v7214_v33 = vld [vmem:[#allocation3 + $0x338] sm:$0xff]  ;;  %v13946_v1 = vld [vmem:[#allocation46_spill] sm:$0xff]  ;;  %v7215_v55 = vld [vmem:[#allocation3 + $0x340] sm:$0xff] }
 0x89f   :  { %13941 = vst [vmem:[#allocation26_spill] sm:$0xff] %v12759_v63  ;;  %v12768_v12 = vadd.f32 %v7214_v33, %v13946_v1  ;;  %v13948_v59 = vld [vmem:[#allocation47_spill] sm:$0xff]  ;;  %v7216_v26 = vld [vmem:[#allocation3 + $0x348] sm:$0xff]  ;;  %v13950_v41 = vld [vmem:[#allocation48_spill] sm:$0xff] }
 0x8a0   :  { %13943 = vst [vmem:[#allocation42_spill] sm:$0xff] %v12762_v57  ;;  %13945 = vst [vmem:[#allocation12_spill] sm:$0xff] %v12765_v34  ;;  %v12771_v51 = vadd.f32 %v7215_v55, %v13948_v59  ;;  %v12774_v53 = vadd.f32 %v7216_v26, %v13950_v41  ;;  %v7217_v37 = vld [vmem:[#allocation3 + $0x350] sm:$0xff]  ;;  %v13952_v63 = vld [vmem:[#allocation49_spill] sm:$0xff] }
 0x8a1   :  { %13947 = vst [vmem:[#allocation14_spill] sm:$0xff] %v12768_v12  ;;  %v12777_v48 = vadd.f32 %v7217_v37, %v13952_v63  ;;  %v7218_v62 = vld [vmem:[#allocation3 + $0x358] sm:$0xff]  ;;  %v13954_v57 = vld [vmem:[#allocation50_spill] sm:$0xff]  ;;  %v7219_v6 = vld [vmem:[#allocation3 + $0x360] sm:$0xff] }
 0x8a2   :  { %13949 = vst [vmem:[#allocation16_spill] sm:$0xff] %v12771_v51  ;;  %13951 = vst [vmem:[#allocation13_spill] sm:$0xff] %v12774_v53  ;;  %v12780_v15 = vadd.f32 %v7218_v62, %v13954_v57  ;;  %v13956_v34 = vld [vmem:[#allocation51_spill] sm:$0xff]  ;;  %v7220_v33 = vld [vmem:[#allocation3 + $0x368] sm:$0xff] }
 0x8a3   :  { %13953 = vst [vmem:[#allocation15_spill] sm:$0xff] %v12777_v48  ;;  %v12783_v1 = vadd.f32 %v7219_v6, %v13956_v34  ;;  %v13958_v12 = vld [vmem:[#allocation52_spill] sm:$0xff]  ;;  %v7221_v55 = vld [vmem:[#allocation3 + $0x370] sm:$0xff]  ;;  %v13959_v51 = vld [vmem:[#allocation53_spill] sm:$0xff] }
 0x8a4   :  { %13955 = vst [vmem:[#allocation18_spill] sm:$0xff] %v12780_v15  ;;  %v12786_v59 = vadd.f32 %v7220_v33, %v13958_v12  ;;  %v12789_v41 = vadd.f32 %v7221_v55, %v13959_v51  ;;  %v7222_v26 = vld [vmem:[#allocation3 + $0x378] sm:$0xff]  ;;  %v13960_v53 = vld [vmem:[#allocation54_spill] sm:$0xff]  ;;  %v7223_v37 = vld [vmem:[#allocation3 + $0x380] sm:$0xff] }
 0x8a5   :  { %13957 = vst [vmem:[#allocation20_spill] sm:$0xff] %v12783_v1  ;;  %v12792_v63 = vadd.f32 %v7222_v26, %v13960_v53  ;;  %v13961_v48 = vld [vmem:[#allocation55_spill] sm:$0xff]  ;;  %v7224_v62 = vld [vmem:[#allocation3 + $0x388] sm:$0xff]  ;;  %v13962_v15 = vld [vmem:[#allocation56_spill] sm:$0xff] }
 0x8a6   :  { %v12795_v57 = vadd.f32 %v7223_v37, %v13961_v48  ;;  %v12798_v34 = vadd.f32 %v7224_v62, %v13962_v15  ;;  %v7225_v6 = vld [vmem:[#allocation3 + $0x390] sm:$0xff]  ;;  %v13963_v1 = vld [vmem:[#allocation57_spill] sm:$0xff]  ;;  %v7226_v33 = vld [vmem:[#allocation3 + $0x398] sm:$0xff] }
 0x8a7   :  { %v12801_v12 = vadd.f32 %v7225_v6, %v13963_v1  ;;  %v12804_v51 = vadd.f32 %v7226_v33, %v12412_v11  ;;  %v7227_v55 = vld [vmem:[#allocation3 + $0x3a0] sm:$0xff]  ;;  %v7228_v26 = vld [vmem:[#allocation3 + $0x3a8] sm:$0xff]  ;;  %v7229_v37 = vld [vmem:[#allocation3 + $0x3b0] sm:$0xff] }
 0x8a8   :  { %v12807_v53 = vadd.f32 %v7227_v55, %v12416_v43  ;;  %v12810_v48 = vadd.f32 %v7228_v26, %v12420_v54  ;;  %v12813_v15 = vadd.f32 %v7229_v37, %v12424_v28  ;;  %v7230_v62 = vld [vmem:[#allocation3 + $0x3b8] sm:$0xff]  ;;  %v7231_v6 = vld [vmem:[#allocation3 + $0x3c0] sm:$0xff]  ;;  %v7232_v33 = vld [vmem:[#allocation3 + $0x3c8] sm:$0xff] }
 0x8a9   :  { %13964 = vst [vmem:[#allocation17_spill] sm:$0xff] %v12804_v51  ;;  %v12816_v1 = vadd.f32 %v7230_v62, %v12428_v52  ;;  %v12819_v11 = vadd.f32 %v7231_v6, %v12432_v40  ;;  %v13968_v51 = vld [vmem:[#allocation58_spill] sm:$0xff]  ;;  %v7233_v55 = vld [vmem:[#allocation3 + $0x3d0] sm:$0xff]  ;;  %v7234_v26 = vld [vmem:[#allocation3 + $0x3d8] sm:$0xff] }
 0x8aa   :  { %13965 = vst [vmem:[#allocation28_spill] sm:$0xff] %v12807_v53  ;;  %13966 = vst [vmem:[#allocation25_spill] sm:$0xff] %v12810_v48  ;;  %v12822_v43 = vadd.f32 %v7232_v33, %v13968_v51  ;;  %v13969_v53 = vld [vmem:[#allocation59_spill] sm:$0xff]  ;;  %v13970_v48 = vld [vmem:[#allocation60_spill] sm:$0xff]  ;;  %v6365_v33 = vmax.f32 %v12459_v23, 0.0  ;;  %v6375_v23 = vmax.f32 %v12489_v21, 0.0 }
 0x8ab   :  { %13967 = vst [vmem:[#allocation27_spill] sm:$0xff] %v12813_v15  ;;  %v12825_v54 = vadd.f32 %v7233_v55, %v13969_v53  ;;  %v12828_v28 = vadd.f32 %v7234_v26, %v13970_v48  ;;  %v7235_v37 = vld [vmem:[#allocation3 + $0x3e0] sm:$0xff]  ;;  %v7236_v62 = vld [vmem:[#allocation3 + $0x3e8] sm:$0xff]  ;;  %v7237_v6 = vld [vmem:[#allocation3 + $0x3f0] sm:$0xff]  ;;  %v6366_v53 = vmax.f32 %v12462_v7, 0.0  ;;  %v6367_v55 = vmax.f32 %v12465_v20, 0.0 }
 0x8ac   :  { %v13971_v15 = vld [vmem:[#allocation61_spill] sm:$0xff]  ;;  %v12834_v40 = vadd.f32 %v7236_v62, %v12452_v49  ;;  %v12837_v51 = vadd.f32 %v7237_v6, %v12456_v24  ;;  %v6368_v48 = vmax.f32 %v12468_v10, 0.0  ;;  %v6369_v26 = vmax.f32 %v12471_v17, 0.0  ;;  %6493 = vst [vmem:[#allocation6] sm:$0xff] %v6365_v33  ;;  %6503 = vst [vmem:[#allocation6 + $0x50] sm:$0xff] %v6375_v23  ;;  %v13976_v33 = vld [vmem:[#allocation66_spill] sm:$0xff] }
 0x8ad   :  { %v12831_v52 = vadd.f32 %v7235_v37, %v13971_v15  ;;  %v6370_v15 = vmax.f32 %v12474_v30, 0.0  ;;  %v6371_v37 = vmax.f32 %v12477_v60, 0.0  ;;  %v6372_v49 = vmax.f32 %v12480_v38, 0.0  ;;  %6494 = vst [vmem:[#allocation6 + $0x8] sm:$0xff] %v6366_v53  ;;  %6495 = vst [vmem:[#allocation6 + $0x10] sm:$0xff] %v6367_v55  ;;  %v13978_v55 = vld [vmem:[#allocation68_spill] sm:$0xff] }
 0x8ae   :  { %v6373_v62 = vmax.f32 %v12483_v58, 0.0  ;;  %v6374_v24 = vmax.f32 %v12486_v0, 0.0  ;;  %v6376_v7 = vmax.f32 %v12492_v5, 0.0  ;;  %v6377_v20 = vmax.f32 %v12495_v61, 0.0  ;;  %6496 = vst [vmem:[#allocation6 + $0x18] sm:$0xff] %v6368_v48  ;;  %6497 = vst [vmem:[#allocation6 + $0x20] sm:$0xff] %v6369_v26 }
 0x8af   :  { %v6378_v10 = vmax.f32 %v12498_v32, 0.0  ;;  %v6379_v17 = vmax.f32 %v12501_v44, 0.0  ;;  %6498 = vst [vmem:[#allocation6 + $0x28] sm:$0xff] %v6370_v15  ;;  %6499 = vst [vmem:[#allocation6 + $0x30] sm:$0xff] %v6371_v37  ;;  %v6380_v30 = vmax.f32 %v12504_v16, 0.0  ;;  %v6381_v60 = vmax.f32 %v12507_v46, 0.0 }
 0x8b0   :  { %v6382_v38 = vmax.f32 %v12510_v14, 0.0  ;;  %v6383_v58 = vmax.f32 %v12513_v45, 0.0  ;;  %6500 = vst [vmem:[#allocation6 + $0x38] sm:$0xff] %v6372_v49  ;;  %6501 = vst [vmem:[#allocation6 + $0x40] sm:$0xff] %v6373_v62  ;;  %v6384_v0 = vmax.f32 %v12516_v36, 0.0  ;;  %v6385_v21 = vmax.f32 %v12519_v2, 0.0 }
 0x8b1   :  { %6502 = vst [vmem:[#allocation6 + $0x48] sm:$0xff] %v6374_v24  ;;  %v6386_v5 = vmax.f32 %v12522_v35, 0.0  ;;  %v6387_v61 = vmax.f32 %v12525_v25, 0.0  ;;  %6504 = vst [vmem:[#allocation6 + $0x58] sm:$0xff] %v6376_v7  ;;  %v6388_v32 = vmax.f32 %v12528_v18, 0.0  ;;  %v6389_v44 = vmax.f32 %v12531_v13, 0.0 }
 0x8b2   :  { %6505 = vst [vmem:[#allocation6 + $0x60] sm:$0xff] %v6377_v20  ;;  %6506 = vst [vmem:[#allocation6 + $0x68] sm:$0xff] %v6378_v10  ;;  %v6390_v16 = vmax.f32 %v12534_v4, 0.0  ;;  %v6391_v46 = vmax.f32 %v12537_v56, 0.0  ;;  %v6392_v14 = vmax.f32 %v12540_v9, 0.0  ;;  %v6393_v45 = vmax.f32 %v12543_v22, 0.0 }
 0x8b3   :  { %6507 = vst [vmem:[#allocation6 + $0x70] sm:$0xff] %v6379_v17  ;;  %6508 = vst [vmem:[#allocation6 + $0x78] sm:$0xff] %v6380_v30  ;;  %v6394_v36 = vmax.f32 %v12546_v29, 0.0  ;;  %v6395_v2 = vmax.f32 %v12549_v42, 0.0  ;;  %v6396_v35 = vmax.f32 %v12552_v50, 0.0  ;;  %v6397_v25 = vmax.f32 %v12555_v27, 0.0 }
 0x8b4   :  { %6509 = vst [vmem:[#allocation6 + $0x80] sm:$0xff] %v6381_v60  ;;  %6510 = vst [vmem:[#allocation6 + $0x88] sm:$0xff] %v6382_v38  ;;  %v6398_v18 = vmax.f32 %v12558_v19, 0.0  ;;  %v6399_v13 = vmax.f32 %v12561_v39, 0.0  ;;  %v6400_v4 = vmax.f32 %v12564_v8, 0.0  ;;  %v6401_v56 = vmax.f32 %v12567_v47, 0.0 }
 0x8b5   :  { %6511 = vst [vmem:[#allocation6 + $0x90] sm:$0xff] %v6383_v58  ;;  %6512 = vst [vmem:[#allocation6 + $0x98] sm:$0xff] %v6384_v0  ;;  %v13972_v9 = vld [vmem:[#allocation62_spill] sm:$0xff]  ;;  %v13973_v29 = vld [vmem:[#allocation63_spill] sm:$0xff]  ;;  %v6405_v19 = vmax.f32 %v12579_v3, 0.0  ;;  %v6407_v53 = vmax.f32 %v13976_v33, 0.0 }
 0x8b6   :  { %6513 = vst [vmem:[#allocation6 + $0xa0] sm:$0xff] %v6385_v21  ;;  %6514 = vst [vmem:[#allocation6 + $0xa8] sm:$0xff] %v6386_v5  ;;  %v6402_v22 = vmax.f32 %v13972_v9, 0.0  ;;  %v6403_v42 = vmax.f32 %v13973_v29, 0.0  ;;  %v13974_v50 = vld [vmem:[#allocation64_spill] sm:$0xff]  ;;  %v13975_v39 = vld [vmem:[#allocation65_spill] sm:$0xff] }
 0x8b7   :  { %6515 = vst [vmem:[#allocation6 + $0xb0] sm:$0xff] %v6387_v61  ;;  %6516 = vst [vmem:[#allocation6 + $0xb8] sm:$0xff] %v6388_v32  ;;  %v6404_v27 = vmax.f32 %v13974_v50, 0.0  ;;  %v6406_v6 = vmax.f32 %v13975_v39, 0.0  ;;  %v13977_v8 = vld [vmem:[#allocation67_spill] sm:$0xff]  ;;  %v6409_v48 = vmax.f32 %v13978_v55, 0.0 }
 0x8b8   :  { %6517 = vst [vmem:[#allocation6 + $0xc0] sm:$0xff] %v6389_v44  ;;  %6518 = vst [vmem:[#allocation6 + $0xc8] sm:$0xff] %v6390_v16  ;;  %v6408_v47 = vmax.f32 %v13977_v8, 0.0  ;;  %v13979_v26 = vld [vmem:[#allocation69_spill] sm:$0xff]  ;;  %v13980_v37 = vld [vmem:[#allocation70_spill] sm:$0xff]  ;;  %v6412_v3 = vmax.f32 %v12600_v31, 0.0 }
 0x8b9   :  { %6519 = vst [vmem:[#allocation6 + $0xd0] sm:$0xff] %v6391_v46  ;;  %6520 = vst [vmem:[#allocation6 + $0xd8] sm:$0xff] %v6392_v14  ;;  %v6410_v15 = vmax.f32 %v13979_v26, 0.0  ;;  %v6411_v49 = vmax.f32 %v13980_v37, 0.0  ;;  %v13981_v62 = vld [vmem:[#allocation71_spill] sm:$0xff]  ;;  %v13982_v23 = vld [vmem:[#allocation72_spill] sm:$0xff] }
 0x8ba   :  { %6521 = vst [vmem:[#allocation6 + $0xe0] sm:$0xff] %v6393_v45  ;;  %6522 = vst [vmem:[#allocation6 + $0xe8] sm:$0xff] %v6394_v36  ;;  %v6413_v24 = vmax.f32 %v13981_v62, 0.0  ;;  %v6414_v7 = vmax.f32 %v13982_v23, 0.0  ;;  %v13983_v20 = vld [vmem:[#allocation73_spill] sm:$0xff]  ;;  %v13984_v17 = vld [vmem:[#allocation74_spill] sm:$0xff] }
 0x8bb   :  { %6523 = vst [vmem:[#allocation6 + $0xf0] sm:$0xff] %v6395_v2  ;;  %6524 = vst [vmem:[#allocation6 + $0xf8] sm:$0xff] %v6396_v35  ;;  %v6415_v10 = vmax.f32 %v13983_v20, 0.0  ;;  %v6416_v30 = vmax.f32 %v13984_v17, 0.0  ;;  %v13985_v60 = vld [vmem:[#allocation75_spill] sm:$0xff]  ;;  %v13986_v58 = vld [vmem:[#allocation76_spill] sm:$0xff] }
 0x8bc   :  { %6525 = vst [vmem:[#allocation6 + $0x100] sm:$0xff] %v6397_v25  ;;  %6526 = vst [vmem:[#allocation6 + $0x108] sm:$0xff] %v6398_v18  ;;  %v6417_v38 = vmax.f32 %v13985_v60, 0.0  ;;  %v6418_v0 = vmax.f32 %v13986_v58, 0.0  ;;  %v13987_v21 = vld [vmem:[#allocation77_spill] sm:$0xff]  ;;  %v13988_v31 = vld [vmem:[#allocation78_spill] sm:$0xff] }
 0x8bd   :  { %6527 = vst [vmem:[#allocation6 + $0x110] sm:$0xff] %v6399_v13  ;;  %6528 = vst [vmem:[#allocation6 + $0x118] sm:$0xff] %v6400_v4  ;;  %v6419_v5 = vmax.f32 %v13987_v21, 0.0  ;;  %v6420_v61 = vmax.f32 %v13988_v31, 0.0  ;;  %v13989_v32 = vld [vmem:[#allocation79_spill] sm:$0xff]  ;;  %v13990_v16 = vld [vmem:[#allocation80_spill] sm:$0xff] }
 0x8be   :  { %6529 = vst [vmem:[#allocation6 + $0x120] sm:$0xff] %v6401_v56  ;;  %6530 = vst [vmem:[#allocation6 + $0x128] sm:$0xff] %v6402_v22  ;;  %v6421_v44 = vmax.f32 %v13989_v32, 0.0  ;;  %v6422_v46 = vmax.f32 %v13990_v16, 0.0  ;;  %v13991_v14 = vld [vmem:[#allocation81_spill] sm:$0xff]  ;;  %v13992_v36 = vld [vmem:[#allocation82_spill] sm:$0xff] }
 0x8bf   :  { %6531 = vst [vmem:[#allocation6 + $0x130] sm:$0xff] %v6403_v42  ;;  %6532 = vst [vmem:[#allocation6 + $0x138] sm:$0xff] %v6404_v27  ;;  %v6423_v45 = vmax.f32 %v13991_v14, 0.0  ;;  %v6424_v2 = vmax.f32 %v13992_v36, 0.0  ;;  %v13993_v35 = vld [vmem:[#allocation83_spill] sm:$0xff]  ;;  %v13994_v18 = vld [vmem:[#allocation84_spill] sm:$0xff] }
 0x8c0   :  { %6533 = vst [vmem:[#allocation6 + $0x140] sm:$0xff] %v6405_v19  ;;  %6534 = vst [vmem:[#allocation6 + $0x148] sm:$0xff] %v6406_v6  ;;  %v6425_v25 = vmax.f32 %v13993_v35, 0.0  ;;  %v6426_v13 = vmax.f32 %v13994_v18, 0.0  ;;  %v13995_v4 = vld [vmem:[#allocation85_spill] sm:$0xff]  ;;  %v13996_v9 = vld [vmem:[#allocation86_spill] sm:$0xff] }
 0x8c1   :  { %6535 = vst [vmem:[#allocation6 + $0x150] sm:$0xff] %v6407_v53  ;;  %6536 = vst [vmem:[#allocation6 + $0x158] sm:$0xff] %v6408_v47  ;;  %v6427_v56 = vmax.f32 %v13995_v4, 0.0  ;;  %v6428_v22 = vmax.f32 %v13996_v9, 0.0  ;;  %v13997_v29 = vld [vmem:[#allocation87_spill] sm:$0xff]  ;;  %v13998_v50 = vld [vmem:[#allocation88_spill] sm:$0xff] }
 0x8c2   :  { %6537 = vst [vmem:[#allocation6 + $0x160] sm:$0xff] %v6409_v48  ;;  %6538 = vst [vmem:[#allocation6 + $0x168] sm:$0xff] %v6410_v15  ;;  %v6429_v42 = vmax.f32 %v13997_v29, 0.0  ;;  %v6430_v27 = vmax.f32 %v13998_v50, 0.0  ;;  %v13999_v19 = vld [vmem:[#allocation89_spill] sm:$0xff]  ;;  %v14000_v6 = vld [vmem:[#allocation90_spill] sm:$0xff] }
 0x8c3   :  { %6539 = vst [vmem:[#allocation6 + $0x170] sm:$0xff] %v6411_v49  ;;  %6540 = vst [vmem:[#allocation6 + $0x178] sm:$0xff] %v6412_v3  ;;  %v6431_v39 = vmax.f32 %v13999_v19, 0.0  ;;  %v6432_v33 = vmax.f32 %v14000_v6, 0.0  ;;  %v14001_v53 = vld [vmem:[#allocation91_spill] sm:$0xff]  ;;  %v14002_v47 = vld [vmem:[#allocation92_spill] sm:$0xff] }
 0x8c4   :  { %6541 = vst [vmem:[#allocation6 + $0x180] sm:$0xff] %v6413_v24  ;;  %6542 = vst [vmem:[#allocation6 + $0x188] sm:$0xff] %v6414_v7  ;;  %v6433_v8 = vmax.f32 %v14001_v53, 0.0  ;;  %v6434_v55 = vmax.f32 %v14002_v47, 0.0  ;;  %v14003_v48 = vld [vmem:[#allocation93_spill] sm:$0xff]  ;;  %v14004_v15 = vld [vmem:[#allocation94_spill] sm:$0xff] }
 0x8c5   :  { %6543 = vst [vmem:[#allocation6 + $0x190] sm:$0xff] %v6415_v10  ;;  %6544 = vst [vmem:[#allocation6 + $0x198] sm:$0xff] %v6416_v30  ;;  %v6435_v26 = vmax.f32 %v14003_v48, 0.0  ;;  %v6436_v37 = vmax.f32 %v14004_v15, 0.0  ;;  %v14005_v49 = vld [vmem:[#allocation95_spill] sm:$0xff]  ;;  %v14006_v62 = vld [vmem:[#allocation96_spill] sm:$0xff] }
 0x8c6   :  { %6545 = vst [vmem:[#allocation6 + $0x1a0] sm:$0xff] %v6417_v38  ;;  %6546 = vst [vmem:[#allocation6 + $0x1a8] sm:$0xff] %v6418_v0  ;;  %v6437_v3 = vmax.f32 %v14005_v49, 0.0  ;;  %v6438_v24 = vmax.f32 %v14006_v62, 0.0  ;;  %v14007_v23 = vld [vmem:[#allocation97_spill] sm:$0xff]  ;;  %v14008_v20 = vld [vmem:[#allocation98_spill] sm:$0xff] }
 0x8c7   :  { %6547 = vst [vmem:[#allocation6 + $0x1b0] sm:$0xff] %v6419_v5  ;;  %6548 = vst [vmem:[#allocation6 + $0x1b8] sm:$0xff] %v6420_v61  ;;  %v6439_v7 = vmax.f32 %v14007_v23, 0.0  ;;  %v6440_v10 = vmax.f32 %v14008_v20, 0.0  ;;  %v14009_v17 = vld [vmem:[#allocation99_spill] sm:$0xff]  ;;  %v14010_v60 = vld [vmem:[#allocation100_spill] sm:$0xff] }
 0x8c8   :  { %6549 = vst [vmem:[#allocation6 + $0x1c0] sm:$0xff] %v6421_v44  ;;  %6550 = vst [vmem:[#allocation6 + $0x1c8] sm:$0xff] %v6422_v46  ;;  %v6441_v30 = vmax.f32 %v14009_v17, 0.0  ;;  %v6442_v38 = vmax.f32 %v14010_v60, 0.0  ;;  %v14011_v58 = vld [vmem:[#allocation101_spill] sm:$0xff]  ;;  %v14012_v21 = vld [vmem:[#allocation32_spill] sm:$0xff] }
 0x8c9   :  { %6551 = vst [vmem:[#allocation6 + $0x1d0] sm:$0xff] %v6423_v45  ;;  %6552 = vst [vmem:[#allocation6 + $0x1d8] sm:$0xff] %v6424_v2  ;;  %v6443_v0 = vmax.f32 %v14011_v58, 0.0  ;;  %v6444_v5 = vmax.f32 %v14012_v21, 0.0  ;;  %v14013_v31 = vld [vmem:[#allocation33_spill] sm:$0xff]  ;;  %v14014_v32 = vld [vmem:[#allocation30_spill] sm:$0xff] }
 0x8ca   :  { %6553 = vst [vmem:[#allocation6 + $0x1e0] sm:$0xff] %v6425_v25  ;;  %6554 = vst [vmem:[#allocation6 + $0x1e8] sm:$0xff] %v6426_v13  ;;  %v6445_v61 = vmax.f32 %v14013_v31, 0.0  ;;  %v6446_v44 = vmax.f32 %v14014_v32, 0.0  ;;  %v14015_v16 = vld [vmem:[#allocation9_spill] sm:$0xff]  ;;  %v14017_v36 = vld [vmem:[#allocation31_spill] sm:$0xff] }
 0x8cb   :  { %6555 = vst [vmem:[#allocation6 + $0x1f0] sm:$0xff] %v6427_v56  ;;  %6556 = vst [vmem:[#allocation6 + $0x1f8] sm:$0xff] %v6428_v22  ;;  %v6447_v46 = vmax.f32 %v14015_v16, 0.0  ;;  %v14016_v14 = vld [vmem:[#allocation29_spill] sm:$0xff]  ;;  %v6449_v2 = vmax.f32 %v14017_v36, 0.0  ;;  %v14018_v35 = vld [vmem:[#allocation11_spill] sm:$0xff] }
 0x8cc   :  { %6557 = vst [vmem:[#allocation6 + $0x200] sm:$0xff] %v6429_v42  ;;  %6558 = vst [vmem:[#allocation6 + $0x208] sm:$0xff] %v6430_v27  ;;  %v6448_v45 = vmax.f32 %v14016_v14, 0.0  ;;  %v6450_v25 = vmax.f32 %v14018_v35, 0.0  ;;  %v14019_v18 = vld [vmem:[#allocation35_spill] sm:$0xff]  ;;  %v14020_v4 = vld [vmem:[#allocation10_spill] sm:$0xff] }
 0x8cd   :  { %6559 = vst [vmem:[#allocation6 + $0x210] sm:$0xff] %v6431_v39  ;;  %6560 = vst [vmem:[#allocation6 + $0x218] sm:$0xff] %v6432_v33  ;;  %v6451_v13 = vmax.f32 %v14019_v18, 0.0  ;;  %v6452_v56 = vmax.f32 %v14020_v4, 0.0  ;;  %v14021_v9 = vld [vmem:[#allocation34_spill] sm:$0xff]  ;;  %v14022_v29 = vld [vmem:[#allocation37_spill] sm:$0xff] }
 0x8ce   :  { %6561 = vst [vmem:[#allocation6 + $0x220] sm:$0xff] %v6433_v8  ;;  %6562 = vst [vmem:[#allocation6 + $0x228] sm:$0xff] %v6434_v55  ;;  %v6453_v22 = vmax.f32 %v14021_v9, 0.0  ;;  %v6454_v42 = vmax.f32 %v14022_v29, 0.0  ;;  %v14023_v50 = vld [vmem:[#allocation39_spill] sm:$0xff]  ;;  %v14024_v19 = vld [vmem:[#allocation36_spill] sm:$0xff] }
 0x8cf   :  { %6563 = vst [vmem:[#allocation6 + $0x230] sm:$0xff] %v6435_v26  ;;  %6564 = vst [vmem:[#allocation6 + $0x238] sm:$0xff] %v6436_v37  ;;  %v6455_v27 = vmax.f32 %v14023_v50, 0.0  ;;  %v6456_v39 = vmax.f32 %v14024_v19, 0.0  ;;  %v14025_v6 = vld [vmem:[#allocation38_spill] sm:$0xff]  ;;  %v14026_v53 = vld [vmem:[#allocation41_spill] sm:$0xff] }
 0x8d0   :  { %6565 = vst [vmem:[#allocation6 + $0x240] sm:$0xff] %v6437_v3  ;;  %6566 = vst [vmem:[#allocation6 + $0x248] sm:$0xff] %v6438_v24  ;;  %v6457_v33 = vmax.f32 %v14025_v6, 0.0  ;;  %v6458_v8 = vmax.f32 %v14026_v53, 0.0  ;;  %v14027_v47 = vld [vmem:[#allocation43_spill] sm:$0xff]  ;;  %v14029_v15 = vld [vmem:[#allocation22_spill] sm:$0xff] }
 0x8d1   :  { %6567 = vst [vmem:[#allocation6 + $0x250] sm:$0xff] %v6439_v7  ;;  %6568 = vst [vmem:[#allocation6 + $0x258] sm:$0xff] %v6440_v10  ;;  %v6459_v55 = vmax.f32 %v14027_v47, 0.0  ;;  %v14028_v48 = vld [vmem:[#allocation19_spill] sm:$0xff]  ;;  %v6461_v37 = vmax.f32 %v14029_v15, 0.0  ;;  %v14030_v49 = vld [vmem:[#allocation24_spill] sm:$0xff] }
 0x8d2   :  { %6569 = vst [vmem:[#allocation6 + $0x260] sm:$0xff] %v6441_v30  ;;  %6570 = vst [vmem:[#allocation6 + $0x268] sm:$0xff] %v6442_v38  ;;  %v6460_v26 = vmax.f32 %v14028_v48, 0.0  ;;  %v6462_v3 = vmax.f32 %v14030_v49, 0.0  ;;  %v14031_v62 = vld [vmem:[#allocation21_spill] sm:$0xff]  ;;  %v14032_v23 = vld [vmem:[#allocation23_spill] sm:$0xff] }
 0x8d3   :  { %6571 = vst [vmem:[#allocation6 + $0x270] sm:$0xff] %v6443_v0  ;;  %6572 = vst [vmem:[#allocation6 + $0x278] sm:$0xff] %v6444_v5  ;;  %v6463_v24 = vmax.f32 %v14031_v62, 0.0  ;;  %v6464_v7 = vmax.f32 %v14032_v23, 0.0  ;;  %v14033_v20 = vld [vmem:[#allocation26_spill] sm:$0xff]  ;;  %v14035_v60 = vld [vmem:[#allocation12_spill] sm:$0xff] }
 0x8d4   :  { %6573 = vst [vmem:[#allocation6 + $0x280] sm:$0xff] %v6445_v61  ;;  %6574 = vst [vmem:[#allocation6 + $0x288] sm:$0xff] %v6446_v44  ;;  %v6465_v10 = vmax.f32 %v14033_v20, 0.0  ;;  %v14034_v17 = vld [vmem:[#allocation42_spill] sm:$0xff]  ;;  %v6467_v38 = vmax.f32 %v14035_v60, 0.0  ;;  %v14037_v21 = vld [vmem:[#allocation16_spill] sm:$0xff] }
 0x8d5   :  { %6575 = vst [vmem:[#allocation6 + $0x290] sm:$0xff] %v6447_v46  ;;  %6576 = vst [vmem:[#allocation6 + $0x298] sm:$0xff] %v6448_v45  ;;  %v6466_v30 = vmax.f32 %v14034_v17, 0.0  ;;  %v14036_v58 = vld [vmem:[#allocation14_spill] sm:$0xff]  ;;  %v6469_v5 = vmax.f32 %v14037_v21, 0.0  ;;  %v14038_v31 = vld [vmem:[#allocation13_spill] sm:$0xff] }
 0x8d6   :  { %6577 = vst [vmem:[#allocation6 + $0x2a0] sm:$0xff] %v6449_v2  ;;  %6578 = vst [vmem:[#allocation6 + $0x2a8] sm:$0xff] %v6450_v25  ;;  %v6468_v0 = vmax.f32 %v14036_v58, 0.0  ;;  %v6470_v61 = vmax.f32 %v14038_v31, 0.0  ;;  %v14039_v32 = vld [vmem:[#allocation15_spill] sm:$0xff]  ;;  %v14040_v16 = vld [vmem:[#allocation18_spill] sm:$0xff] }
 0x8d7   :  { %6579 = vst [vmem:[#allocation6 + $0x2b0] sm:$0xff] %v6451_v13  ;;  %6580 = vst [vmem:[#allocation6 + $0x2b8] sm:$0xff] %v6452_v56  ;;  %v6471_v44 = vmax.f32 %v14039_v32, 0.0  ;;  %v6472_v46 = vmax.f32 %v14040_v16, 0.0  ;;  %v14041_v14 = vld [vmem:[#allocation20_spill] sm:$0xff]  ;;  %v6474_v36 = vmax.f32 %v12786_v59, 0.0 }
 0x8d8   :  { %6581 = vst [vmem:[#allocation6 + $0x2c0] sm:$0xff] %v6453_v22  ;;  %6582 = vst [vmem:[#allocation6 + $0x2c8] sm:$0xff] %v6454_v42  ;;  %v6473_v45 = vmax.f32 %v14041_v14, 0.0  ;;  %v6475_v2 = vmax.f32 %v12789_v41, 0.0  ;;  %v6476_v35 = vmax.f32 %v12792_v63, 0.0  ;;  %v6477_v25 = vmax.f32 %v12795_v57, 0.0 }
 0x8d9   :  { %6583 = vst [vmem:[#allocation6 + $0x2d0] sm:$0xff] %v6455_v27  ;;  %6584 = vst [vmem:[#allocation6 + $0x2d8] sm:$0xff] %v6456_v39  ;;  %v6478_v18 = vmax.f32 %v12798_v34, 0.0  ;;  %v6479_v13 = vmax.f32 %v12801_v12, 0.0  ;;  %v14042_v59 = vld [vmem:[#allocation17_spill] sm:$0xff]  ;;  %v14043_v4 = vld [vmem:[#allocation28_spill] sm:$0xff] }
 0x8da   :  { %6585 = vst [vmem:[#allocation6 + $0x2e0] sm:$0xff] %v6457_v33  ;;  %6586 = vst [vmem:[#allocation6 + $0x2e8] sm:$0xff] %v6458_v8  ;;  %v6480_v41 = vmax.f32 %v14042_v59, 0.0  ;;  %v6481_v56 = vmax.f32 %v14043_v4, 0.0  ;;  %v14044_v9 = vld [vmem:[#allocation25_spill] sm:$0xff]  ;;  %v14045_v29 = vld [vmem:[#allocation27_spill] sm:$0xff] }
 0x8db   :  { %6587 = vst [vmem:[#allocation6 + $0x2f0] sm:$0xff] %v6459_v55  ;;  %6588 = vst [vmem:[#allocation6 + $0x2f8] sm:$0xff] %v6460_v26  ;;  %v6482_v22 = vmax.f32 %v14044_v9, 0.0  ;;  %v6483_v63 = vmax.f32 %v14045_v29, 0.0  ;;  %v6484_v57 = vmax.f32 %v12816_v1, 0.0  ;;  %v6485_v34 = vmax.f32 %v12819_v11, 0.0 }
 0x8dc   :  { %6589 = vst [vmem:[#allocation6 + $0x300] sm:$0xff] %v6461_v37  ;;  %6590 = vst [vmem:[#allocation6 + $0x308] sm:$0xff] %v6462_v3  ;;  %v6486_v12 = vmax.f32 %v12822_v43, 0.0  ;;  %v6487_v42 = vmax.f32 %v12825_v54, 0.0  ;;  %v6488_v50 = vmax.f32 %v12828_v28, 0.0  ;;  %v6489_v27 = vmax.f32 %v12831_v52, 0.0 }
 0x8dd   :  { %6591 = vst [vmem:[#allocation6 + $0x310] sm:$0xff] %v6463_v24  ;;  %6592 = vst [vmem:[#allocation6 + $0x318] sm:$0xff] %v6464_v7  ;;  %v6490_v19 = vmax.f32 %v12834_v40, 0.0  ;;  %v6491_v39 = vmax.f32 %v12837_v51, 0.0 }
 0x8de   :  { %6593 = vst [vmem:[#allocation6 + $0x320] sm:$0xff] %v6465_v10  ;;  %6594 = vst [vmem:[#allocation6 + $0x328] sm:$0xff] %v6466_v30 }
 0x8df   :  { %6595 = vst [vmem:[#allocation6 + $0x330] sm:$0xff] %v6467_v38  ;;  %6596 = vst [vmem:[#allocation6 + $0x338] sm:$0xff] %v6468_v0 }
 0x8e0   :  { %6597 = vst [vmem:[#allocation6 + $0x340] sm:$0xff] %v6469_v5  ;;  %6598 = vst [vmem:[#allocation6 + $0x348] sm:$0xff] %v6470_v61 }
 0x8e1   :  { %6599 = vst [vmem:[#allocation6 + $0x350] sm:$0xff] %v6471_v44  ;;  %6600 = vst [vmem:[#allocation6 + $0x358] sm:$0xff] %v6472_v46 }
 0x8e2   :  { %6601 = vst [vmem:[#allocation6 + $0x360] sm:$0xff] %v6473_v45  ;;  %6602 = vst [vmem:[#allocation6 + $0x368] sm:$0xff] %v6474_v36 }
 0x8e3   :  { %6603 = vst [vmem:[#allocation6 + $0x370] sm:$0xff] %v6475_v2  ;;  %6604 = vst [vmem:[#allocation6 + $0x378] sm:$0xff] %v6476_v35 }
 0x8e4   :  { %6605 = vst [vmem:[#allocation6 + $0x380] sm:$0xff] %v6477_v25  ;;  %6606 = vst [vmem:[#allocation6 + $0x388] sm:$0xff] %v6478_v18 }
 0x8e5   :  { %6607 = vst [vmem:[#allocation6 + $0x390] sm:$0xff] %v6479_v13  ;;  %6608 = vst [vmem:[#allocation6 + $0x398] sm:$0xff] %v6480_v41 }
 0x8e6   :  { %6609 = vst [vmem:[#allocation6 + $0x3a0] sm:$0xff] %v6481_v56  ;;  %6610 = vst [vmem:[#allocation6 + $0x3a8] sm:$0xff] %v6482_v22 }
 0x8e7   :  { %6611 = vst [vmem:[#allocation6 + $0x3b0] sm:$0xff] %v6483_v63  ;;  %6612 = vst [vmem:[#allocation6 + $0x3b8] sm:$0xff] %v6484_v57 }
 0x8e8   :  { %6613 = vst [vmem:[#allocation6 + $0x3c0] sm:$0xff] %v6485_v34  ;;  %6614 = vst [vmem:[#allocation6 + $0x3c8] sm:$0xff] %v6486_v12 }
 0x8e9   :  { %6615 = vst [vmem:[#allocation6 + $0x3d0] sm:$0xff] %v6487_v42  ;;  %6616 = vst [vmem:[#allocation6 + $0x3d8] sm:$0xff] %v6488_v50 }
 0x8ea   :  { %6617 = vst [vmem:[#allocation6 + $0x3e0] sm:$0xff] %v6489_v27  ;;  %6618 = vst [vmem:[#allocation6 + $0x3e8] sm:$0xff] %v6490_v19 }
 0x8eb   :  { %6619 = vst [vmem:[#allocation6 + $0x3f0] sm:$0xff] %v6491_v39 }
 0x8ec   :  { %7271 = shalt.err (!%p7268_p12)
}
 0x8ed   :  { %s7272_s20 = scalar_lea.hbm %s12991_s10, 16384 }
 0x8ee   :  { %p7273_p13 = scmp.ne.s32.totalorder %s12991_s10, %s7272_s20  ;;  %p7276_p0 = scmp.lt.u32.totalorder %s7272_s20, %s12991_s10 }
 0x8f0   :  { %p7278_p1 = pnand %p7276_p0, %p7273_p13 }
 0x8f2   :  { %7281 = shalt.err (!%p7278_p1)
}
 0x8f3   :  { %6632 = dma.vmem_to_hbm [thread:$0]  %s6627_s29, 16384, %s12991_s10, [#allocation5], %s7287_s23, %s7287_s23, %s7288_s24  }
 0x8f4   :  { %7284 = dma.done.wait [#allocation5], 16384  }
 0x8f5   :  { %7285 = vsyncadd [#allocation5], 4294950912 }
 0x8f6   :  { %6636 = vsyncpa [#allocation4], 1 }
 0x8f7   :  { %6637 = vsyncpa [#allocation5], 1 }

</bundles_post_ra>
